<compile_context>
chip_gen: v7x
topology: tpu7x:2x2x1
jax: 0.10.0
libtpu: 0.0.40
codegen_flags: <defaults>
</compile_context>

<pallas_src>
import jax
import jax.numpy as jnp
from jax.experimental import pallas as pl
from jax.experimental.pallas import tpu as pltpu

THRESHOLD = 5e-3      # piggyback Binarizer default threshold
MASK_SCALE = 1e-2     # mask_scale, mask_init='uniform'

# toy-scale architecture (stands in for the full VGG feature stack / 4096-wide classifier)
CONV_CFG = [(3, 16), (16, 32), (32, 32)]   # (Cin, Cout); each conv is followed by ReLU + 2x2 maxpool
IMG = 16
FC_HID = 64
NUM_CLASSES = 10
PAD_CLASSES = 128                          # lane-dense final HBM store


def _vmem():
    return pl.BlockSpec(memory_space=pltpu.MemorySpace.VMEM)


# ----------------------------- in-kernel helpers (traced inline) -----------------------------
def _masked_bf16(w_ref, m_ref):
    # Piggyback binarizer: compare + multiply in f32, cast to bf16 only for the MXU.
    mask = (m_ref[...] > THRESHOLD).astype(jnp.float32)
    return (w_ref[...] * mask).astype(jnp.bfloat16)


def _conv_relu_pool(x_nhwc, w_bf16, b_ref, pad_ref, slab_ref):
    """Masked 3x3 conv (pad=1) + bias + ReLU + 2x2/2 maxpool, fully VMEM-resident.

    x_nhwc : f32 value (N, H, W, Cin)
    w_bf16 : bf16 value (9*Cin, Cout)   -- im2col weight layout
    b_ref  : f32 ref (1, Cout)
    pad_ref: f32 VMEM scratch (N, H+2, W+2, Cin)
    slab_ref: f32 VMEM scratch (N, H, W, 9*Cin)
    returns: f32 value (N, H//2, W//2, Cout)
    """
    N, H, W, Cin = x_nhwc.shape
    Cout = w_bf16.shape[1]

    # zero padding in VMEM (no HBM round trip)
    pad_ref[...] = jnp.zeros(pad_ref.shape, jnp.float32)
    pad_ref[:, 1:H + 1, 1:W + 1, :] = x_nhwc

    # im2col: gather the 9 taps once; a single K=9*Cin matmul replaces 9 tiny dots
    for kh in range(3):
        for kw in range(3):
            t = kh * 3 + kw
            slab_ref[:, :, :, t * Cin:(t + 1) * Cin] = pad_ref[:, kh:kh + H, kw:kw + W, :]

    slab2d = slab_ref[...].reshape(N * H * W, 9 * Cin).astype(jnp.bfloat16)
    acc = jnp.dot(slab2d, w_bf16, preferred_element_type=jnp.float32)   # (N*H*W, Cout) f32
    y = jnp.maximum(acc + b_ref[...], 0.0)                              # bias + ReLU (f32)

    # fused 2x2 stride-2 maxpool (last dim unchanged -> cheap reshape)
    t6 = y.reshape(N, H // 2, 2, W // 2, 2, Cout)
    return jnp.maximum(jnp.maximum(t6[:, :, 0, :, 0, :], t6[:, :, 0, :, 1, :]),
                       jnp.maximum(t6[:, :, 1, :, 0, :], t6[:, :, 1, :, 1, :]))


# --------------------------------------- fused kernel ----------------------------------------
def vgg_fused_kernel(x_ref,
                     cw1_ref, cm1_ref, cb1_ref,
                     cw2_ref, cm2_ref, cb2_ref,
                     cw3_ref, cm3_ref, cb3_ref,
                     fw1_ref, fm1_ref, fb1_ref,
                     fw2_ref, fm2_ref, fb2_ref,
                     fw3_ref, fb3_ref,
                     o_ref,
                     pad1, slab1, pad2, slab2, pad3, slab3):
    x = x_ref[...]                                                         # (N, 16, 16, 3) f32
    x = _conv_relu_pool(x, _masked_bf16(cw1_ref, cm1_ref), cb1_ref, pad1, slab1)  # (N, 8, 8, 16)
    x = _conv_relu_pool(x, _masked_bf16(cw2_ref, cm2_ref), cb2_ref, pad2, slab2)  # (N, 4, 4, 32)
    x = _conv_relu_pool(x, _masked_bf16(cw3_ref, cm3_ref), cb3_ref, pad3, slab3)  # (N, 2, 2, 32)

    # Classifier. The x.view(N, -1) flatten is realized by summing the four (h, w)
    # position blocks against the matching 32-row blocks of the (HWC-row-permuted) fc1
    # weight — avoids a lane-changing reshape while matching PyTorch's NCHW flatten order.
    N, Hf, Wf, Cf = x.shape
    fw1 = _masked_bf16(fw1_ref, fm1_ref)                                   # (Hf*Wf*Cf, FC_HID) bf16
    acc1 = jnp.zeros((N, fw1.shape[1]), jnp.float32)
    for hh in range(Hf):
        for ww in range(Wf):
            r0 = (hh * Wf + ww) * Cf
            acc1 = acc1 + jnp.dot(x[:, hh, ww, :].astype(jnp.bfloat16),
                                  fw1[r0:r0 + Cf, :],
                                  preferred_element_type=jnp.float32)
    h = jnp.maximum(acc1 + fb1_ref[...], 0.0)
    # TODO(synk): nn.Dropout() is identity at inference; training-mode dropout not implemented.
    h = jnp.dot(h.astype(jnp.bfloat16), _masked_bf16(fw2_ref, fm2_ref),
                preferred_element_type=jnp.float32) + fb2_ref[...]
    h = jnp.maximum(h, 0.0)
    out = jnp.dot(h.astype(jnp.bfloat16), fw3_ref[...].astype(jnp.bfloat16),
                  preferred_element_type=jnp.float32) + fb3_ref[...]
    o_ref[...] = out                                                       # (N, 128) lane-dense


# ------------------------------------------ wrapper ------------------------------------------
@jax.jit
def vgg_forward(x_nchw, params):
    N = x_nchw.shape[0]
    x = jnp.transpose(x_nchw, (0, 2, 3, 1)).astype(jnp.float32)           # NCHW -> NHWC, once

    # conv weights/masks -> im2col (9*Cin, Cout) layout; biases -> (1, Cout)
    conv_args = []
    for (w, m, b) in params["conv"]:
        kh, kw, cin, cout = w.shape
        conv_args += [w.reshape(kh * kw * cin, cout),
                      m.reshape(kh * kw * cin, cout),
                      b.reshape(1, cout)]

    p = params["classifier"]
    # PyTorch flattens NCHW (channel-major); the kernel consumes NHWC-ordered blocks, so
    # permute the rows of the first classifier layer once, host-side (values unchanged).
    C, Hf, Wf = CONV_CFG[-1][1], IMG // 8, IMG // 8

    def _chw_to_hwc_rows(a):
        return a.reshape(C, Hf, Wf, -1).transpose(1, 2, 0, 3).reshape(C * Hf * Wf, -1)

    fw1 = _chw_to_hwc_rows(p["w1"])
    fm1 = _chw_to_hwc_rows(p["m1"])
    fb1 = p["b1"].reshape(1, -1)
    fw2, fm2, fb2 = p["w2"], p["m2"], p["b2"].reshape(1, -1)

    # pad the final layer to 128 output lanes so the single HBM store is lane-dense
    ncls = p["w3"].shape[1]
    fw3 = jnp.pad(p["w3"], ((0, 0), (0, PAD_CLASSES - ncls)))
    fb3 = jnp.pad(p["b3"], (0, PAD_CLASSES - ncls)).reshape(1, PAD_CLASSES)

    # VMEM scratch: per conv stage one zero-padded input buffer + one im2col slab
    scratch = []
    H = IMG
    for (cin, _cout) in CONV_CFG:
        scratch.append(pltpu.VMEM((N, H + 2, H + 2, cin), jnp.float32))
        scratch.append(pltpu.VMEM((N, H, H, 9 * cin), jnp.float32))
        H //= 2

    out = pl.pallas_call(
        vgg_fused_kernel,
        out_shape=jax.ShapeDtypeStruct((N, PAD_CLASSES), jnp.float32),
        in_specs=[_vmem()] * (1 + len(conv_args) + 8),
        out_specs=_vmem(),
        scratch_shapes=scratch,
    )(x, *conv_args, fw1, fm1, fb1, fw2, fm2, fb2, fw3, fb3)
    return out[:, :ncls]


# ----------------------------------------- parameters ----------------------------------------
def init_params(key):
    conv = []
    for (cin, cout) in CONV_CFG:
        key, kw_, km_ = jax.random.split(key, 3)
        std = (2.0 / (3 * 3 * cout)) ** 0.5                     # VGG kaiming-ish init
        w = std * jax.random.normal(kw_, (3, 3, cin, cout), jnp.float32)   # HWIO
        m = jax.random.uniform(km_, (3, 3, cin, cout), jnp.float32,
                               -MASK_SCALE, MASK_SCALE)         # mask_init='uniform'
        b = jnp.zeros((cout,), jnp.float32)
        conv.append((w, m, b))

    flat = CONV_CFG[-1][1] * (IMG // 8) * (IMG // 8)            # 128, stands in for 512*7*7

    def lin(key, fin, fout, masked):
        key, kw_, km_ = jax.random.split(key, 3)
        w = 0.01 * jax.random.normal(kw_, (fin, fout), jnp.float32)        # (in, out) layout
        b = jnp.zeros((fout,), jnp.float32)
        if masked:
            m = jax.random.uniform(km_, (fin, fout), jnp.float32,
                                   -MASK_SCALE, MASK_SCALE)
            return key, (w, m, b)
        return key, (w, b)

    key, (w1, m1, b1) = lin(key, flat, FC_HID, True)
    key, (w2, m2, b2) = lin(key, FC_HID, FC_HID, True)
    key, (w3, b3) = lin(key, FC_HID, NUM_CLASSES, False)
    classifier = dict(w1=w1, m1=m1, b1=b1, w2=w2, m2=m2, b2=b2, w3=w3, b3=b3)
    return dict(conv=conv, classifier=classifier)


if __name__ == "__main__":
    key = jax.random.PRNGKey(0)
    key, kx = jax.random.split(key)
    x = jax.random.normal(kx, (2, 3, IMG, IMG), jnp.float32)    # NCHW like PyTorch
    params = init_params(key)
    out = vgg_forward(x, params)
    out = jax.block_until_ready(out)
    assert out.shape == (2, NUM_CLASSES) and out.dtype == jnp.float32
    print("KERNEL_OK")
</pallas_src>

<mosaic_0001>
module attributes {stable_mosaic.version = 11 : i64} {
  func.func @vgg_fused_kernel(%arg0: memref<2x16x16x3xf32, #tpu.memory_space<vmem>>, %arg1: memref<27x16xf32, #tpu.memory_space<vmem>>, %arg2: memref<27x16xf32, #tpu.memory_space<vmem>>, %arg3: memref<1x16xf32, #tpu.memory_space<vmem>>, %arg4: memref<144x32xf32, #tpu.memory_space<vmem>>, %arg5: memref<144x32xf32, #tpu.memory_space<vmem>>, %arg6: memref<1x32xf32, #tpu.memory_space<vmem>>, %arg7: memref<288x32xf32, #tpu.memory_space<vmem>>, %arg8: memref<288x32xf32, #tpu.memory_space<vmem>>, %arg9: memref<1x32xf32, #tpu.memory_space<vmem>>, %arg10: memref<128x64xf32, #tpu.memory_space<vmem>>, %arg11: memref<128x64xf32, #tpu.memory_space<vmem>>, %arg12: memref<1x64xf32, #tpu.memory_space<vmem>>, %arg13: memref<64x64xf32, #tpu.memory_space<vmem>>, %arg14: memref<64x64xf32, #tpu.memory_space<vmem>>, %arg15: memref<1x64xf32, #tpu.memory_space<vmem>>, %arg16: memref<64x128xf32, #tpu.memory_space<vmem>>, %arg17: memref<1x128xf32, #tpu.memory_space<vmem>>, %arg18: memref<2x128xf32, #tpu.memory_space<vmem>>, %arg19: memref<2x18x18x3xf32, #tpu.memory_space<vmem>>, %arg20: memref<2x16x16x27xf32, #tpu.memory_space<vmem>>, %arg21: memref<2x10x10x16xf32, #tpu.memory_space<vmem>>, %arg22: memref<2x8x8x144xf32, #tpu.memory_space<vmem>>, %arg23: memref<2x6x6x32xf32, #tpu.memory_space<vmem>>, %arg24: memref<2x4x4x288xf32, #tpu.memory_space<vmem>>) attributes {dimension_semantics = [], scalar_prefetch = 0 : i64, scratch_operands = 6 : i64, tpu.core_type = #tpu.core_type<tc>} {
    %c0 = arith.constant 0 : index
    %c0_0 = arith.constant 0 : index
    %c0_1 = arith.constant 0 : index
    %c0_2 = arith.constant 0 : index
    %0 = vector.load %arg0[%c0, %c0_0, %c0_1, %c0_2] : memref<2x16x16x3xf32, #tpu.memory_space<vmem>>, vector<2x16x16x3xf32>
    %c0_3 = arith.constant 0 : index
    %c0_4 = arith.constant 0 : index
    %1 = vector.load %arg2[%c0_3, %c0_4] : memref<27x16xf32, #tpu.memory_space<vmem>>, vector<27x16xf32>
    %cst = arith.constant 5.000000e-03 : f32
    %2 = vector.broadcast %cst : f32 to vector<27x16xf32>
    %3 = arith.cmpf ogt, %1, %2 : vector<27x16xf32>
    %4 = arith.extui %3 : vector<27x16xi1> to vector<27x16xi32>
    %5 = arith.sitofp %4 : vector<27x16xi32> to vector<27x16xf32>
    %c0_5 = arith.constant 0 : index
    %c0_6 = arith.constant 0 : index
    %6 = vector.load %arg1[%c0_5, %c0_6] : memref<27x16xf32, #tpu.memory_space<vmem>>, vector<27x16xf32>
    %7 = arith.mulf %6, %5 : vector<27x16xf32>
    %8 = arith.truncf %7 : vector<27x16xf32> to vector<27x16xbf16>
    %cst_7 = arith.constant 0.000000e+00 : f32
    %9 = vector.broadcast %cst_7 : f32 to vector<2x18x18x3xf32>
    %c0_8 = arith.constant 0 : index
    %c0_9 = arith.constant 0 : index
    %c0_10 = arith.constant 0 : index
    %c0_11 = arith.constant 0 : index
    %10 = vector.load %arg19[%c0_8, %c0_9, %c0_10, %c0_11] : memref<2x18x18x3xf32, #tpu.memory_space<vmem>>, vector<2x18x18x3xf32>
    tpu.vector_store %arg19[%c0_8, %c0_9, %c0_10, %c0_11], %9 {strides = array<i32>} : memref<2x18x18x3xf32, #tpu.memory_space<vmem>>, vector<2x18x18x3xf32>,
    %c0_12 = arith.constant 0 : index
    %c1 = arith.constant 1 : index
    %c1_13 = arith.constant 1 : index
    %c0_14 = arith.constant 0 : index
    %11 = vector.load %arg19[%c0_12, %c1, %c1_13, %c0_14] : memref<2x18x18x3xf32, #tpu.memory_space<vmem>>, vector<2x16x16x3xf32>
    tpu.vector_store %arg19[%c0_12, %c1, %c1_13, %c0_14], %0 {strides = array<i32>} : memref<2x18x18x3xf32, #tpu.memory_space<vmem>>, vector<2x16x16x3xf32>,
    %c0_15 = arith.constant 0 : index
    %c0_16 = arith.constant 0 : index
    %c0_17 = arith.constant 0 : index
    %c0_18 = arith.constant 0 : index
    %12 = vector.load %arg19[%c0_15, %c0_16, %c0_17, %c0_18] : memref<2x18x18x3xf32, #tpu.memory_space<vmem>>, vector<2x16x16x3xf32>
    %c0_19 = arith.constant 0 : index
    %c0_20 = arith.constant 0 : index
    %c0_21 = arith.constant 0 : index
    %c0_22 = arith.constant 0 : index
    %13 = vector.load %arg20[%c0_19, %c0_20, %c0_21, %c0_22] : memref<2x16x16x27xf32, #tpu.memory_space<vmem>>, vector<2x16x16x3xf32>
    tpu.vector_store %arg20[%c0_19, %c0_20, %c0_21, %c0_22], %12 {strides = array<i32>} : memref<2x16x16x27xf32, #tpu.memory_space<vmem>>, vector<2x16x16x3xf32>,
    %c0_23 = arith.constant 0 : index
    %c0_24 = arith.constant 0 : index
    %c1_25 = arith.constant 1 : index
    %c0_26 = arith.constant 0 : index
    %14 = vector.load %arg19[%c0_23, %c0_24, %c1_25, %c0_26] : memref<2x18x18x3xf32, #tpu.memory_space<vmem>>, vector<2x16x16x3xf32>
    %c0_27 = arith.constant 0 : index
    %c0_28 = arith.constant 0 : index
    %c0_29 = arith.constant 0 : index
    %c3 = arith.constant 3 : index
    %15 = vector.load %arg20[%c0_27, %c0_28, %c0_29, %c3] : memref<2x16x16x27xf32, #tpu.memory_space<vmem>>, vector<2x16x16x3xf32>
    tpu.vector_store %arg20[%c0_27, %c0_28, %c0_29, %c3], %14 {strides = array<i32>} : memref<2x16x16x27xf32, #tpu.memory_space<vmem>>, vector<2x16x16x3xf32>,
    %c0_30 = arith.constant 0 : index
    %c0_31 = arith.constant 0 : index
    %c2 = arith.constant 2 : index
    %c0_32 = arith.constant 0 : index
    %16 = vector.load %arg19[%c0_30, %c0_31, %c2, %c0_32] : memref<2x18x18x3xf32, #tpu.memory_space<vmem>>, vector<2x16x16x3xf32>
    %c0_33 = arith.constant 0 : index
    %c0_34 = arith.constant 0 : index
    %c0_35 = arith.constant 0 : index
    %c6 = arith.constant 6 : index
    %17 = vector.load %arg20[%c0_33, %c0_34, %c0_35, %c6] : memref<2x16x16x27xf32, #tpu.memory_space<vmem>>, vector<2x16x16x3xf32>
    tpu.vector_store %arg20[%c0_33, %c0_34, %c0_35, %c6], %16 {strides = array<i32>} : memref<2x16x16x27xf32, #tpu.memory_space<vmem>>, vector<2x16x16x3xf32>,
    %c0_36 = arith.constant 0 : index
    %c1_37 = arith.constant 1 : index
    %c0_38 = arith.constant 0 : index
    %c0_39 = arith.constant 0 : index
    %18 = vector.load %arg19[%c0_36, %c1_37, %c0_38, %c0_39] : memref<2x18x18x3xf32, #tpu.memory_space<vmem>>, vector<2x16x16x3xf32>
    %c0_40 = arith.constant 0 : index
    %c0_41 = arith.constant 0 : index
    %c0_42 = arith.constant 0 : index
    %c9 = arith.constant 9 : index
    %19 = vector.load %arg20[%c0_40, %c0_41, %c0_42, %c9] : memref<2x16x16x27xf32, #tpu.memory_space<vmem>>, vector<2x16x16x3xf32>
    tpu.vector_store %arg20[%c0_40, %c0_41, %c0_42, %c9], %18 {strides = array<i32>} : memref<2x16x16x27xf32, #tpu.memory_space<vmem>>, vector<2x16x16x3xf32>,
    %c0_43 = arith.constant 0 : index
    %c1_44 = arith.constant 1 : index
    %c1_45 = arith.constant 1 : index
    %c0_46 = arith.constant 0 : index
    %20 = vector.load %arg19[%c0_43, %c1_44, %c1_45, %c0_46] : memref<2x18x18x3xf32, #tpu.memory_space<vmem>>, vector<2x16x16x3xf32>
    %c0_47 = arith.constant 0 : index
    %c0_48 = arith.constant 0 : index
    %c0_49 = arith.constant 0 : index
    %c12 = arith.constant 12 : index
    %21 = vector.load %arg20[%c0_47, %c0_48, %c0_49, %c12] : memref<2x16x16x27xf32, #tpu.memory_space<vmem>>, vector<2x16x16x3xf32>
    tpu.vector_store %arg20[%c0_47, %c0_48, %c0_49, %c12], %20 {strides = array<i32>} : memref<2x16x16x27xf32, #tpu.memory_space<vmem>>, vector<2x16x16x3xf32>,
    %c0_50 = arith.constant 0 : index
    %c1_51 = arith.constant 1 : index
    %c2_52 = arith.constant 2 : index
    %c0_53 = arith.constant 0 : index
    %22 = vector.load %arg19[%c0_50, %c1_51, %c2_52, %c0_53] : memref<2x18x18x3xf32, #tpu.memory_space<vmem>>, vector<2x16x16x3xf32>
    %c0_54 = arith.constant 0 : index
    %c0_55 = arith.constant 0 : index
    %c0_56 = arith.constant 0 : index
    %c15 = arith.constant 15 : index
    %23 = vector.load %arg20[%c0_54, %c0_55, %c0_56, %c15] : memref<2x16x16x27xf32, #tpu.memory_space<vmem>>, vector<2x16x16x3xf32>
    tpu.vector_store %arg20[%c0_54, %c0_55, %c0_56, %c15], %22 {strides = array<i32>} : memref<2x16x16x27xf32, #tpu.memory_space<vmem>>, vector<2x16x16x3xf32>,
    %c0_57 = arith.constant 0 : index
    %c2_58 = arith.constant 2 : index
    %c0_59 = arith.constant 0 : index
    %c0_60 = arith.constant 0 : index
    %24 = vector.load %arg19[%c0_57, %c2_58, %c0_59, %c0_60] : memref<2x18x18x3xf32, #tpu.memory_space<vmem>>, vector<2x16x16x3xf32>
    %c0_61 = arith.constant 0 : index
    %c0_62 = arith.constant 0 : index
    %c0_63 = arith.constant 0 : index
    %c18 = arith.constant 18 : index
    %25 = vector.load %arg20[%c0_61, %c0_62, %c0_63, %c18] : memref<2x16x16x27xf32, #tpu.memory_space<vmem>>, vector<2x16x16x3xf32>
    tpu.vector_store %arg20[%c0_61, %c0_62, %c0_63, %c18], %24 {strides = array<i32>} : memref<2x16x16x27xf32, #tpu.memory_space<vmem>>, vector<2x16x16x3xf32>,
    %c0_64 = arith.constant 0 : index
    %c2_65 = arith.constant 2 : index
    %c1_66 = arith.constant 1 : index
    %c0_67 = arith.constant 0 : index
    %26 = vector.load %arg19[%c0_64, %c2_65, %c1_66, %c0_67] : memref<2x18x18x3xf32, #tpu.memory_space<vmem>>, vector<2x16x16x3xf32>
    %c0_68 = arith.constant 0 : index
    %c0_69 = arith.constant 0 : index
    %c0_70 = arith.constant 0 : index
    %c21 = arith.constant 21 : index
    %27 = vector.load %arg20[%c0_68, %c0_69, %c0_70, %c21] : memref<2x16x16x27xf32, #tpu.memory_space<vmem>>, vector<2x16x16x3xf32>
    tpu.vector_store %arg20[%c0_68, %c0_69, %c0_70, %c21], %26 {strides = array<i32>} : memref<2x16x16x27xf32, #tpu.memory_space<vmem>>, vector<2x16x16x3xf32>,
    %c0_71 = arith.constant 0 : index
    %c2_72 = arith.constant 2 : index
    %c2_73 = arith.constant 2 : index
    %c0_74 = arith.constant 0 : index
    %28 = vector.load %arg19[%c0_71, %c2_72, %c2_73, %c0_74] : memref<2x18x18x3xf32, #tpu.memory_space<vmem>>, vector<2x16x16x3xf32>
    %c0_75 = arith.constant 0 : index
    %c0_76 = arith.constant 0 : index
    %c0_77 = arith.constant 0 : index
    %c24 = arith.constant 24 : index
    %29 = vector.load %arg20[%c0_75, %c0_76, %c0_77, %c24] : memref<2x16x16x27xf32, #tpu.memory_space<vmem>>, vector<2x16x16x3xf32>
    tpu.vector_store %arg20[%c0_75, %c0_76, %c0_77, %c24], %28 {strides = array<i32>} : memref<2x16x16x27xf32, #tpu.memory_space<vmem>>, vector<2x16x16x3xf32>,
    %c0_78 = arith.constant 0 : index
    %c0_79 = arith.constant 0 : index
    %c0_80 = arith.constant 0 : index
    %c0_81 = arith.constant 0 : index
    %30 = vector.load %arg20[%c0_78, %c0_79, %c0_80, %c0_81] : memref<2x16x16x27xf32, #tpu.memory_space<vmem>>, vector<2x16x16x27xf32>
    %31 = vector.shape_cast %30 : vector<2x16x16x27xf32> to vector<512x27xf32>
    %32 = arith.truncf %31 : vector<512x27xf32> to vector<512x27xbf16>
    %cst_82 = arith.constant dense<0.000000e+00> : vector<512x16xf32>
    %33 = tpu.matmul %32, %8, %cst_82 {dimension_numbers = #tpu.dot_dimension_numbers<[1], [0], [0], [1], [0, 0, 1, 1], [], []>} : vector<512x27xbf16>, vector<27x16xbf16>, vector<512x16xf32> -> vector<512x16xf32>
    %c0_83 = arith.constant 0 : index
    %c0_84 = arith.constant 0 : index
    %34 = vector.load %arg3[%c0_83, %c0_84] : memref<1x16xf32, #tpu.memory_space<vmem>>, vector<1x16xf32>
    %35 = vector.broadcast %34 : vector<1x16xf32> to vector<512x16xf32>
    %36 = arith.addf %33, %35 : vector<512x16xf32>
    %cst_85 = arith.constant 0.000000e+00 : f32
    %37 = vector.broadcast %cst_85 : f32 to vector<512x16xf32>
    %38 = arith.maximumf %36, %37 : vector<512x16xf32>
    %39 = vector.shape_cast %38 : vector<512x16xf32> to vector<2x8x2x8x2x16xf32>
    %40 = vector.extract_strided_slice %39 {offsets = [0, 0, 0, 0, 0, 0], sizes = [2, 8, 1, 8, 1, 16], strides = [1, 1, 1, 1, 1, 1]} : vector<2x8x2x8x2x16xf32> to vector<2x8x1x8x1x16xf32>
    %41 = vector.shape_cast %40 : vector<2x8x1x8x1x16xf32> to vector<2x8x8x16xf32>
    %42 = vector.extract_strided_slice %39 {offsets = [0, 0, 0, 0, 1, 0], sizes = [2, 8, 1, 8, 1, 16], strides = [1, 1, 1, 1, 1, 1]} : vector<2x8x2x8x2x16xf32> to vector<2x8x1x8x1x16xf32>
    %43 = vector.shape_cast %42 : vector<2x8x1x8x1x16xf32> to vector<2x8x8x16xf32>
    %44 = arith.maximumf %41, %43 : vector<2x8x8x16xf32>
    %45 = vector.extract_strided_slice %39 {offsets = [0, 0, 1, 0, 0, 0], sizes = [2, 8, 1, 8, 1, 16], strides = [1, 1, 1, 1, 1, 1]} : vector<2x8x2x8x2x16xf32> to vector<2x8x1x8x1x16xf32>
    %46 = vector.shape_cast %45 : vector<2x8x1x8x1x16xf32> to vector<2x8x8x16xf32>
    %47 = vector.extract_strided_slice %39 {offsets = [0, 0, 1, 0, 1, 0], sizes = [2, 8, 1, 8, 1, 16], strides = [1, 1, 1, 1, 1, 1]} : vector<2x8x2x8x2x16xf32> to vector<2x8x1x8x1x16xf32>
    %48 = vector.shape_cast %47 : vector<2x8x1x8x1x16xf32> to vector<2x8x8x16xf32>
    %49 = arith.maximumf %46, %48 : vector<2x8x8x16xf32>
    %50 = arith.maximumf %44, %49 : vector<2x8x8x16xf32>
    %c0_86 = arith.constant 0 : index
    %c0_87 = arith.constant 0 : index
    %51 = vector.load %arg5[%c0_86, %c0_87] : memref<144x32xf32, #tpu.memory_space<vmem>>, vector<144x32xf32>
    %cst_88 = arith.constant 5.000000e-03 : f32
    %52 = vector.broadcast %cst_88 : f32 to vector<144x32xf32>
    %53 = arith.cmpf ogt, %51, %52 : vector<144x32xf32>
    %54 = arith.extui %53 : vector<144x32xi1> to vector<144x32xi32>
    %55 = arith.sitofp %54 : vector<144x32xi32> to vector<144x32xf32>
    %c0_89 = arith.constant 0 : index
    %c0_90 = arith.constant 0 : index
    %56 = vector.load %arg4[%c0_89, %c0_90] : memref<144x32xf32, #tpu.memory_space<vmem>>, vector<144x32xf32>
    %57 = arith.mulf %56, %55 : vector<144x32xf32>
    %58 = arith.truncf %57 : vector<144x32xf32> to vector<144x32xbf16>
    %cst_91 = arith.constant 0.000000e+00 : f32
    %59 = vector.broadcast %cst_91 : f32 to vector<2x10x10x16xf32>
    %c0_92 = arith.constant 0 : index
    %c0_93 = arith.constant 0 : index
    %c0_94 = arith.constant 0 : index
    %c0_95 = arith.constant 0 : index
    %60 = vector.load %arg21[%c0_92, %c0_93, %c0_94, %c0_95] : memref<2x10x10x16xf32, #tpu.memory_space<vmem>>, vector<2x10x10x16xf32>
    tpu.vector_store %arg21[%c0_92, %c0_93, %c0_94, %c0_95], %59 {strides = array<i32>} : memref<2x10x10x16xf32, #tpu.memory_space<vmem>>, vector<2x10x10x16xf32>,
    %c0_96 = arith.constant 0 : index
    %c1_97 = arith.constant 1 : index
    %c1_98 = arith.constant 1 : index
    %c0_99 = arith.constant 0 : index
    %61 = vector.load %arg21[%c0_96, %c1_97, %c1_98, %c0_99] : memref<2x10x10x16xf32, #tpu.memory_space<vmem>>, vector<2x8x8x16xf32>
    tpu.vector_store %arg21[%c0_96, %c1_97, %c1_98, %c0_99], %50 {strides = array<i32>} : memref<2x10x10x16xf32, #tpu.memory_space<vmem>>, vector<2x8x8x16xf32>,
    %c0_100 = arith.constant 0 : index
    %c0_101 = arith.constant 0 : index
    %c0_102 = arith.constant 0 : index
    %c0_103 = arith.constant 0 : index
    %62 = vector.load %arg21[%c0_100, %c0_101, %c0_102, %c0_103] : memref<2x10x10x16xf32, #tpu.memory_space<vmem>>, vector<2x8x8x16xf32>
    %c0_104 = arith.constant 0 : index
    %c0_105 = arith.constant 0 : index
    %c0_106 = arith.constant 0 : index
    %c0_107 = arith.constant 0 : index
    %63 = vector.load %arg22[%c0_104, %c0_105, %c0_106, %c0_107] : memref<2x8x8x144xf32, #tpu.memory_space<vmem>>, vector<2x8x8x16xf32>
    tpu.vector_store %arg22[%c0_104, %c0_105, %c0_106, %c0_107], %62 {strides = array<i32>} : memref<2x8x8x144xf32, #tpu.memory_space<vmem>>, vector<2x8x8x16xf32>,
    %c0_108 = arith.constant 0 : index
    %c0_109 = arith.constant 0 : index
    %c1_110 = arith.constant 1 : index
    %c0_111 = arith.constant 0 : index
    %64 = vector.load %arg21[%c0_108, %c0_109, %c1_110, %c0_111] : memref<2x10x10x16xf32, #tpu.memory_space<vmem>>, vector<2x8x8x16xf32>
    %c0_112 = arith.constant 0 : index
    %c0_113 = arith.constant 0 : index
    %c0_114 = arith.constant 0 : index
    %c16 = arith.constant 16 : index
    %65 = vector.load %arg22[%c0_112, %c0_113, %c0_114, %c16] : memref<2x8x8x144xf32, #tpu.memory_space<vmem>>, vector<2x8x8x16xf32>
    tpu.vector_store %arg22[%c0_112, %c0_113, %c0_114, %c16], %64 {strides = array<i32>} : memref<2x8x8x144xf32, #tpu.memory_space<vmem>>, vector<2x8x8x16xf32>,
    %c0_115 = arith.constant 0 : index
    %c0_116 = arith.constant 0 : index
    %c2_117 = arith.constant 2 : index
    %c0_118 = arith.constant 0 : index
    %66 = vector.load %arg21[%c0_115, %c0_116, %c2_117, %c0_118] : memref<2x10x10x16xf32, #tpu.memory_space<vmem>>, vector<2x8x8x16xf32>
    %c0_119 = arith.constant 0 : index
    %c0_120 = arith.constant 0 : index
    %c0_121 = arith.constant 0 : index
    %c32 = arith.constant 32 : index
    %67 = vector.load %arg22[%c0_119, %c0_120, %c0_121, %c32] : memref<2x8x8x144xf32, #tpu.memory_space<vmem>>, vector<2x8x8x16xf32>
    tpu.vector_store %arg22[%c0_119, %c0_120, %c0_121, %c32], %66 {strides = array<i32>} : memref<2x8x8x144xf32, #tpu.memory_space<vmem>>, vector<2x8x8x16xf32>,
    %c0_122 = arith.constant 0 : index
    %c1_123 = arith.constant 1 : index
    %c0_124 = arith.constant 0 : index
    %c0_125 = arith.constant 0 : index
    %68 = vector.load %arg21[%c0_122, %c1_123, %c0_124, %c0_125] : memref<2x10x10x16xf32, #tpu.memory_space<vmem>>, vector<2x8x8x16xf32>
    %c0_126 = arith.constant 0 : index
    %c0_127 = arith.constant 0 : index
    %c0_128 = arith.constant 0 : index
    %c48 = arith.constant 48 : index
    %69 = vector.load %arg22[%c0_126, %c0_127, %c0_128, %c48] : memref<2x8x8x144xf32, #tpu.memory_space<vmem>>, vector<2x8x8x16xf32>
    tpu.vector_store %arg22[%c0_126, %c0_127, %c0_128, %c48], %68 {strides = array<i32>} : memref<2x8x8x144xf32, #tpu.memory_space<vmem>>, vector<2x8x8x16xf32>,
    %c0_129 = arith.constant 0 : index
    %c1_130 = arith.constant 1 : index
    %c1_131 = arith.constant 1 : index
    %c0_132 = arith.constant 0 : index
    %70 = vector.load %arg21[%c0_129, %c1_130, %c1_131, %c0_132] : memref<2x10x10x16xf32, #tpu.memory_space<vmem>>, vector<2x8x8x16xf32>
    %c0_133 = arith.constant 0 : index
    %c0_134 = arith.constant 0 : index
    %c0_135 = arith.constant 0 : index
    %c64 = arith.constant 64 : index
    %71 = vector.load %arg22[%c0_133, %c0_134, %c0_135, %c64] : memref<2x8x8x144xf32, #tpu.memory_space<vmem>>, vector<2x8x8x16xf32>
    tpu.vector_store %arg22[%c0_133, %c0_134, %c0_135, %c64], %70 {strides = array<i32>} : memref<2x8x8x144xf32, #tpu.memory_space<vmem>>, vector<2x8x8x16xf32>,
    %c0_136 = arith.constant 0 : index
    %c1_137 = arith.constant 1 : index
    %c2_138 = arith.constant 2 : index
    %c0_139 = arith.constant 0 : index
    %72 = vector.load %arg21[%c0_136, %c1_137, %c2_138, %c0_139] : memref<2x10x10x16xf32, #tpu.memory_space<vmem>>, vector<2x8x8x16xf32>
    %c0_140 = arith.constant 0 : index
    %c0_141 = arith.constant 0 : index
    %c0_142 = arith.constant 0 : index
    %c80 = arith.constant 80 : index
    %73 = vector.load %arg22[%c0_140, %c0_141, %c0_142, %c80] : memref<2x8x8x144xf32, #tpu.memory_space<vmem>>, vector<2x8x8x16xf32>
    tpu.vector_store %arg22[%c0_140, %c0_141, %c0_142, %c80], %72 {strides = array<i32>} : memref<2x8x8x144xf32, #tpu.memory_space<vmem>>, vector<2x8x8x16xf32>,
    %c0_143 = arith.constant 0 : index
    %c2_144 = arith.constant 2 : index
    %c0_145 = arith.constant 0 : index
    %c0_146 = arith.constant 0 : index
    %74 = vector.load %arg21[%c0_143, %c2_144, %c0_145, %c0_146] : memref<2x10x10x16xf32, #tpu.memory_space<vmem>>, vector<2x8x8x16xf32>
    %c0_147 = arith.constant 0 : index
    %c0_148 = arith.constant 0 : index
    %c0_149 = arith.constant 0 : index
    %c96 = arith.constant 96 : index
    %75 = vector.load %arg22[%c0_147, %c0_148, %c0_149, %c96] : memref<2x8x8x144xf32, #tpu.memory_space<vmem>>, vector<2x8x8x16xf32>
    tpu.vector_store %arg22[%c0_147, %c0_148, %c0_149, %c96], %74 {strides = array<i32>} : memref<2x8x8x144xf32, #tpu.memory_space<vmem>>, vector<2x8x8x16xf32>,
    %c0_150 = arith.constant 0 : index
    %c2_151 = arith.constant 2 : index
    %c1_152 = arith.constant 1 : index
    %c0_153 = arith.constant 0 : index
    %76 = vector.load %arg21[%c0_150, %c2_151, %c1_152, %c0_153] : memref<2x10x10x16xf32, #tpu.memory_space<vmem>>, vector<2x8x8x16xf32>
    %c0_154 = arith.constant 0 : index
    %c0_155 = arith.constant 0 : index
    %c0_156 = arith.constant 0 : index
    %c112 = arith.constant 112 : index
    %77 = vector.load %arg22[%c0_154, %c0_155, %c0_156, %c112] : memref<2x8x8x144xf32, #tpu.memory_space<vmem>>, vector<2x8x8x16xf32>
    tpu.vector_store %arg22[%c0_154, %c0_155, %c0_156, %c112], %76 {strides = array<i32>} : memref<2x8x8x144xf32, #tpu.memory_space<vmem>>, vector<2x8x8x16xf32>,
    %c0_157 = arith.constant 0 : index
    %c2_158 = arith.constant 2 : index
    %c2_159 = arith.constant 2 : index
    %c0_160 = arith.constant 0 : index
    %78 = vector.load %arg21[%c0_157, %c2_158, %c2_159, %c0_160] : memref<2x10x10x16xf32, #tpu.memory_space<vmem>>, vector<2x8x8x16xf32>
    %c0_161 = arith.constant 0 : index
    %c0_162 = arith.constant 0 : index
    %c0_163 = arith.constant 0 : index
    %c128 = arith.constant 128 : index
    %79 = vector.load %arg22[%c0_161, %c0_162, %c0_163, %c128] : memref<2x8x8x144xf32, #tpu.memory_space<vmem>>, vector<2x8x8x16xf32>
    tpu.vector_store %arg22[%c0_161, %c0_162, %c0_163, %c128], %78 {strides = array<i32>} : memref<2x8x8x144xf32, #tpu.memory_space<vmem>>, vector<2x8x8x16xf32>,
    %c0_164 = arith.constant 0 : index
    %c0_165 = arith.constant 0 : index
    %c0_166 = arith.constant 0 : index
    %c0_167 = arith.constant 0 : index
    %80 = vector.load %arg22[%c0_164, %c0_165, %c0_166, %c0_167] : memref<2x8x8x144xf32, #tpu.memory_space<vmem>>, vector<2x8x8x144xf32>
    %81 = vector.shape_cast %80 : vector<2x8x8x144xf32> to vector<128x144xf32>
    %82 = arith.truncf %81 : vector<128x144xf32> to vector<128x144xbf16>
    %cst_168 = arith.constant dense<0.000000e+00> : vector<128x32xf32>
    %83 = tpu.matmul %82, %58, %cst_168 {dimension_numbers = #tpu.dot_dimension_numbers<[1], [0], [0], [1], [0, 0, 1, 1], [], []>} : vector<128x144xbf16>, vector<144x32xbf16>, vector<128x32xf32> -> vector<128x32xf32>
    %c0_169 = arith.constant 0 : index
    %c0_170 = arith.constant 0 : index
    %84 = vector.load %arg6[%c0_169, %c0_170] : memref<1x32xf32, #tpu.memory_space<vmem>>, vector<1x32xf32>
    %85 = vector.broadcast %84 : vector<1x32xf32> to vector<128x32xf32>
    %86 = arith.addf %83, %85 : vector<128x32xf32>
    %cst_171 = arith.constant 0.000000e+00 : f32
    %87 = vector.broadcast %cst_171 : f32 to vector<128x32xf32>
    %88 = arith.maximumf %86, %87 : vector<128x32xf32>
    %89 = vector.shape_cast %88 : vector<128x32xf32> to vector<2x4x2x4x2x32xf32>
    %90 = vector.extract_strided_slice %89 {offsets = [0, 0, 0, 0, 0, 0], sizes = [2, 4, 1, 4, 1, 32], strides = [1, 1, 1, 1, 1, 1]} : vector<2x4x2x4x2x32xf32> to vector<2x4x1x4x1x32xf32>
    %91 = vector.shape_cast %90 : vector<2x4x1x4x1x32xf32> to vector<2x4x4x32xf32>
    %92 = vector.extract_strided_slice %89 {offsets = [0, 0, 0, 0, 1, 0], sizes = [2, 4, 1, 4, 1, 32], strides = [1, 1, 1, 1, 1, 1]} : vector<2x4x2x4x2x32xf32> to vector<2x4x1x4x1x32xf32>
    %93 = vector.shape_cast %92 : vector<2x4x1x4x1x32xf32> to vector<2x4x4x32xf32>
    %94 = arith.maximumf %91, %93 : vector<2x4x4x32xf32>
    %95 = vector.extract_strided_slice %89 {offsets = [0, 0, 1, 0, 0, 0], sizes = [2, 4, 1, 4, 1, 32], strides = [1, 1, 1, 1, 1, 1]} : vector<2x4x2x4x2x32xf32> to vector<2x4x1x4x1x32xf32>
    %96 = vector.shape_cast %95 : vector<2x4x1x4x1x32xf32> to vector<2x4x4x32xf32>
    %97 = vector.extract_strided_slice %89 {offsets = [0, 0, 1, 0, 1, 0], sizes = [2, 4, 1, 4, 1, 32], strides = [1, 1, 1, 1, 1, 1]} : vector<2x4x2x4x2x32xf32> to vector<2x4x1x4x1x32xf32>
    %98 = vector.shape_cast %97 : vector<2x4x1x4x1x32xf32> to vector<2x4x4x32xf32>
    %99 = arith.maximumf %96, %98 : vector<2x4x4x32xf32>
    %100 = arith.maximumf %94, %99 : vector<2x4x4x32xf32>
    %c0_172 = arith.constant 0 : index
    %c0_173 = arith.constant 0 : index
    %101 = vector.load %arg8[%c0_172, %c0_173] : memref<288x32xf32, #tpu.memory_space<vmem>>, vector<288x32xf32>
    %cst_174 = arith.constant 5.000000e-03 : f32
    %102 = vector.broadcast %cst_174 : f32 to vector<288x32xf32>
    %103 = arith.cmpf ogt, %101, %102 : vector<288x32xf32>
    %104 = arith.extui %103 : vector<288x32xi1> to vector<288x32xi32>
    %105 = arith.sitofp %104 : vector<288x32xi32> to vector<288x32xf32>
    %c0_175 = arith.constant 0 : index
    %c0_176 = arith.constant 0 : index
    %106 = vector.load %arg7[%c0_175, %c0_176] : memref<288x32xf32, #tpu.memory_space<vmem>>, vector<288x32xf32>
    %107 = arith.mulf %106, %105 : vector<288x32xf32>
    %108 = arith.truncf %107 : vector<288x32xf32> to vector<288x32xbf16>
    %cst_177 = arith.constant 0.000000e+00 : f32
    %109 = vector.broadcast %cst_177 : f32 to vector<2x6x6x32xf32>
    %c0_178 = arith.constant 0 : index
    %c0_179 = arith.constant 0 : index
    %c0_180 = arith.constant 0 : index
    %c0_181 = arith.constant 0 : index
    %110 = vector.load %arg23[%c0_178, %c0_179, %c0_180, %c0_181] : memref<2x6x6x32xf32, #tpu.memory_space<vmem>>, vector<2x6x6x32xf32>
    tpu.vector_store %arg23[%c0_178, %c0_179, %c0_180, %c0_181], %109 {strides = array<i32>} : memref<2x6x6x32xf32, #tpu.memory_space<vmem>>, vector<2x6x6x32xf32>,
    %c0_182 = arith.constant 0 : index
    %c1_183 = arith.constant 1 : index
    %c1_184 = arith.constant 1 : index
    %c0_185 = arith.constant 0 : index
    %111 = vector.load %arg23[%c0_182, %c1_183, %c1_184, %c0_185] : memref<2x6x6x32xf32, #tpu.memory_space<vmem>>, vector<2x4x4x32xf32>
    tpu.vector_store %arg23[%c0_182, %c1_183, %c1_184, %c0_185], %100 {strides = array<i32>} : memref<2x6x6x32xf32, #tpu.memory_space<vmem>>, vector<2x4x4x32xf32>,
    %c0_186 = arith.constant 0 : index
    %c0_187 = arith.constant 0 : index
    %c0_188 = arith.constant 0 : index
    %c0_189 = arith.constant 0 : index
    %112 = vector.load %arg23[%c0_186, %c0_187, %c0_188, %c0_189] : memref<2x6x6x32xf32, #tpu.memory_space<vmem>>, vector<2x4x4x32xf32>
    %c0_190 = arith.constant 0 : index
    %c0_191 = arith.constant 0 : index
    %c0_192 = arith.constant 0 : index
    %c0_193 = arith.constant 0 : index
    %113 = vector.load %arg24[%c0_190, %c0_191, %c0_192, %c0_193] : memref<2x4x4x288xf32, #tpu.memory_space<vmem>>, vector<2x4x4x32xf32>
    tpu.vector_store %arg24[%c0_190, %c0_191, %c0_192, %c0_193], %112 {strides = array<i32>} : memref<2x4x4x288xf32, #tpu.memory_space<vmem>>, vector<2x4x4x32xf32>,
    %c0_194 = arith.constant 0 : index
    %c0_195 = arith.constant 0 : index
    %c1_196 = arith.constant 1 : index
    %c0_197 = arith.constant 0 : index
    %114 = vector.load %arg23[%c0_194, %c0_195, %c1_196, %c0_197] : memref<2x6x6x32xf32, #tpu.memory_space<vmem>>, vector<2x4x4x32xf32>
    %c0_198 = arith.constant 0 : index
    %c0_199 = arith.constant 0 : index
    %c0_200 = arith.constant 0 : index
    %c32_201 = arith.constant 32 : index
    %115 = vector.load %arg24[%c0_198, %c0_199, %c0_200, %c32_201] : memref<2x4x4x288xf32, #tpu.memory_space<vmem>>, vector<2x4x4x32xf32>
    tpu.vector_store %arg24[%c0_198, %c0_199, %c0_200, %c32_201], %114 {strides = array<i32>} : memref<2x4x4x288xf32, #tpu.memory_space<vmem>>, vector<2x4x4x32xf32>,
    %c0_202 = arith.constant 0 : index
    %c0_203 = arith.constant 0 : index
    %c2_204 = arith.constant 2 : index
    %c0_205 = arith.constant 0 : index
    %116 = vector.load %arg23[%c0_202, %c0_203, %c2_204, %c0_205] : memref<2x6x6x32xf32, #tpu.memory_space<vmem>>, vector<2x4x4x32xf32>
    %c0_206 = arith.constant 0 : index
    %c0_207 = arith.constant 0 : index
    %c0_208 = arith.constant 0 : index
    %c64_209 = arith.constant 64 : index
    %117 = vector.load %arg24[%c0_206, %c0_207, %c0_208, %c64_209] : memref<2x4x4x288xf32, #tpu.memory_space<vmem>>, vector<2x4x4x32xf32>
    tpu.vector_store %arg24[%c0_206, %c0_207, %c0_208, %c64_209], %116 {strides = array<i32>} : memref<2x4x4x288xf32, #tpu.memory_space<vmem>>, vector<2x4x4x32xf32>,
    %c0_210 = arith.constant 0 : index
    %c1_211 = arith.constant 1 : index
    %c0_212 = arith.constant 0 : index
    %c0_213 = arith.constant 0 : index
    %118 = vector.load %arg23[%c0_210, %c1_211, %c0_212, %c0_213] : memref<2x6x6x32xf32, #tpu.memory_space<vmem>>, vector<2x4x4x32xf32>
    %c0_214 = arith.constant 0 : index
    %c0_215 = arith.constant 0 : index
    %c0_216 = arith.constant 0 : index
    %c96_217 = arith.constant 96 : index
    %119 = vector.load %arg24[%c0_214, %c0_215, %c0_216, %c96_217] : memref<2x4x4x288xf32, #tpu.memory_space<vmem>>, vector<2x4x4x32xf32>
    tpu.vector_store %arg24[%c0_214, %c0_215, %c0_216, %c96_217], %118 {strides = array<i32>} : memref<2x4x4x288xf32, #tpu.memory_space<vmem>>, vector<2x4x4x32xf32>,
    %c0_218 = arith.constant 0 : index
    %c1_219 = arith.constant 1 : index
    %c1_220 = arith.constant 1 : index
    %c0_221 = arith.constant 0 : index
    %120 = vector.load %arg23[%c0_218, %c1_219, %c1_220, %c0_221] : memref<2x6x6x32xf32, #tpu.memory_space<vmem>>, vector<2x4x4x32xf32>
    %c0_222 = arith.constant 0 : index
    %c0_223 = arith.constant 0 : index
    %c0_224 = arith.constant 0 : index
    %c128_225 = arith.constant 128 : index
    %121 = vector.load %arg24[%c0_222, %c0_223, %c0_224, %c128_225] : memref<2x4x4x288xf32, #tpu.memory_space<vmem>>, vector<2x4x4x32xf32>
    tpu.vector_store %arg24[%c0_222, %c0_223, %c0_224, %c128_225], %120 {strides = array<i32>} : memref<2x4x4x288xf32, #tpu.memory_space<vmem>>, vector<2x4x4x32xf32>,
    %c0_226 = arith.constant 0 : index
    %c1_227 = arith.constant 1 : index
    %c2_228 = arith.constant 2 : index
    %c0_229 = arith.constant 0 : index
    %122 = vector.load %arg23[%c0_226, %c1_227, %c2_228, %c0_229] : memref<2x6x6x32xf32, #tpu.memory_space<vmem>>, vector<2x4x4x32xf32>
    %c0_230 = arith.constant 0 : index
    %c0_231 = arith.constant 0 : index
    %c0_232 = arith.constant 0 : index
    %c160 = arith.constant 160 : index
    %123 = vector.load %arg24[%c0_230, %c0_231, %c0_232, %c160] : memref<2x4x4x288xf32, #tpu.memory_space<vmem>>, vector<2x4x4x32xf32>
    tpu.vector_store %arg24[%c0_230, %c0_231, %c0_232, %c160], %122 {strides = array<i32>} : memref<2x4x4x288xf32, #tpu.memory_space<vmem>>, vector<2x4x4x32xf32>,
    %c0_233 = arith.constant 0 : index
    %c2_234 = arith.constant 2 : index
    %c0_235 = arith.constant 0 : index
    %c0_236 = arith.constant 0 : index
    %124 = vector.load %arg23[%c0_233, %c2_234, %c0_235, %c0_236] : memref<2x6x6x32xf32, #tpu.memory_space<vmem>>, vector<2x4x4x32xf32>
    %c0_237 = arith.constant 0 : index
    %c0_238 = arith.constant 0 : index
    %c0_239 = arith.constant 0 : index
    %c192 = arith.constant 192 : index
    %125 = vector.load %arg24[%c0_237, %c0_238, %c0_239, %c192] : memref<2x4x4x288xf32, #tpu.memory_space<vmem>>, vector<2x4x4x32xf32>
    tpu.vector_store %arg24[%c0_237, %c0_238, %c0_239, %c192], %124 {strides = array<i32>} : memref<2x4x4x288xf32, #tpu.memory_space<vmem>>, vector<2x4x4x32xf32>,
    %c0_240 = arith.constant 0 : index
    %c2_241 = arith.constant 2 : index
    %c1_242 = arith.constant 1 : index
    %c0_243 = arith.constant 0 : index
    %126 = vector.load %arg23[%c0_240, %c2_241, %c1_242, %c0_243] : memref<2x6x6x32xf32, #tpu.memory_space<vmem>>, vector<2x4x4x32xf32>
    %c0_244 = arith.constant 0 : index
    %c0_245 = arith.constant 0 : index
    %c0_246 = arith.constant 0 : index
    %c224 = arith.constant 224 : index
    %127 = vector.load %arg24[%c0_244, %c0_245, %c0_246, %c224] : memref<2x4x4x288xf32, #tpu.memory_space<vmem>>, vector<2x4x4x32xf32>
    tpu.vector_store %arg24[%c0_244, %c0_245, %c0_246, %c224], %126 {strides = array<i32>} : memref<2x4x4x288xf32, #tpu.memory_space<vmem>>, vector<2x4x4x32xf32>,
    %c0_247 = arith.constant 0 : index
    %c2_248 = arith.constant 2 : index
    %c2_249 = arith.constant 2 : index
    %c0_250 = arith.constant 0 : index
    %128 = vector.load %arg23[%c0_247, %c2_248, %c2_249, %c0_250] : memref<2x6x6x32xf32, #tpu.memory_space<vmem>>, vector<2x4x4x32xf32>
    %c0_251 = arith.constant 0 : index
    %c0_252 = arith.constant 0 : index
    %c0_253 = arith.constant 0 : index
    %c256 = arith.constant 256 : index
    %129 = vector.load %arg24[%c0_251, %c0_252, %c0_253, %c256] : memref<2x4x4x288xf32, #tpu.memory_space<vmem>>, vector<2x4x4x32xf32>
    tpu.vector_store %arg24[%c0_251, %c0_252, %c0_253, %c256], %128 {strides = array<i32>} : memref<2x4x4x288xf32, #tpu.memory_space<vmem>>, vector<2x4x4x32xf32>,
    %c0_254 = arith.constant 0 : index
    %c0_255 = arith.constant 0 : index
    %c0_256 = arith.constant 0 : index
    %c0_257 = arith.constant 0 : index
    %130 = vector.load %arg24[%c0_254, %c0_255, %c0_256, %c0_257] : memref<2x4x4x288xf32, #tpu.memory_space<vmem>>, vector<2x4x4x288xf32>
    %131 = vector.shape_cast %130 : vector<2x4x4x288xf32> to vector<32x288xf32>
    %132 = arith.truncf %131 : vector<32x288xf32> to vector<32x288xbf16>
    %cst_258 = arith.constant dense<0.000000e+00> : vector<32x32xf32>
    %133 = tpu.matmul %132, %108, %cst_258 {dimension_numbers = #tpu.dot_dimension_numbers<[1], [0], [0], [1], [0, 0, 1, 1], [], []>} : vector<32x288xbf16>, vector<288x32xbf16>, vector<32x32xf32> -> vector<32x32xf32>
    %c0_259 = arith.constant 0 : index
    %c0_260 = arith.constant 0 : index
    %134 = vector.load %arg9[%c0_259, %c0_260] : memref<1x32xf32, #tpu.memory_space<vmem>>, vector<1x32xf32>
    %135 = vector.broadcast %134 : vector<1x32xf32> to vector<32x32xf32>
    %136 = arith.addf %133, %135 : vector<32x32xf32>
    %cst_261 = arith.constant 0.000000e+00 : f32
    %137 = vector.broadcast %cst_261 : f32 to vector<32x32xf32>
    %138 = arith.maximumf %136, %137 : vector<32x32xf32>
    %139 = vector.shape_cast %138 : vector<32x32xf32> to vector<2x2x2x2x2x32xf32>
    %140 = vector.extract_strided_slice %139 {offsets = [0, 0, 0, 0, 0, 0], sizes = [2, 2, 1, 2, 1, 32], strides = [1, 1, 1, 1, 1, 1]} : vector<2x2x2x2x2x32xf32> to vector<2x2x1x2x1x32xf32>
    %141 = vector.shape_cast %140 : vector<2x2x1x2x1x32xf32> to vector<2x2x2x32xf32>
    %142 = vector.extract_strided_slice %139 {offsets = [0, 0, 0, 0, 1, 0], sizes = [2, 2, 1, 2, 1, 32], strides = [1, 1, 1, 1, 1, 1]} : vector<2x2x2x2x2x32xf32> to vector<2x2x1x2x1x32xf32>
    %143 = vector.shape_cast %142 : vector<2x2x1x2x1x32xf32> to vector<2x2x2x32xf32>
    %144 = arith.maximumf %141, %143 : vector<2x2x2x32xf32>
    %145 = vector.extract_strided_slice %139 {offsets = [0, 0, 1, 0, 0, 0], sizes = [2, 2, 1, 2, 1, 32], strides = [1, 1, 1, 1, 1, 1]} : vector<2x2x2x2x2x32xf32> to vector<2x2x1x2x1x32xf32>
    %146 = vector.shape_cast %145 : vector<2x2x1x2x1x32xf32> to vector<2x2x2x32xf32>
    %147 = vector.extract_strided_slice %139 {offsets = [0, 0, 1, 0, 1, 0], sizes = [2, 2, 1, 2, 1, 32], strides = [1, 1, 1, 1, 1, 1]} : vector<2x2x2x2x2x32xf32> to vector<2x2x1x2x1x32xf32>
    %148 = vector.shape_cast %147 : vector<2x2x1x2x1x32xf32> to vector<2x2x2x32xf32>
    %149 = arith.maximumf %146, %148 : vector<2x2x2x32xf32>
    %150 = arith.maximumf %144, %149 : vector<2x2x2x32xf32>
    %c0_262 = arith.constant 0 : index
    %c0_263 = arith.constant 0 : index
    %151 = vector.load %arg11[%c0_262, %c0_263] : memref<128x64xf32, #tpu.memory_space<vmem>>, vector<128x64xf32>
    %cst_264 = arith.constant 5.000000e-03 : f32
    %152 = vector.broadcast %cst_264 : f32 to vector<128x64xf32>
    %153 = arith.cmpf ogt, %151, %152 : vector<128x64xf32>
    %154 = arith.extui %153 : vector<128x64xi1> to vector<128x64xi32>
    %155 = arith.sitofp %154 : vector<128x64xi32> to vector<128x64xf32>
    %c0_265 = arith.constant 0 : index
    %c0_266 = arith.constant 0 : index
    %156 = vector.load %arg10[%c0_265, %c0_266] : memref<128x64xf32, #tpu.memory_space<vmem>>, vector<128x64xf32>
    %157 = arith.mulf %156, %155 : vector<128x64xf32>
    %158 = arith.truncf %157 : vector<128x64xf32> to vector<128x64xbf16>
    %cst_267 = arith.constant 0.000000e+00 : f32
    %159 = vector.broadcast %cst_267 : f32 to vector<2x64xf32>
    %160 = vector.extract_strided_slice %150 {offsets = [0, 0, 0, 0], sizes = [2, 1, 1, 32], strides = [1, 1, 1, 1]} : vector<2x2x2x32xf32> to vector<2x1x1x32xf32>
    %161 = vector.shape_cast %160 : vector<2x1x1x32xf32> to vector<2x32xf32>
    %162 = arith.truncf %161 : vector<2x32xf32> to vector<2x32xbf16>
    %163 = vector.extract_strided_slice %158 {offsets = [0, 0], sizes = [32, 64], strides = [1, 1]} : vector<128x64xbf16> to vector<32x64xbf16>
    %cst_268 = arith.constant dense<0.000000e+00> : vector<2x64xf32>
    %164 = tpu.matmul %162, %163, %cst_268 {dimension_numbers = #tpu.dot_dimension_numbers<[1], [0], [0], [1], [0, 0, 1, 1], [], []>} : vector<2x32xbf16>, vector<32x64xbf16>, vector<2x64xf32> -> vector<2x64xf32>
    %165 = arith.addf %159, %164 : vector<2x64xf32>
    %166 = vector.extract_strided_slice %150 {offsets = [0, 0, 1, 0], sizes = [2, 1, 1, 32], strides = [1, 1, 1, 1]} : vector<2x2x2x32xf32> to vector<2x1x1x32xf32>
    %167 = vector.shape_cast %166 : vector<2x1x1x32xf32> to vector<2x32xf32>
    %168 = arith.truncf %167 : vector<2x32xf32> to vector<2x32xbf16>
    %169 = vector.extract_strided_slice %158 {offsets = [32, 0], sizes = [32, 64], strides = [1, 1]} : vector<128x64xbf16> to vector<32x64xbf16>
    %cst_269 = arith.constant dense<0.000000e+00> : vector<2x64xf32>
    %170 = tpu.matmul %168, %169, %cst_269 {dimension_numbers = #tpu.dot_dimension_numbers<[1], [0], [0], [1], [0, 0, 1, 1], [], []>} : vector<2x32xbf16>, vector<32x64xbf16>, vector<2x64xf32> -> vector<2x64xf32>
    %171 = arith.addf %165, %170 : vector<2x64xf32>
    %172 = vector.extract_strided_slice %150 {offsets = [0, 1, 0, 0], sizes = [2, 1, 1, 32], strides = [1, 1, 1, 1]} : vector<2x2x2x32xf32> to vector<2x1x1x32xf32>
    %173 = vector.shape_cast %172 : vector<2x1x1x32xf32> to vector<2x32xf32>
    %174 = arith.truncf %173 : vector<2x32xf32> to vector<2x32xbf16>
    %175 = vector.extract_strided_slice %158 {offsets = [64, 0], sizes = [32, 64], strides = [1, 1]} : vector<128x64xbf16> to vector<32x64xbf16>
    %cst_270 = arith.constant dense<0.000000e+00> : vector<2x64xf32>
    %176 = tpu.matmul %174, %175, %cst_270 {dimension_numbers = #tpu.dot_dimension_numbers<[1], [0], [0], [1], [0, 0, 1, 1], [], []>} : vector<2x32xbf16>, vector<32x64xbf16>, vector<2x64xf32> -> vector<2x64xf32>
    %177 = arith.addf %171, %176 : vector<2x64xf32>
    %178 = vector.extract_strided_slice %150 {offsets = [0, 1, 1, 0], sizes = [2, 1, 1, 32], strides = [1, 1, 1, 1]} : vector<2x2x2x32xf32> to vector<2x1x1x32xf32>
    %179 = vector.shape_cast %178 : vector<2x1x1x32xf32> to vector<2x32xf32>
    %180 = arith.truncf %179 : vector<2x32xf32> to vector<2x32xbf16>
    %181 = vector.extract_strided_slice %158 {offsets = [96, 0], sizes = [32, 64], strides = [1, 1]} : vector<128x64xbf16> to vector<32x64xbf16>
    %cst_271 = arith.constant dense<0.000000e+00> : vector<2x64xf32>
    %182 = tpu.matmul %180, %181, %cst_271 {dimension_numbers = #tpu.dot_dimension_numbers<[1], [0], [0], [1], [0, 0, 1, 1], [], []>} : vector<2x32xbf16>, vector<32x64xbf16>, vector<2x64xf32> -> vector<2x64xf32>
    %183 = arith.addf %177, %182 : vector<2x64xf32>
    %c0_272 = arith.constant 0 : index
    %c0_273 = arith.constant 0 : index
    %184 = vector.load %arg12[%c0_272, %c0_273] : memref<1x64xf32, #tpu.memory_space<vmem>>, vector<1x64xf32>
    %185 = vector.broadcast %184 : vector<1x64xf32> to vector<2x64xf32>
    %186 = arith.addf %183, %185 : vector<2x64xf32>
    %cst_274 = arith.constant 0.000000e+00 : f32
    %187 = vector.broadcast %cst_274 : f32 to vector<2x64xf32>
    %188 = arith.maximumf %186, %187 : vector<2x64xf32>
    %189 = arith.truncf %188 : vector<2x64xf32> to vector<2x64xbf16>
    %c0_275 = arith.constant 0 : index
    %c0_276 = arith.constant 0 : index
    %190 = vector.load %arg14[%c0_275, %c0_276] : memref<64x64xf32, #tpu.memory_space<vmem>>, vector<64x64xf32>
    %cst_277 = arith.constant 5.000000e-03 : f32
    %191 = vector.broadcast %cst_277 : f32 to vector<64x64xf32>
    %192 = arith.cmpf ogt, %190, %191 : vector<64x64xf32>
    %193 = arith.extui %192 : vector<64x64xi1> to vector<64x64xi32>
    %194 = arith.sitofp %193 : vector<64x64xi32> to vector<64x64xf32>
    %c0_278 = arith.constant 0 : index
    %c0_279 = arith.constant 0 : index
    %195 = vector.load %arg13[%c0_278, %c0_279] : memref<64x64xf32, #tpu.memory_space<vmem>>, vector<64x64xf32>
    %196 = arith.mulf %195, %194 : vector<64x64xf32>
    %197 = arith.truncf %196 : vector<64x64xf32> to vector<64x64xbf16>
    %cst_280 = arith.constant dense<0.000000e+00> : vector<2x64xf32>
    %198 = tpu.matmul %189, %197, %cst_280 {dimension_numbers = #tpu.dot_dimension_numbers<[1], [0], [0], [1], [0, 0, 1, 1], [], []>} : vector<2x64xbf16>, vector<64x64xbf16>, vector<2x64xf32> -> vector<2x64xf32>
    %c0_281 = arith.constant 0 : index
    %c0_282 = arith.constant 0 : index
    %199 = vector.load %arg15[%c0_281, %c0_282] : memref<1x64xf32, #tpu.memory_space<vmem>>, vector<1x64xf32>
    %200 = vector.broadcast %199 : vector<1x64xf32> to vector<2x64xf32>
    %201 = arith.addf %198, %200 : vector<2x64xf32>
    %cst_283 = arith.constant 0.000000e+00 : f32
    %202 = vector.broadcast %cst_283 : f32 to vector<2x64xf32>
    %203 = arith.maximumf %201, %202 : vector<2x64xf32>
    %204 = arith.truncf %203 : vector<2x64xf32> to vector<2x64xbf16>
    %c0_284 = arith.constant 0 : index
    %c0_285 = arith.constant 0 : index
    %205 = vector.load %arg16[%c0_284, %c0_285] : memref<64x128xf32, #tpu.memory_space<vmem>>, vector<64x128xf32>
    %206 = arith.truncf %205 : vector<64x128xf32> to vector<64x128xbf16>
    %cst_286 = arith.constant dense<0.000000e+00> : vector<2x128xf32>
    %207 = tpu.matmul %204, %206, %cst_286 {dimension_numbers = #tpu.dot_dimension_numbers<[1], [0], [0], [1], [0, 0, 1, 1], [], []>} : vector<2x64xbf16>, vector<64x128xbf16>, vector<2x128xf32> -> vector<2x128xf32>
    %c0_287 = arith.constant 0 : index
    %c0_288 = arith.constant 0 : index
    %208 = vector.load %arg17[%c0_287, %c0_288] : memref<1x128xf32, #tpu.memory_space<vmem>>, vector<1x128xf32>
    %209 = vector.broadcast %208 : vector<1x128xf32> to vector<2x128xf32>
    %210 = arith.addf %207, %209 : vector<2x128xf32>
    %c0_289 = arith.constant 0 : index
    %c0_290 = arith.constant 0 : index
    %211 = vector.load %arg18[%c0_289, %c0_290] : memref<2x128xf32, #tpu.memory_space<vmem>>, vector<2x128xf32>
    tpu.vector_store %arg18[%c0_289, %c0_290], %210 {strides = array<i32>} : memref<2x128xf32, #tpu.memory_space<vmem>>, vector<2x128xf32>,
    return
  }
}

</mosaic_0001>

<bundles_post_ra>
// kernel: vgg_forward.1
= control target key start
LH: loop header
LB: loop body
LE: loop exit
PB: predicated region body
PF: predicated region fallthrough
CT: control target
= control target key end

     0   :  { %s16024_s0 = inlined_call_operand.vmem [shape: f32[2,16,16,3], index: 0, kind: input, shape index: {}]   ;;  %s16025_s1 = inlined_call_operand.vmem [shape: f32[27,16], index: 1, kind: input, shape index: {}]   ;;  %s16026_s2 = inlined_call_operand.vmem [shape: f32[27,16], index: 2, kind: input, shape index: {}]   ;;  %s16027_s3 = inlined_call_operand.vmem [shape: f32[1,16], index: 3, kind: input, shape index: {}]   ;;  %s16028_s4 = inlined_call_operand.vmem [shape: f32[144,32], index: 4, kind: input, shape index: {}]   ;;  %s16029_s5 = inlined_call_operand.vmem [shape: f32[144,32], index: 5, kind: input, shape index: {}]   ;;  %s16030_s6 = inlined_call_operand.vmem [shape: f32[1,32], index: 6, kind: input, shape index: {}]   ;;  %s16031_s7 = inlined_call_operand.vmem [shape: f32[288,32], index: 7, kind: input, shape index: {}]   ;;  %s16032_s8 = inlined_call_operand.vmem [shape: f32[288,32], index: 8, kind: input, shape index: {}]   ;;  %s16033_s9 = inlined_call_operand.vmem [shape: f32[1,32], index: 9, kind: input, shape index: {}]   ;;  %s16034_s10 = inlined_call_operand.vmem [shape: f32[128,64], index: 10, kind: input, shape index: {}]   ;;  %s16035_s11 = inlined_call_operand.vmem [shape: f32[128,64], index: 11, kind: input, shape index: {}]   ;;  %s16036_s12 = inlined_call_operand.vmem [shape: f32[1,64], index: 12, kind: input, shape index: {}]   ;;  %s16037_s13 = inlined_call_operand.vmem [shape: f32[64,64], index: 13, kind: input, shape index: {}]   ;;  %s16038_s14 = inlined_call_operand.vmem [shape: f32[64,64], index: 14, kind: input, shape index: {}]   ;;  %s16039_s15 = inlined_call_operand.vmem [shape: f32[1,64], index: 15, kind: input, shape index: {}]   ;;  %s16040_s16 = inlined_call_operand.vmem [shape: f32[64,128], index: 16, kind: input, shape index: {}]   ;;  %s16041_s17 = inlined_call_operand.vmem [shape: f32[1,128], index: 17, kind: input, shape index: {}]   ;;  %s16042_s18 = inlined_call_operand.hbm [shape: f32[2,128], index: 18, kind: output, shape index: {}]  }
   0x1   :  { %16060 = sst [smem:[#allocation11_spill]] %s16024_s0 }
   0x2   :  { %16061 = sst [smem:[#allocation12_spill]] %s16025_s1 }
   0x3   :  { %16062 = sst [smem:[#allocation13_spill]] %s16026_s2 }
   0x4   :  { %vm151_vm0 = vcmask 23552   ;;  %vm154_vm1 = vcmask 17408   ;;  %s16063_s29 = sld [smem:[#allocation11_spill]]  ;;  %v11574_v1 = vmov 0.0  }
   0x5   :  { %153 = vst.msk [vmem:[#allocation2 + $0x8] sm:$0xff] %vm151_vm0, %v11574_v1  ;;  %152 = vst.msk [vmem:[#allocation2] sm:$0xff] %vm151_vm0, %v11574_v1 }
   0x6   :  { %155 = vst.msk [vmem:[#allocation2 + $0x10] sm:$0x3] %vm154_vm1, %v11574_v1  ;;  %158 = vst.msk [vmem:[#allocation2 + $0x28] sm:$0x3] %vm154_vm1, %v11574_v1 }
   0x7   :  { %156 = vst.msk [vmem:[#allocation2 + $0x18] sm:$0xff] %vm151_vm0, %v11574_v1  ;;  %157 = vst.msk [vmem:[#allocation2 + $0x20] sm:$0xff] %vm151_vm0, %v11574_v1 }
   0x8   :  { %159 = vst.msk [vmem:[#allocation2 + $0x30] sm:$0xff] %vm151_vm0, %v11574_v1  ;;  %160 = vst.msk [vmem:[#allocation2 + $0x38] sm:$0xff] %vm151_vm0, %v11574_v1 }
   0x9   :  { %161 = vst.msk [vmem:[#allocation2 + $0x40] sm:$0x3] %vm154_vm1, %v11574_v1  ;;  %164 = vst.msk [vmem:[#allocation2 + $0x58] sm:$0x3] %vm154_vm1, %v11574_v1 }
   0xa   :  { %v11693_v0 = vld [vmem:[%s16063_s29] sm:$0xff]  ;;  %162 = vst.msk [vmem:[#allocation2 + $0x48] sm:$0xff] %vm151_vm0, %v11574_v1  ;;  %163 = vst.msk [vmem:[#allocation2 + $0x50] sm:$0xff] %vm151_vm0, %v11574_v1  ;;  %v62_v2 = vld [vmem:[%s16063_s29 + $0x8] sm:$0xff] }
   0xb   :  { %165 = vst.msk [vmem:[#allocation2 + $0x60] sm:$0xff] %vm151_vm0, %v11574_v1  ;;  %166 = vst.msk [vmem:[#allocation2 + $0x68] sm:$0xff] %vm151_vm0, %v11574_v1  ;;  %v63_v3 = vld [vmem:[%s16063_s29 + $0x10] sm:$0xff]  ;;  %v64_v4 = vld [vmem:[%s16063_s29 + $0x18] sm:$0xff] }
   0xc   :  { %167 = vst.msk [vmem:[#allocation2 + $0x70] sm:$0x3] %vm154_vm1, %v11574_v1  ;;  %170 = vst.msk [vmem:[#allocation2 + $0x88] sm:$0x3] %vm154_vm1, %v11574_v1  ;;  %v65_v5 = vld [vmem:[%s16063_s29 + $0x20] sm:$0xff]  ;;  %v66_v6 = vld [vmem:[%s16063_s29 + $0x28] sm:$0xff] }
   0xd   :  { %168 = vst.msk [vmem:[#allocation2 + $0x78] sm:$0xff] %vm151_vm0, %v11574_v1  ;;  %169 = vst.msk [vmem:[#allocation2 + $0x80] sm:$0xff] %vm151_vm0, %v11574_v1  ;;  %v67_v7 = vld [vmem:[%s16063_s29 + $0x30] sm:$0xff]  ;;  %v68_v8 = vld [vmem:[%s16063_s29 + $0x38] sm:$0xff] }
   0xe   :  { %171 = vst.msk [vmem:[#allocation2 + $0x90] sm:$0xff] %vm151_vm0, %v11574_v1  ;;  %172 = vst.msk [vmem:[#allocation2 + $0x98] sm:$0xff] %vm151_vm0, %v11574_v1  ;;  %v69_v9 = vld [vmem:[%s16063_s29 + $0x40] sm:$0xff]  ;;  %v70_v10 = vld [vmem:[%s16063_s29 + $0x48] sm:$0xff] }
   0xf   :  { %173 = vst.msk [vmem:[#allocation2 + $0xa0] sm:$0x3] %vm154_vm1, %v11574_v1  ;;  %176 = vst.msk [vmem:[#allocation2 + $0xb8] sm:$0x3] %vm154_vm1, %v11574_v1 }
  0x10   :  { %174 = vst.msk [vmem:[#allocation2 + $0xa8] sm:$0xff] %vm151_vm0, %v11574_v1  ;;  %175 = vst.msk [vmem:[#allocation2 + $0xb0] sm:$0xff] %vm151_vm0, %v11574_v1 }
  0x11   :  { %177 = vst.msk [vmem:[#allocation2 + $0xc0] sm:$0xff] %vm151_vm0, %v11574_v1  ;;  %178 = vst.msk [vmem:[#allocation2 + $0xc8] sm:$0xff] %vm151_vm0, %v11574_v1 }
  0x12   :  { %179 = vst.msk [vmem:[#allocation2 + $0xd0] sm:$0x3] %vm154_vm1, %v11574_v1  ;;  %182 = vst.msk [vmem:[#allocation2 + $0xe8] sm:$0x3] %vm154_vm1, %v11574_v1 }
  0x13   :  { %180 = vst.msk [vmem:[#allocation2 + $0xd8] sm:$0xff] %vm151_vm0, %v11574_v1  ;;  %181 = vst.msk [vmem:[#allocation2 + $0xe0] sm:$0xff] %vm151_vm0, %v11574_v1 }
  0x14   :  { %183 = vst.msk [vmem:[#allocation2 + $0xf0] sm:$0xff] %vm151_vm0, %v11574_v1  ;;  %184 = vst.msk [vmem:[#allocation2 + $0xf8] sm:$0xff] %vm151_vm0, %v11574_v1 }
  0x15   :  { %185 = vst.msk [vmem:[#allocation2 + $0x100] sm:$0x3] %vm154_vm1, %v11574_v1  ;;  %188 = vst.msk [vmem:[#allocation2 + $0x118] sm:$0x3] %vm154_vm1, %v11574_v1 }
  0x16   :  { %186 = vst.msk [vmem:[#allocation2 + $0x108] sm:$0xff] %vm151_vm0, %v11574_v1  ;;  %187 = vst.msk [vmem:[#allocation2 + $0x110] sm:$0xff] %vm151_vm0, %v11574_v1 }
  0x17   :  { %189 = vst.msk [vmem:[#allocation2 + $0x120] sm:$0xff] %vm151_vm0, %v11574_v1  ;;  %190 = vst.msk [vmem:[#allocation2 + $0x128] sm:$0xff] %vm151_vm0, %v11574_v1 }
  0x18   :  { %191 = vst.msk [vmem:[#allocation2 + $0x130] sm:$0x3] %vm154_vm1, %v11574_v1  ;;  %194 = vst.msk [vmem:[#allocation2 + $0x148] sm:$0x3] %vm154_vm1, %v11574_v1 }
  0x19   :  { %192 = vst.msk [vmem:[#allocation2 + $0x138] sm:$0xff] %vm151_vm0, %v11574_v1  ;;  %193 = vst.msk [vmem:[#allocation2 + $0x140] sm:$0xff] %vm151_vm0, %v11574_v1 }
  0x1a   :  { %195 = vst.msk [vmem:[#allocation2 + $0x150] sm:$0xff] %vm151_vm0, %v11574_v1  ;;  %196 = vst.msk [vmem:[#allocation2 + $0x158] sm:$0xff] %vm151_vm0, %v11574_v1 }
  0x1b   :  { %197 = vst.msk [vmem:[#allocation2 + $0x160] sm:$0x3] %vm154_vm1, %v11574_v1  ;;  %200 = vst.msk [vmem:[#allocation2 + $0x178] sm:$0x3] %vm154_vm1, %v11574_v1 }
  0x1c   :  { %198 = vst.msk [vmem:[#allocation2 + $0x168] sm:$0xff] %vm151_vm0, %v11574_v1  ;;  %199 = vst.msk [vmem:[#allocation2 + $0x170] sm:$0xff] %vm151_vm0, %v11574_v1 }
  0x1d   :  { %201 = vst.msk [vmem:[#allocation2 + $0x180] sm:$0xff] %vm151_vm0, %v11574_v1  ;;  %202 = vst.msk [vmem:[#allocation2 + $0x188] sm:$0xff] %vm151_vm0, %v11574_v1 }
  0x1e   :  { %203 = vst.msk [vmem:[#allocation2 + $0x190] sm:$0x3] %vm154_vm1, %v11574_v1  ;;  %206 = vst.msk [vmem:[#allocation2 + $0x1a8] sm:$0x3] %vm154_vm1, %v11574_v1 }
  0x1f   :  { %204 = vst.msk [vmem:[#allocation2 + $0x198] sm:$0xff] %vm151_vm0, %v11574_v1  ;;  %205 = vst.msk [vmem:[#allocation2 + $0x1a0] sm:$0xff] %vm151_vm0, %v11574_v1 }
  0x20   :  { %207 = vst.msk [vmem:[#allocation2 + $0x1b0] sm:$0xff] %vm151_vm0, %v11574_v1  ;;  %208 = vst.msk [vmem:[#allocation2 + $0x1b8] sm:$0xff] %vm151_vm0, %v11574_v1 }
  0x21   :  { %209 = vst.msk [vmem:[#allocation2 + $0x1c0] sm:$0x3] %vm154_vm1, %v11574_v1  ;;  %212 = vst.msk [vmem:[#allocation2 + $0x1d8] sm:$0x3] %vm154_vm1, %v11574_v1 }
  0x22   :  { %210 = vst.msk [vmem:[#allocation2 + $0x1c8] sm:$0xff] %vm151_vm0, %v11574_v1  ;;  %211 = vst.msk [vmem:[#allocation2 + $0x1d0] sm:$0xff] %vm151_vm0, %v11574_v1 }
  0x23   :  { %213 = vst.msk [vmem:[#allocation2 + $0x1e0] sm:$0xff] %vm151_vm0, %v11574_v1  ;;  %214 = vst.msk [vmem:[#allocation2 + $0x1e8] sm:$0xff] %vm151_vm0, %v11574_v1 }
  0x24   :  { %215 = vst.msk [vmem:[#allocation2 + $0x1f0] sm:$0x3] %vm154_vm1, %v11574_v1  ;;  %218 = vst.msk [vmem:[#allocation2 + $0x208] sm:$0x3] %vm154_vm1, %v11574_v1 }
  0x25   :  { %216 = vst.msk [vmem:[#allocation2 + $0x1f8] sm:$0xff] %vm151_vm0, %v11574_v1  ;;  %217 = vst.msk [vmem:[#allocation2 + $0x200] sm:$0xff] %vm151_vm0, %v11574_v1 }
  0x26   :  { %219 = vst.msk [vmem:[#allocation2 + $0x210] sm:$0xff] %vm151_vm0, %v11574_v1  ;;  %220 = vst.msk [vmem:[#allocation2 + $0x218] sm:$0xff] %vm151_vm0, %v11574_v1 }
  0x27   :  { %221 = vst.msk [vmem:[#allocation2 + $0x220] sm:$0x3] %vm154_vm1, %v11574_v1  ;;  %224 = vst.msk [vmem:[#allocation2 + $0x238] sm:$0x3] %vm154_vm1, %v11574_v1 }
  0x28   :  { %222 = vst.msk [vmem:[#allocation2 + $0x228] sm:$0xff] %vm151_vm0, %v11574_v1  ;;  %223 = vst.msk [vmem:[#allocation2 + $0x230] sm:$0xff] %vm151_vm0, %v11574_v1 }
  0x29   :  { %225 = vst.msk [vmem:[#allocation2 + $0x240] sm:$0xff] %vm151_vm0, %v11574_v1  ;;  %226 = vst.msk [vmem:[#allocation2 + $0x248] sm:$0xff] %vm151_vm0, %v11574_v1 }
  0x2a   :  { %227 = vst.msk [vmem:[#allocation2 + $0x250] sm:$0x3] %vm154_vm1, %v11574_v1  ;;  %230 = vst.msk [vmem:[#allocation2 + $0x268] sm:$0x3] %vm154_vm1, %v11574_v1 }
  0x2b   :  { %228 = vst.msk [vmem:[#allocation2 + $0x258] sm:$0xff] %vm151_vm0, %v11574_v1  ;;  %229 = vst.msk [vmem:[#allocation2 + $0x260] sm:$0xff] %vm151_vm0, %v11574_v1 }
  0x2c   :  { %231 = vst.msk [vmem:[#allocation2 + $0x270] sm:$0xff] %vm151_vm0, %v11574_v1  ;;  %232 = vst.msk [vmem:[#allocation2 + $0x278] sm:$0xff] %vm151_vm0, %v11574_v1 }
  0x2d   :  { %233 = vst.msk [vmem:[#allocation2 + $0x280] sm:$0x3] %vm154_vm1, %v11574_v1  ;;  %236 = vst.msk [vmem:[#allocation2 + $0x298] sm:$0x3] %vm154_vm1, %v11574_v1 }
  0x2e   :  { %234 = vst.msk [vmem:[#allocation2 + $0x288] sm:$0xff] %vm151_vm0, %v11574_v1  ;;  %235 = vst.msk [vmem:[#allocation2 + $0x290] sm:$0xff] %vm151_vm0, %v11574_v1 }
  0x2f   :  { %237 = vst.msk [vmem:[#allocation2 + $0x2a0] sm:$0xff] %vm151_vm0, %v11574_v1  ;;  %238 = vst.msk [vmem:[#allocation2 + $0x2a8] sm:$0xff] %vm151_vm0, %v11574_v1 }
  0x30   :  { %239 = vst.msk [vmem:[#allocation2 + $0x2b0] sm:$0x3] %vm154_vm1, %v11574_v1  ;;  %242 = vst.msk [vmem:[#allocation2 + $0x2c8] sm:$0x3] %vm154_vm1, %v11574_v1 }
  0x31   :  { %240 = vst.msk [vmem:[#allocation2 + $0x2b8] sm:$0xff] %vm151_vm0, %v11574_v1  ;;  %241 = vst.msk [vmem:[#allocation2 + $0x2c0] sm:$0xff] %vm151_vm0, %v11574_v1 }
  0x32   :  { %243 = vst.msk [vmem:[#allocation2 + $0x2d0] sm:$0xff] %vm151_vm0, %v11574_v1  ;;  %244 = vst.msk [vmem:[#allocation2 + $0x2d8] sm:$0xff] %vm151_vm0, %v11574_v1 }
  0x33   :  { %245 = vst.msk [vmem:[#allocation2 + $0x2e0] sm:$0x3] %vm154_vm1, %v11574_v1  ;;  %248 = vst.msk [vmem:[#allocation2 + $0x2f8] sm:$0x3] %vm154_vm1, %v11574_v1 }
  0x34   :  { %246 = vst.msk [vmem:[#allocation2 + $0x2e8] sm:$0xff] %vm151_vm0, %v11574_v1  ;;  %247 = vst.msk [vmem:[#allocation2 + $0x2f0] sm:$0xff] %vm151_vm0, %v11574_v1 }
  0x35   :  { %249 = vst.msk [vmem:[#allocation2 + $0x300] sm:$0xff] %vm151_vm0, %v11574_v1  ;;  %250 = vst.msk [vmem:[#allocation2 + $0x308] sm:$0xff] %vm151_vm0, %v11574_v1 }
  0x36   :  { %251 = vst.msk [vmem:[#allocation2 + $0x310] sm:$0x3] %vm154_vm1, %v11574_v1  ;;  %254 = vst.msk [vmem:[#allocation2 + $0x328] sm:$0x3] %vm154_vm1, %v11574_v1 }
  0x37   :  { %252 = vst.msk [vmem:[#allocation2 + $0x318] sm:$0xff] %vm151_vm0, %v11574_v1  ;;  %253 = vst.msk [vmem:[#allocation2 + $0x320] sm:$0xff] %vm151_vm0, %v11574_v1 }
  0x38   :  { %255 = vst.msk [vmem:[#allocation2 + $0x330] sm:$0xff] %vm151_vm0, %v11574_v1  ;;  %256 = vst.msk [vmem:[#allocation2 + $0x338] sm:$0xff] %vm151_vm0, %v11574_v1 }
  0x39   :  { %257 = vst.msk [vmem:[#allocation2 + $0x340] sm:$0x3] %vm154_vm1, %v11574_v1  ;;  %260 = vst.msk [vmem:[#allocation2 + $0x358] sm:$0x3] %vm154_vm1, %v11574_v1 }
  0x3a   :  { %258 = vst.msk [vmem:[#allocation2 + $0x348] sm:$0xff] %vm151_vm0, %v11574_v1  ;;  %259 = vst.msk [vmem:[#allocation2 + $0x350] sm:$0xff] %vm151_vm0, %v11574_v1 }
  0x3b   :  { %262 = vst.msk [vmem:[#allocation2 + $0x19] sm:$0xff] %vm151_vm0, %v11693_v0  ;;  %263 = vst.msk [vmem:[#allocation2 + $0x21] sm:$0xff] %vm151_vm0, %v62_v2 }
  0x3c   :  { %264 = vst.msk [vmem:[#allocation2 + $0x31] sm:$0xff] %vm151_vm0, %v63_v3  ;;  %265 = vst.msk [vmem:[#allocation2 + $0x39] sm:$0xff] %vm151_vm0, %v64_v4 }
  0x3d   :  { %266 = vst.msk [vmem:[#allocation2 + $0x49] sm:$0xff] %vm151_vm0, %v65_v5  ;;  %267 = vst.msk [vmem:[#allocation2 + $0x51] sm:$0xff] %vm151_vm0, %v66_v6 }
  0x3e   :  { %268 = vst.msk [vmem:[#allocation2 + $0x61] sm:$0xff] %vm151_vm0, %v67_v7  ;;  %269 = vst.msk [vmem:[#allocation2 + $0x69] sm:$0xff] %vm151_vm0, %v68_v8 }
  0x3f   :  { %270 = vst.msk [vmem:[#allocation2 + $0x79] sm:$0xff] %vm151_vm0, %v69_v9  ;;  %271 = vst.msk [vmem:[#allocation2 + $0x81] sm:$0xff] %vm151_vm0, %v70_v10 }
  0x40   :  { %23 = vsyncpa [#allocation9], 0  ;;  %v840_v11 = vld [vmem:[#allocation2 + $0xa] sm:$0xff]  ;;  %v454_v12 = vld [vmem:[#allocation2 + $0x1] sm:$0xff]  ;;  %s11575_s20 = smov 6   ;;  %s11576_s21 = smov 3  }
  0x41   :  { %969 = vrot.lane.b32.xlu1 %v840_v11, %s11575_s20  ;;  %582 = vrot.lane.b32.xlu0 %v454_v12, %s11576_s21  ;;  %v455_v13 = vld [vmem:[#allocation2 + $0x9] sm:$0xff]  ;;  %v326_v29 = vld [vmem:[#allocation2] sm:$0xff]  ;;  %v72_v32 = vld [vmem:[%s16063_s29 + $0x58] sm:$0xff]  ;;  %s16052_s25 = smov 9   ;;  %s16050_s26 = smov 12   ;;  %vm3735_vm6 = vcmask 1044480  }
  0x42   :  { %v456_v14 = vld [vmem:[#allocation2 + $0x19] sm:$0xff]  ;;  %v839_v21 = vld [vmem:[#allocation2 + $0x2] sm:$0xff]  ;;  %390 = vst.msk [vmem:[#allocation3] sm:$0xff] %vm151_vm0, %v326_v29  ;;  %v71_v31 = vld [vmem:[%s16063_s29 + $0x50] sm:$0xff]  ;;  %s16048_s27 = smov 15   ;;  %s16046_s1 = smov 18  }
  0x43   :  { %v1224_v15 = vld [vmem:[#allocation2 + $0x18] sm:$0xff]  ;;  %v1225_v16 = vld [vmem:[#allocation2 + $0x20] sm:$0xff]  ;;  %v11951_v17 = vld [vmem:[#allocation2 + $0x30] sm:$0xff]  ;;  %272 = vst.msk [vmem:[#allocation2 + $0x91] sm:$0xff] %vm151_vm0, %v71_v31  ;;  %s16064_s23 = sld [smem:[#allocation13_spill]]  ;;  %s11581_s30 = smov 21  }
  0x44   :  { %v11953_v18 = vld [vmem:[#allocation2 + $0x38] sm:$0xff]  ;;  %392 = vst.msk [vmem:[#allocation3 + $0x10] sm:$0xff] %vm151_vm0, %v1224_v15  ;;  %393 = vst.msk [vmem:[#allocation3 + $0x18] sm:$0xff] %vm151_vm0, %v1225_v16  ;;  %v11963_v19 = vld [vmem:[#allocation2 + $0x48] sm:$0xff]  ;;  %s16065_s22 = sld [smem:[#allocation12_spill]]  ;;  %vm3736_vm7 = vcmask 1045504  }
  0x45   :  { %394 = vst.msk [vmem:[#allocation3 + $0x20] sm:$0xff] %vm151_vm0, %v11951_v17  ;;  %395 = vst.msk [vmem:[#allocation3 + $0x28] sm:$0xff] %vm151_vm0, %v11953_v18  ;;  %584 = vrot.lane.b32.xlu0 %v455_v13, %s11576_s21  ;;  %586 = vrot.lane.b32.xlu1 %v456_v14, %s11576_s21  ;;  %v11965_v20 = vld [vmem:[#allocation2 + $0x50] sm:$0xff]  ;;  %v457_v22 = vld [vmem:[#allocation2 + $0x21] sm:$0xff]  ;;  %v11582_v63 = vmov 65535   ;;  %s16067_s24 = smov 12  }
  0x46   :  { %396 = vst.msk [vmem:[#allocation3 + $0x30] sm:$0xff] %vm151_vm0, %v11963_v19  ;;  %397 = vst.msk [vmem:[#allocation3 + $0x38] sm:$0xff] %vm151_vm0, %v11965_v20  ;;  %v11971_v23 = vld [vmem:[#allocation2 + $0x60] sm:$0xff]  ;;  %v11973_v24 = vld [vmem:[#allocation2 + $0x68] sm:$0xff]  ;;  %v3737_v0 = vsel %vm3735_vm6, 4294967295, %v11582_v63  ;;  %s16068_s28 = smov 15  }
  0x47   :  { %398 = vst.msk [vmem:[#allocation3 + $0x40] sm:$0xff] %vm151_vm0, %v11971_v23  ;;  %399 = vst.msk [vmem:[#allocation3 + $0x48] sm:$0xff] %vm151_vm0, %v11973_v24  ;;  %v11981_v25 = vld [vmem:[#allocation2 + $0x78] sm:$0xff]  ;;  %v11983_v26 = vld [vmem:[#allocation2 + $0x80] sm:$0xff]  ;;  %v3738_v2 = vsel %vm3736_vm7, %v3737_v0, 0  ;;  %vm774_vm8 = vcmask 48152  }
  0x48   :  { %v841_v27 = vld [vmem:[#allocation2 + $0x1a] sm:$0xff]  ;;  %v842_v28 = vld [vmem:[#allocation2 + $0x22] sm:$0xff]  ;;  %400 = vst.msk [vmem:[#allocation3 + $0x50] sm:$0xff] %vm151_vm0, %v11981_v25  ;;  %401 = vst.msk [vmem:[#allocation3 + $0x58] sm:$0xff] %vm151_vm0, %v11983_v26  ;;  %vm1159_vm9 = vcmask 72752   ;;  %vm1544_vm10 = vcmask 97352  }
  0x49   :  { %967 = vrot.lane.b32.xlu0 %v839_v21, %s11575_s20  ;;  %588 = vrot.lane.b32.xlu1 %v457_v22, %s11576_s21  ;;  %v327_v30 = vld [vmem:[#allocation2 + $0x8] sm:$0xff]  ;;  %273 = vst.msk [vmem:[#allocation2 + $0x99] sm:$0xff] %vm151_vm0, %v72_v32  ;;  %v12017_v35 = vld [vmem:[#allocation2 + $0x31] sm:$0xff]  ;;  %v12019_v36 = vld [vmem:[#allocation2 + $0x39] sm:$0xff]  ;;  %vm16059_vm11 = vcmask 121952   ;;  %vm16057_vm12 = vcmask 146552  }
  0x4a   :  { %391 = vst.msk [vmem:[#allocation3 + $0x8] sm:$0xff] %vm151_vm0, %v327_v30  ;;  %v12003_v33 = vld [vmem:[#allocation2 + $0x90] sm:$0xff]  ;;  %v12029_v38 = vld [vmem:[#allocation2 + $0x3a] sm:$0xff]  ;;  %v74_v40 = vld [vmem:[%s16063_s29 + $0x68] sm:$0xff]  ;;  %vm16056_vm13 = vcmask 171152   ;;  %vm16055_vm14 = vcmask 195752  }
  0x4b   :  { %402 = vst.msk [vmem:[#allocation3 + $0x60] sm:$0xff] %vm151_vm0, %v12003_v33  ;;  %v12027_v37 = vld [vmem:[#allocation2 + $0x32] sm:$0xff]  ;;  %v73_v39 = vld [vmem:[%s16063_s29 + $0x60] sm:$0xff]  ;;  %275 = vst.msk [vmem:[#allocation2 + $0xb1] sm:$0xff] %vm151_vm0, %v74_v40  ;;  %vm3470_vm15 = vcmask 220352   ;;  %vm3638_vm1 = vcmask 220160  }
  0x4c   :  { %274 = vst.msk [vmem:[#allocation2 + $0xa9] sm:$0xff] %vm151_vm0, %v73_v39  ;;  %v125_v43 = vld [vmem:[%s16064_s23] sm:$0xff]  ;;  %v126_v44 = vld [vmem:[%s16064_s23 + $0x8] sm:$0xff]  ;;  %v2768_v50 = vld [vmem:[#allocation2 + $0x51] sm:$0xff]  ;;  %vm16054_vm6 = vcmask 1043459   ;;  %vm7460_vm7 = vcmask 1044484  }
  0x4d   :  { %971 = vrot.lane.b32.xlu0 %v841_v27, %s11575_s20  ;;  %973 = vrot.lane.b32.xlu1 %v842_v28, %s11575_s20  ;;  %vm129_vm2 = vcmp.gt.f32.partialorder %v125_v43, 0.005  ;;  %vm130_vm3 = vcmp.gt.f32.partialorder %v126_v44, 0.005  ;;  %v2767_v45 = vld [vmem:[#allocation2 + $0x49] sm:$0xff]  ;;  %v141_v48 = vld [vmem:[%s16065_s22] sm:$0xff] }
  0x4e   :  { %v10815_v46 = vsel %vm129_vm2, 1.0, %v11574_v1  ;;  %v10816_v47 = vsel %vm130_vm3, 1.0, %v11574_v1  ;;  %v142_v49 = vld [vmem:[%s16065_s22 + $0x8] sm:$0xff]  ;;  %v127_v53 = vld [vmem:[%s16064_s23 + $0x10] sm:$0xff]  ;;  %v128_v54 = vld [vmem:[%s16064_s23 + $0x18] sm:$0x7] }
  0x4f   :  { %v145_v51 = vmul.f32 %v10815_v46, %v141_v48  ;;  %v146_v52 = vmul.f32 %v10816_v47, %v142_v49  ;;  %vm131_vm4 = vcmp.gt.f32.partialorder %v127_v53, 0.005  ;;  %vm132_vm5 = vcmp.gt.f32.partialorder %v128_v54, 0.005  ;;  %v143_v55 = vld [vmem:[%s16065_s22 + $0x10] sm:$0xff]  ;;  %v76_v7 = vld [vmem:[%s16063_s29 + $0x78] sm:$0xff] }
  0x50   :  { %v12005_v34 = vld [vmem:[#allocation2 + $0x98] sm:$0xff]  ;;  %v10817_v57 = vsel %vm131_vm4, 1.0, %v11574_v1  ;;  %v10818_v58 = vsel %vm132_vm5, 1.0, %v11574_v1  ;;  %v3152_v4 = vld [vmem:[#allocation2 + $0x4a] sm:$0xff]  ;;  %277 = vst.msk [vmem:[#allocation2 + $0xc9] sm:$0xff] %vm151_vm0, %v76_v7  ;;  %v1615_v10 = vld [vmem:[#allocation2 + $0x61] sm:$0xff] }
  0x51   :  { %1352 = vrot.lane.b32.xlu0 %v1224_v15, %s16052_s25  ;;  %1354 = vrot.lane.b32.xlu1 %v1225_v16, %s16052_s25  ;;  %403 = vst.msk [vmem:[#allocation3 + $0x68] sm:$0xff] %vm151_vm0, %v12005_v34  ;;  %v149_v56 = vpack.c.bf16 %v146_v52, %v145_v51  ;;  %v144_v59 = vld [vmem:[%s16065_s22 + $0x18] sm:$0x7]  ;;  %v147_v60 = vmul.f32 %v10817_v57, %v143_v55  ;;  %v75_v6 = vld [vmem:[%s16063_s29 + $0x70] sm:$0xff]  ;;  %s16066_s22 = smov 9   ;;  %v2000_v12 = vld [vmem:[#allocation2 + $0x62] sm:$0xff] }
  0x52   :  { %v148_v61 = vmul.f32 %v10818_v58, %v144_v59  ;;  %v3153_v5 = vld [vmem:[#allocation2 + $0x52] sm:$0xff]  ;;  %276 = vst.msk [vmem:[#allocation2 + $0xc1] sm:$0xff] %vm151_vm0, %v75_v6  ;;  %v1616_v11 = vld [vmem:[#allocation2 + $0x69] sm:$0xff]  ;;  %v12266_v57 = vld [vmem:[#allocation2 + $0x9a] sm:$0xff]  ;;  %vm6772_vm2 = vcmask 130048   ;;  %vm6774_vm3 = vcmask 123904  }
  0x53   :  { %v12047_v41 = vld [vmem:[#allocation2 + $0xa8] sm:$0xff]  ;;  %v12053_v42 = vld [vmem:[#allocation2 + $0xb0] sm:$0xff]  ;;  %11375 = vmatprep.subr.bf16.mxu0 %v149_v56  ;;  %v80_v43 = vld [vmem:[%s16063_s29 + $0x98] sm:$0xff]  ;;  %6776 = vst.msk [vmem:[#allocation4 + $0x10] sm:$0xff] %vm6772_vm2, %v11574_v1  ;;  %vm16058_vm4 = vcmask 1041409   ;;  %vm7456_vm5 = vcmask 1042434  }
  0x54   :  { %404 = vst.msk [vmem:[#allocation3 + $0x70] sm:$0xff] %vm151_vm0, %v12047_v41  ;;  %405 = vst.msk [vmem:[#allocation3 + $0x78] sm:$0xff] %vm151_vm0, %v12053_v42  ;;  %11376 = vmatpush3.bf16.msra.mxu0 %v149_v56  ;;  %v150_v62 = vpack.c.bf16 %v148_v61, %v147_v60  ;;  %v2001_v13 = vld [vmem:[#allocation2 + $0x6a] sm:$0xff]  ;;  %v12190_v29 = vld [vmem:[#allocation2 + $0x82] sm:$0xff]  ;;  %s11588_s2 = smov 48  }
  0x55   :  { %1356 = vrot.lane.b32.xlu0 %v11951_v17, %s16052_s25  ;;  %1358 = vrot.lane.b32.xlu1 %v11953_v18, %s16052_s25  ;;  %s11583_s25 = smov 24   ;;  %v78_v15 = vld [vmem:[%s16063_s29 + $0x88] sm:$0xff]  ;;  %v79_v40 = vld [vmem:[%s16063_s29 + $0x90] sm:$0xff]  ;;  %281 = vst.msk [vmem:[#allocation2 + $0xf9] sm:$0xff] %vm151_vm0, %v80_v43  ;;  %v12250_v51 = vld [vmem:[#allocation2 + $0x99] sm:$0xff] }
  0x56   :  { %v3740_v3 = vand.u32 %v3738_v2, %v150_v62  ;;  %279 = vst.msk [vmem:[#allocation2 + $0xe1] sm:$0xff] %vm151_vm0, %v78_v15  ;;  %280 = vst.msk [vmem:[#allocation2 + $0xf1] sm:$0xff] %vm151_vm0, %v79_v40  ;;  %v12264_v56 = vld [vmem:[#allocation2 + $0x92] sm:$0xff]  ;;  %v81_v60 = vld [vmem:[%s16063_s29 + $0xa0] sm:$0xff] }
  0x57   :  { %282 = vst.msk [vmem:[#allocation2 + $0x109] sm:$0xff] %vm151_vm0, %v81_v60  ;;  %v82_v61 = vld [vmem:[%s16063_s29 + $0xa8] sm:$0xff]  ;;  %v12310_v6 = vld [vmem:[#allocation2 + $0xb1] sm:$0xff] }
  0x58   :  { %11377 = vmatprep.subr.bf16.mxu0 %v3740_v3  ;;  %283 = vst.msk [vmem:[#allocation2 + $0x111] sm:$0xff] %vm151_vm0, %v82_v61 }
  0x59   :  { %1737 = vrot.lane.b32.xlu0 %v456_v14, %s16050_s26  ;;  %1739 = vrot.lane.b32.xlu1 %v457_v22, %s16050_s26  ;;  %v12124_v8 = vld [vmem:[#allocation2 + $0xc0] sm:$0xff]  ;;  %v12126_v9 = vld [vmem:[#allocation2 + $0xc8] sm:$0xff]  ;;  %6777 = vst.msk [vmem:[#allocation4 + $0x18] sm:$0x3] %vm6774_vm3, %v11574_v1  ;;  %6775 = vst.msk [vmem:[#allocation4 + $0x8] sm:$0x3] %vm6774_vm3, %v11574_v1 }
  0x5a   :  { %11378 = vmatpush3.bf16.msra.mxu0 %v3740_v3  ;;  %406 = vst.msk [vmem:[#allocation3 + $0x80] sm:$0xff] %vm151_vm0, %v12124_v8  ;;  %407 = vst.msk [vmem:[#allocation3 + $0x88] sm:$0xff] %vm151_vm0, %v12126_v9  ;;  %v77_v14 = vld [vmem:[%s16063_s29 + $0x80] sm:$0xff] }
  0x5b   :  { %11467 = vmatprep.subr.bf16.mxu0 %v11574_v1  ;;  %278 = vst.msk [vmem:[#allocation2 + $0xd9] sm:$0xff] %vm151_vm0, %v77_v14 }
  0x5c   :  { %6773 = vst.msk [vmem:[#allocation4] sm:$0xff] %vm6772_vm2, %v11574_v1  ;;  %6778 = vst.msk [vmem:[#allocation4 + $0x20] sm:$0xff] %vm6772_vm2, %v11574_v1 }
  0x5d   :  { %1741 = vrot.lane.b32.xlu0 %v12017_v35, %s16050_s26  ;;  %1743 = vrot.lane.b32.xlu1 %v12019_v36, %s16050_s26  ;;  %v12230_v48 = vld [vmem:[#allocation2 + $0xf0] sm:$0xff]  ;;  %v12232_v49 = vld [vmem:[#allocation2 + $0xf8] sm:$0xff]  ;;  %6779 = vst.msk [vmem:[#allocation4 + $0x28] sm:$0x3] %vm6774_vm3, %v11574_v1  ;;  %6781 = vst.msk [vmem:[#allocation4 + $0x38] sm:$0x3] %vm6774_vm3, %v11574_v1 }
  0x5e   :  { %410 = vst.msk [vmem:[#allocation3 + $0xa0] sm:$0xff] %vm151_vm0, %v12230_v48  ;;  %411 = vst.msk [vmem:[#allocation3 + $0xa8] sm:$0xff] %vm151_vm0, %v12232_v49  ;;  %v12290_v3 = vld [vmem:[#allocation2 + $0x108] sm:$0xff] }
  0x5f   :  { %412 = vst.msk [vmem:[#allocation3 + $0xb0] sm:$0xff] %vm151_vm0, %v12290_v3 }
  0x60   :  { %6780 = vst.msk [vmem:[#allocation4 + $0x30] sm:$0xff] %vm6772_vm2, %v11574_v1  ;;  %6782 = vst.msk [vmem:[#allocation4 + $0x40] sm:$0xff] %vm6772_vm2, %v11574_v1 }
  0x61   :  { %2122 = vrot.lane.b32.xlu0 %v841_v27, %s16048_s27  ;;  %2124 = vrot.lane.b32.xlu1 %v842_v28, %s16048_s27  ;;  %v12188_v28 = vld [vmem:[#allocation2 + $0x7a] sm:$0xff]  ;;  %6783 = vst.msk [vmem:[#allocation4 + $0x48] sm:$0x3] %vm6774_vm3, %v11574_v1  ;;  %6785 = vst.msk [vmem:[#allocation4 + $0x58] sm:$0x3] %vm6774_vm3, %v11574_v1 }
  0x62   :  { %v12156_v16 = vld [vmem:[#allocation2 + $0xd8] sm:$0xff]  ;;  %6784 = vst.msk [vmem:[#allocation4 + $0x50] sm:$0xff] %vm6772_vm2, %v11574_v1  ;;  %6786 = vst.msk [vmem:[#allocation4 + $0x60] sm:$0xff] %vm6772_vm2, %v11574_v1 }
  0x63   :  { %408 = vst.msk [vmem:[#allocation3 + $0x90] sm:$0xff] %vm151_vm0, %v12156_v16 }
  0x64   :  { %6787 = vst.msk [vmem:[#allocation4 + $0x68] sm:$0x3] %vm6774_vm3, %v11574_v1  ;;  %6789 = vst.msk [vmem:[#allocation4 + $0x78] sm:$0x3] %vm6774_vm3, %v11574_v1 }
  0x65   :  { %2126 = vrot.lane.b32.xlu0 %v12027_v37, %s16048_s27  ;;  %2128 = vrot.lane.b32.xlu1 %v12029_v38, %s16048_s27  ;;  %s16069_s27 = smov 18   ;;  %6788 = vst.msk [vmem:[#allocation4 + $0x70] sm:$0xff] %vm6772_vm2, %v11574_v1  ;;  %6790 = vst.msk [vmem:[#allocation4 + $0x80] sm:$0xff] %vm6772_vm2, %v11574_v1 }
  0x66   :  { %6791 = vst.msk [vmem:[#allocation4 + $0x88] sm:$0x3] %vm6774_vm3, %v11574_v1  ;;  %6793 = vst.msk [vmem:[#allocation4 + $0x98] sm:$0x3] %vm6774_vm3, %v11574_v1 }
  0x67   :  { %6792 = vst.msk [vmem:[#allocation4 + $0x90] sm:$0xff] %vm6772_vm2, %v11574_v1  ;;  %6794 = vst.msk [vmem:[#allocation4 + $0xa0] sm:$0xff] %vm6772_vm2, %v11574_v1 }
  0x68   :  { %6795 = vst.msk [vmem:[#allocation4 + $0xa8] sm:$0x3] %vm6774_vm3, %v11574_v1  ;;  %6797 = vst.msk [vmem:[#allocation4 + $0xb8] sm:$0x3] %vm6774_vm3, %v11574_v1 }
  0x69   :  { %2508 = vrot.lane.b32.xlu0 %v11951_v17, %s16046_s1  ;;  %2510 = vrot.lane.b32.xlu1 %v11953_v18, %s16046_s1  ;;  %v12162_v17 = vld [vmem:[#allocation2 + $0xe0] sm:$0xff]  ;;  %6796 = vst.msk [vmem:[#allocation4 + $0xb0] sm:$0xff] %vm6772_vm2, %v11574_v1  ;;  %6798 = vst.msk [vmem:[#allocation4 + $0xc0] sm:$0xff] %vm6772_vm2, %v11574_v1 }
  0x6a   :  { %409 = vst.msk [vmem:[#allocation3 + $0x98] sm:$0xff] %vm151_vm0, %v12162_v17  ;;  %v12170_v18 = vld [vmem:[#allocation2 + $0x79] sm:$0xff] }
  0x6b   :  { %6799 = vst.msk [vmem:[#allocation4 + $0xc8] sm:$0x3] %vm6774_vm3, %v11574_v1  ;;  %6801 = vst.msk [vmem:[#allocation4 + $0xd8] sm:$0x3] %vm6774_vm3, %v11574_v1 }
  0x6c   :  { %6800 = vst.msk [vmem:[#allocation4 + $0xd0] sm:$0xff] %vm6772_vm2, %v11574_v1  ;;  %6802 = vst.msk [vmem:[#allocation4 + $0xe0] sm:$0xff] %vm6772_vm2, %v11574_v1 }
  0x6d   :  { %2512 = vrot.lane.b32.xlu0 %v11963_v19, %s16046_s1  ;;  %2514 = vrot.lane.b32.xlu1 %v11965_v20, %s16046_s1  ;;  %6803 = vst.msk [vmem:[#allocation4 + $0xe8] sm:$0x3] %vm6774_vm3, %v11574_v1  ;;  %6805 = vst.msk [vmem:[#allocation4 + $0xf8] sm:$0x3] %vm6774_vm3, %v11574_v1 }
  0x6e   :  { %6804 = vst.msk [vmem:[#allocation4 + $0xf0] sm:$0xff] %vm6772_vm2, %v11574_v1  ;;  %6806 = vst.msk [vmem:[#allocation4 + $0x100] sm:$0xff] %vm6772_vm2, %v11574_v1 }
  0x6f   :  { %6807 = vst.msk [vmem:[#allocation4 + $0x108] sm:$0x3] %vm6774_vm3, %v11574_v1  ;;  %6809 = vst.msk [vmem:[#allocation4 + $0x118] sm:$0x3] %vm6774_vm3, %v11574_v1 }
  0x70   :  { %6808 = vst.msk [vmem:[#allocation4 + $0x110] sm:$0xff] %vm6772_vm2, %v11574_v1  ;;  %6810 = vst.msk [vmem:[#allocation4 + $0x120] sm:$0xff] %vm6772_vm2, %v11574_v1 }
  0x71   :  { %2893 = vrot.lane.b32.xlu0 %v12017_v35, %s11581_s30  ;;  %2895 = vrot.lane.b32.xlu1 %v12019_v36, %s11581_s30  ;;  %6811 = vst.msk [vmem:[#allocation4 + $0x128] sm:$0x3] %vm6774_vm3, %v11574_v1  ;;  %6813 = vst.msk [vmem:[#allocation4 + $0x138] sm:$0x3] %vm6774_vm3, %v11574_v1  ;;  %vm7462_vm3 = vcmask 1045509  }
  0x72   :  { %6812 = vst.msk [vmem:[#allocation4 + $0x130] sm:$0xff] %vm6772_vm2, %v11574_v1 }
  0x75   :  { %2897 = vrot.lane.b32.xlu0 %v2767_v45, %s11581_s30  ;;  %2899 = vrot.lane.b32.xlu1 %v2768_v50, %s11581_s30 }
  0x79   :  { %3278 = vrot.lane.b32.xlu0 %v12027_v37, %s11583_s25  ;;  %3280 = vrot.lane.b32.xlu1 %v12029_v38, %s11583_s25 }
  0x7d   :  { %590 = vrot.lane.b32.xlu0 %v12017_v35, %s11576_s21  ;;  %592 = vrot.lane.b32.xlu1 %v12019_v36, %s11576_s21 }
  0x81   :  { %3282 = vrot.lane.b32.xlu0 %v3152_v4, %s11583_s25  ;;  %3284 = vrot.lane.b32.xlu1 %v3153_v5, %s11583_s25 }
  0x85   :  { %594 = vrot.lane.b32.xlu0 %v2767_v45, %s11576_s21  ;;  %596 = vrot.lane.b32.xlu1 %v2768_v50, %s11576_s21 }
  0x89   :  { %975 = vrot.lane.b32.xlu0 %v12027_v37, %s11575_s20  ;;  %977 = vrot.lane.b32.xlu1 %v12029_v38, %s11575_s20 }
  0x8d   :  { %979 = vrot.lane.b32.xlu0 %v3152_v4, %s11575_s20  ;;  %981 = vrot.lane.b32.xlu1 %v3153_v5, %s11575_s20 }
  0x91   :  { %1360 = vrot.lane.b32.xlu0 %v11963_v19, %s16066_s22  ;;  %1362 = vrot.lane.b32.xlu1 %v11965_v20, %s16066_s22  ;;  %v12172_v19 = vld [vmem:[#allocation2 + $0x81] sm:$0xff] }
  0x95   :  { %1364 = vrot.lane.b32.xlu0 %v11971_v23, %s16066_s22  ;;  %1366 = vrot.lane.b32.xlu1 %v11973_v24, %s16066_s22 }
  0x99   :  { %1745 = vrot.lane.b32.xlu0 %v2767_v45, %s16067_s24  ;;  %1747 = vrot.lane.b32.xlu1 %v2768_v50, %s16067_s24  ;;  %v12248_v50 = vld [vmem:[#allocation2 + $0x91] sm:$0xff] }
  0x9d   :  { %1749 = vrot.lane.b32.xlu0 %v1615_v10, %s16067_s24  ;;  %1751 = vrot.lane.b32.xlu1 %v1616_v11, %s16067_s24 }
  0xa1   :  { %2130 = vrot.lane.b32.xlu0 %v3152_v4, %s16068_s28  ;;  %2132 = vrot.lane.b32.xlu1 %v3153_v5, %s16068_s28  ;;  %v12296_v4 = vld [vmem:[#allocation2 + $0x110] sm:$0xff] }
  0xa2   :  { %413 = vst.msk [vmem:[#allocation3 + $0xb8] sm:$0xff] %vm151_vm0, %v12296_v4  ;;  %v12308_v5 = vld [vmem:[#allocation2 + $0xa9] sm:$0xff] }
  0xa5   :  { %2134 = vrot.lane.b32.xlu0 %v2000_v12, %s16068_s28  ;;  %2136 = vrot.lane.b32.xlu1 %v2001_v13, %s16068_s28 }
  0xa9   :  { %2516 = vrot.lane.b32.xlu0 %v11971_v23, %s16069_s27  ;;  %2518 = vrot.lane.b32.xlu1 %v11973_v24, %s16069_s27 }
  0xad   :  { %2520 = vrot.lane.b32.xlu0 %v11981_v25, %s16069_s27  ;;  %2522 = vrot.lane.b32.xlu1 %v11983_v26, %s16069_s27 }
  0xb1   :  { %2901 = vrot.lane.b32.xlu0 %v1615_v10, %s11581_s30  ;;  %2903 = vrot.lane.b32.xlu1 %v1616_v11, %s11581_s30 }
  0xb3   :  { %v970_v20 = vpop.permute.xlu1 %969  ;;  %v583_v21 = vpop.permute.xlu0 %582 }
  0xb4   :  { %775 = vst.msk [vmem:[#allocation3] sm:$0xff] %vm774_vm8, %v583_v21 }
  0xb5   :  { %2905 = vrot.lane.b32.xlu0 %v12170_v18, %s11581_s30  ;;  %2907 = vrot.lane.b32.xlu1 %v12172_v19, %s11581_s30 }
  0xb7   :  { %v585_v22 = vpop.permute.xlu0 %584  ;;  %v587_v23 = vpop.permute.xlu1 %586 }
  0xb8   :  { %776 = vst.msk [vmem:[#allocation3 + $0x8] sm:$0xff] %vm774_vm8, %v585_v22  ;;  %777 = vst.msk [vmem:[#allocation3 + $0x10] sm:$0xff] %vm774_vm8, %v587_v23  ;;  %v3160_v23 = vld [vmem:[#allocation2 + $0xaa] sm:$0xff] }
  0xb9   :  { %3286 = vrot.lane.b32.xlu0 %v2000_v12, %s11583_s25  ;;  %3288 = vrot.lane.b32.xlu1 %v2001_v13, %s11583_s25  ;;  %1161 = vst.msk [vmem:[#allocation3 + $0x8] sm:$0xff] %vm1159_vm9, %v970_v20 }
  0xbb   :  { %v968_v24 = vpop.permute.xlu0 %967  ;;  %v589_v27 = vpop.permute.xlu1 %588 }
  0xbc   :  { %1160 = vst.msk [vmem:[#allocation3] sm:$0xff] %vm1159_vm9, %v968_v24  ;;  %v3161_v24 = vld [vmem:[#allocation2 + $0xb2] sm:$0xff] }
  0xbd   :  { %778 = vst.msk [vmem:[#allocation3 + $0x18] sm:$0xff] %vm774_vm8, %v589_v27  ;;  %598 = vrot.lane.b32.xlu0 %v1615_v10, %s11576_s21  ;;  %600 = vrot.lane.b32.xlu1 %v1616_v11, %s11576_s21 }
  0xbf   :  { %v972_v30 = vpop.permute.xlu0 %971  ;;  %v974_v31 = vpop.permute.xlu1 %973 }
  0xc0   :  { %1162 = vst.msk [vmem:[#allocation3 + $0x10] sm:$0xff] %vm1159_vm9, %v972_v30  ;;  %1163 = vst.msk [vmem:[#allocation3 + $0x18] sm:$0xff] %vm1159_vm9, %v974_v31 }
  0xc1   :  { %3290 = vrot.lane.b32.xlu0 %v12188_v28, %s11583_s25  ;;  %3292 = vrot.lane.b32.xlu1 %v12190_v29, %s11583_s25 }
  0xc3   :  { %v1353_v32 = vpop.permute.xlu0 %1352  ;;  %v1355_v35 = vpop.permute.xlu1 %1354 }
  0xc4   :  { %1545 = vst.msk [vmem:[#allocation3] sm:$0xff] %vm1544_vm10, %v1353_v32  ;;  %1546 = vst.msk [vmem:[#allocation3 + $0x8] sm:$0xff] %vm1544_vm10, %v1355_v35 }
  0xc5   :  { %602 = vrot.lane.b32.xlu0 %v12170_v18, %s11576_s21  ;;  %604 = vrot.lane.b32.xlu1 %v12172_v19, %s11576_s21 }
  0xc7   :  { %v1357_v36 = vpop.permute.xlu0 %1356  ;;  %v1359_v37 = vpop.permute.xlu1 %1358 }
  0xc8   :  { %1547 = vst.msk [vmem:[#allocation3 + $0x10] sm:$0xff] %vm1544_vm10, %v1357_v36  ;;  %1548 = vst.msk [vmem:[#allocation3 + $0x18] sm:$0xff] %vm1544_vm10, %v1359_v37  ;;  %v83_v37 = vld [vmem:[%s16063_s29 + $0xb0] sm:$0xff] }
  0xc9   :  { %983 = vrot.lane.b32.xlu0 %v2000_v12, %s11575_s20  ;;  %985 = vrot.lane.b32.xlu1 %v2001_v13, %s11575_s20  ;;  %284 = vst.msk [vmem:[#allocation2 + $0x121] sm:$0xff] %vm151_vm0, %v83_v37  ;;  %v12500_v37 = vld [vmem:[#allocation2 + $0xf9] sm:$0xff] }
  0xcb   :  { %v1738_v38 = vpop.permute.xlu0 %1737  ;;  %v1740_v39 = vpop.permute.xlu1 %1739 }
  0xcc   :  { %1930 = vst.msk [vmem:[#allocation3] sm:$0xff] %vm16059_vm11, %v1738_v38  ;;  %1931 = vst.msk [vmem:[#allocation3 + $0x8] sm:$0xff] %vm16059_vm11, %v1740_v39  ;;  %v84_v38 = vld [vmem:[%s16063_s29 + $0xb8] sm:$0xff] }
  0xcd   :  { %987 = vrot.lane.b32.xlu0 %v12188_v28, %s11575_s20  ;;  %989 = vrot.lane.b32.xlu1 %v12190_v29, %s11575_s20  ;;  %285 = vst.msk [vmem:[#allocation2 + $0x129] sm:$0xff] %vm151_vm0, %v84_v38 }
  0xcf   :  { %v1742_v44 = vpop.permute.xlu0 %1741  ;;  %v1744_v45 = vpop.permute.xlu1 %1743 }
  0xd0   :  { %1932 = vst.msk [vmem:[#allocation3 + $0x10] sm:$0xff] %vm16059_vm11, %v1742_v44  ;;  %1933 = vst.msk [vmem:[#allocation3 + $0x18] sm:$0xff] %vm16059_vm11, %v1744_v45 }
  0xd1   :  { %1368 = vrot.lane.b32.xlu0 %v11981_v25, %s16066_s22  ;;  %1370 = vrot.lane.b32.xlu1 %v11983_v26, %s16066_s22 }
  0xd3   :  { %v2123_v46 = vpop.permute.xlu0 %2122  ;;  %v2125_v47 = vpop.permute.xlu1 %2124 }
  0xd4   :  { %2315 = vst.msk [vmem:[#allocation3] sm:$0xff] %vm16057_vm12, %v2123_v46  ;;  %2316 = vst.msk [vmem:[#allocation3 + $0x8] sm:$0xff] %vm16057_vm12, %v2125_v47 }
  0xd5   :  { %1372 = vrot.lane.b32.xlu0 %v12003_v33, %s16066_s22  ;;  %1374 = vrot.lane.b32.xlu1 %v12005_v34, %s16066_s22 }
  0xd7   :  { %v2127_v25 = vpop.permute.xlu0 %2126  ;;  %v2129_v26 = vpop.permute.xlu1 %2128 }
  0xd8   :  { %2317 = vst.msk [vmem:[#allocation3 + $0x10] sm:$0xff] %vm16057_vm12, %v2127_v25  ;;  %2318 = vst.msk [vmem:[#allocation3 + $0x18] sm:$0xff] %vm16057_vm12, %v2129_v26 }
  0xd9   :  { %1753 = vrot.lane.b32.xlu0 %v12170_v18, %s16067_s24  ;;  %1755 = vrot.lane.b32.xlu1 %v12172_v19, %s16067_s24 }
  0xdb   :  { %v2509_v52 = vpop.permute.xlu0 %2508  ;;  %v2511_v53 = vpop.permute.xlu1 %2510 }
  0xdc   :  { %2701 = vst.msk [vmem:[#allocation3] sm:$0xff] %vm16056_vm13, %v2509_v52  ;;  %2702 = vst.msk [vmem:[#allocation3 + $0x8] sm:$0xff] %vm16056_vm13, %v2511_v53  ;;  %v12394_v52 = vld [vmem:[#allocation2 + $0xca] sm:$0xff] }
  0xdd   :  { %1757 = vrot.lane.b32.xlu0 %v12248_v50, %s16067_s24  ;;  %1759 = vrot.lane.b32.xlu1 %v12250_v51, %s16067_s24 }
  0xdf   :  { %v2513_v54 = vpop.permute.xlu0 %2512  ;;  %v2515_v55 = vpop.permute.xlu1 %2514 }
  0xe0   :  { %2703 = vst.msk [vmem:[#allocation3 + $0x10] sm:$0xff] %vm16056_vm13, %v2513_v54  ;;  %2704 = vst.msk [vmem:[#allocation3 + $0x18] sm:$0xff] %vm16056_vm13, %v2515_v55  ;;  %v85_v55 = vld [vmem:[%s16063_s29 + $0xc0] sm:$0xff] }
  0xe1   :  { %2138 = vrot.lane.b32.xlu0 %v12188_v28, %s16068_s28  ;;  %2140 = vrot.lane.b32.xlu1 %v12190_v29, %s16068_s28  ;;  %286 = vst.msk [vmem:[#allocation2 + $0x139] sm:$0xff] %vm151_vm0, %v85_v55 }
  0xe3   :  { %v2894_v58 = vpop.permute.xlu0 %2893  ;;  %v2896_v59 = vpop.permute.xlu1 %2895 }
  0xe4   :  { %3086 = vst.msk [vmem:[#allocation3] sm:$0xff] %vm16055_vm14, %v2894_v58  ;;  %3087 = vst.msk [vmem:[#allocation3 + $0x8] sm:$0xff] %vm16055_vm14, %v2896_v59 }
  0xe5   :  { %2142 = vrot.lane.b32.xlu0 %v12264_v56, %s16068_s28  ;;  %2144 = vrot.lane.b32.xlu1 %v12266_v57, %s16068_s28 }
  0xe7   :  { %v2898_v62 = vpop.permute.xlu0 %2897  ;;  %v2900_v63 = vpop.permute.xlu1 %2899 }
  0xe8   :  { %3088 = vst.msk [vmem:[#allocation3 + $0x10] sm:$0xff] %vm16055_vm14, %v2898_v62  ;;  %3089 = vst.msk [vmem:[#allocation3 + $0x18] sm:$0xff] %vm16055_vm14, %v2900_v63 }
  0xe9   :  { %2524 = vrot.lane.b32.xlu0 %v12003_v33, %s16069_s27  ;;  %2526 = vrot.lane.b32.xlu1 %v12005_v34, %s16069_s27 }
  0xeb   :  { %v3279_v0 = vpop.permute.xlu0 %3278  ;;  %v3281_v2 = vpop.permute.xlu1 %3280 }
  0xec   :  { %3471 = vst.msk [vmem:[#allocation3] sm:$0xff] %vm3470_vm15, %v3279_v0  ;;  %3472 = vst.msk [vmem:[#allocation3 + $0x8] sm:$0xff] %vm3470_vm15, %v3281_v2 }
  0xed   :  { %2528 = vrot.lane.b32.xlu0 %v12047_v41, %s16069_s27  ;;  %2530 = vrot.lane.b32.xlu1 %v12053_v42, %s16069_s27 }
  0xef   :  { %v591_v33 = vpop.permute.xlu0 %590  ;;  %v593_v34 = vpop.permute.xlu1 %592 }
  0xf0   :  { %779 = vst.msk [vmem:[#allocation3 + $0x20] sm:$0xff] %vm774_vm8, %v591_v33  ;;  %780 = vst.msk [vmem:[#allocation3 + $0x28] sm:$0xff] %vm774_vm8, %v593_v34 }
  0xf1   :  { %2909 = vrot.lane.b32.xlu0 %v12248_v50, %s11581_s30  ;;  %2911 = vrot.lane.b32.xlu1 %v12250_v51, %s11581_s30 }
  0xf3   :  { %v3283_v7 = vpop.permute.xlu0 %3282  ;;  %v3285_v10 = vpop.permute.xlu1 %3284  ;;  %v3535_v11 = vld [vmem:[#allocation3] sm:$0xff]  ;;  %v3536_v12 = vld [vmem:[#allocation3 + $0x8] sm:$0xff] }
  0xf4   :  { %3473 = vst.msk [vmem:[#allocation3 + $0x10] sm:$0xff] %vm3470_vm15, %v3283_v7  ;;  %3474 = vst.msk [vmem:[#allocation3 + $0x18] sm:$0xff] %vm3470_vm15, %v3285_v10  ;;  %v3599_v13 = vpack.c.bf16 %v3536_v12, %v3535_v11 }
  0xf5   :  { %2913 = vrot.lane.b32.xlu0 %v12308_v5, %s11581_s30  ;;  %2915 = vrot.lane.b32.xlu1 %v12310_v6, %s11581_s30 }
  0xf6   :  { %11379 = vmatprep.mubr.msk.bf16.mxu0 %vm3638_vm1, %v3599_v13 }
  0xf7   :  { %v595_v14 = vpop.permute.xlu0 %594  ;;  %v597_v15 = vpop.permute.xlu1 %596 }
  0xf8   :  { %781 = vst.msk [vmem:[#allocation3 + $0x30] sm:$0xff] %vm774_vm8, %v595_v14  ;;  %782 = vst.msk [vmem:[#allocation3 + $0x38] sm:$0xff] %vm774_vm8, %v597_v15  ;;  %v3164_v14 = vld [vmem:[#allocation2 + $0xda] sm:$0xff]  ;;  %v3165_v15 = vld [vmem:[#allocation2 + $0xe2] sm:$0xff] }
  0xf9   :  { %3294 = vrot.lane.b32.xlu0 %v12264_v56, %s11583_s25  ;;  %3296 = vrot.lane.b32.xlu1 %v12266_v57, %s11583_s25 }
  0xfb   :  { %v976_v18 = vpop.permute.xlu0 %975  ;;  %v978_v19 = vpop.permute.xlu1 %977  ;;  %v3537_v20 = vld [vmem:[#allocation3 + $0x10] sm:$0xff]  ;;  %v3538_v21 = vld [vmem:[#allocation3 + $0x18] sm:$0xff] }
  0xfc   :  { %1164 = vst.msk [vmem:[#allocation3 + $0x20] sm:$0xff] %vm1159_vm9, %v976_v18  ;;  %1165 = vst.msk [vmem:[#allocation3 + $0x28] sm:$0xff] %vm1159_vm9, %v978_v19  ;;  %v3600_v22 = vpack.c.bf16 %v3538_v21, %v3537_v20 }
  0xfd   :  { %606 = vrot.lane.b32.xlu0 %v12248_v50, %s11576_s21  ;;  %608 = vrot.lane.b32.xlu1 %v12250_v51, %s11576_s21  ;;  %v12392_v51 = vld [vmem:[#allocation2 + $0xc2] sm:$0xff] }
  0xfe   :  { %11380 = vmatmul.mubr.msk.bf16.vlgmr.msra.gmra.mrb[0].mxu0 %vm3638_vm1, %v3600_v22 }
  0xff   :  { %v980_v27 = vpop.permute.xlu0 %979  ;;  %v982_v28 = vpop.permute.xlu1 %981 }
 0x100   :  { %1166 = vst.msk [vmem:[#allocation3 + $0x30] sm:$0xff] %vm1159_vm9, %v980_v27  ;;  %1167 = vst.msk [vmem:[#allocation3 + $0x38] sm:$0xff] %vm1159_vm9, %v982_v28 }
 0x101   :  { %3298 = vrot.lane.b32.xlu0 %v3160_v23, %s11583_s25  ;;  %3300 = vrot.lane.b32.xlu1 %v3161_v24, %s11583_s25 }
 0x103   :  { %v1361_v29 = vpop.permute.xlu0 %1360  ;;  %v1363_v30 = vpop.permute.xlu1 %1362 }
 0x104   :  { %1549 = vst.msk [vmem:[#allocation3 + $0x20] sm:$0xff] %vm1544_vm10, %v1361_v29  ;;  %1550 = vst.msk [vmem:[#allocation3 + $0x28] sm:$0xff] %vm1544_vm10, %v1363_v30 }
 0x105   :  { %610 = vrot.lane.b32.xlu0 %v12308_v5, %s11576_s21  ;;  %612 = vrot.lane.b32.xlu1 %v12310_v6, %s11576_s21 }
 0x107   :  { %v1365_v31 = vpop.permute.xlu0 %1364  ;;  %v1367_v32 = vpop.permute.xlu1 %1366 }
 0x108   :  { %1551 = vst.msk [vmem:[#allocation3 + $0x30] sm:$0xff] %vm1544_vm10, %v1365_v31  ;;  %1552 = vst.msk [vmem:[#allocation3 + $0x38] sm:$0xff] %vm1544_vm10, %v1367_v32  ;;  %v87_v32 = vld [vmem:[%s16063_s29 + $0xd0] sm:$0xff] }
 0x109   :  { %991 = vrot.lane.b32.xlu0 %v12264_v56, %s11575_s20  ;;  %993 = vrot.lane.b32.xlu1 %v12266_v57, %s11575_s20  ;;  %v86_v56 = vld [vmem:[%s16063_s29 + $0xc8] sm:$0xff]  ;;  %288 = vst.msk [vmem:[#allocation2 + $0x151] sm:$0xff] %vm151_vm0, %v87_v32 }
 0x10a   :  { %287 = vst.msk [vmem:[#allocation2 + $0x141] sm:$0xff] %vm151_vm0, %v86_v56 }
 0x10b   :  { %v1746_v35 = vpop.permute.xlu0 %1745  ;;  %v1748_v36 = vpop.permute.xlu1 %1747 }
 0x10c   :  { %1934 = vst.msk [vmem:[#allocation3 + $0x20] sm:$0xff] %vm16059_vm11, %v1746_v35  ;;  %1935 = vst.msk [vmem:[#allocation3 + $0x28] sm:$0xff] %vm16059_vm11, %v1748_v36  ;;  %v12498_v36 = vld [vmem:[#allocation2 + $0xf1] sm:$0xff] }
 0x10d   :  { %995 = vrot.lane.b32.xlu0 %v3160_v23, %s11575_s20  ;;  %997 = vrot.lane.b32.xlu1 %v3161_v24, %s11575_s20 }
 0x10f   :  { %v1750_v39 = vpop.permute.xlu0 %1749  ;;  %v1752_v40 = vpop.permute.xlu1 %1751 }
 0x110   :  { %1936 = vst.msk [vmem:[#allocation3 + $0x30] sm:$0xff] %vm16059_vm11, %v1750_v39  ;;  %1937 = vst.msk [vmem:[#allocation3 + $0x38] sm:$0xff] %vm16059_vm11, %v1752_v40 }
 0x111   :  { %1376 = vrot.lane.b32.xlu0 %v12047_v41, %s16066_s22  ;;  %1378 = vrot.lane.b32.xlu1 %v12053_v42, %s16066_s22  ;;  %v12378_v41 = vld [vmem:[#allocation2 + $0xc1] sm:$0xff]  ;;  %v12380_v42 = vld [vmem:[#allocation2 + $0xc9] sm:$0xff] }
 0x113   :  { %v2131_v43 = vpop.permute.xlu0 %2130  ;;  %v2133_v44 = vpop.permute.xlu1 %2132 }
 0x114   :  { %2319 = vst.msk [vmem:[#allocation3 + $0x20] sm:$0xff] %vm16057_vm12, %v2131_v43  ;;  %2320 = vst.msk [vmem:[#allocation3 + $0x28] sm:$0xff] %vm16057_vm12, %v2133_v44  ;;  %v12512_v44 = vld [vmem:[#allocation2 + $0xf2] sm:$0xff] }
 0x115   :  { %1380 = vrot.lane.b32.xlu0 %v12124_v8, %s16066_s22  ;;  %1382 = vrot.lane.b32.xlu1 %v12126_v9, %s16066_s22 }
 0x117   :  { %v2135_v45 = vpop.permute.xlu0 %2134  ;;  %v2137_v46 = vpop.permute.xlu1 %2136 }
 0x118   :  { %2321 = vst.msk [vmem:[#allocation3 + $0x30] sm:$0xff] %vm16057_vm12, %v2135_v45  ;;  %2322 = vst.msk [vmem:[#allocation3 + $0x38] sm:$0xff] %vm16057_vm12, %v2137_v46  ;;  %v12514_v45 = vld [vmem:[#allocation2 + $0xfa] sm:$0xff] }
 0x119   :  { %1761 = vrot.lane.b32.xlu0 %v12308_v5, %s16067_s24  ;;  %1763 = vrot.lane.b32.xlu1 %v12310_v6, %s16067_s24 }
 0x11b   :  { %v2517_v47 = vpop.permute.xlu0 %2516  ;;  %v2519_v25 = vpop.permute.xlu1 %2518 }
 0x11c   :  { %2705 = vst.msk [vmem:[#allocation3 + $0x20] sm:$0xff] %vm16056_vm13, %v2517_v47  ;;  %2706 = vst.msk [vmem:[#allocation3 + $0x28] sm:$0xff] %vm16056_vm13, %v2519_v25 }
 0x11d   :  { %1765 = vrot.lane.b32.xlu0 %v12378_v41, %s16067_s24  ;;  %1767 = vrot.lane.b32.xlu1 %v12380_v42, %s16067_s24 }
 0x11f   :  { %v2521_v26 = vpop.permute.xlu0 %2520  ;;  %v2523_v50 = vpop.permute.xlu1 %2522 }
 0x120   :  { %2707 = vst.msk [vmem:[#allocation3 + $0x30] sm:$0xff] %vm16056_vm13, %v2521_v26  ;;  %2708 = vst.msk [vmem:[#allocation3 + $0x38] sm:$0xff] %vm16056_vm13, %v2523_v50 }
 0x121   :  { %2146 = vrot.lane.b32.xlu0 %v3160_v23, %s16068_s28  ;;  %2148 = vrot.lane.b32.xlu1 %v3161_v24, %s16068_s28 }
 0x123   :  { %v2902_v53 = vpop.permute.xlu0 %2901  ;;  %v2904_v54 = vpop.permute.xlu1 %2903 }
 0x124   :  { %3090 = vst.msk [vmem:[#allocation3 + $0x20] sm:$0xff] %vm16055_vm14, %v2902_v53  ;;  %3091 = vst.msk [vmem:[#allocation3 + $0x28] sm:$0xff] %vm16055_vm14, %v2904_v54  ;;  %v12630_v53 = vld [vmem:[#allocation2 + $0x111] sm:$0xff] }
 0x125   :  { %2150 = vrot.lane.b32.xlu0 %v12392_v51, %s16068_s28  ;;  %2152 = vrot.lane.b32.xlu1 %v12394_v52, %s16068_s28 }
 0x127   :  { %v2906_v57 = vpop.permute.xlu0 %2905  ;;  %v2908_v58 = vpop.permute.xlu1 %2907 }
 0x128   :  { %3092 = vst.msk [vmem:[#allocation3 + $0x30] sm:$0xff] %vm16055_vm14, %v2906_v57  ;;  %3093 = vst.msk [vmem:[#allocation3 + $0x38] sm:$0xff] %vm16055_vm14, %v2908_v58 }
 0x129   :  { %2532 = vrot.lane.b32.xlu0 %v12124_v8, %s16069_s27  ;;  %2534 = vrot.lane.b32.xlu1 %v12126_v9, %s16069_s27  ;;  %v12428_v8 = vld [vmem:[#allocation2 + $0xd9] sm:$0xff]  ;;  %v12430_v9 = vld [vmem:[#allocation2 + $0xe1] sm:$0xff] }
 0x12b   :  { %v3287_v59 = vpop.permute.xlu0 %3286  ;;  %v3289_v60 = vpop.permute.xlu1 %3288 }
 0x12c   :  { %3475 = vst.msk [vmem:[#allocation3 + $0x20] sm:$0xff] %vm3470_vm15, %v3287_v59  ;;  %3476 = vst.msk [vmem:[#allocation3 + $0x28] sm:$0xff] %vm3470_vm15, %v3289_v60 }
 0x12d   :  { %2536 = vrot.lane.b32.xlu0 %v12156_v16, %s16069_s27  ;;  %2538 = vrot.lane.b32.xlu1 %v12162_v17, %s16069_s27 }
 0x12f   :  { %v599_v61 = vpop.permute.xlu0 %598  ;;  %v601_v62 = vpop.permute.xlu1 %600 }
 0x130   :  { %783 = vst.msk [vmem:[#allocation3 + $0x40] sm:$0xff] %vm774_vm8, %v599_v61  ;;  %784 = vst.msk [vmem:[#allocation3 + $0x48] sm:$0xff] %vm774_vm8, %v601_v62 }
 0x131   :  { %2917 = vrot.lane.b32.xlu0 %v12378_v41, %s11581_s30  ;;  %2919 = vrot.lane.b32.xlu1 %v12380_v42, %s11581_s30 }
 0x133   :  { %v3291_v63 = vpop.permute.xlu0 %3290  ;;  %v3293_v0 = vpop.permute.xlu1 %3292  ;;  %v3539_v2 = vld [vmem:[#allocation3 + $0x20] sm:$0xff]  ;;  %v3540_v33 = vld [vmem:[#allocation3 + $0x28] sm:$0xff] }
 0x134   :  { %3477 = vst.msk [vmem:[#allocation3 + $0x30] sm:$0xff] %vm3470_vm15, %v3291_v63  ;;  %3478 = vst.msk [vmem:[#allocation3 + $0x38] sm:$0xff] %vm3470_vm15, %v3293_v0  ;;  %v3601_v34 = vpack.c.bf16 %v3540_v33, %v3539_v2  ;;  %v3168_v33 = vld [vmem:[#allocation2 + $0x10a] sm:$0xff] }
 0x135   :  { %2921 = vrot.lane.b32.xlu0 %v12428_v8, %s11581_s30  ;;  %2923 = vrot.lane.b32.xlu1 %v12430_v9, %s11581_s30 }
 0x136   :  { %11383 = vmatprep.mubr.msk.bf16.mxu0 %vm3638_vm1, %v3601_v34  ;;  %v3169_v34 = vld [vmem:[#allocation2 + $0x112] sm:$0xff] }
 0x137   :  { %v603_v5 = vpop.permute.xlu0 %602  ;;  %v605_v6 = vpop.permute.xlu1 %604 }
 0x138   :  { %785 = vst.msk [vmem:[#allocation3 + $0x50] sm:$0xff] %vm774_vm8, %v603_v5  ;;  %786 = vst.msk [vmem:[#allocation3 + $0x58] sm:$0xff] %vm774_vm8, %v605_v6 }
 0x139   :  { %3302 = vrot.lane.b32.xlu0 %v12392_v51, %s11583_s25  ;;  %3304 = vrot.lane.b32.xlu1 %v12394_v52, %s11583_s25 }
 0x13b   :  { %v984_v7 = vpop.permute.xlu0 %983  ;;  %v986_v10 = vpop.permute.xlu1 %985  ;;  %v3541_v11 = vld [vmem:[#allocation3 + $0x30] sm:$0xff]  ;;  %v3542_v12 = vld [vmem:[#allocation3 + $0x38] sm:$0xff] }
 0x13c   :  { %1168 = vst.msk [vmem:[#allocation3 + $0x40] sm:$0xff] %vm1159_vm9, %v984_v7  ;;  %1169 = vst.msk [vmem:[#allocation3 + $0x48] sm:$0xff] %vm1159_vm9, %v986_v10  ;;  %v3602_v13 = vpack.c.bf16 %v3542_v12, %v3541_v11 }
 0x13d   :  { %614 = vrot.lane.b32.xlu0 %v12378_v41, %s11576_s21  ;;  %616 = vrot.lane.b32.xlu1 %v12380_v42, %s11576_s21 }
 0x13e   :  { %11384 = vmatmul.mubr.msk.bf16.gmra.mrb[4].mxu0 %vm3638_vm1, %v3602_v13 }
 0x13f   :  { %v988_v18 = vpop.permute.xlu0 %987  ;;  %v990_v19 = vpop.permute.xlu1 %989 }
 0x140   :  { %1170 = vst.msk [vmem:[#allocation3 + $0x50] sm:$0xff] %vm1159_vm9, %v988_v18  ;;  %1171 = vst.msk [vmem:[#allocation3 + $0x58] sm:$0xff] %vm1159_vm9, %v990_v19  ;;  %v1246_v19 = vld [vmem:[#allocation2 + $0x120] sm:$0xff] }
 0x141   :  { %3306 = vrot.lane.b32.xlu0 %v3164_v14, %s11583_s25  ;;  %3308 = vrot.lane.b32.xlu1 %v3165_v15, %s11583_s25 }
 0x143   :  { %v1369_v20 = vpop.permute.xlu0 %1368  ;;  %v1371_v21 = vpop.permute.xlu1 %1370 }
 0x144   :  { %1553 = vst.msk [vmem:[#allocation3 + $0x40] sm:$0xff] %vm1544_vm10, %v1369_v20  ;;  %1554 = vst.msk [vmem:[#allocation3 + $0x48] sm:$0xff] %vm1544_vm10, %v1371_v21  ;;  %v1247_v20 = vld [vmem:[#allocation2 + $0x128] sm:$0xff] }
 0x145   :  { %618 = vrot.lane.b32.xlu0 %v12428_v8, %s11576_s21  ;;  %620 = vrot.lane.b32.xlu1 %v12430_v9, %s11576_s21 }
 0x147   :  { %v1373_v22 = vpop.permute.xlu0 %1372  ;;  %v1375_v23 = vpop.permute.xlu1 %1374 }
 0x148   :  { %1555 = vst.msk [vmem:[#allocation3 + $0x50] sm:$0xff] %vm1544_vm10, %v1373_v22  ;;  %1556 = vst.msk [vmem:[#allocation3 + $0x58] sm:$0xff] %vm1544_vm10, %v1375_v23  ;;  %v91_v23 = vld [vmem:[%s16063_s29 + $0xf0] sm:$0xff] }
 0x149   :  { %999 = vrot.lane.b32.xlu0 %v12392_v51, %s11575_s20  ;;  %1001 = vrot.lane.b32.xlu1 %v12394_v52, %s11575_s20  ;;  %v12628_v52 = vld [vmem:[#allocation2 + $0x109] sm:$0xff]  ;;  %292 = vst.msk [vmem:[#allocation2 + $0x181] sm:$0xff] %vm151_vm0, %v91_v23 }
 0x14b   :  { %v1754_v24 = vpop.permute.xlu0 %1753  ;;  %v1756_v27 = vpop.permute.xlu1 %1755 }
 0x14c   :  { %1938 = vst.msk [vmem:[#allocation3 + $0x40] sm:$0xff] %vm16059_vm11, %v1754_v24  ;;  %1939 = vst.msk [vmem:[#allocation3 + $0x48] sm:$0xff] %vm16059_vm11, %v1756_v27  ;;  %v12704_v27 = vld [vmem:[#allocation2 + $0x121] sm:$0xff] }
 0x14d   :  { %1003 = vrot.lane.b32.xlu0 %v3164_v14, %s11575_s20  ;;  %1005 = vrot.lane.b32.xlu1 %v3165_v15, %s11575_s20 }
 0x14f   :  { %v1758_v28 = vpop.permute.xlu0 %1757  ;;  %v1760_v29 = vpop.permute.xlu1 %1759 }
 0x150   :  { %1940 = vst.msk [vmem:[#allocation3 + $0x50] sm:$0xff] %vm16059_vm11, %v1758_v28  ;;  %1941 = vst.msk [vmem:[#allocation3 + $0x58] sm:$0xff] %vm16059_vm11, %v1760_v29  ;;  %v12706_v28 = vld [vmem:[#allocation2 + $0x129] sm:$0xff] }
 0x151   :  { %1384 = vrot.lane.b32.xlu0 %v12156_v16, %s16066_s22  ;;  %1386 = vrot.lane.b32.xlu1 %v12162_v17, %s16066_s22  ;;  %v88_v16 = vld [vmem:[%s16063_s29 + $0xd8] sm:$0xff] }
 0x152   :  { %289 = vst.msk [vmem:[#allocation2 + $0x159] sm:$0xff] %vm151_vm0, %v88_v16  ;;  %v12718_v16 = vld [vmem:[#allocation2 + $0x122] sm:$0xff] }
 0x153   :  { %v2139_v30 = vpop.permute.xlu0 %2138  ;;  %v2141_v31 = vpop.permute.xlu1 %2140 }
 0x154   :  { %2323 = vst.msk [vmem:[#allocation3 + $0x40] sm:$0xff] %vm16057_vm12, %v2139_v30  ;;  %2324 = vst.msk [vmem:[#allocation3 + $0x48] sm:$0xff] %vm16057_vm12, %v2141_v31 }
 0x155   :  { %1388 = vrot.lane.b32.xlu0 %v12230_v48, %s16066_s22  ;;  %1390 = vrot.lane.b32.xlu1 %v12232_v49, %s16066_s22 }
 0x157   :  { %v2143_v17 = vpop.permute.xlu0 %2142  ;;  %v2145_v35 = vpop.permute.xlu1 %2144 }
 0x158   :  { %2325 = vst.msk [vmem:[#allocation3 + $0x50] sm:$0xff] %vm16057_vm12, %v2143_v17  ;;  %2326 = vst.msk [vmem:[#allocation3 + $0x58] sm:$0xff] %vm16057_vm12, %v2145_v35  ;;  %v12720_v17 = vld [vmem:[#allocation2 + $0x12a] sm:$0xff] }
 0x159   :  { %1769 = vrot.lane.b32.xlu0 %v12428_v8, %s16067_s24  ;;  %1771 = vrot.lane.b32.xlu1 %v12430_v9, %s16067_s24 }
 0x15b   :  { %v2525_v38 = vpop.permute.xlu0 %2524  ;;  %v2527_v39 = vpop.permute.xlu1 %2526 }
 0x15c   :  { %2709 = vst.msk [vmem:[#allocation3 + $0x40] sm:$0xff] %vm16056_vm13, %v2525_v38  ;;  %2710 = vst.msk [vmem:[#allocation3 + $0x48] sm:$0xff] %vm16056_vm13, %v2527_v39  ;;  %v12732_v39 = vld [vmem:[#allocation2 + $0x138] sm:$0xff] }
 0x15d   :  { %1773 = vrot.lane.b32.xlu0 %v12498_v36, %s16067_s24  ;;  %1775 = vrot.lane.b32.xlu1 %v12500_v37, %s16067_s24 }
 0x15f   :  { %v2529_v40 = vpop.permute.xlu0 %2528  ;;  %v2531_v43 = vpop.permute.xlu1 %2530 }
 0x160   :  { %2711 = vst.msk [vmem:[#allocation3 + $0x50] sm:$0xff] %vm16056_vm13, %v2529_v40  ;;  %2712 = vst.msk [vmem:[#allocation3 + $0x58] sm:$0xff] %vm16056_vm13, %v2531_v43  ;;  %v12734_v40 = vld [vmem:[#allocation2 + $0x140] sm:$0xff] }
 0x161   :  { %2154 = vrot.lane.b32.xlu0 %v3164_v14, %s16068_s28  ;;  %2156 = vrot.lane.b32.xlu1 %v3165_v15, %s16068_s28 }
 0x163   :  { %v2910_v46 = vpop.permute.xlu0 %2909  ;;  %v2912_v41 = vpop.permute.xlu1 %2911 }
 0x164   :  { %3094 = vst.msk [vmem:[#allocation3 + $0x40] sm:$0xff] %vm16055_vm14, %v2910_v46  ;;  %3095 = vst.msk [vmem:[#allocation3 + $0x48] sm:$0xff] %vm16055_vm14, %v2912_v41  ;;  %v350_v41 = vld [vmem:[#allocation2 + $0x120] sm:$0xff] }
 0x165   :  { %2158 = vrot.lane.b32.xlu0 %v12512_v44, %s16068_s28  ;;  %2160 = vrot.lane.b32.xlu1 %v12514_v45, %s16068_s28  ;;  %414 = vst.msk [vmem:[#allocation3 + $0xc0] sm:$0xff] %vm151_vm0, %v350_v41 }
 0x167   :  { %v2914_v42 = vpop.permute.xlu0 %2913  ;;  %v2916_v47 = vpop.permute.xlu1 %2915 }
 0x168   :  { %3096 = vst.msk [vmem:[#allocation3 + $0x50] sm:$0xff] %vm16055_vm14, %v2914_v42  ;;  %3097 = vst.msk [vmem:[#allocation3 + $0x58] sm:$0xff] %vm16055_vm14, %v2916_v47  ;;  %v12748_v42 = vld [vmem:[#allocation2 + $0x139] sm:$0xff]  ;;  %v12750_v47 = vld [vmem:[#allocation2 + $0x141] sm:$0xff] }
 0x169   :  { %2540 = vrot.lane.b32.xlu0 %v12230_v48, %s16069_s27  ;;  %2542 = vrot.lane.b32.xlu1 %v12232_v49, %s16069_s27  ;;  %v89_v48 = vld [vmem:[%s16063_s29 + $0xe0] sm:$0xff]  ;;  %v90_v49 = vld [vmem:[%s16063_s29 + $0xe8] sm:$0xff] }
 0x16a   :  { %290 = vst.msk [vmem:[#allocation2 + $0x169] sm:$0xff] %vm151_vm0, %v89_v48  ;;  %291 = vst.msk [vmem:[#allocation2 + $0x171] sm:$0xff] %vm151_vm0, %v90_v49 }
 0x16b   :  { %v3295_v25 = vpop.permute.xlu0 %3294  ;;  %v3297_v26 = vpop.permute.xlu1 %3296 }
 0x16c   :  { %3479 = vst.msk [vmem:[#allocation3 + $0x40] sm:$0xff] %vm3470_vm15, %v3295_v25  ;;  %3480 = vst.msk [vmem:[#allocation3 + $0x48] sm:$0xff] %vm3470_vm15, %v3297_v26  ;;  %v351_v25 = vld [vmem:[#allocation2 + $0x128] sm:$0xff] }
 0x16d   :  { %2544 = vrot.lane.b32.xlu0 %v12290_v3, %s16069_s27  ;;  %2546 = vrot.lane.b32.xlu1 %v12296_v4, %s16069_s27  ;;  %415 = vst.msk [vmem:[#allocation3 + $0xc8] sm:$0xff] %vm151_vm0, %v351_v25 }
 0x16f   :  { %v607_v50 = vpop.permute.xlu0 %606  ;;  %v609_v51 = vpop.permute.xlu1 %608 }
 0x170   :  { %787 = vst.msk [vmem:[#allocation3 + $0x60] sm:$0xff] %vm774_vm8, %v607_v50  ;;  %788 = vst.msk [vmem:[#allocation3 + $0x68] sm:$0xff] %vm774_vm8, %v609_v51 }
 0x171   :  { %2925 = vrot.lane.b32.xlu0 %v12498_v36, %s11581_s30  ;;  %2927 = vrot.lane.b32.xlu1 %v12500_v37, %s11581_s30  ;;  %v12638_v59 = vld [vmem:[#allocation2 + $0x168] sm:$0xff]  ;;  %v12641_v60 = vld [vmem:[#allocation2 + $0x170] sm:$0xff] }
 0x172   :  { %420 = vst.msk [vmem:[#allocation3 + $0xf0] sm:$0xff] %vm151_vm0, %v12638_v59  ;;  %421 = vst.msk [vmem:[#allocation3 + $0xf8] sm:$0xff] %vm151_vm0, %v12641_v60 }
 0x173   :  { %v3299_v54 = vpop.permute.xlu0 %3298  ;;  %v3301_v55 = vpop.permute.xlu1 %3300  ;;  %v3543_v56 = vld [vmem:[#allocation3 + $0x40] sm:$0xff]  ;;  %v3544_v57 = vld [vmem:[#allocation3 + $0x48] sm:$0xff] }
 0x174   :  { %3481 = vst.msk [vmem:[#allocation3 + $0x50] sm:$0xff] %vm3470_vm15, %v3299_v54  ;;  %3482 = vst.msk [vmem:[#allocation3 + $0x58] sm:$0xff] %vm3470_vm15, %v3301_v55  ;;  %v3603_v58 = vpack.c.bf16 %v3544_v57, %v3543_v56  ;;  %v353_v55 = vld [vmem:[#allocation2 + $0x140] sm:$0xff] }
 0x175   :  { %2929 = vrot.lane.b32.xlu0 %v12628_v52, %s11581_s30  ;;  %2931 = vrot.lane.b32.xlu1 %v12630_v53, %s11581_s30  ;;  %417 = vst.msk [vmem:[#allocation3 + $0xd8] sm:$0xff] %vm151_vm0, %v353_v55 }
 0x176   :  { %11387 = vmatprep.mubr.msk.bf16.mxu0 %vm3638_vm1, %v3603_v58 }
 0x177   :  { %v611_v61 = vpop.permute.xlu0 %610  ;;  %v613_v62 = vpop.permute.xlu1 %612 }
 0x178   :  { %789 = vst.msk [vmem:[#allocation3 + $0x70] sm:$0xff] %vm774_vm8, %v611_v61  ;;  %790 = vst.msk [vmem:[#allocation3 + $0x78] sm:$0xff] %vm774_vm8, %v613_v62 }
 0x179   :  { %3310 = vrot.lane.b32.xlu0 %v12512_v44, %s11583_s25  ;;  %3312 = vrot.lane.b32.xlu1 %v12514_v45, %s11583_s25 }
 0x17b   :  { %v992_v8 = vpop.permute.xlu0 %991  ;;  %v994_v9 = vpop.permute.xlu1 %993  ;;  %v3545_v63 = vld [vmem:[#allocation3 + $0x50] sm:$0xff]  ;;  %v3546_v0 = vld [vmem:[#allocation3 + $0x58] sm:$0xff] }
 0x17c   :  { %1172 = vst.msk [vmem:[#allocation3 + $0x60] sm:$0xff] %vm1159_vm9, %v992_v8  ;;  %1173 = vst.msk [vmem:[#allocation3 + $0x68] sm:$0xff] %vm1159_vm9, %v994_v9  ;;  %v3604_v2 = vpack.c.bf16 %v3546_v0, %v3545_v63  ;;  %v12776_v8 = vld [vmem:[#allocation2 + $0x13a] sm:$0xff]  ;;  %v12778_v9 = vld [vmem:[#allocation2 + $0x142] sm:$0xff] }
 0x17d   :  { %622 = vrot.lane.b32.xlu0 %v12498_v36, %s11576_s21  ;;  %624 = vrot.lane.b32.xlu1 %v12500_v37, %s11576_s21 }
 0x17e   :  { %11388 = vmatmul.mubr.msk.bf16.gmra.mrb[8].mxu0 %vm3638_vm1, %v3604_v2 }
 0x17f   :  { %v996_v5 = vpop.permute.xlu0 %995  ;;  %v998_v6 = vpop.permute.xlu1 %997 }
 0x180   :  { %1174 = vst.msk [vmem:[#allocation3 + $0x70] sm:$0xff] %vm1159_vm9, %v996_v5  ;;  %1175 = vst.msk [vmem:[#allocation3 + $0x78] sm:$0xff] %vm1159_vm9, %v998_v6  ;;  %v94_v5 = vld [vmem:[%s16063_s29 + $0x108] sm:$0xff] }
 0x181   :  { %3314 = vrot.lane.b32.xlu0 %v3168_v33, %s11583_s25  ;;  %3316 = vrot.lane.b32.xlu1 %v3169_v34, %s11583_s25  ;;  %295 = vst.msk [vmem:[#allocation2 + $0x1d1] sm:$0xff] %vm151_vm0, %v94_v5 }
 0x183   :  { %v1377_v7 = vpop.permute.xlu0 %1376  ;;  %v1379_v10 = vpop.permute.xlu1 %1378 }
 0x184   :  { %1557 = vst.msk [vmem:[#allocation3 + $0x60] sm:$0xff] %vm1544_vm10, %v1377_v7  ;;  %1558 = vst.msk [vmem:[#allocation3 + $0x68] sm:$0xff] %vm1544_vm10, %v1379_v10  ;;  %v11584_v10 = vmov 1983009808  }
 0x185   :  { %626 = vrot.lane.b32.xlu0 %v12628_v52, %s11576_s21  ;;  %628 = vrot.lane.b32.xlu1 %v12630_v53, %s11576_s21 }
 0x187   :  { %v1381_v11 = vpop.permute.xlu0 %1380  ;;  %v1383_v12 = vpop.permute.xlu1 %1382 }
 0x188   :  { %1559 = vst.msk [vmem:[#allocation3 + $0x70] sm:$0xff] %vm1544_vm10, %v1381_v11  ;;  %1560 = vst.msk [vmem:[#allocation3 + $0x78] sm:$0xff] %vm1544_vm10, %v1383_v12  ;;  %v4161_v11 = vunpack.c.l.s4 %v11584_v10  ;;  %v4163_v12 = vlaneseq }
 0x189   :  { %1007 = vrot.lane.b32.xlu0 %v12512_v44, %s11575_s20  ;;  %1009 = vrot.lane.b32.xlu1 %v12514_v45, %s11575_s20 }
 0x18b   :  { %v1762_v13 = vpop.permute.xlu0 %1761  ;;  %v1764_v14 = vpop.permute.xlu1 %1763 }
 0x18c   :  { %1942 = vst.msk [vmem:[#allocation3 + $0x60] sm:$0xff] %vm16059_vm11, %v1762_v13  ;;  %1943 = vst.msk [vmem:[#allocation3 + $0x68] sm:$0xff] %vm16059_vm11, %v1764_v14 }
 0x18d   :  { %1011 = vrot.lane.b32.xlu0 %v3168_v33, %s11575_s20  ;;  %1013 = vrot.lane.b32.xlu1 %v3169_v34, %s11575_s20 }
 0x18f   :  { %v1766_v15 = vpop.permute.xlu0 %1765  ;;  %v1768_v18 = vpop.permute.xlu1 %1767 }
 0x190   :  { %1944 = vst.msk [vmem:[#allocation3 + $0x70] sm:$0xff] %vm16059_vm11, %v1766_v15  ;;  %1945 = vst.msk [vmem:[#allocation3 + $0x78] sm:$0xff] %vm16059_vm11, %v1768_v18  ;;  %v4162_v15 = vunpack.c.0.s8 %v4161_v11  ;;  %v4164_v18 = vshrl.u32 %v4163_v12, 7 }
 0x191   :  { %1392 = vrot.lane.b32.xlu0 %v12290_v3, %s16066_s22  ;;  %1394 = vrot.lane.b32.xlu1 %v12296_v4, %s16066_s22  ;;  %v92_v3 = vld [vmem:[%s16063_s29 + $0xf8] sm:$0xff] }
 0x192   :  { %293 = vst.msk [vmem:[#allocation2 + $0x189] sm:$0xff] %vm151_vm0, %v92_v3  ;;  %v12857_v41 = vsub.s32 0, %v4164_v18 }
 0x193   :  { %v2147_v21 = vpop.permute.xlu0 %2146  ;;  %v2149_v22 = vpop.permute.xlu1 %2148 }
 0x194   :  { %2327 = vst.msk [vmem:[#allocation3 + $0x60] sm:$0xff] %vm16057_vm12, %v2147_v21  ;;  %2328 = vst.msk [vmem:[#allocation3 + $0x68] sm:$0xff] %vm16057_vm12, %v2149_v22  ;;  %v12815_v21 = vld [vmem:[%s16027_s3] ss:$0 sm:$0xff] }
 0x195   :  { %1396 = vrot.lane.b32.xlu0 %v1246_v19, %s16066_s22  ;;  %1398 = vrot.lane.b32.xlu1 %v1247_v20, %s16066_s22 }
 0x197   :  { %v2151_v4 = vpop.permute.xlu0 %2150  ;;  %v2153_v24 = vpop.permute.xlu1 %2152 }
 0x198   :  { %2329 = vst.msk [vmem:[#allocation3 + $0x70] sm:$0xff] %vm16057_vm12, %v2151_v4  ;;  %2330 = vst.msk [vmem:[#allocation3 + $0x78] sm:$0xff] %vm16057_vm12, %v2153_v24  ;;  %v12830_v24 = vsub.s32 %v4162_v15, %v4164_v18 }
 0x199   :  { %1777 = vrot.lane.b32.xlu0 %v12628_v52, %s16067_s24  ;;  %1779 = vrot.lane.b32.xlu1 %v12630_v53, %s16067_s24  ;;  %v352_v52 = vld [vmem:[#allocation2 + $0x138] sm:$0xff] }
 0x19a   :  { %416 = vst.msk [vmem:[#allocation3 + $0xd0] sm:$0xff] %vm151_vm0, %v352_v52 }
 0x19b   :  { %v2533_v29 = vpop.permute.xlu0 %2532  ;;  %v2535_v30 = vpop.permute.xlu1 %2534 }
 0x19c   :  { %2713 = vst.msk [vmem:[#allocation3 + $0x60] sm:$0xff] %vm16056_vm13, %v2533_v29  ;;  %2714 = vst.msk [vmem:[#allocation3 + $0x68] sm:$0xff] %vm16056_vm13, %v2535_v30  ;;  %v12834_v29 = vld [vmem:[#allocation2 + $0x158] sm:$0xff] }
 0x19d   :  { %1781 = vrot.lane.b32.xlu0 %v12704_v27, %s16067_s24  ;;  %1783 = vrot.lane.b32.xlu1 %v12706_v28, %s16067_s24 }
 0x19f   :  { %v2537_v31 = vpop.permute.xlu0 %2536  ;;  %v2539_v32 = vpop.permute.xlu1 %2538 }
 0x1a0   :  { %2715 = vst.msk [vmem:[#allocation3 + $0x70] sm:$0xff] %vm16056_vm13, %v2537_v31  ;;  %2716 = vst.msk [vmem:[#allocation3 + $0x78] sm:$0xff] %vm16056_vm13, %v2539_v32 }
 0x1a1   :  { %2162 = vrot.lane.b32.xlu0 %v3168_v33, %s16068_s28  ;;  %2164 = vrot.lane.b32.xlu1 %v3169_v34, %s16068_s28  ;;  %v93_v34 = vld [vmem:[%s16063_s29 + $0x100] sm:$0xff] }
 0x1a2   :  { %294 = vst.msk [vmem:[#allocation2 + $0x1c9] sm:$0xff] %vm151_vm0, %v93_v34 }
 0x1a3   :  { %v2918_v35 = vpop.permute.xlu0 %2917  ;;  %v2920_v36 = vpop.permute.xlu1 %2919 }
 0x1a4   :  { %3098 = vst.msk [vmem:[#allocation3 + $0x60] sm:$0xff] %vm16055_vm14, %v2918_v35  ;;  %3099 = vst.msk [vmem:[#allocation3 + $0x68] sm:$0xff] %vm16055_vm14, %v2920_v36 }
 0x1a5   :  { %2166 = vrot.lane.b32.xlu0 %v12718_v16, %s16068_s28  ;;  %2168 = vrot.lane.b32.xlu1 %v12720_v17, %s16068_s28 }
 0x1a7   :  { %v2922_v37 = vpop.permute.xlu0 %2921  ;;  %v2924_v38 = vpop.permute.xlu1 %2923 }
 0x1a8   :  { %3100 = vst.msk [vmem:[#allocation3 + $0x70] sm:$0xff] %vm16055_vm14, %v2922_v37  ;;  %3101 = vst.msk [vmem:[#allocation3 + $0x78] sm:$0xff] %vm16055_vm14, %v2924_v38  ;;  %v95_v38 = vld [vmem:[%s16063_s29 + $0x110] sm:$0xff] }
 0x1a9   :  { %2548 = vrot.lane.b32.xlu0 %v1246_v19, %s16069_s27  ;;  %2550 = vrot.lane.b32.xlu1 %v1247_v20, %s16069_s27  ;;  %v12819_v22 = vld [vmem:[#allocation2 + $0x1c8] sm:$0xff]  ;;  %v12825_v3 = vld [vmem:[#allocation2 + $0x1d0] sm:$0xff]  ;;  %296 = vst.msk [vmem:[#allocation2 + $0x1e1] sm:$0xff] %vm151_vm0, %v95_v38 }
 0x1aa   :  { %424 = vst.msk [vmem:[#allocation3 + $0x110] sm:$0xff] %vm151_vm0, %v12819_v22  ;;  %425 = vst.msk [vmem:[#allocation3 + $0x118] sm:$0xff] %vm151_vm0, %v12825_v3 }
 0x1ab   :  { %v3303_v43 = vpop.permute.xlu0 %3302  ;;  %v3305_v44 = vpop.permute.xlu1 %3304 }
 0x1ac   :  { %3483 = vst.msk [vmem:[#allocation3 + $0x60] sm:$0xff] %vm3470_vm15, %v3303_v43  ;;  %3484 = vst.msk [vmem:[#allocation3 + $0x68] sm:$0xff] %vm3470_vm15, %v3305_v44 }
 0x1ad   :  { %2552 = vrot.lane.b32.xlu0 %v12732_v39, %s16069_s27  ;;  %2554 = vrot.lane.b32.xlu1 %v12734_v40, %s16069_s27 }
 0x1af   :  { %v615_v45 = vpop.permute.xlu0 %614  ;;  %v617_v46 = vpop.permute.xlu1 %616 }
 0x1b0   :  { %791 = vst.msk [vmem:[#allocation3 + $0x80] sm:$0xff] %vm774_vm8, %v615_v45  ;;  %792 = vst.msk [vmem:[#allocation3 + $0x88] sm:$0xff] %vm774_vm8, %v617_v46 }
 0x1b1   :  { %2933 = vrot.lane.b32.xlu0 %v12704_v27, %s11581_s30  ;;  %2935 = vrot.lane.b32.xlu1 %v12706_v28, %s11581_s30 }
 0x1b3   :  { %v3307_v26 = vpop.permute.xlu0 %3306  ;;  %v3309_v48 = vpop.permute.xlu1 %3308  ;;  %v3547_v49 = vld [vmem:[#allocation3 + $0x60] sm:$0xff]  ;;  %v3548_v50 = vld [vmem:[#allocation3 + $0x68] sm:$0xff] }
 0x1b4   :  { %3485 = vst.msk [vmem:[#allocation3 + $0x70] sm:$0xff] %vm3470_vm15, %v3307_v26  ;;  %3486 = vst.msk [vmem:[#allocation3 + $0x78] sm:$0xff] %vm3470_vm15, %v3309_v48  ;;  %v3605_v51 = vpack.c.bf16 %v3548_v50, %v3547_v49 }
 0x1b5   :  { %2937 = vrot.lane.b32.xlu0 %v12748_v42, %s11581_s30  ;;  %2939 = vrot.lane.b32.xlu1 %v12750_v47, %s11581_s30 }
 0x1b6   :  { %11391 = vmatprep.mubr.msk.bf16.mxu0 %vm3638_vm1, %v3605_v51 }
 0x1b7   :  { %v619_v53 = vpop.permute.xlu0 %618  ;;  %v621_v54 = vpop.permute.xlu1 %620 }
 0x1b8   :  { %793 = vst.msk [vmem:[#allocation3 + $0x90] sm:$0xff] %vm774_vm8, %v619_v53  ;;  %794 = vst.msk [vmem:[#allocation3 + $0x98] sm:$0xff] %vm774_vm8, %v621_v54 }
 0x1b9   :  { %3318 = vrot.lane.b32.xlu0 %v12718_v16, %s11583_s25  ;;  %3320 = vrot.lane.b32.xlu1 %v12720_v17, %s11583_s25 }
 0x1bb   :  { %v1000_v56 = vpop.permute.xlu0 %999  ;;  %v1002_v57 = vpop.permute.xlu1 %1001  ;;  %v3549_v58 = vld [vmem:[#allocation3 + $0x70] sm:$0xff]  ;;  %v3550_v61 = vld [vmem:[#allocation3 + $0x78] sm:$0xff] }
 0x1bc   :  { %1176 = vst.msk [vmem:[#allocation3 + $0x80] sm:$0xff] %vm1159_vm9, %v1000_v56  ;;  %1177 = vst.msk [vmem:[#allocation3 + $0x88] sm:$0xff] %vm1159_vm9, %v1002_v57  ;;  %v3606_v62 = vpack.c.bf16 %v3550_v61, %v3549_v58 }
 0x1bd   :  { %630 = vrot.lane.b32.xlu0 %v12704_v27, %s11576_s21  ;;  %632 = vrot.lane.b32.xlu1 %v12706_v28, %s11576_s21  ;;  %v12832_v28 = vld [vmem:[#allocation2 + $0x150] sm:$0xff] }
 0x1be   :  { %11392 = vmatmul.mubr.msk.bf16.gmra.mrb[12].mxu0 %vm3638_vm1, %v3606_v62 }
 0x1bf   :  { %v1004_v63 = vpop.permute.xlu0 %1003  ;;  %v1006_v0 = vpop.permute.xlu1 %1005 }
 0x1c0   :  { %1178 = vst.msk [vmem:[#allocation3 + $0x90] sm:$0xff] %vm1159_vm9, %v1004_v63  ;;  %1179 = vst.msk [vmem:[#allocation3 + $0x98] sm:$0xff] %vm1159_vm9, %v1006_v0  ;;  %v12869_v63 = vld [vmem:[#allocation2 + $0x151] sm:$0xff]  ;;  %v12871_v0 = vld [vmem:[#allocation2 + $0x159] sm:$0xff] }
 0x1c1   :  { %3322 = vrot.lane.b32.xlu0 %v12776_v8, %s11583_s25  ;;  %3324 = vrot.lane.b32.xlu1 %v12778_v9, %s11583_s25 }
 0x1c3   :  { %v1385_v2 = vpop.permute.xlu0 %1384  ;;  %v1387_v33 = vpop.permute.xlu1 %1386 }
 0x1c4   :  { %1561 = vst.msk [vmem:[#allocation3 + $0x80] sm:$0xff] %vm1544_vm10, %v1385_v2  ;;  %1562 = vst.msk [vmem:[#allocation3 + $0x88] sm:$0xff] %vm1544_vm10, %v1387_v33 }
 0x1c5   :  { %634 = vrot.lane.b32.xlu0 %v12748_v42, %s11576_s21  ;;  %636 = vrot.lane.b32.xlu1 %v12750_v47, %s11576_s21 }
 0x1c7   :  { %v1389_v6 = vpop.permute.xlu0 %1388  ;;  %v1391_v7 = vpop.permute.xlu1 %1390 }
 0x1c8   :  { %1563 = vst.msk [vmem:[#allocation3 + $0x90] sm:$0xff] %vm1544_vm10, %v1389_v6  ;;  %1564 = vst.msk [vmem:[#allocation3 + $0x98] sm:$0xff] %vm1544_vm10, %v1391_v7 }
 0x1c9   :  { %1015 = vrot.lane.b32.xlu0 %v12718_v16, %s11575_s20  ;;  %1017 = vrot.lane.b32.xlu1 %v12720_v17, %s11575_s20 }
 0x1cb   :  { %v1770_v13 = vpop.permute.xlu0 %1769  ;;  %v1772_v14 = vpop.permute.xlu1 %1771 }
 0x1cc   :  { %1946 = vst.msk [vmem:[#allocation3 + $0x80] sm:$0xff] %vm16059_vm11, %v1770_v13  ;;  %1947 = vst.msk [vmem:[#allocation3 + $0x88] sm:$0xff] %vm16059_vm11, %v1772_v14 }
 0x1cd   :  { %1019 = vrot.lane.b32.xlu0 %v12776_v8, %s11575_s20  ;;  %1021 = vrot.lane.b32.xlu1 %v12778_v9, %s11575_s20 }
 0x1cf   :  { %v1774_v19 = vpop.permute.xlu0 %1773  ;;  %v1776_v20 = vpop.permute.xlu1 %1775 }
 0x1d0   :  { %1948 = vst.msk [vmem:[#allocation3 + $0x90] sm:$0xff] %vm16059_vm11, %v1774_v19  ;;  %1949 = vst.msk [vmem:[#allocation3 + $0x98] sm:$0xff] %vm16059_vm11, %v1776_v20 }
 0x1d1   :  { %1400 = vrot.lane.b32.xlu0 %v12732_v39, %s16066_s22  ;;  %1402 = vrot.lane.b32.xlu1 %v12734_v40, %s16066_s22  ;;  %v11381_v23 = vpop.f32.mrb[0].mxu0  ;;  %v96_v39 = vld [vmem:[%s16063_s29 + $0x118] sm:$0xff] }
 0x1d2   :  { %v3785_v4 = vadd.f32 %v11381_v23, %v12815_v21  ;;  %v3776_v27 = vpop.f32.mrb[1].mxu0  ;;  %297 = vst.msk [vmem:[#allocation2 + $0x1e9] sm:$0xff] %vm151_vm0, %v96_v39 }
 0x1d3   :  { %v3777_v30 = vadd.f32 %v12815_v21, %v3776_v27  ;;  %v2155_v31 = vpop.permute.xlu0 %2154  ;;  %v2157_v32 = vpop.permute.xlu1 %2156 }
 0x1d4   :  { %v4033_v16 = vmax.f32 %v3785_v4, 0.0  ;;  %2331 = vst.msk [vmem:[#allocation3 + $0x80] sm:$0xff] %vm16057_vm12, %v2155_v31  ;;  %2332 = vst.msk [vmem:[#allocation3 + $0x88] sm:$0xff] %vm16057_vm12, %v2157_v32  ;;  %v11382_v17 = vpop.f32.mrb[2].mxu0 }
 0x1d5   :  { %v4031_v35 = vmax.f32 %v3777_v30, 0.0  ;;  %v3788_v36 = vadd.f32 %v11382_v17, %v12815_v21  ;;  %v3779_v37 = vpop.f32.mrb[3].mxu0  ;;  %1404 = vrot.lane.b32.xlu0 %v12832_v28, %s16066_s22  ;;  %1406 = vrot.lane.b32.xlu1 %v12834_v29, %s16066_s22 }
 0x1d6   :  { %v4193_v40 = vcombine.high %v4033_v16, %v4033_v16  ;;  %v4200_v43 = vrot.slane %v4033_v16, %v12830_v24  ;;  %v3780_v44 = vadd.f32 %v12815_v21, %v3779_v37 }
 0x1d7   :  { %v4159_v45 = vcombine.high %v4031_v35, %v4031_v35  ;;  %v4166_v46 = vrot.slane %v4031_v35, %v12830_v24  ;;  %v4034_v25 = vmax.f32 %v3788_v36, 0.0  ;;  %v2159_v26 = vpop.permute.xlu0 %2158  ;;  %v2161_v48 = vpop.permute.xlu1 %2160 }
 0x1d8   :  { %v4207_v49 = vrot.slane %v4193_v40, %v12830_v24  ;;  %v4208_v50 = vcombine.high %v4200_v43, %v4200_v43  ;;  %v10980_v51 = vrot.slane %v4200_v43, 9  ;;  %v12860_v52 = vmax.f32 %v3780_v44, 0.0  ;;  %2333 = vst.msk [vmem:[#allocation3 + $0x90] sm:$0xff] %vm16057_vm12, %v2159_v26  ;;  %2334 = vst.msk [vmem:[#allocation3 + $0x98] sm:$0xff] %vm16057_vm12, %v2161_v48  ;;  %v12894_v44 = vld [vmem:[#allocation2 + $0x152] sm:$0xff] }
 0x1d9   :  { %v4173_v53 = vrot.slane %v4159_v45, %v12830_v24  ;;  %v4174_v54 = vcombine.high %v4166_v46, %v4166_v46  ;;  %v10852_v55 = vrot.slane %v4166_v46, 9  ;;  %v4210_v56 = vcombine.high %v4034_v25, %v4034_v25  ;;  %1785 = vrot.lane.b32.xlu0 %v12748_v42, %s16067_s24  ;;  %1787 = vrot.lane.b32.xlu1 %v12750_v47, %s16067_s24 }
 0x1da   :  { %v4209_v57 = vcombine.high %v4207_v49, %v4207_v49  ;;  %v10981_v58 = vrot.slane %v4208_v50, 9  ;;  %v10982_v61 = vrot.slane %v4207_v49, 9  ;;  %v6399_v62 = vmax.f32 %v4200_v43, %v10980_v51 }
 0x1db   :  { %v4175_v2 = vcombine.high %v4173_v53, %v4173_v53  ;;  %v10853_v33 = vrot.slane %v4174_v54, 9  ;;  %v10854_v34 = vrot.slane %v4173_v53, 9  ;;  %v5887_v5 = vmax.f32 %v4166_v46, %v10852_v55  ;;  %v2541_v6 = vpop.permute.xlu0 %2540  ;;  %v2543_v7 = vpop.permute.xlu1 %2542 }
 0x1dc   :  { %v10983_v10 = vrot.slane %v4209_v57, 9  ;;  %v6400_v11 = vmax.f32 %v4208_v50, %v10981_v58  ;;  %v6401_v42 = vmax.f32 %v4207_v49, %v10982_v61  ;;  %v4217_v12 = vrot.slane %v4034_v25, %v12830_v24  ;;  %2717 = vst.msk [vmem:[#allocation3 + $0x80] sm:$0xff] %vm16056_vm13, %v2541_v6  ;;  %2718 = vst.msk [vmem:[#allocation3 + $0x88] sm:$0xff] %vm16056_vm13, %v2543_v7 }
 0x1dd   :  { %v10855_v47 = vrot.slane %v4175_v2, 9  ;;  %v5888_v13 = vmax.f32 %v4174_v54, %v10853_v33  ;;  %v5889_v14 = vmax.f32 %v4173_v53, %v10854_v34  ;;  %v6527_v15 = vmax.f32 %v5887_v5, %v6399_v62  ;;  %1789 = vrot.lane.b32.xlu0 %v12869_v63, %s16067_s24  ;;  %1791 = vrot.lane.b32.xlu1 %v12871_v0, %s16067_s24 }
 0x1de   :  { %v6402_v18 = vmax.f32 %v4209_v57, %v10983_v10  ;;  %v4224_v19 = vrot.slane %v4210_v56, %v12830_v24  ;;  %v4225_v20 = vcombine.high %v4217_v12, %v4217_v12  ;;  %v10984_v17 = vrot.slane %v4217_v12, 9 }
 0x1df   :  { %v5890_v23 = vmax.f32 %v4175_v2, %v10855_v47  ;;  %v6528_v4 = vmax.f32 %v5888_v13, %v6400_v11  ;;  %v6529_v27 = vmax.f32 %v5889_v14, %v6401_v42  ;;  %v2545_v30 = vpop.permute.xlu0 %2544  ;;  %v2547_v31 = vpop.permute.xlu1 %2546  ;;  %v6945_v32 = vrot.slane %v6527_v15, %v12857_v41 }
 0x1e0   :  { %v4226_v16 = vcombine.high %v4224_v19, %v4224_v19  ;;  %v10986_v35 = vrot.slane %v4224_v19, 9  ;;  %2719 = vst.msk [vmem:[#allocation3 + $0x90] sm:$0xff] %vm16056_vm13, %v2545_v30  ;;  %2720 = vst.msk [vmem:[#allocation3 + $0x98] sm:$0xff] %vm16056_vm13, %v2547_v31  ;;  %v4176_v39 = vcombine.high %v12860_v52, %v12860_v52  ;;  %v10985_v40 = vrot.slane %v4225_v20, 9 }
 0x1e1   :  { %v6530_v36 = vmax.f32 %v5890_v23, %v6402_v18  ;;  %v6949_v37 = vrot.slane %v6528_v4, %v12857_v41  ;;  %v6953_v38 = vrot.slane %v6529_v27, %v12857_v41  ;;  %2170 = vrot.lane.b32.xlu0 %v12776_v8, %s16068_s28  ;;  %v4183_v43 = vrot.slane %v12860_v52, %v12830_v24  ;;  %v12899_v8 = vld [vmem:[#allocation2 + $0x15a] sm:$0xff]  ;;  %v98_v23 = vld [vmem:[%s16063_s29 + $0x128] sm:$0xff] }
 0x1e2   :  { %2172 = vrot.lane.b32.xlu1 %v12778_v9, %s16068_s28  ;;  %v10987_v25 = vrot.slane %v4226_v16, 9  ;;  %v4190_v26 = vrot.slane %v4176_v39, %v12830_v24  ;;  %v6403_v51 = vmax.f32 %v4217_v12, %v10984_v17  ;;  %v6405_v9 = vmax.f32 %v4224_v19, %v10986_v35  ;;  %299 = vst.msk [vmem:[#allocation2 + $0x201] sm:$0xff] %vm151_vm0, %v98_v23  ;;  %v12944_v17 = vld [vmem:[#allocation2 + $0x169] sm:$0xff] }
 0x1e3   :  { %v6957_v45 = vrot.slane %v6530_v36, %v12857_v41  ;;  %v7455_v46 = vsel %vm16058_vm4, %v6949_v37, %v6945_v32  ;;  %v2926_v48 = vpop.permute.xlu0 %2925  ;;  %v2928_v49 = vpop.permute.xlu1 %2927  ;;  %v4191_v52 = vcombine.high %v4183_v43, %v4183_v43  ;;  %v10856_v53 = vrot.slane %v4183_v43, 9  ;;  %v354_v32 = vld [vmem:[#allocation2 + $0x150] sm:$0xff] }
 0x1e4   :  { %v7457_v50 = vsel %vm7456_vm5, %v6953_v38, %v7455_v46  ;;  %3102 = vst.msk [vmem:[#allocation3 + $0x80] sm:$0xff] %vm16055_vm14, %v2926_v48  ;;  %3103 = vst.msk [vmem:[#allocation3 + $0x88] sm:$0xff] %vm16055_vm14, %v2928_v49  ;;  %v4192_v54 = vcombine.high %v4190_v26, %v4190_v26  ;;  %v10858_v55 = vrot.slane %v4190_v26, 9  ;;  %v6404_v57 = vmax.f32 %v4225_v20, %v10985_v40  ;;  %v12948_v37 = vld [vmem:[#allocation2 + $0x171] sm:$0xff] }
 0x1e5   :  { %v7459_v56 = vsel %vm16054_vm6, %v6957_v45, %v7457_v50  ;;  %2174 = vrot.lane.b32.xlu0 %v12894_v44, %s16068_s28  ;;  %v10857_v58 = vrot.slane %v4191_v52, 9  ;;  %v5891_v61 = vmax.f32 %v4183_v43, %v10856_v53  ;;  %v6406_v62 = vmax.f32 %v4226_v16, %v10987_v25  ;;  %v355_v16 = vld [vmem:[#allocation2 + $0x158] sm:$0xff]  ;;  %418 = vst.msk [vmem:[#allocation3 + $0xe0] sm:$0xff] %vm151_vm0, %v354_v32 }
 0x1e6   :  { %2176 = vrot.lane.b32.xlu1 %v12899_v8, %s16068_s28  ;;  %v10859_v2 = vrot.slane %v4192_v54, 9  ;;  %v5893_v33 = vmax.f32 %v4190_v26, %v10858_v55  ;;  %vm7464_vm6 = vcmask 1046534   ;;  %419 = vst.msk [vmem:[#allocation3 + $0xe8] sm:$0xff] %vm151_vm0, %v355_v16 }
 0x1e7   :  { %v2930_v34 = vpop.permute.xlu0 %2929  ;;  %v2932_v5 = vpop.permute.xlu1 %2931  ;;  %v5892_v6 = vmax.f32 %v4191_v52, %v10857_v58  ;;  %v6531_v7 = vmax.f32 %v5891_v61, %v6403_v51  ;;  %v12974_v51 = vld [vmem:[#allocation2 + $0x16a] sm:$0xff] }
 0x1e8   :  { %3104 = vst.msk [vmem:[#allocation3 + $0x90] sm:$0xff] %vm16055_vm14, %v2930_v34  ;;  %3105 = vst.msk [vmem:[#allocation3 + $0x98] sm:$0xff] %vm16055_vm14, %v2932_v5  ;;  %v5894_v10 = vmax.f32 %v4192_v54, %v10859_v2  ;;  %v6533_v11 = vmax.f32 %v5893_v33, %v6405_v9  ;;  %vm7466_vm14 = vcmask 1047559   ;;  %v12976_v9 = vld [vmem:[#allocation2 + $0x172] sm:$0xff]  ;;  %v13009_v2 = vld [vmem:[#allocation2 + $0x180] sm:$0xff] }
 0x1e9   :  { %2556 = vrot.lane.b32.xlu0 %v12832_v28, %s16069_s27  ;;  %v6532_v42 = vmax.f32 %v5892_v6, %v6404_v57  ;;  %v6961_v12 = vrot.slane %v6531_v7, %v12857_v41  ;;  %v13012_v6 = vld [vmem:[#allocation2 + $0x188] sm:$0xff] }
 0x1ea   :  { %2558 = vrot.lane.b32.xlu1 %v12834_v29, %s16069_s27  ;;  %v6534_v47 = vmax.f32 %v5894_v10, %v6406_v62  ;;  %v6969_v28 = vrot.slane %v6533_v11, %v12857_v41  ;;  %v97_v29 = vld [vmem:[%s16063_s29 + $0x120] sm:$0xff] }
 0x1eb   :  { %v3311_v13 = vpop.permute.xlu0 %3310  ;;  %v3313_v14 = vpop.permute.xlu1 %3312  ;;  %v6965_v15 = vrot.slane %v6532_v42, %v12857_v41  ;;  %v7461_v18 = vsel %vm7460_vm7, %v6961_v12, %v7459_v56  ;;  %298 = vst.msk [vmem:[#allocation2 + $0x1f9] sm:$0xff] %vm151_vm0, %v97_v29  ;;  %v99_v42 = vld [vmem:[%s16063_s29 + $0x130] sm:$0xff]  ;;  %v100_v12 = vld [vmem:[%s16063_s29 + $0x138] sm:$0xff] }
 0x1ec   :  { %3487 = vst.msk [vmem:[#allocation3 + $0x80] sm:$0xff] %vm3470_vm15, %v3311_v13  ;;  %3488 = vst.msk [vmem:[#allocation3 + $0x88] sm:$0xff] %vm3470_vm15, %v3313_v14  ;;  %v6973_v19 = vrot.slane %v6534_v47, %v12857_v41 }
 0x1ed   :  { %2560 = vrot.lane.b32.xlu0 %v12638_v59, %s16069_s27  ;;  %v7463_v20 = vsel %vm7462_vm3, %v6965_v15, %v7461_v18  ;;  %300 = vst.msk [vmem:[#allocation2 + $0x211] sm:$0xff] %vm151_vm0, %v99_v42  ;;  %301 = vst.msk [vmem:[#allocation2 + $0x219] sm:$0xff] %vm151_vm0, %v100_v12 }
 0x1ee   :  { %2562 = vrot.lane.b32.xlu1 %v12641_v60, %s16069_s27  ;;  %v7465_v4 = vsel %vm7464_vm6, %v6969_v28, %v7463_v20 }
 0x1ef   :  { %v623_v27 = vpop.permute.xlu0 %622  ;;  %v625_v30 = vpop.permute.xlu1 %624  ;;  %v7467_v31 = vsel %vm7466_vm14, %v6973_v19, %v7465_v4 }
 0x1f0   :  { %795 = vst.msk [vmem:[#allocation3 + $0xa0] sm:$0xff] %vm774_vm8, %v623_v27  ;;  %796 = vst.msk [vmem:[#allocation3 + $0xa8] sm:$0xff] %vm774_vm8, %v625_v30 }
 0x1f1   :  { %7590 = vst.msk [vmem:[#allocation4 + $0x11] sm:$0xff] %vm6772_vm2, %v7467_v31  ;;  %2941 = vrot.lane.b32.xlu0 %v12869_v63, %s11581_s30 }
 0x1f2   :  { %2943 = vrot.lane.b32.xlu1 %v12871_v0, %s11581_s30 }
 0x1f3   :  { %v3315_v35 = vpop.permute.xlu0 %3314  ;;  %v3317_v36 = vpop.permute.xlu1 %3316  ;;  %v3551_v38 = vld [vmem:[#allocation3 + $0x80] sm:$0xff]  ;;  %v3552_v39 = vld [vmem:[#allocation3 + $0x88] sm:$0xff] }
 0x1f4   :  { %3489 = vst.msk [vmem:[#allocation3 + $0x90] sm:$0xff] %vm3470_vm15, %v3315_v35  ;;  %3490 = vst.msk [vmem:[#allocation3 + $0x98] sm:$0xff] %vm3470_vm15, %v3317_v36  ;;  %v3607_v40 = vpack.c.bf16 %v3552_v39, %v3551_v38 }
 0x1f5   :  { %2945 = vrot.lane.b32.xlu0 %v12944_v17, %s11581_s30 }
 0x1f6   :  { %2947 = vrot.lane.b32.xlu1 %v12948_v37, %s11581_s30  ;;  %11395 = vmatprep.mubr.msk.bf16.mxu0 %vm3638_vm1, %v3607_v40  ;;  %v13040_v40 = vld [vmem:[#allocation2 + $0x181] sm:$0xff] }
 0x1f7   :  { %v627_v43 = vpop.permute.xlu0 %626  ;;  %v629_v45 = vpop.permute.xlu1 %628 }
 0x1f8   :  { %797 = vst.msk [vmem:[#allocation3 + $0xb0] sm:$0xff] %vm774_vm8, %v627_v43  ;;  %798 = vst.msk [vmem:[#allocation3 + $0xb8] sm:$0xff] %vm774_vm8, %v629_v45  ;;  %v12959_v46 = vld [vmem:[#allocation4 + $0x10] sm:$0xff] }
 0x1f9   :  { %3326 = vrot.lane.b32.xlu0 %v12894_v44, %s11583_s25  ;;  %7623 = vst.msk [vmem:[#allocation5 + $0x10] sm:$0xff] %vm6772_vm2, %v12959_v46 }
 0x1fa   :  { %3328 = vrot.lane.b32.xlu1 %v12899_v8, %s11583_s25 }
 0x1fb   :  { %v1008_v25 = vpop.permute.xlu0 %1007  ;;  %v1010_v26 = vpop.permute.xlu1 %1009  ;;  %v3553_v48 = vld [vmem:[#allocation3 + $0x90] sm:$0xff]  ;;  %v3554_v49 = vld [vmem:[#allocation3 + $0x98] sm:$0xff] }
 0x1fc   :  { %1180 = vst.msk [vmem:[#allocation3 + $0xa0] sm:$0xff] %vm1159_vm9, %v1008_v25  ;;  %1181 = vst.msk [vmem:[#allocation3 + $0xa8] sm:$0xff] %vm1159_vm9, %v1010_v26  ;;  %v3608_v50 = vpack.c.bf16 %v3554_v49, %v3553_v48 }
 0x1fd   :  { %638 = vrot.lane.b32.xlu0 %v12869_v63, %s11576_s21 }
 0x1fe   :  { %640 = vrot.lane.b32.xlu1 %v12871_v0, %s11576_s21  ;;  %11396 = vmatmul.mubr.msk.bf16.gmra.mrb[16].mxu0 %vm3638_vm1, %v3608_v50  ;;  %v13042_v50 = vld [vmem:[#allocation2 + $0x189] sm:$0xff] }
 0x1ff   :  { %v1012_v52 = vpop.permute.xlu0 %1011  ;;  %v1014_v53 = vpop.permute.xlu1 %1013 }
 0x200   :  { %1182 = vst.msk [vmem:[#allocation3 + $0xb0] sm:$0xff] %vm1159_vm9, %v1012_v52  ;;  %1183 = vst.msk [vmem:[#allocation3 + $0xb8] sm:$0xff] %vm1159_vm9, %v1014_v53 }
 0x201   :  { %3330 = vrot.lane.b32.xlu0 %v12974_v51, %s11583_s25 }
 0x202   :  { %3332 = vrot.lane.b32.xlu1 %v12976_v9, %s11583_s25 }
 0x203   :  { %v1393_v63 = vpop.permute.xlu0 %1392  ;;  %v1395_v0 = vpop.permute.xlu1 %1394 }
 0x204   :  { %1565 = vst.msk [vmem:[#allocation3 + $0xa0] sm:$0xff] %vm1544_vm10, %v1393_v63  ;;  %1566 = vst.msk [vmem:[#allocation3 + $0xa8] sm:$0xff] %vm1544_vm10, %v1395_v0 }
 0x205   :  { %642 = vrot.lane.b32.xlu0 %v12944_v17, %s11576_s21 }
 0x206   :  { %644 = vrot.lane.b32.xlu1 %v12948_v37, %s11576_s21 }
 0x207   :  { %v1397_v54 = vpop.permute.xlu0 %1396  ;;  %v1399_v55 = vpop.permute.xlu1 %1398 }
 0x208   :  { %1567 = vst.msk [vmem:[#allocation3 + $0xb0] sm:$0xff] %vm1544_vm10, %v1397_v54  ;;  %1568 = vst.msk [vmem:[#allocation3 + $0xb8] sm:$0xff] %vm1544_vm10, %v1399_v55 }
 0x209   :  { %1023 = vrot.lane.b32.xlu0 %v12894_v44, %s11575_s20 }
 0x20a   :  { %1025 = vrot.lane.b32.xlu1 %v12899_v8, %s11575_s20 }
 0x20b   :  { %v1778_v56 = vpop.permute.xlu0 %1777  ;;  %v1780_v57 = vpop.permute.xlu1 %1779 }
 0x20c   :  { %1950 = vst.msk [vmem:[#allocation3 + $0xa0] sm:$0xff] %vm16059_vm11, %v1778_v56  ;;  %1951 = vst.msk [vmem:[#allocation3 + $0xa8] sm:$0xff] %vm16059_vm11, %v1780_v57 }
 0x20d   :  { %1027 = vrot.lane.b32.xlu0 %v12974_v51, %s11575_s20 }
 0x20e   :  { %1029 = vrot.lane.b32.xlu1 %v12976_v9, %s11575_s20 }
 0x20f   :  { %v1782_v58 = vpop.permute.xlu0 %1781  ;;  %v1784_v61 = vpop.permute.xlu1 %1783 }
 0x210   :  { %1952 = vst.msk [vmem:[#allocation3 + $0xb0] sm:$0xff] %vm16059_vm11, %v1782_v58  ;;  %1953 = vst.msk [vmem:[#allocation3 + $0xb8] sm:$0xff] %vm16059_vm11, %v1784_v61 }
 0x211   :  { %1408 = vrot.lane.b32.xlu0 %v12638_v59, %s16066_s22  ;;  %v11385_v44 = vpop.f32.mrb[4].mxu0 }
 0x212   :  { %1410 = vrot.lane.b32.xlu1 %v12641_v60, %s16066_s22  ;;  %v3801_v8 = vadd.f32 %v11385_v44, %v12815_v21  ;;  %v3792_v62 = vpop.f32.mrb[5].mxu0 }
 0x213   :  { %v3793_v33 = vadd.f32 %v12815_v21, %v3792_v62  ;;  %v2163_v34 = vpop.permute.xlu0 %2162  ;;  %v2165_v5 = vpop.permute.xlu1 %2164 }
 0x214   :  { %v4037_v7 = vmax.f32 %v3801_v8, 0.0  ;;  %2335 = vst.msk [vmem:[#allocation3 + $0xa0] sm:$0xff] %vm16057_vm12, %v2163_v34  ;;  %2336 = vst.msk [vmem:[#allocation3 + $0xa8] sm:$0xff] %vm16057_vm12, %v2165_v5  ;;  %v11386_v59 = vpop.f32.mrb[6].mxu0 }
 0x215   :  { %v4035_v10 = vmax.f32 %v3793_v33, 0.0  ;;  %v3804_v60 = vadd.f32 %v11386_v59, %v12815_v21  ;;  %v3795_v11 = vpop.f32.mrb[7].mxu0  ;;  %1412 = vrot.lane.b32.xlu0 %v13009_v2, %s16066_s22 }
 0x216   :  { %v4261_v47 = vcombine.high %v4037_v7, %v4037_v7  ;;  %v4268_v13 = vrot.slane %v4037_v7, %v12830_v24  ;;  %v3796_v14 = vadd.f32 %v12815_v21, %v3795_v11  ;;  %1414 = vrot.lane.b32.xlu1 %v13012_v6, %s16066_s22 }
 0x217   :  { %v4227_v15 = vcombine.high %v4035_v10, %v4035_v10  ;;  %v4234_v18 = vrot.slane %v4035_v10, %v12830_v24  ;;  %v4038_v28 = vmax.f32 %v3804_v60, 0.0  ;;  %v2167_v29 = vpop.permute.xlu0 %2166  ;;  %v2169_v19 = vpop.permute.xlu1 %2168 }
 0x218   :  { %v4275_v20 = vrot.slane %v4261_v47, %v12830_v24  ;;  %v4276_v23 = vcombine.high %v4268_v13, %v4268_v13  ;;  %v10988_v4 = vrot.slane %v4268_v13, 9  ;;  %v4036_v27 = vmax.f32 %v3796_v14, 0.0  ;;  %2337 = vst.msk [vmem:[#allocation3 + $0xb0] sm:$0xff] %vm16057_vm12, %v2167_v29  ;;  %2338 = vst.msk [vmem:[#allocation3 + $0xb8] sm:$0xff] %vm16057_vm12, %v2169_v19 }
 0x219   :  { %v4241_v30 = vrot.slane %v4227_v15, %v12830_v24  ;;  %v4242_v31 = vcombine.high %v4234_v18, %v4234_v18  ;;  %v10860_v32 = vrot.slane %v4234_v18, 9  ;;  %v4278_v16 = vcombine.high %v4038_v28, %v4038_v28  ;;  %1793 = vrot.lane.b32.xlu0 %v12944_v17, %s16067_s24 }
 0x21a   :  { %v4277_v35 = vcombine.high %v4275_v20, %v4275_v20  ;;  %v10989_v36 = vrot.slane %v4276_v23, 9  ;;  %v10990_v38 = vrot.slane %v4275_v20, 9  ;;  %v6407_v39 = vmax.f32 %v4268_v13, %v10988_v4  ;;  %1795 = vrot.lane.b32.xlu1 %v12948_v37, %s16067_s24  ;;  %v13062_v13 = vld [vmem:[#allocation2 + $0x182] sm:$0xff] }
 0x21b   :  { %v4243_v43 = vcombine.high %v4241_v30, %v4241_v30  ;;  %v10861_v45 = vrot.slane %v4242_v31, 9  ;;  %v10862_v25 = vrot.slane %v4241_v30, 9  ;;  %v5895_v26 = vmax.f32 %v4234_v18, %v10860_v32  ;;  %v2549_v48 = vpop.permute.xlu0 %2548  ;;  %v2551_v49 = vpop.permute.xlu1 %2550 }
 0x21c   :  { %v10991_v52 = vrot.slane %v4277_v35, 9  ;;  %v6408_v53 = vmax.f32 %v4276_v23, %v10989_v36  ;;  %v6409_v17 = vmax.f32 %v4275_v20, %v10990_v38  ;;  %v4285_v63 = vrot.slane %v4038_v28, %v12830_v24  ;;  %2721 = vst.msk [vmem:[#allocation3 + $0xa0] sm:$0xff] %vm16056_vm13, %v2549_v48  ;;  %2722 = vst.msk [vmem:[#allocation3 + $0xa8] sm:$0xff] %vm16056_vm13, %v2551_v49  ;;  %v13067_v20 = vld [vmem:[#allocation2 + $0x18a] sm:$0xff] }
 0x21d   :  { %v10863_v37 = vrot.slane %v4243_v43, 9  ;;  %v5896_v0 = vmax.f32 %v4242_v31, %v10861_v45  ;;  %v5897_v54 = vmax.f32 %v4241_v30, %v10862_v25  ;;  %v6535_v55 = vmax.f32 %v5895_v26, %v6407_v39  ;;  %1797 = vrot.lane.b32.xlu0 %v13040_v40, %s16067_s24 }
 0x21e   :  { %v6410_v56 = vmax.f32 %v4277_v35, %v10991_v52  ;;  %v4292_v57 = vrot.slane %v4278_v16, %v12830_v24  ;;  %v4293_v58 = vcombine.high %v4285_v63, %v4285_v63  ;;  %1799 = vrot.lane.b32.xlu1 %v13042_v50, %s16067_s24  ;;  %v10992_v7 = vrot.slane %v4285_v63, 9 }
 0x21f   :  { %v5898_v61 = vmax.f32 %v4243_v43, %v10863_v37  ;;  %v6536_v44 = vmax.f32 %v5896_v0, %v6408_v53  ;;  %v6537_v8 = vmax.f32 %v5897_v54, %v6409_v17  ;;  %v2553_v62 = vpop.permute.xlu0 %2552  ;;  %v2555_v33 = vpop.permute.xlu1 %2554  ;;  %v6977_v34 = vrot.slane %v6535_v55, %v12857_v41  ;;  %v2411_v55 = vld [vmem:[#allocation2 + $0x1a0] sm:$0xff] }
 0x220   :  { %v4294_v5 = vcombine.high %v4292_v57, %v4292_v57  ;;  %v10994_v59 = vrot.slane %v4292_v57, 9  ;;  %2723 = vst.msk [vmem:[#allocation3 + $0xb0] sm:$0xff] %vm16056_vm13, %v2553_v62  ;;  %2724 = vst.msk [vmem:[#allocation3 + $0xb8] sm:$0xff] %vm16056_vm13, %v2555_v33  ;;  %v4244_v42 = vcombine.high %v4036_v27, %v4036_v27  ;;  %v10993_v12 = vrot.slane %v4293_v58, 9 }
 0x221   :  { %v6538_v10 = vmax.f32 %v5898_v61, %v6410_v56  ;;  %v6981_v60 = vrot.slane %v6536_v44, %v12857_v41  ;;  %v6985_v11 = vrot.slane %v6537_v8, %v12857_v41  ;;  %2178 = vrot.lane.b32.xlu0 %v12974_v51, %s16068_s28  ;;  %v4251_v47 = vrot.slane %v4036_v27, %v12830_v24  ;;  %v102_v44 = vld [vmem:[%s16063_s29 + $0x148] sm:$0xff] }
 0x222   :  { %2180 = vrot.lane.b32.xlu1 %v12976_v9, %s16068_s28  ;;  %v10995_v18 = vrot.slane %v4294_v5, 9  ;;  %v4258_v28 = vrot.slane %v4244_v42, %v12830_v24  ;;  %v6411_v23 = vmax.f32 %v4285_v63, %v10992_v7  ;;  %vm16070_vm13 = vcmask 195752   ;;  %v2410_v63 = vld [vmem:[#allocation2 + $0x198] sm:$0xff]  ;;  %303 = vst.msk [vmem:[#allocation2 + $0x231] sm:$0xff] %vm151_vm0, %v102_v44  ;;  %v103_v44 = vld [vmem:[%s16063_s29 + $0x150] sm:$0xff] }
 0x223   :  { %v6989_v14 = vrot.slane %v6538_v10, %v12857_v41  ;;  %v7468_v15 = vsel %vm16058_vm4, %v6981_v60, %v6977_v34  ;;  %v2934_v29 = vpop.permute.xlu0 %2933  ;;  %v2936_v19 = vpop.permute.xlu1 %2935  ;;  %v4259_v4 = vcombine.high %v4251_v47, %v4251_v47  ;;  %v10864_v27 = vrot.slane %v4251_v47, 9  ;;  %vm16071_vm12 = vmmov %vm16070_vm13  ;;  %v359_v7 = vld [vmem:[#allocation2 + $0x1b8] sm:$0xff]  ;;  %304 = vst.msk [vmem:[#allocation2 + $0x241] sm:$0xff] %vm151_vm0, %v103_v44 }
 0x224   :  { %v7469_v51 = vsel %vm7456_vm5, %v6985_v11, %v7468_v15  ;;  %3106 = vst.msk [vmem:[#allocation3 + $0xa0] sm:$0xff] %vm16070_vm13, %v2934_v29  ;;  %v6413_v9 = vmax.f32 %v4292_v57, %v10994_v59  ;;  %v4260_v30 = vcombine.high %v4258_v28, %v4258_v28  ;;  %v10866_v31 = vrot.slane %v4258_v28, 9  ;;  %vm16073_vm13 = vmmov %vm16071_vm12  ;;  %v2795_v59 = vld [vmem:[#allocation2 + $0x199] sm:$0xff]  ;;  %v2796_v11 = vld [vmem:[#allocation2 + $0x1a1] sm:$0xff] }
 0x225   :  { %3107 = vst.msk [vmem:[#allocation3 + $0xa8] sm:$0xff] %vm16071_vm12, %v2936_v19  ;;  %vm16072_vm4 = vcmask 1043459   ;;  %2182 = vrot.lane.b32.xlu0 %v13062_v13, %s16068_s28  ;;  %v6412_v16 = vmax.f32 %v4293_v58, %v10993_v12  ;;  %v10865_v35 = vrot.slane %v4259_v4, 9  ;;  %v5899_v36 = vmax.f32 %v4251_v47, %v10864_v27  ;;  %v486_v29 = vld [vmem:[#allocation2 + $0x1b1] sm:$0xff] }
 0x226   :  { %v7470_v32 = vsel %vm16072_vm4, %v6989_v14, %v7469_v51  ;;  %2184 = vrot.lane.b32.xlu1 %v13067_v20, %s16068_s28  ;;  %v6414_v38 = vmax.f32 %v4294_v5, %v10995_v18  ;;  %v10867_v39 = vrot.slane %v4260_v30, 9  ;;  %v5901_v43 = vmax.f32 %v4258_v28, %v10866_v31  ;;  %v358_v5 = vld [vmem:[#allocation2 + $0x1b0] sm:$0xff]  ;;  %423 = vst.msk [vmem:[#allocation3 + $0x108] sm:$0xff] %vm151_vm0, %v359_v7  ;;  %v3181_v31 = vld [vmem:[#allocation2 + $0x1a2] sm:$0xff] }
 0x227   :  { %v2938_v45 = vpop.permute.xlu0 %2937  ;;  %v2940_v25 = vpop.permute.xlu1 %2939  ;;  %v5900_v26 = vmax.f32 %v4259_v4, %v10865_v35  ;;  %v6539_v48 = vmax.f32 %v5899_v36, %v6411_v23  ;;  %422 = vst.msk [vmem:[#allocation3 + $0x100] sm:$0xff] %vm151_vm0, %v358_v5  ;;  %v487_v23 = vld [vmem:[#allocation2 + $0x1b9] sm:$0xff]  ;;  %v13144_v36 = vld [vmem:[#allocation2 + $0x1d1] sm:$0xff]  ;;  %vm16074_vm4 = vcmask 146552  }
 0x228   :  { %3108 = vst.msk [vmem:[#allocation3 + $0xb0] sm:$0xff] %vm16071_vm12, %v2938_v45  ;;  %v5902_v49 = vmax.f32 %v4260_v30, %v10867_v39  ;;  %v6541_v52 = vmax.f32 %v5901_v43, %v6413_v9  ;;  %v872_v45 = vld [vmem:[#allocation2 + $0x1ba] sm:$0xff]  ;;  %vm16075_vm12 = vmmov %vm16074_vm4 }
 0x229   :  { %3109 = vst.msk [vmem:[#allocation3 + $0xb8] sm:$0xff] %vm16073_vm13, %v2940_v25  ;;  %2564 = vrot.lane.b32.xlu0 %v13009_v2, %s16069_s27  ;;  %v6540_v53 = vmax.f32 %v5900_v26, %v6412_v16  ;;  %v6993_v17 = vrot.slane %v6539_v48, %v12857_v41  ;;  %v13156_v25 = vld [vmem:[#allocation2 + $0x1ca] sm:$0xff]  ;;  %vm16076_vm13 = vmmov %vm16074_vm4 }
 0x22a   :  { %2566 = vrot.lane.b32.xlu1 %v13012_v6, %s16069_s27  ;;  %v6542_v37 = vmax.f32 %v5902_v49, %v6414_v38  ;;  %v7001_v2 = vrot.slane %v6541_v52, %v12857_v41  ;;  %v101_v6 = vld [vmem:[%s16063_s29 + $0x140] sm:$0xff]  ;;  %v871_v38 = vld [vmem:[#allocation2 + $0x1b2] sm:$0xff] }
 0x22b   :  { %v3319_v0 = vpop.permute.xlu0 %3318  ;;  %v3321_v54 = vpop.permute.xlu1 %3320  ;;  %v6997_v56 = vrot.slane %v6540_v53, %v12857_v41  ;;  %v7471_v57 = vsel %vm7460_vm7, %v6993_v17, %v7470_v32  ;;  %302 = vst.msk [vmem:[#allocation2 + $0x229] sm:$0xff] %vm151_vm0, %v101_v6  ;;  %v13142_v32 = vld [vmem:[#allocation2 + $0x1c9] sm:$0xff]  ;;  %v13158_v49 = vld [vmem:[#allocation2 + $0x1d2] sm:$0xff] }
 0x22c   :  { %3491 = vst.msk [vmem:[#allocation3 + $0xa0] sm:$0xff] %vm3470_vm15, %v3319_v0  ;;  %3492 = vst.msk [vmem:[#allocation3 + $0xa8] sm:$0xff] %vm3470_vm15, %v3321_v54  ;;  %v7005_v58 = vrot.slane %v6542_v37, %v12857_v41  ;;  %v13173_v0 = vld [vmem:[#allocation2 + $0x1e0] sm:$0xff] }
 0x22d   :  { %2568 = vrot.lane.b32.xlu0 %v2410_v63, %s16069_s27  ;;  %v7472_v61 = vsel %vm7462_vm3, %v6997_v56, %v7471_v57  ;;  %v13176_v57 = vld [vmem:[#allocation2 + $0x1e8] sm:$0xff] }
 0x22e   :  { %2570 = vrot.lane.b32.xlu1 %v2411_v55, %s16069_s27  ;;  %v7473_v8 = vsel %vm7464_vm6, %v7001_v2, %v7472_v61 }
 0x22f   :  { %v631_v62 = vpop.permute.xlu0 %630  ;;  %v633_v33 = vpop.permute.xlu1 %632  ;;  %v7474_v34 = vsel %vm7466_vm14, %v7005_v58, %v7473_v8  ;;  %v104_v8 = vld [vmem:[%s16063_s29 + $0x158] sm:$0xff] }
 0x230   :  { %799 = vst.msk [vmem:[#allocation3 + $0xc0] sm:$0xff] %vm774_vm8, %v631_v62  ;;  %800 = vst.msk [vmem:[#allocation3 + $0xc8] sm:$0xff] %vm774_vm8, %v633_v33 }
 0x231   :  { %7591 = vst.msk [vmem:[#allocation4 + $0x21] sm:$0xff] %vm6772_vm2, %v7474_v34  ;;  %2949 = vrot.lane.b32.xlu0 %v13040_v40, %s11581_s30 }
 0x232   :  { %2951 = vrot.lane.b32.xlu1 %v13042_v50, %s11581_s30  ;;  %v13115_v47 = vld [vmem:[#allocation2 + $0x228] sm:$0xff]  ;;  %v13119_v50 = vld [vmem:[#allocation2 + $0x230] sm:$0xff]  ;;  %305 = vst.msk [vmem:[#allocation2 + $0x249] sm:$0xff] %vm151_vm0, %v104_v8 }
 0x233   :  { %v3323_v10 = vpop.permute.xlu0 %3322  ;;  %v3325_v60 = vpop.permute.xlu1 %3324  ;;  %v3555_v42 = vld [vmem:[#allocation3 + $0xa0] sm:$0xff]  ;;  %v3556_v12 = vld [vmem:[#allocation3 + $0xa8] sm:$0xff]  ;;  %432 = vst.msk [vmem:[#allocation3 + $0x150] sm:$0xff] %vm151_vm0, %v13115_v47  ;;  %433 = vst.msk [vmem:[#allocation3 + $0x158] sm:$0xff] %vm151_vm0, %v13119_v50 }
 0x234   :  { %3493 = vst.msk [vmem:[#allocation3 + $0xb0] sm:$0xff] %vm3470_vm15, %v3323_v10  ;;  %3494 = vst.msk [vmem:[#allocation3 + $0xb8] sm:$0xff] %vm3470_vm15, %v3325_v60  ;;  %v3609_v40 = vpack.c.bf16 %v3556_v12, %v3555_v42  ;;  %v13231_v8 = vld [vmem:[#allocation2 + $0x1e2] sm:$0xff] }
 0x235   :  { %2953 = vrot.lane.b32.xlu0 %v2795_v59, %s11581_s30 }
 0x236   :  { %2955 = vrot.lane.b32.xlu1 %v2796_v11, %s11581_s30  ;;  %11399 = vmatprep.mubr.msk.bf16.mxu0 %vm3638_vm1, %v3609_v40 }
 0x237   :  { %v635_v14 = vpop.permute.xlu0 %634  ;;  %v637_v15 = vpop.permute.xlu1 %636 }
 0x238   :  { %801 = vst.msk [vmem:[#allocation3 + $0xd0] sm:$0xff] %vm774_vm8, %v635_v14  ;;  %802 = vst.msk [vmem:[#allocation3 + $0xd8] sm:$0xff] %vm774_vm8, %v637_v15  ;;  %v8318_v18 = vld [vmem:[#allocation4 + $0x22] sm:$0xff] }
 0x239   :  { %3334 = vrot.lane.b32.xlu0 %v13062_v13, %s11583_s25  ;;  %8334 = vst.msk [vmem:[#allocation5 + $0x8] sm:$0xff] %vm6772_vm2, %v8318_v18  ;;  %v7608_v28 = vld [vmem:[#allocation4 + $0x20] sm:$0xff] }
 0x23a   :  { %3336 = vrot.lane.b32.xlu1 %v13067_v20, %s11583_s25  ;;  %7624 = vst.msk [vmem:[#allocation5 + $0x20] sm:$0xff] %vm6772_vm2, %v7608_v28  ;;  %v3180_v13 = vld [vmem:[#allocation2 + $0x19a] sm:$0xff] }
 0x23b   :  { %v1016_v19 = vpop.permute.xlu0 %1015  ;;  %v1018_v51 = vpop.permute.xlu1 %1017  ;;  %v3557_v4 = vld [vmem:[#allocation3 + $0xb0] sm:$0xff]  ;;  %v3558_v27 = vld [vmem:[#allocation3 + $0xb8] sm:$0xff] }
 0x23c   :  { %1184 = vst.msk [vmem:[#allocation3 + $0xc0] sm:$0xff] %vm1159_vm9, %v1016_v19  ;;  %1185 = vst.msk [vmem:[#allocation3 + $0xc8] sm:$0xff] %vm1159_vm9, %v1018_v51  ;;  %v3610_v9 = vpack.c.bf16 %v3558_v27, %v3557_v4 }
 0x23d   :  { %646 = vrot.lane.b32.xlu0 %v486_v29, %s11576_s21 }
 0x23e   :  { %648 = vrot.lane.b32.xlu1 %v487_v23, %s11576_s21  ;;  %11400 = vmatmul.mubr.msk.bf16.gmra.mrb[20].mxu0 %vm3638_vm1, %v3610_v9  ;;  %v13207_v23 = vld [vmem:[#allocation2 + $0x1e1] sm:$0xff] }
 0x23f   :  { %v1020_v20 = vpop.permute.xlu0 %1019  ;;  %v1022_v30 = vpop.permute.xlu1 %1021 }
 0x240   :  { %1186 = vst.msk [vmem:[#allocation3 + $0xd0] sm:$0xff] %vm1159_vm9, %v1020_v20  ;;  %1187 = vst.msk [vmem:[#allocation3 + $0xd8] sm:$0xff] %vm1159_vm9, %v1022_v30  ;;  %v13209_v30 = vld [vmem:[#allocation2 + $0x1e9] sm:$0xff] }
 0x241   :  { %3338 = vrot.lane.b32.xlu0 %v3180_v13, %s11583_s25 }
 0x242   :  { %3340 = vrot.lane.b32.xlu1 %v3181_v31, %s11583_s25 }
 0x243   :  { %v1401_v16 = vpop.permute.xlu0 %1400  ;;  %v1403_v35 = vpop.permute.xlu1 %1402 }
 0x244   :  { %1569 = vst.msk [vmem:[#allocation3 + $0xc0] sm:$0xff] %vm1544_vm10, %v1401_v16  ;;  %1570 = vst.msk [vmem:[#allocation3 + $0xc8] sm:$0xff] %vm1544_vm10, %v1403_v35 }
 0x245   :  { %650 = vrot.lane.b32.xlu0 %v13142_v32, %s11576_s21 }
 0x246   :  { %652 = vrot.lane.b32.xlu1 %v13144_v36, %s11576_s21 }
 0x247   :  { %v1405_v39 = vpop.permute.xlu0 %1404  ;;  %v1407_v43 = vpop.permute.xlu1 %1406 }
 0x248   :  { %1571 = vst.msk [vmem:[#allocation3 + $0xd0] sm:$0xff] %vm1544_vm10, %v1405_v39  ;;  %1572 = vst.msk [vmem:[#allocation3 + $0xd8] sm:$0xff] %vm1544_vm10, %v1407_v43 }
 0x249   :  { %1031 = vrot.lane.b32.xlu0 %v871_v38, %s11575_s20 }
 0x24a   :  { %1033 = vrot.lane.b32.xlu1 %v872_v45, %s11575_s20 }
 0x24b   :  { %v1786_v26 = vpop.permute.xlu0 %1785  ;;  %v1788_v48 = vpop.permute.xlu1 %1787 }
 0x24c   :  { %1954 = vst.msk [vmem:[#allocation3 + $0xc0] sm:$0xff] %vm16059_vm11, %v1786_v26  ;;  %1955 = vst.msk [vmem:[#allocation3 + $0xc8] sm:$0xff] %vm16059_vm11, %v1788_v48 }
 0x24d   :  { %1035 = vrot.lane.b32.xlu0 %v13156_v25, %s11575_s20 }
 0x24e   :  { %1037 = vrot.lane.b32.xlu1 %v13158_v49, %s11575_s20 }
 0x24f   :  { %v1790_v52 = vpop.permute.xlu0 %1789  ;;  %v1792_v53 = vpop.permute.xlu1 %1791 }
 0x250   :  { %1956 = vst.msk [vmem:[#allocation3 + $0xd0] sm:$0xff] %vm16059_vm11, %v1790_v52  ;;  %1957 = vst.msk [vmem:[#allocation3 + $0xd8] sm:$0xff] %vm16059_vm11, %v1792_v53 }
 0x251   :  { %1416 = vrot.lane.b32.xlu0 %v12819_v22, %s16066_s22  ;;  %v11389_v17 = vpop.f32.mrb[8].mxu0 }
 0x252   :  { %1418 = vrot.lane.b32.xlu1 %v12825_v3, %s16066_s22  ;;  %v3817_v63 = vadd.f32 %v11389_v17, %v12815_v21  ;;  %v3808_v37 = vpop.f32.mrb[9].mxu0 }
 0x253   :  { %v3809_v54 = vadd.f32 %v12815_v21, %v3808_v37  ;;  %v2171_v55 = vpop.permute.xlu0 %2170  ;;  %v11390_v56 = vpop.f32.mrb[10].mxu0 }
 0x254   :  { %v4041_v2 = vmax.f32 %v3817_v63, 0.0  ;;  %2339 = vst.msk [vmem:[#allocation3 + $0xc0] sm:$0xff] %vm16074_vm4, %v2171_v55  ;;  %v2173_v6 = vpop.permute.xlu1 %2172  ;;  %v3820_v22 = vadd.f32 %v11390_v56, %v12815_v21  ;;  %v3811_v58 = vpop.f32.mrb[11].mxu0 }
 0x255   :  { %v4039_v61 = vmax.f32 %v3809_v54, 0.0  ;;  %2340 = vst.msk [vmem:[#allocation3 + $0xc8] sm:$0xff] %vm16075_vm12, %v2173_v6  ;;  %v3812_v3 = vadd.f32 %v12815_v21, %v3811_v58  ;;  %1420 = vrot.lane.b32.xlu0 %v13173_v0, %s16066_s22  ;;  %vm16077_vm12 = vcmask 171152  }
 0x256   :  { %v4329_v62 = vcombine.high %v4041_v2, %v4041_v2  ;;  %v4336_v33 = vrot.slane %v4041_v2, %v12830_v24  ;;  %v4042_v34 = vmax.f32 %v3820_v22, 0.0  ;;  %1422 = vrot.lane.b32.xlu1 %v13176_v57, %s16066_s22 }
 0x257   :  { %v4295_v21 = vcombine.high %v4039_v61, %v4039_v61  ;;  %v4302_v5 = vrot.slane %v4039_v61, %v12830_v24  ;;  %v13196_v7 = vmax.f32 %v3812_v3, 0.0  ;;  %v2175_v59 = vpop.permute.xlu0 %2174 }
 0x258   :  { %v4343_v10 = vrot.slane %v4329_v62, %v12830_v24  ;;  %v4344_v60 = vcombine.high %v4336_v33, %v4336_v33  ;;  %v10996_v11 = vrot.slane %v4336_v33, 9  ;;  %v4346_v42 = vcombine.high %v4042_v34, %v4042_v34  ;;  %2341 = vst.msk [vmem:[#allocation3 + $0xd0] sm:$0xff] %vm16076_vm13, %v2175_v59  ;;  %v2177_v12 = vpop.permute.xlu1 %2176  ;;  %vm16078_vm13 = vmmov %vm16077_vm12  ;;  %v13236_v59 = vld [vmem:[#allocation2 + $0x1ea] sm:$0xff] }
 0x259   :  { %v4309_v40 = vrot.slane %v4295_v21, %v12830_v24  ;;  %v4310_v14 = vcombine.high %v4302_v5, %v4302_v5  ;;  %v10868_v15 = vrot.slane %v4302_v5, 9  ;;  %v4353_v18 = vrot.slane %v4042_v34, %v12830_v24  ;;  %2342 = vst.msk [vmem:[#allocation3 + $0xd8] sm:$0xff] %vm16074_vm4, %v2177_v12  ;;  %1801 = vrot.lane.b32.xlu0 %v13142_v32, %s16067_s24  ;;  %vm16079_vm4 = vmmov %vm16077_vm12 }
 0x25a   :  { %v4345_v28 = vcombine.high %v4343_v10, %v4343_v10  ;;  %v10997_v29 = vrot.slane %v4344_v60, 9  ;;  %v10998_v19 = vrot.slane %v4343_v10, 9  ;;  %v6415_v51 = vmax.f32 %v4336_v33, %v10996_v11  ;;  %1803 = vrot.lane.b32.xlu1 %v13144_v36, %s16067_s24 }
 0x25b   :  { %v4311_v4 = vcombine.high %v4309_v40, %v4309_v40  ;;  %v10869_v27 = vrot.slane %v4310_v14, 9  ;;  %v10870_v9 = vrot.slane %v4309_v40, 9  ;;  %v5903_v13 = vmax.f32 %v4302_v5, %v10868_v15  ;;  %v2557_v20 = vpop.permute.xlu0 %2556 }
 0x25c   :  { %v10999_v31 = vrot.slane %v4345_v28, 9  ;;  %v6416_v16 = vmax.f32 %v4344_v60, %v10997_v29  ;;  %v6417_v35 = vmax.f32 %v4343_v10, %v10998_v19  ;;  %v4360_v32 = vrot.slane %v4346_v42, %v12830_v24  ;;  %2725 = vst.msk [vmem:[#allocation3 + $0xc0] sm:$0xff] %vm16077_vm12, %v2557_v20  ;;  %v2559_v38 = vpop.permute.xlu1 %2558  ;;  %vm16080_vm12 = vmmov %vm16079_vm4 }
 0x25d   :  { %v10871_v39 = vrot.slane %v4311_v4, 9  ;;  %v5904_v43 = vmax.f32 %v4310_v14, %v10869_v27  ;;  %v5905_v36 = vmax.f32 %v4309_v40, %v10870_v9  ;;  %v6543_v45 = vmax.f32 %v5903_v13, %v6415_v51  ;;  %2726 = vst.msk [vmem:[#allocation3 + $0xc8] sm:$0xff] %vm16078_vm13, %v2559_v38  ;;  %1805 = vrot.lane.b32.xlu0 %v13207_v23, %s16067_s24 }
 0x25e   :  { %v6418_v26 = vmax.f32 %v4345_v28, %v10999_v31  ;;  %v4361_v48 = vcombine.high %v4353_v18, %v4353_v18  ;;  %1807 = vrot.lane.b32.xlu1 %v13209_v30, %s16067_s24  ;;  %v4362_v63 = vcombine.high %v4360_v32, %v4360_v32  ;;  %v11000_v55 = vrot.slane %v4353_v18, 9 }
 0x25f   :  { %v5906_v52 = vmax.f32 %v4311_v4, %v10871_v39  ;;  %v6544_v53 = vmax.f32 %v5904_v43, %v6416_v16  ;;  %v6545_v17 = vmax.f32 %v5905_v36, %v6417_v35  ;;  %v2561_v37 = vpop.permute.xlu0 %2560  ;;  %v7009_v54 = vrot.slane %v6543_v45, %v12857_v41  ;;  %v13253_v35 = vld [vmem:[#allocation2 + $0x1f8] sm:$0xff]  ;;  %v13255_v39 = vld [vmem:[#allocation2 + $0x200] sm:$0xff] }
 0x260   :  { %v11002_v56 = vrot.slane %v4360_v32, 9  ;;  %2727 = vst.msk [vmem:[#allocation3 + $0xd0] sm:$0xff] %vm16079_vm4, %v2561_v37  ;;  %v2563_v2 = vpop.permute.xlu1 %2562  ;;  %v4312_v61 = vcombine.high %v13196_v7, %v13196_v7  ;;  %v11001_v3 = vrot.slane %v4361_v48, 9  ;;  %v4319_v44 = vrot.slane %v13196_v7, %v12830_v24 }
 0x261   :  { %v6546_v6 = vmax.f32 %v5906_v52, %v6418_v26  ;;  %v7013_v22 = vrot.slane %v6544_v53, %v12857_v41  ;;  %v7017_v58 = vrot.slane %v6545_v17, %v12857_v41  ;;  %2728 = vst.msk [vmem:[#allocation3 + $0xd8] sm:$0xff] %vm16080_vm12, %v2563_v2  ;;  %2186 = vrot.lane.b32.xlu0 %v13156_v25, %s16068_s28  ;;  %vm16081_vm13 = vcmask 1041409   ;;  %v106_v52 = vld [vmem:[%s16063_s29 + $0x168] sm:$0xff] }
 0x262   :  { %2188 = vrot.lane.b32.xlu1 %v13158_v49, %s16068_s28  ;;  %v11003_v34 = vrot.slane %v4362_v63, 9  ;;  %v4326_v21 = vrot.slane %v4312_v61, %v12830_v24  ;;  %v6419_v10 = vmax.f32 %v4353_v18, %v11000_v55  ;;  %v4327_v60 = vcombine.high %v4319_v44, %v4319_v44  ;;  %307 = vst.msk [vmem:[#allocation2 + $0x261] sm:$0xff] %vm151_vm0, %v106_v52  ;;  %v363_v55 = vld [vmem:[#allocation2 + $0x1e8] sm:$0xff]  ;;  %v108_v52 = vld [vmem:[%s16063_s29 + $0x178] sm:$0xff] }
 0x263   :  { %v7021_v62 = vrot.slane %v6546_v6, %v12857_v41  ;;  %v7475_v33 = vsel %vm16081_vm13, %v7013_v22, %v7009_v54  ;;  %v2942_v5 = vpop.permute.xlu0 %2941  ;;  %v10872_v7 = vrot.slane %v4319_v44, 9  ;;  %vm16082_vm4 = vcmask 195752   ;;  %v362_v54 = vld [vmem:[#allocation2 + $0x1e0] sm:$0xff]  ;;  %427 = vst.msk [vmem:[#allocation3 + $0x128] sm:$0xff] %vm151_vm0, %v363_v55  ;;  %309 = vst.msk [vmem:[#allocation2 + $0x279] sm:$0xff] %vm151_vm0, %v108_v52 }
 0x264   :  { %v7476_v25 = vsel %vm7456_vm5, %v7017_v58, %v7475_v33  ;;  %3110 = vst.msk [vmem:[#allocation3 + $0xc0] sm:$0xff] %vm16082_vm4, %v2942_v5  ;;  %v2944_v49 = vpop.permute.xlu1 %2943  ;;  %v6421_v11 = vmax.f32 %v4360_v32, %v11002_v56  ;;  %v4328_v42 = vcombine.high %v4326_v21, %v4326_v21  ;;  %v10874_v12 = vrot.slane %v4326_v21, 9  ;;  %vm16084_vm13 = vmmov %vm16082_vm4  ;;  %v13285_v56 = vld [vmem:[#allocation2 + $0x1f9] sm:$0xff]  ;;  %v13289_v6 = vld [vmem:[#allocation2 + $0x201] sm:$0xff] }
 0x265   :  { %vm16083_vm12 = vcmask 1043459   ;;  %3111 = vst.msk [vmem:[#allocation3 + $0xc8] sm:$0xff] %vm16084_vm13, %v2944_v49  ;;  %2190 = vrot.lane.b32.xlu0 %v13231_v8, %s16068_s28  ;;  %v6420_v14 = vmax.f32 %v4361_v48, %v11001_v3  ;;  %v10873_v15 = vrot.slane %v4327_v60, 9  ;;  %v5907_v28 = vmax.f32 %v4319_v44, %v10872_v7 }
 0x266   :  { %v7477_v40 = vsel %vm16083_vm12, %v7021_v62, %v7476_v25  ;;  %2192 = vrot.lane.b32.xlu1 %v13236_v59, %s16068_s28  ;;  %v6422_v18 = vmax.f32 %v4362_v63, %v11003_v34  ;;  %v10875_v29 = vrot.slane %v4328_v42, 9  ;;  %v5909_v19 = vmax.f32 %v4326_v21, %v10874_v12  ;;  %vm16085_vm12 = vmmov %vm16082_vm4  ;;  %426 = vst.msk [vmem:[#allocation3 + $0x120] sm:$0xff] %vm151_vm0, %v362_v54  ;;  %v364_v34 = vld [vmem:[#allocation2 + $0x1f8] sm:$0xff]  ;;  %v365_v25 = vld [vmem:[#allocation2 + $0x200] sm:$0xff] }
 0x267   :  { %v2946_v51 = vpop.permute.xlu0 %2945  ;;  %v5908_v4 = vmax.f32 %v4327_v60, %v10873_v15  ;;  %v6547_v27 = vmax.f32 %v5907_v28, %v6419_v10  ;;  %428 = vst.msk [vmem:[#allocation3 + $0x130] sm:$0xff] %vm151_vm0, %v364_v34  ;;  %429 = vst.msk [vmem:[#allocation3 + $0x138] sm:$0xff] %vm151_vm0, %v365_v25  ;;  %v13325_v12 = vld [vmem:[#allocation2 + $0x1fa] sm:$0xff]  ;;  %v8351_v15 = vld [vmem:[#allocation5 + $0x8] sm:$0xff]  ;;  %vm16086_vm13 = vcmask 146552  }
 0x268   :  { %3112 = vst.msk [vmem:[#allocation3 + $0xd0] sm:$0xff] %vm16082_vm4, %v2946_v51  ;;  %v2948_v9 = vpop.permute.xlu1 %2947  ;;  %v5910_v13 = vmax.f32 %v4328_v42, %v10875_v29  ;;  %v6549_v20 = vmax.f32 %v5909_v19, %v6421_v11  ;;  %vm16087_vm4 = vmmov %vm16086_vm13 }
 0x269   :  { %3113 = vst.msk [vmem:[#allocation3 + $0xd8] sm:$0xff] %vm16085_vm12, %v2948_v9  ;;  %2572 = vrot.lane.b32.xlu0 %v13173_v0, %s16069_s27  ;;  %v6548_v31 = vmax.f32 %v5908_v4, %v6420_v14  ;;  %v7025_v16 = vrot.slane %v6547_v27, %v12857_v41  ;;  %v13328_v14 = vld [vmem:[#allocation2 + $0x202] sm:$0xff]  ;;  %vm16088_vm12 = vmmov %vm16087_vm4 }
 0x26a   :  { %2574 = vrot.lane.b32.xlu1 %v13176_v57, %s16069_s27  ;;  %v6550_v32 = vmax.f32 %v5910_v13, %v6422_v18  ;;  %v7033_v0 = vrot.slane %v6549_v20, %v12857_v41  ;;  %v105_v57 = vld [vmem:[%s16063_s29 + $0x160] sm:$0xff] }
 0x26b   :  { %v3327_v38 = vpop.permute.xlu0 %3326  ;;  %v7029_v43 = vrot.slane %v6548_v31, %v12857_v41  ;;  %v7478_v36 = vsel %vm7460_vm7, %v7025_v16, %v7477_v40  ;;  %306 = vst.msk [vmem:[#allocation2 + $0x259] sm:$0xff] %vm151_vm0, %v105_v57  ;;  %v13367_v16 = vld [vmem:[#allocation2 + $0x210] sm:$0xff] }
 0x26c   :  { %3495 = vst.msk [vmem:[#allocation3 + $0xc0] sm:$0xff] %vm3470_vm15, %v3327_v38  ;;  %v3329_v45 = vpop.permute.xlu1 %3328  ;;  %v7037_v26 = vrot.slane %v6550_v32, %v12857_v41 }
 0x26d   :  { %3496 = vst.msk [vmem:[#allocation3 + $0xc8] sm:$0xff] %vm3470_vm15, %v3329_v45  ;;  %2576 = vrot.lane.b32.xlu0 %v13253_v35, %s16069_s27  ;;  %v7479_v48 = vsel %vm7462_vm3, %v7029_v43, %v7478_v36  ;;  %v13370_v36 = vld [vmem:[#allocation2 + $0x218] sm:$0xff] }
 0x26e   :  { %2578 = vrot.lane.b32.xlu1 %v13255_v39, %s16069_s27  ;;  %v7480_v53 = vsel %vm7464_vm6, %v7033_v0, %v7479_v48  ;;  %v107_v48 = vld [vmem:[%s16063_s29 + $0x170] sm:$0xff] }
 0x26f   :  { %v639_v17 = vpop.permute.xlu0 %638  ;;  %v7481_v63 = vsel %vm7466_vm14, %v7037_v26, %v7480_v53  ;;  %308 = vst.msk [vmem:[#allocation2 + $0x271] sm:$0xff] %vm151_vm0, %v107_v48 }
 0x270   :  { %803 = vst.msk [vmem:[#allocation3 + $0xe0] sm:$0xff] %vm774_vm8, %v639_v17  ;;  %v641_v37 = vpop.permute.xlu1 %640 }
 0x271   :  { %7592 = vst.msk [vmem:[#allocation4 + $0x31] sm:$0xff] %vm6772_vm2, %v7481_v63  ;;  %2957 = vrot.lane.b32.xlu0 %v13207_v23, %s11581_s30 }
 0x272   :  { %804 = vst.msk [vmem:[#allocation3 + $0xe8] sm:$0xff] %vm774_vm8, %v641_v37  ;;  %2959 = vrot.lane.b32.xlu1 %v13209_v30, %s11581_s30  ;;  %v13295_v44 = vld [vmem:[#allocation2 + $0x258] sm:$0xff]  ;;  %v13299_v62 = vld [vmem:[#allocation2 + $0x260] sm:$0xff] }
 0x273   :  { %v3331_v2 = vpop.permute.xlu0 %3330  ;;  %v3559_v22 = vld [vmem:[#allocation3 + $0xc0] sm:$0xff]  ;;  %436 = vst.msk [vmem:[#allocation3 + $0x170] sm:$0xff] %vm151_vm0, %v13295_v44  ;;  %437 = vst.msk [vmem:[#allocation3 + $0x178] sm:$0xff] %vm151_vm0, %v13299_v62 }
 0x274   :  { %3497 = vst.msk [vmem:[#allocation3 + $0xd0] sm:$0xff] %vm3470_vm15, %v3331_v2  ;;  %v3333_v58 = vpop.permute.xlu1 %3332  ;;  %v3560_v61 = vld [vmem:[#allocation3 + $0xc8] sm:$0xff] }
 0x275   :  { %3498 = vst.msk [vmem:[#allocation3 + $0xd8] sm:$0xff] %vm3470_vm15, %v3333_v58  ;;  %2961 = vrot.lane.b32.xlu0 %v13285_v56, %s11581_s30  ;;  %v3611_v3 = vpack.c.bf16 %v3560_v61, %v3559_v22 }
 0x276   :  { %2963 = vrot.lane.b32.xlu1 %v13289_v6, %s11581_s30 }
 0x277   :  { %11403 = vmatprep.mubr.msk.bf16.mxu0 %vm3638_vm1, %v3611_v3  ;;  %v643_v33 = vpop.permute.xlu0 %642 }
 0x278   :  { %805 = vst.msk [vmem:[#allocation3 + $0xf0] sm:$0xff] %vm774_vm8, %v643_v33  ;;  %v645_v21 = vpop.permute.xlu1 %644  ;;  %v8319_v5 = vld [vmem:[#allocation4 + $0x32] sm:$0xff] }
 0x279   :  { %v13308_v10 = vld [vmem:[#allocation4 + $0x30] sm:$0xff]  ;;  %806 = vst.msk [vmem:[#allocation3 + $0xf8] sm:$0xff] %vm774_vm8, %v645_v21  ;;  %3342 = vrot.lane.b32.xlu0 %v13231_v8, %s11583_s25 }
 0x27a   :  { %8335 = vst.msk [vmem:[#allocation5 + $0x18] sm:$0xff] %vm6772_vm2, %v8319_v5  ;;  %7625 = vst.msk [vmem:[#allocation5 + $0x30] sm:$0xff] %vm6772_vm2, %v13308_v10  ;;  %3344 = vrot.lane.b32.xlu1 %v13236_v59, %s11583_s25 }
 0x27b   :  { %v1024_v60 = vpop.permute.xlu0 %1023  ;;  %v3561_v7 = vld [vmem:[#allocation3 + $0xd0] sm:$0xff] }
 0x27c   :  { %1188 = vst.msk [vmem:[#allocation3 + $0xe0] sm:$0xff] %vm1159_vm9, %v1024_v60  ;;  %v1026_v49 = vpop.permute.xlu1 %1025  ;;  %v3562_v11 = vld [vmem:[#allocation3 + $0xd8] sm:$0xff] }
 0x27d   :  { %1189 = vst.msk [vmem:[#allocation3 + $0xe8] sm:$0xff] %vm1159_vm9, %v1026_v49  ;;  %654 = vrot.lane.b32.xlu0 %v13207_v23, %s11576_s21  ;;  %v3612_v42 = vpack.c.bf16 %v3562_v11, %v3561_v7 }
 0x27e   :  { %656 = vrot.lane.b32.xlu1 %v13209_v30, %s11576_s21 }
 0x27f   :  { %11404 = vmatmul.mubr.msk.bf16.gmra.mrb[24].mxu0 %vm3638_vm1, %v3612_v42  ;;  %v1028_v40 = vpop.permute.xlu0 %1027  ;;  %v13401_v42 = vld [vmem:[#allocation2 + $0x211] sm:$0xff] }
 0x280   :  { %1190 = vst.msk [vmem:[#allocation3 + $0xf0] sm:$0xff] %vm1159_vm9, %v1028_v40  ;;  %v1030_v18 = vpop.permute.xlu1 %1029 }
 0x281   :  { %v8353_v28 = vld [vmem:[#allocation5 + $0x18] sm:$0xff]  ;;  %1191 = vst.msk [vmem:[#allocation3 + $0xf8] sm:$0xff] %vm1159_vm9, %v1030_v18  ;;  %3346 = vrot.lane.b32.xlu0 %v13325_v12, %s11583_s25 }
 0x282   :  { %v8383_v29 = vpack.c.bf16 %v8353_v28, %v8351_v15  ;;  %3348 = vrot.lane.b32.xlu1 %v13328_v14, %s11583_s25 }
 0x283   :  { %v1409_v23 = vpop.permute.xlu0 %1408 }
 0x284   :  { %11127 = vmatprep.mubr.msk.bf16.mxu1 %vm6772_vm2, %v8383_v29  ;;  %1573 = vst.msk [vmem:[#allocation3 + $0xe0] sm:$0xff] %vm1544_vm10, %v1409_v23  ;;  %v1411_v30 = vpop.permute.xlu1 %1410  ;;  %v13403_v23 = vld [vmem:[#allocation2 + $0x219] sm:$0xff] }
 0x285   :  { %1574 = vst.msk [vmem:[#allocation3 + $0xe8] sm:$0xff] %vm1544_vm10, %v1411_v30  ;;  %658 = vrot.lane.b32.xlu0 %v13285_v56, %s11576_s21 }
 0x286   :  { %660 = vrot.lane.b32.xlu1 %v13289_v6, %s11576_s21 }
 0x287   :  { %v1413_v19 = vpop.permute.xlu0 %1412 }
 0x288   :  { %1575 = vst.msk [vmem:[#allocation3 + $0xf0] sm:$0xff] %vm1544_vm10, %v1413_v19  ;;  %v1415_v51 = vpop.permute.xlu1 %1414 }
 0x289   :  { %1576 = vst.msk [vmem:[#allocation3 + $0xf8] sm:$0xff] %vm1544_vm10, %v1415_v51  ;;  %1039 = vrot.lane.b32.xlu0 %v13231_v8, %s11575_s20 }
 0x28a   :  { %1041 = vrot.lane.b32.xlu1 %v13236_v59, %s11575_s20  ;;  %v13364_v59 = vld [vmem:[%s16027_s3] ss:$0 sm:$0xff] }
 0x28b   :  { %v1794_v4 = vpop.permute.xlu0 %1793 }
 0x28c   :  { %1958 = vst.msk [vmem:[#allocation3 + $0xe0] sm:$0xff] %vm16059_vm11, %v1794_v4  ;;  %v1796_v27 = vpop.permute.xlu1 %1795 }
 0x28d   :  { %1959 = vst.msk [vmem:[#allocation3 + $0xe8] sm:$0xff] %vm16059_vm11, %v1796_v27  ;;  %1043 = vrot.lane.b32.xlu0 %v13325_v12, %s11575_s20 }
 0x28e   :  { %1045 = vrot.lane.b32.xlu1 %v13328_v14, %s11575_s20 }
 0x28f   :  { %v1798_v9 = vpop.permute.xlu0 %1797 }
 0x290   :  { %1960 = vst.msk [vmem:[#allocation3 + $0xf0] sm:$0xff] %vm16059_vm11, %v1798_v9  ;;  %v1800_v13 = vpop.permute.xlu1 %1799 }
 0x291   :  { %1961 = vst.msk [vmem:[#allocation3 + $0xf8] sm:$0xff] %vm16059_vm11, %v1800_v13  ;;  %1424 = vrot.lane.b32.xlu0 %v13253_v35, %s16066_s22  ;;  %v11393_v8 = vpop.f32.mrb[12].mxu0 }
 0x292   :  { %1426 = vrot.lane.b32.xlu1 %v13255_v39, %s16066_s22  ;;  %v3833_v20 = vadd.f32 %v13364_v59, %v11393_v8  ;;  %v3824_v31 = vpop.f32.mrb[13].mxu0 }
 0x293   :  { %v3825_v32 = vadd.f32 %v13364_v59, %v3824_v31  ;;  %v2179_v38 = vpop.permute.xlu0 %2178  ;;  %v11394_v43 = vpop.f32.mrb[14].mxu0 }
 0x294   :  { %v4045_v35 = vmax.f32 %v3833_v20, 0.0  ;;  %2343 = vst.msk [vmem:[#allocation3 + $0xe0] sm:$0xff] %vm16086_vm13, %v2179_v38  ;;  %v2181_v39 = vpop.permute.xlu1 %2180  ;;  %v3836_v45 = vadd.f32 %v13364_v59, %v11394_v43  ;;  %v3827_v0 = vpop.f32.mrb[15].mxu0  ;;  %vm16089_vm13 = vmmov %vm16087_vm4 }
 0x295   :  { %v4043_v57 = vmax.f32 %v3825_v32, 0.0  ;;  %2344 = vst.msk [vmem:[#allocation3 + $0xe8] sm:$0xff] %vm16087_vm4, %v2181_v39  ;;  %v3828_v26 = vadd.f32 %v13364_v59, %v3827_v0  ;;  %1428 = vrot.lane.b32.xlu0 %v13367_v16, %s16066_s22  ;;  %vm16090_vm4 = vcmask 171152  }
 0x296   :  { %v4397_v53 = vcombine.high %v4045_v35, %v4045_v35  ;;  %v4404_v17 = vrot.slane %v4045_v35, %v12830_v24  ;;  %v4046_v63 = vmax.f32 %v3836_v45, 0.0  ;;  %1430 = vrot.lane.b32.xlu1 %v13370_v36, %s16066_s22 }
 0x297   :  { %v4363_v37 = vcombine.high %v4043_v57, %v4043_v57  ;;  %v4370_v54 = vrot.slane %v4043_v57, %v12830_v24  ;;  %v13390_v55 = vmax.f32 %v3828_v26, 0.0  ;;  %v2183_v2 = vpop.permute.xlu0 %2182 }
 0x298   :  { %v4411_v22 = vrot.slane %v4397_v53, %v12830_v24  ;;  %v4412_v58 = vcombine.high %v4404_v17, %v4404_v17  ;;  %v11004_v61 = vrot.slane %v4404_v17, 9  ;;  %v4414_v3 = vcombine.high %v4046_v63, %v4046_v63  ;;  %2345 = vst.msk [vmem:[#allocation3 + $0xf0] sm:$0xff] %vm16088_vm12, %v2183_v2  ;;  %v2185_v33 = vpop.permute.xlu1 %2184  ;;  %vm16091_vm12 = vmmov %vm16090_vm4 }
 0x299   :  { %v4377_v34 = vrot.slane %v4363_v37, %v12830_v24  ;;  %v4378_v21 = vcombine.high %v4370_v54, %v4370_v54  ;;  %v10876_v5 = vrot.slane %v4370_v54, 9  ;;  %v4421_v25 = vrot.slane %v4046_v63, %v12830_v24  ;;  %2346 = vst.msk [vmem:[#allocation3 + $0xf8] sm:$0xff] %vm16089_vm13, %v2185_v33  ;;  %1809 = vrot.lane.b32.xlu0 %v13285_v56, %s16067_s24  ;;  %vm16092_vm13 = vmmov %vm16090_vm4  ;;  %v13425_v37 = vld [vmem:[#allocation2 + $0x212] sm:$0xff] }
 0x29a   :  { %v4413_v60 = vcombine.high %v4411_v22, %v4411_v22  ;;  %v11005_v7 = vrot.slane %v4412_v58, 9  ;;  %v11006_v49 = vrot.slane %v4411_v22, 9  ;;  %v6423_v11 = vmax.f32 %v4404_v17, %v11004_v61  ;;  %1811 = vrot.lane.b32.xlu1 %v13289_v6, %s16067_s24 }
 0x29b   :  { %v4379_v40 = vcombine.high %v4377_v34, %v4377_v34  ;;  %v10877_v15 = vrot.slane %v4378_v21, 9  ;;  %v10878_v28 = vrot.slane %v4377_v34, 9  ;;  %v5911_v18 = vmax.f32 %v4370_v54, %v10876_v5  ;;  %v2565_v29 = vpop.permute.xlu0 %2564 }
 0x29c   :  { %v11007_v30 = vrot.slane %v4413_v60, 9  ;;  %v6424_v19 = vmax.f32 %v4412_v58, %v11005_v7  ;;  %v6425_v51 = vmax.f32 %v4411_v22, %v11006_v49  ;;  %v4428_v56 = vrot.slane %v4414_v3, %v12830_v24  ;;  %2729 = vst.msk [vmem:[#allocation3 + $0xe0] sm:$0xff] %vm16090_vm4, %v2565_v29  ;;  %v2567_v4 = vpop.permute.xlu1 %2566  ;;  %v13430_v3 = vld [vmem:[#allocation2 + $0x21a] sm:$0xff] }
 0x29d   :  { %v10879_v27 = vrot.slane %v4379_v40, 9  ;;  %v5912_v9 = vmax.f32 %v4378_v21, %v10877_v15  ;;  %v5913_v6 = vmax.f32 %v4377_v34, %v10878_v28  ;;  %v6551_v13 = vmax.f32 %v5911_v18, %v6423_v11  ;;  %2730 = vst.msk [vmem:[#allocation3 + $0xe8] sm:$0xff] %vm16091_vm12, %v2567_v4  ;;  %1813 = vrot.lane.b32.xlu0 %v13401_v42, %s16067_s24 }
 0x29e   :  { %v6426_v8 = vmax.f32 %v4413_v60, %v11007_v30  ;;  %v4429_v20 = vcombine.high %v4421_v25, %v4421_v25  ;;  %1815 = vrot.lane.b32.xlu1 %v13403_v23, %s16067_s24  ;;  %v4430_v43 = vcombine.high %v4428_v56, %v4428_v56  ;;  %v11008_v45 = vrot.slane %v4421_v25, 9 }
 0x29f   :  { %v5914_v31 = vmax.f32 %v4379_v40, %v10879_v27  ;;  %v6552_v32 = vmax.f32 %v5912_v9, %v6424_v19  ;;  %v6553_v38 = vmax.f32 %v5913_v6, %v6425_v51  ;;  %v2569_v35 = vpop.permute.xlu0 %2568  ;;  %v7041_v39 = vrot.slane %v6551_v13, %v12857_v41 }
 0x2a0   :  { %v11010_v0 = vrot.slane %v4428_v56, 9  ;;  %2731 = vst.msk [vmem:[#allocation3 + $0xf0] sm:$0xff] %vm16092_vm13, %v2569_v35  ;;  %v2571_v57 = vpop.permute.xlu1 %2570  ;;  %v4380_v53 = vcombine.high %v13390_v55, %v13390_v55  ;;  %v11009_v17 = vrot.slane %v4429_v20, 9  ;;  %v4387_v63 = vrot.slane %v13390_v55, %v12830_v24 }
 0x2a1   :  { %v6554_v26 = vmax.f32 %v5914_v31, %v6426_v8  ;;  %v7045_v48 = vrot.slane %v6552_v32, %v12857_v41  ;;  %v7049_v52 = vrot.slane %v6553_v38, %v12857_v41  ;;  %2732 = vst.msk [vmem:[#allocation3 + $0xf8] sm:$0xff] %vm16090_vm4, %v2571_v57  ;;  %2194 = vrot.lane.b32.xlu0 %v13325_v12, %s16068_s28  ;;  %vm16093_vm12 = vcmask 1041409   ;;  %v110_v38 = vld [vmem:[%s16063_s29 + $0x188] sm:$0xff]  ;;  %v367_v57 = vld [vmem:[#allocation2 + $0x218] sm:$0xff] }
 0x2a2   :  { %2196 = vrot.lane.b32.xlu1 %v13328_v14, %s16068_s28  ;;  %v11011_v22 = vrot.slane %v4430_v43, 9  ;;  %v4394_v58 = vrot.slane %v4380_v53, %v12830_v24  ;;  %v6427_v33 = vmax.f32 %v4421_v25, %v11008_v45  ;;  %v4395_v34 = vcombine.high %v4387_v63, %v4387_v63  ;;  %311 = vst.msk [vmem:[#allocation2 + $0x291] sm:$0xff] %vm151_vm0, %v110_v38 }
 0x2a3   :  { %v7053_v54 = vrot.slane %v6554_v26, %v12857_v41  ;;  %v7482_v2 = vsel %vm16093_vm12, %v7045_v48, %v7041_v39  ;;  %v2950_v61 = vpop.permute.xlu0 %2949  ;;  %v10880_v55 = vrot.slane %v4387_v63, 9  ;;  %vm16094_vm13 = vcmask 195752   ;;  %v13475_v26 = vld [vmem:[#allocation2 + $0x229] sm:$0xff]  ;;  %431 = vst.msk [vmem:[#allocation3 + $0x148] sm:$0xff] %vm151_vm0, %v367_v57 }
 0x2a4   :  { %v7483_v12 = vsel %vm7456_vm5, %v7049_v52, %v7482_v2  ;;  %3114 = vst.msk [vmem:[#allocation3 + $0xe0] sm:$0xff] %vm16094_vm13, %v2950_v61  ;;  %v2952_v14 = vpop.permute.xlu1 %2951  ;;  %v6429_v21 = vmax.f32 %v4428_v56, %v11010_v0  ;;  %v4396_v5 = vcombine.high %v4394_v58, %v4394_v58  ;;  %v10882_v60 = vrot.slane %v4394_v58, 9  ;;  %vm16096_vm12 = vmmov %vm16094_vm13  ;;  %v366_v0 = vld [vmem:[#allocation2 + $0x210] sm:$0xff] }
 0x2a5   :  { %vm16095_vm4 = vcmask 1043459   ;;  %3115 = vst.msk [vmem:[#allocation3 + $0xe8] sm:$0xff] %vm16096_vm12, %v2952_v14  ;;  %2198 = vrot.lane.b32.xlu0 %v13425_v37, %s16068_s28  ;;  %v6428_v49 = vmax.f32 %v4429_v20, %v11009_v17  ;;  %v10881_v11 = vrot.slane %v4395_v34, 9  ;;  %v5915_v40 = vmax.f32 %v4387_v63, %v10880_v55  ;;  %vm16097_vm13 = vmmov %vm16096_vm12  ;;  %v13479_v52 = vld [vmem:[#allocation2 + $0x231] sm:$0xff] }
 0x2a6   :  { %v7484_v7 = vsel %vm16095_vm4, %v7053_v54, %v7483_v12  ;;  %2200 = vrot.lane.b32.xlu1 %v13430_v3, %s16068_s28  ;;  %v6430_v25 = vmax.f32 %v4430_v43, %v11011_v22  ;;  %v10883_v15 = vrot.slane %v4396_v5, 9  ;;  %v5917_v28 = vmax.f32 %v4394_v58, %v10882_v60  ;;  %vm16098_vm4 = vmmov %vm16096_vm12  ;;  %430 = vst.msk [vmem:[#allocation3 + $0x140] sm:$0xff] %vm151_vm0, %v366_v0  ;;  %v13510_v60 = vld [vmem:[#allocation2 + $0x22a] sm:$0xff] }
 0x2a7   :  { %v2954_v18 = vpop.permute.xlu0 %2953  ;;  %v5916_v29 = vmax.f32 %v4395_v34, %v10881_v11  ;;  %v6555_v30 = vmax.f32 %v5915_v40, %v6427_v33  ;;  %vm16099_vm12 = vcmask 146552  }
 0x2a8   :  { %3116 = vst.msk [vmem:[#allocation3 + $0xf0] sm:$0xff] %vm16097_vm13, %v2954_v18  ;;  %v2956_v19 = vpop.permute.xlu1 %2955  ;;  %v5918_v51 = vmax.f32 %v4396_v5, %v10883_v15  ;;  %v6557_v56 = vmax.f32 %v5917_v28, %v6429_v21  ;;  %vm16100_vm13 = vmmov %vm16099_vm12 }
 0x2a9   :  { %3117 = vst.msk [vmem:[#allocation3 + $0xf8] sm:$0xff] %vm16098_vm4, %v2956_v19  ;;  %2580 = vrot.lane.b32.xlu0 %v13367_v16, %s16069_s27  ;;  %v6556_v4 = vmax.f32 %v5916_v29, %v6428_v49  ;;  %v7057_v27 = vrot.slane %v6555_v30, %v12857_v41  ;;  %v109_v16 = vld [vmem:[%s16063_s29 + $0x180] sm:$0xff]  ;;  %v13513_v49 = vld [vmem:[#allocation2 + $0x232] sm:$0xff]  ;;  %vm16101_vm4 = vmmov %vm16099_vm12 }
 0x2aa   :  { %2582 = vrot.lane.b32.xlu1 %v13370_v36, %s16069_s27  ;;  %v6558_v9 = vmax.f32 %v5918_v51, %v6430_v25  ;;  %v7065_v31 = vrot.slane %v6557_v56, %v12857_v41  ;;  %310 = vst.msk [vmem:[#allocation2 + $0x289] sm:$0xff] %vm151_vm0, %v109_v16  ;;  %v13546_v19 = vld [vmem:[#allocation2 + $0x240] sm:$0xff] }
 0x2ab   :  { %v3335_v6 = vpop.permute.xlu0 %3334  ;;  %v7061_v13 = vrot.slane %v6556_v4, %v12857_v41  ;;  %v7485_v8 = vsel %vm7460_vm7, %v7057_v27, %v7484_v7  ;;  %v13549_v27 = vld [vmem:[#allocation2 + $0x248] sm:$0xff] }
 0x2ac   :  { %3499 = vst.msk [vmem:[#allocation3 + $0xe0] sm:$0xff] %vm3470_vm15, %v3335_v6  ;;  %v3337_v20 = vpop.permute.xlu1 %3336  ;;  %v7069_v36 = vrot.slane %v6558_v9, %v12857_v41 }
 0x2ad   :  { %3500 = vst.msk [vmem:[#allocation3 + $0xe8] sm:$0xff] %vm3470_vm15, %v3337_v20  ;;  %2584 = vrot.lane.b32.xlu0 %v13115_v47, %s16069_s27  ;;  %v7486_v32 = vsel %vm7462_vm3, %v7061_v13, %v7485_v8 }
 0x2ae   :  { %2586 = vrot.lane.b32.xlu1 %v13119_v50, %s16069_s27  ;;  %v7487_v43 = vsel %vm7464_vm6, %v7065_v31, %v7486_v32  ;;  %v112_v32 = vld [vmem:[%s16063_s29 + $0x198] sm:$0xff] }
 0x2af   :  { %v647_v35 = vpop.permute.xlu0 %646  ;;  %v7488_v39 = vsel %vm7466_vm14, %v7069_v36, %v7487_v43  ;;  %v111_v36 = vld [vmem:[%s16063_s29 + $0x190] sm:$0xff]  ;;  %313 = vst.msk [vmem:[#allocation2 + $0x2a9] sm:$0xff] %vm151_vm0, %v112_v32 }
 0x2b0   :  { %807 = vst.msk [vmem:[#allocation3 + $0x100] sm:$0xff] %vm774_vm8, %v647_v35  ;;  %v649_v45 = vpop.permute.xlu1 %648 }
 0x2b1   :  { %7593 = vst.msk [vmem:[#allocation4 + $0x41] sm:$0xff] %vm6772_vm2, %v7488_v39  ;;  %2965 = vrot.lane.b32.xlu0 %v13401_v42, %s11581_s30  ;;  %v13485_v2 = vld [vmem:[#allocation2 + $0x288] sm:$0xff]  ;;  %v13489_v22 = vld [vmem:[#allocation2 + $0x290] sm:$0xff] }
 0x2b2   :  { %808 = vst.msk [vmem:[#allocation3 + $0x108] sm:$0xff] %vm774_vm8, %v649_v45  ;;  %2967 = vrot.lane.b32.xlu1 %v13403_v23, %s11581_s30 }
 0x2b3   :  { %v3339_v48 = vpop.permute.xlu0 %3338  ;;  %v3563_v53 = vld [vmem:[#allocation3 + $0xe0] sm:$0xff]  ;;  %440 = vst.msk [vmem:[#allocation3 + $0x190] sm:$0xff] %vm151_vm0, %v13485_v2  ;;  %441 = vst.msk [vmem:[#allocation3 + $0x198] sm:$0xff] %vm151_vm0, %v13489_v22 }
 0x2b4   :  { %3501 = vst.msk [vmem:[#allocation3 + $0xf0] sm:$0xff] %vm3470_vm15, %v3339_v48  ;;  %v3341_v17 = vpop.permute.xlu1 %3340  ;;  %v3564_v63 = vld [vmem:[#allocation3 + $0xe8] sm:$0xff] }
 0x2b5   :  { %3502 = vst.msk [vmem:[#allocation3 + $0xf8] sm:$0xff] %vm3470_vm15, %v3341_v17  ;;  %2969 = vrot.lane.b32.xlu0 %v13475_v26, %s11581_s30  ;;  %v3613_v54 = vpack.c.bf16 %v3564_v63, %v3563_v53 }
 0x2b6   :  { %2971 = vrot.lane.b32.xlu1 %v13479_v52, %s11581_s30  ;;  %312 = vst.msk [vmem:[#allocation2 + $0x2a1] sm:$0xff] %vm151_vm0, %v111_v36 }
 0x2b7   :  { %11407 = vmatprep.mubr.msk.bf16.mxu0 %vm3638_vm1, %v3613_v54  ;;  %v651_v58 = vpop.permute.xlu0 %650 }
 0x2b8   :  { %809 = vst.msk [vmem:[#allocation3 + $0x110] sm:$0xff] %vm774_vm8, %v651_v58  ;;  %v653_v61 = vpop.permute.xlu1 %652  ;;  %v8320_v12 = vld [vmem:[#allocation4 + $0x42] sm:$0xff] }
 0x2b9   :  { %810 = vst.msk [vmem:[#allocation3 + $0x118] sm:$0xff] %vm774_vm8, %v653_v61  ;;  %3350 = vrot.lane.b32.xlu0 %v13425_v37, %s11583_s25  ;;  %v7610_v33 = vld [vmem:[#allocation4 + $0x40] sm:$0xff] }
 0x2ba   :  { %3352 = vrot.lane.b32.xlu1 %v13430_v3, %s11583_s25  ;;  %8336 = vst.msk [vmem:[#allocation5 + $0x28] sm:$0xff] %vm6772_vm2, %v8320_v12  ;;  %7626 = vst.msk [vmem:[#allocation5 + $0x40] sm:$0xff] %vm6772_vm2, %v7610_v33 }
 0x2bb   :  { %v1032_v34 = vpop.permute.xlu0 %1031  ;;  %v3565_v55 = vld [vmem:[#allocation3 + $0xf0] sm:$0xff] }
 0x2bc   :  { %1192 = vst.msk [vmem:[#allocation3 + $0x100] sm:$0xff] %vm1159_vm9, %v1032_v34  ;;  %v1034_v14 = vpop.permute.xlu1 %1033  ;;  %v3566_v21 = vld [vmem:[#allocation3 + $0xf8] sm:$0xff] }
 0x2bd   :  { %1193 = vst.msk [vmem:[#allocation3 + $0x108] sm:$0xff] %vm1159_vm9, %v1034_v14  ;;  %662 = vrot.lane.b32.xlu0 %v13401_v42, %s11576_s21  ;;  %v3614_v5 = vpack.c.bf16 %v3566_v21, %v3565_v55  ;;  %v13580_v55 = vld [vmem:[#allocation2 + $0x241] sm:$0xff] }
 0x2be   :  { %664 = vrot.lane.b32.xlu1 %v13403_v23, %s11576_s21 }
 0x2bf   :  { %11408 = vmatmul.mubr.msk.bf16.gmra.mrb[28].mxu0 %vm3638_vm1, %v3614_v5  ;;  %v1036_v7 = vpop.permute.xlu0 %1035 }
 0x2c0   :  { %1194 = vst.msk [vmem:[#allocation3 + $0x110] sm:$0xff] %vm1159_vm9, %v1036_v7  ;;  %v1038_v11 = vpop.permute.xlu1 %1037 }
 0x2c1   :  { %1195 = vst.msk [vmem:[#allocation3 + $0x118] sm:$0xff] %vm1159_vm9, %v1038_v11  ;;  %3354 = vrot.lane.b32.xlu0 %v13510_v60, %s11583_s25 }
 0x2c2   :  { %3356 = vrot.lane.b32.xlu1 %v13513_v49, %s11583_s25 }
 0x2c3   :  { %v1417_v42 = vpop.permute.xlu0 %1416 }
 0x2c4   :  { %1577 = vst.msk [vmem:[#allocation3 + $0x100] sm:$0xff] %vm1544_vm10, %v1417_v42  ;;  %v1419_v23 = vpop.permute.xlu1 %1418  ;;  %v13582_v42 = vld [vmem:[#allocation2 + $0x249] sm:$0xff] }
 0x2c5   :  { %1578 = vst.msk [vmem:[#allocation3 + $0x108] sm:$0xff] %vm1544_vm10, %v1419_v23  ;;  %666 = vrot.lane.b32.xlu0 %v13475_v26, %s11576_s21 }
 0x2c6   :  { %668 = vrot.lane.b32.xlu1 %v13479_v52, %s11576_s21 }
 0x2c7   :  { %v1421_v40 = vpop.permute.xlu0 %1420 }
 0x2c8   :  { %1579 = vst.msk [vmem:[#allocation3 + $0x110] sm:$0xff] %vm1544_vm10, %v1421_v40  ;;  %v1423_v25 = vpop.permute.xlu1 %1422 }
 0x2c9   :  { %1580 = vst.msk [vmem:[#allocation3 + $0x118] sm:$0xff] %vm1544_vm10, %v1423_v25  ;;  %1047 = vrot.lane.b32.xlu0 %v13425_v37, %s11575_s20 }
 0x2ca   :  { %1049 = vrot.lane.b32.xlu1 %v13430_v3, %s11575_s20 }
 0x2cb   :  { %v1802_v15 = vpop.permute.xlu0 %1801 }
 0x2cc   :  { %1962 = vst.msk [vmem:[#allocation3 + $0x100] sm:$0xff] %vm16059_vm11, %v1802_v15  ;;  %v1804_v28 = vpop.permute.xlu1 %1803 }
 0x2cd   :  { %1963 = vst.msk [vmem:[#allocation3 + $0x108] sm:$0xff] %vm16059_vm11, %v1804_v28  ;;  %1051 = vrot.lane.b32.xlu0 %v13510_v60, %s11575_s20 }
 0x2ce   :  { %1053 = vrot.lane.b32.xlu1 %v13513_v49, %s11575_s20 }
 0x2cf   :  { %v1806_v18 = vpop.permute.xlu0 %1805 }
 0x2d0   :  { %1964 = vst.msk [vmem:[#allocation3 + $0x110] sm:$0xff] %vm16059_vm11, %v1806_v18  ;;  %v1808_v29 = vpop.permute.xlu1 %1807 }
 0x2d1   :  { %1965 = vst.msk [vmem:[#allocation3 + $0x118] sm:$0xff] %vm16059_vm11, %v1808_v29  ;;  %1432 = vrot.lane.b32.xlu0 %v13115_v47, %s16066_s22  ;;  %v11397_v37 = vpop.f32.mrb[16].mxu0 }
 0x2d2   :  { %1434 = vrot.lane.b32.xlu1 %v13119_v50, %s16066_s22  ;;  %v3849_v3 = vadd.f32 %v13364_v59, %v11397_v37  ;;  %v3840_v30 = vpop.f32.mrb[17].mxu0 }
 0x2d3   :  { %v3841_v51 = vadd.f32 %v13364_v59, %v3840_v30  ;;  %v2187_v56 = vpop.permute.xlu0 %2186  ;;  %v11398_v4 = vpop.f32.mrb[18].mxu0 }
 0x2d4   :  { %v4049_v9 = vmax.f32 %v3849_v3, 0.0  ;;  %2347 = vst.msk [vmem:[#allocation3 + $0x100] sm:$0xff] %vm16099_vm12, %v2187_v56  ;;  %v2189_v6 = vpop.permute.xlu1 %2188  ;;  %v3852_v47 = vadd.f32 %v13364_v59, %v11398_v4  ;;  %v3843_v13 = vpop.f32.mrb[19].mxu0  ;;  %vm16102_vm12 = vmmov %vm16101_vm4 }
 0x2d5   :  { %v4047_v8 = vmax.f32 %v3841_v51, 0.0  ;;  %2348 = vst.msk [vmem:[#allocation3 + $0x108] sm:$0xff] %vm16100_vm13, %v2189_v6  ;;  %v3844_v50 = vadd.f32 %v13364_v59, %v3843_v13  ;;  %1436 = vrot.lane.b32.xlu0 %v13546_v19, %s16066_s22  ;;  %vm16103_vm13 = vcmask 171152  }
 0x2d6   :  { %v4465_v20 = vcombine.high %v4049_v9, %v4049_v9  ;;  %v4472_v31 = vrot.slane %v4049_v9, %v12830_v24  ;;  %v4050_v16 = vmax.f32 %v3852_v47, 0.0  ;;  %1438 = vrot.lane.b32.xlu1 %v13549_v27, %s16066_s22 }
 0x2d7   :  { %v4431_v38 = vcombine.high %v4047_v8, %v4047_v8  ;;  %v4438_v43 = vrot.slane %v4047_v8, %v12830_v24  ;;  %v13567_v35 = vmax.f32 %v3844_v50, 0.0  ;;  %v2191_v39 = vpop.permute.xlu0 %2190 }
 0x2d8   :  { %v4479_v45 = vrot.slane %v4465_v20, %v12830_v24  ;;  %v4480_v0 = vcombine.high %v4472_v31, %v4472_v31  ;;  %v11012_v57 = vrot.slane %v4472_v31, 9  ;;  %v4482_v48 = vcombine.high %v4050_v16, %v4050_v16  ;;  %2349 = vst.msk [vmem:[#allocation3 + $0x110] sm:$0xff] %vm16101_vm4, %v2191_v39  ;;  %v2193_v53 = vpop.permute.xlu1 %2192  ;;  %vm16104_vm4 = vmmov %vm16103_vm13 }
 0x2d9   :  { %v4445_v17 = vrot.slane %v4431_v38, %v12830_v24  ;;  %v4446_v63 = vcombine.high %v4438_v43, %v4438_v43  ;;  %v10884_v54 = vrot.slane %v4438_v43, 9  ;;  %v4489_v58 = vrot.slane %v4050_v16, %v12830_v24  ;;  %2350 = vst.msk [vmem:[#allocation3 + $0x118] sm:$0xff] %vm16102_vm12, %v2193_v53  ;;  %1817 = vrot.lane.b32.xlu0 %v13475_v26, %s16067_s24  ;;  %vm16105_vm12 = vmmov %vm16104_vm4  ;;  %v13604_v38 = vld [vmem:[#allocation2 + $0x242] sm:$0xff] }
 0x2da   :  { %v4481_v61 = vcombine.high %v4479_v45, %v4479_v45  ;;  %v11013_v12 = vrot.slane %v4480_v0, 9  ;;  %v11014_v33 = vrot.slane %v4479_v45, 9  ;;  %v6431_v34 = vmax.f32 %v4472_v31, %v11012_v57  ;;  %1819 = vrot.lane.b32.xlu1 %v13479_v52, %s16067_s24 }
 0x2db   :  { %v4447_v14 = vcombine.high %v4445_v17, %v4445_v17  ;;  %v10885_v21 = vrot.slane %v4446_v63, 9  ;;  %v10886_v5 = vrot.slane %v4445_v17, 9  ;;  %v5919_v7 = vmax.f32 %v4438_v43, %v10884_v54  ;;  %v2573_v11 = vpop.permute.xlu0 %2572 }
 0x2dc   :  { %v11015_v23 = vrot.slane %v4481_v61, 9  ;;  %v6432_v40 = vmax.f32 %v4480_v0, %v11013_v12  ;;  %v6433_v25 = vmax.f32 %v4479_v45, %v11014_v33  ;;  %v4496_v26 = vrot.slane %v4482_v48, %v12830_v24  ;;  %2733 = vst.msk [vmem:[#allocation3 + $0x100] sm:$0xff] %vm16103_vm13, %v2573_v11  ;;  %v2575_v15 = vpop.permute.xlu1 %2574  ;;  %vm16106_vm13 = vmmov %vm16104_vm4  ;;  %v13609_v48 = vld [vmem:[#allocation2 + $0x24a] sm:$0xff] }
 0x2dd   :  { %v10887_v28 = vrot.slane %v4447_v14, 9  ;;  %v5920_v18 = vmax.f32 %v4446_v63, %v10885_v21  ;;  %v5921_v52 = vmax.f32 %v4445_v17, %v10886_v5  ;;  %v6559_v29 = vmax.f32 %v5919_v7, %v6431_v34  ;;  %2734 = vst.msk [vmem:[#allocation3 + $0x108] sm:$0xff] %vm16104_vm4, %v2575_v15  ;;  %1821 = vrot.lane.b32.xlu0 %v13580_v55, %s16067_s24 }
 0x2de   :  { %v6434_v37 = vmax.f32 %v4481_v61, %v11015_v23  ;;  %v4497_v3 = vcombine.high %v4489_v58, %v4489_v58  ;;  %1823 = vrot.lane.b32.xlu1 %v13582_v42, %s16067_s24  ;;  %v4498_v4 = vcombine.high %v4496_v26, %v4496_v26  ;;  %v11016_v47 = vrot.slane %v4489_v58, 9 }
 0x2df   :  { %v5922_v30 = vmax.f32 %v4447_v14, %v10887_v28  ;;  %v6560_v51 = vmax.f32 %v5920_v18, %v6432_v40  ;;  %v6561_v56 = vmax.f32 %v5921_v52, %v6433_v25  ;;  %v2577_v9 = vpop.permute.xlu0 %2576  ;;  %v7073_v6 = vrot.slane %v6559_v29, %v12857_v41 }
 0x2e0   :  { %v11018_v13 = vrot.slane %v4496_v26, 9  ;;  %2735 = vst.msk [vmem:[#allocation3 + $0x110] sm:$0xff] %vm16105_vm12, %v2577_v9  ;;  %v2579_v8 = vpop.permute.xlu1 %2578  ;;  %v4448_v16 = vcombine.high %v13567_v35, %v13567_v35  ;;  %v11017_v36 = vrot.slane %v4497_v3, 9  ;;  %v4455_v32 = vrot.slane %v13567_v35, %v12830_v24  ;;  %v114_v9 = vld [vmem:[%s16063_s29 + $0x1a8] sm:$0xff] }
 0x2e1   :  { %v6562_v50 = vmax.f32 %v5922_v30, %v6434_v37  ;;  %v7077_v20 = vrot.slane %v6560_v51, %v12857_v41  ;;  %v7081_v31 = vrot.slane %v6561_v56, %v12857_v41  ;;  %2736 = vst.msk [vmem:[#allocation3 + $0x118] sm:$0xff] %vm16106_vm13, %v2579_v8  ;;  %2202 = vrot.lane.b32.xlu0 %v13510_v60, %s16068_s28  ;;  %vm16107_vm4 = vcmask 1041409   ;;  %v113_v51 = vld [vmem:[%s16063_s29 + $0x1a0] sm:$0xff] }
 0x2e2   :  { %2204 = vrot.lane.b32.xlu1 %v13513_v49, %s16068_s28  ;;  %v11019_v45 = vrot.slane %v4498_v4, 9  ;;  %v4462_v0 = vrot.slane %v4448_v16, %v12830_v24  ;;  %v6435_v53 = vmax.f32 %v4489_v58, %v11016_v47  ;;  %v4463_v17 = vcombine.high %v4455_v32, %v4455_v32  ;;  %314 = vst.msk [vmem:[#allocation2 + $0x2b9] sm:$0xff] %vm151_vm0, %v113_v51  ;;  %v370_v8 = vld [vmem:[#allocation2 + $0x240] sm:$0xff]  ;;  %v116_v51 = vld [vmem:[%s16063_s29 + $0x1b8] sm:$0xff] }
 0x2e3   :  { %v7085_v43 = vrot.slane %v6562_v50, %v12857_v41  ;;  %v7489_v39 = vsel %vm16107_vm4, %v7077_v20, %v7073_v6  ;;  %v2958_v57 = vpop.permute.xlu0 %2957  ;;  %v10888_v35 = vrot.slane %v4455_v32, 9  ;;  %vm16108_vm12 = vcmask 195752   ;;  %315 = vst.msk [vmem:[#allocation2 + $0x2c1] sm:$0xff] %vm151_vm0, %v114_v9  ;;  %v371_v50 = vld [vmem:[#allocation2 + $0x248] sm:$0xff]  ;;  %434 = vst.msk [vmem:[#allocation3 + $0x160] sm:$0xff] %vm151_vm0, %v370_v8 }
 0x2e4   :  { %v7490_v60 = vsel %vm7456_vm5, %v7081_v31, %v7489_v39  ;;  %3118 = vst.msk [vmem:[#allocation3 + $0x100] sm:$0xff] %vm16108_vm12, %v2958_v57  ;;  %v2960_v49 = vpop.permute.xlu1 %2959  ;;  %v6437_v63 = vmax.f32 %v4496_v26, %v11018_v13  ;;  %v4464_v54 = vcombine.high %v4462_v0, %v4462_v0  ;;  %v10890_v61 = vrot.slane %v4462_v0, 9  ;;  %vm16110_vm4 = vmmov %vm16108_vm12  ;;  %v13654_v13 = vld [vmem:[#allocation2 + $0x259] sm:$0xff]  ;;  %v13656_v31 = vld [vmem:[#allocation2 + $0x261] sm:$0xff] }
 0x2e5   :  { %vm16109_vm13 = vcmask 1043459   ;;  %3119 = vst.msk [vmem:[#allocation3 + $0x108] sm:$0xff] %vm16110_vm4, %v2960_v49  ;;  %2206 = vrot.lane.b32.xlu0 %v13604_v38, %s16068_s28  ;;  %v6436_v33 = vmax.f32 %v4497_v3, %v11017_v36  ;;  %v10889_v34 = vrot.slane %v4463_v17, 9  ;;  %v5923_v14 = vmax.f32 %v4455_v32, %v10888_v35  ;;  %vm16111_vm12 = vmmov %vm16110_vm4 }
 0x2e6   :  { %v7491_v12 = vsel %vm16109_vm13, %v7085_v43, %v7490_v60  ;;  %2208 = vrot.lane.b32.xlu1 %v13609_v48, %s16068_s28  ;;  %v6438_v58 = vmax.f32 %v4498_v4, %v11019_v45  ;;  %v10891_v21 = vrot.slane %v4464_v54, 9  ;;  %v5925_v5 = vmax.f32 %v4462_v0, %v10890_v61  ;;  %vm16112_vm13 = vmmov %vm16110_vm4  ;;  %435 = vst.msk [vmem:[#allocation3 + $0x168] sm:$0xff] %vm151_vm0, %v371_v50  ;;  %v13692_v61 = vld [vmem:[#allocation2 + $0x25a] sm:$0xff] }
 0x2e7   :  { %v2962_v7 = vpop.permute.xlu0 %2961  ;;  %v5924_v11 = vmax.f32 %v4463_v17, %v10889_v34  ;;  %v6563_v23 = vmax.f32 %v5923_v14, %v6435_v53  ;;  %vm16113_vm4 = vcmask 146552   ;;  %317 = vst.msk [vmem:[#allocation2 + $0x2d9] sm:$0xff] %vm151_vm0, %v116_v51 }
 0x2e8   :  { %3120 = vst.msk [vmem:[#allocation3 + $0x110] sm:$0xff] %vm16111_vm12, %v2962_v7  ;;  %v2964_v40 = vpop.permute.xlu1 %2963  ;;  %v5926_v25 = vmax.f32 %v4464_v54, %v10891_v21  ;;  %v6565_v26 = vmax.f32 %v5925_v5, %v6437_v63  ;;  %vm16114_vm12 = vmmov %vm16113_vm4 }
 0x2e9   :  { %3121 = vst.msk [vmem:[#allocation3 + $0x118] sm:$0xff] %vm16112_vm13, %v2964_v40  ;;  %2588 = vrot.lane.b32.xlu0 %v13546_v19, %s16069_s27  ;;  %v6564_v15 = vmax.f32 %v5924_v11, %v6436_v33  ;;  %v7089_v28 = vrot.slane %v6563_v23, %v12857_v41  ;;  %v13666_v39 = vld [vmem:[#allocation2 + $0x2b8] sm:$0xff]  ;;  %v13695_v33 = vld [vmem:[#allocation2 + $0x262] sm:$0xff]  ;;  %v13728_v40 = vld [vmem:[#allocation2 + $0x270] sm:$0xff] }
 0x2ea   :  { %2590 = vrot.lane.b32.xlu1 %v13549_v27, %s16069_s27  ;;  %v6566_v18 = vmax.f32 %v5926_v25, %v6438_v58  ;;  %v7097_v30 = vrot.slane %v6565_v26, %v12857_v41  ;;  %v13669_v0 = vld [vmem:[#allocation2 + $0x2c0] sm:$0xff]  ;;  %444 = vst.msk [vmem:[#allocation3 + $0x1b0] sm:$0xff] %vm151_vm0, %v13666_v39  ;;  %vm16115_vm13 = vmmov %vm16113_vm4 }
 0x2eb   :  { %v3343_v52 = vpop.permute.xlu0 %3342  ;;  %v7093_v29 = vrot.slane %v6564_v15, %v12857_v41  ;;  %v7492_v37 = vsel %vm7460_vm7, %v7089_v28, %v7491_v12  ;;  %445 = vst.msk [vmem:[#allocation3 + $0x1b8] sm:$0xff] %vm151_vm0, %v13669_v0  ;;  %v13731_v28 = vld [vmem:[#allocation2 + $0x278] sm:$0xff] }
 0x2ec   :  { %3503 = vst.msk [vmem:[#allocation3 + $0x100] sm:$0xff] %vm3470_vm15, %v3343_v52  ;;  %v3345_v3 = vpop.permute.xlu1 %3344  ;;  %v7101_v19 = vrot.slane %v6566_v18, %v12857_v41 }
 0x2ed   :  { %3504 = vst.msk [vmem:[#allocation3 + $0x108] sm:$0xff] %vm3470_vm15, %v3345_v3  ;;  %2592 = vrot.lane.b32.xlu0 %v13295_v44, %s16069_s27  ;;  %v7493_v27 = vsel %vm7462_vm3, %v7093_v29, %v7492_v37 }
 0x2ee   :  { %2594 = vrot.lane.b32.xlu1 %v13299_v62, %s16069_s27  ;;  %v7494_v56 = vsel %vm7464_vm6, %v7097_v30, %v7493_v27  ;;  %v115_v27 = vld [vmem:[%s16063_s29 + $0x1b0] sm:$0xff] }
 0x2ef   :  { %v655_v4 = vpop.permute.xlu0 %654  ;;  %v7495_v6 = vsel %vm7466_vm14, %v7101_v19, %v7494_v56  ;;  %316 = vst.msk [vmem:[#allocation2 + $0x2d1] sm:$0xff] %vm151_vm0, %v115_v27 }
 0x2f0   :  { %811 = vst.msk [vmem:[#allocation3 + $0x120] sm:$0xff] %vm774_vm8, %v655_v4  ;;  %v657_v47 = vpop.permute.xlu1 %656 }
 0x2f1   :  { %7594 = vst.msk [vmem:[#allocation4 + $0x51] sm:$0xff] %vm6772_vm2, %v7495_v6  ;;  %2973 = vrot.lane.b32.xlu0 %v13580_v55, %s11581_s30 }
 0x2f2   :  { %812 = vst.msk [vmem:[#allocation3 + $0x128] sm:$0xff] %vm774_vm8, %v657_v47  ;;  %2975 = vrot.lane.b32.xlu1 %v13582_v42, %s11581_s30 }
 0x2f3   :  { %v3347_v20 = vpop.permute.xlu0 %3346  ;;  %v3567_v16 = vld [vmem:[#allocation3 + $0x100] sm:$0xff] }
 0x2f4   :  { %3505 = vst.msk [vmem:[#allocation3 + $0x110] sm:$0xff] %vm3470_vm15, %v3347_v20  ;;  %v3349_v36 = vpop.permute.xlu1 %3348  ;;  %v3568_v32 = vld [vmem:[#allocation3 + $0x108] sm:$0xff] }
 0x2f5   :  { %3506 = vst.msk [vmem:[#allocation3 + $0x118] sm:$0xff] %vm3470_vm15, %v3349_v36  ;;  %2977 = vrot.lane.b32.xlu0 %v13654_v13, %s11581_s30  ;;  %v3615_v43 = vpack.c.bf16 %v3568_v32, %v3567_v16 }
 0x2f6   :  { %2979 = vrot.lane.b32.xlu1 %v13656_v31, %s11581_s30 }
 0x2f7   :  { %11411 = vmatprep.mubr.msk.bf16.mxu0 %vm3638_vm1, %v3615_v43  ;;  %v659_v45 = vpop.permute.xlu0 %658 }
 0x2f8   :  { %813 = vst.msk [vmem:[#allocation3 + $0x130] sm:$0xff] %vm774_vm8, %v659_v45  ;;  %v661_v57 = vpop.permute.xlu1 %660  ;;  %v13676_v60 = vld [vmem:[#allocation4 + $0x52] sm:$0xff] }
 0x2f9   :  { %814 = vst.msk [vmem:[#allocation3 + $0x138] sm:$0xff] %vm774_vm8, %v661_v57  ;;  %3358 = vrot.lane.b32.xlu0 %v13604_v38, %s11583_s25  ;;  %v7611_v53 = vld [vmem:[#allocation4 + $0x50] sm:$0xff] }
 0x2fa   :  { %8337 = vst.msk [vmem:[#allocation5 + $0x38] sm:$0xff] %vm6772_vm2, %v13676_v60  ;;  %3360 = vrot.lane.b32.xlu1 %v13609_v48, %s11583_s25  ;;  %7627 = vst.msk [vmem:[#allocation5 + $0x50] sm:$0xff] %vm6772_vm2, %v7611_v53 }
 0x2fb   :  { %v1040_v17 = vpop.permute.xlu0 %1039  ;;  %v3569_v35 = vld [vmem:[#allocation3 + $0x110] sm:$0xff] }
 0x2fc   :  { %1196 = vst.msk [vmem:[#allocation3 + $0x120] sm:$0xff] %vm1159_vm9, %v1040_v17  ;;  %v1042_v49 = vpop.permute.xlu1 %1041  ;;  %v3570_v63 = vld [vmem:[#allocation3 + $0x118] sm:$0xff] }
 0x2fd   :  { %1197 = vst.msk [vmem:[#allocation3 + $0x128] sm:$0xff] %vm1159_vm9, %v1042_v49  ;;  %670 = vrot.lane.b32.xlu0 %v13580_v55, %s11576_s21  ;;  %v3616_v54 = vpack.c.bf16 %v3570_v63, %v3569_v35  ;;  %v13762_v35 = vld [vmem:[#allocation2 + $0x271] sm:$0xff] }
 0x2fe   :  { %672 = vrot.lane.b32.xlu1 %v13582_v42, %s11576_s21 }
 0x2ff   :  { %11412 = vmatmul.mubr.msk.bf16.gmra.mrb[32].mxu0 %vm3638_vm1, %v3616_v54  ;;  %v1044_v12 = vpop.permute.xlu0 %1043 }
 0x300   :  { %1198 = vst.msk [vmem:[#allocation3 + $0x130] sm:$0xff] %vm1159_vm9, %v1044_v12  ;;  %v1046_v34 = vpop.permute.xlu1 %1045 }
 0x301   :  { %1199 = vst.msk [vmem:[#allocation3 + $0x138] sm:$0xff] %vm1159_vm9, %v1046_v34  ;;  %3362 = vrot.lane.b32.xlu0 %v13692_v61, %s11583_s25 }
 0x302   :  { %3364 = vrot.lane.b32.xlu1 %v13695_v33, %s11583_s25 }
 0x303   :  { %v1425_v55 = vpop.permute.xlu0 %1424 }
 0x304   :  { %1581 = vst.msk [vmem:[#allocation3 + $0x120] sm:$0xff] %vm1544_vm10, %v1425_v55  ;;  %v1427_v42 = vpop.permute.xlu1 %1426  ;;  %v13764_v55 = vld [vmem:[#allocation2 + $0x279] sm:$0xff] }
 0x305   :  { %1582 = vst.msk [vmem:[#allocation3 + $0x128] sm:$0xff] %vm1544_vm10, %v1427_v42  ;;  %674 = vrot.lane.b32.xlu0 %v13654_v13, %s11576_s21 }
 0x306   :  { %676 = vrot.lane.b32.xlu1 %v13656_v31, %s11576_s21 }
 0x307   :  { %v1429_v14 = vpop.permute.xlu0 %1428 }
 0x308   :  { %1583 = vst.msk [vmem:[#allocation3 + $0x130] sm:$0xff] %vm1544_vm10, %v1429_v14  ;;  %v1431_v58 = vpop.permute.xlu1 %1430 }
 0x309   :  { %1584 = vst.msk [vmem:[#allocation3 + $0x138] sm:$0xff] %vm1544_vm10, %v1431_v58  ;;  %1055 = vrot.lane.b32.xlu0 %v13604_v38, %s11575_s20 }
 0x30a   :  { %1057 = vrot.lane.b32.xlu1 %v13609_v48, %s11575_s20 }
 0x30b   :  { %v1810_v21 = vpop.permute.xlu0 %1809 }
 0x30c   :  { %1966 = vst.msk [vmem:[#allocation3 + $0x120] sm:$0xff] %vm16059_vm11, %v1810_v21  ;;  %v1812_v5 = vpop.permute.xlu1 %1811 }
 0x30d   :  { %1967 = vst.msk [vmem:[#allocation3 + $0x128] sm:$0xff] %vm16059_vm11, %v1812_v5  ;;  %1059 = vrot.lane.b32.xlu0 %v13692_v61, %s11575_s20 }
 0x30e   :  { %1061 = vrot.lane.b32.xlu1 %v13695_v33, %s11575_s20 }
 0x30f   :  { %v1814_v7 = vpop.permute.xlu0 %1813 }
 0x310   :  { %1968 = vst.msk [vmem:[#allocation3 + $0x130] sm:$0xff] %vm16059_vm11, %v1814_v7  ;;  %v1816_v11 = vpop.permute.xlu1 %1815 }
 0x311   :  { %1969 = vst.msk [vmem:[#allocation3 + $0x138] sm:$0xff] %vm16059_vm11, %v1816_v11  ;;  %1440 = vrot.lane.b32.xlu0 %v13295_v44, %s16066_s22  ;;  %v11401_v38 = vpop.f32.mrb[20].mxu0 }
 0x312   :  { %1442 = vrot.lane.b32.xlu1 %v13299_v62, %s16066_s22  ;;  %v3865_v48 = vadd.f32 %v13364_v59, %v11401_v38  ;;  %v3856_v23 = vpop.f32.mrb[21].mxu0 }
 0x313   :  { %v3857_v25 = vadd.f32 %v13364_v59, %v3856_v23  ;;  %v2195_v26 = vpop.permute.xlu0 %2194  ;;  %v11402_v15 = vpop.f32.mrb[22].mxu0 }
 0x314   :  { %v4053_v18 = vmax.f32 %v3865_v48, 0.0  ;;  %2351 = vst.msk [vmem:[#allocation3 + $0x120] sm:$0xff] %vm16113_vm4, %v2195_v26  ;;  %v2197_v52 = vpop.permute.xlu1 %2196  ;;  %v3868_v44 = vadd.f32 %v13364_v59, %v11402_v15  ;;  %v3859_v29 = vpop.f32.mrb[23].mxu0 }
 0x315   :  { %v4051_v37 = vmax.f32 %v3857_v25, 0.0  ;;  %2352 = vst.msk [vmem:[#allocation3 + $0x128] sm:$0xff] %vm16114_vm12, %v2197_v52  ;;  %v3860_v62 = vadd.f32 %v13364_v59, %v3859_v29  ;;  %1444 = vrot.lane.b32.xlu0 %v13728_v40, %s16066_s22  ;;  %vm16116_vm12 = vcmask 171152  }
 0x316   :  { %v4533_v3 = vcombine.high %v4053_v18, %v4053_v18  ;;  %v4540_v30 = vrot.slane %v4053_v18, %v12830_v24  ;;  %v4054_v19 = vmax.f32 %v3868_v44, 0.0  ;;  %1446 = vrot.lane.b32.xlu1 %v13731_v28, %s16066_s22 }
 0x317   :  { %v4499_v56 = vcombine.high %v4051_v37, %v4051_v37  ;;  %v4506_v59 = vrot.slane %v4051_v37, %v12830_v24  ;;  %v13749_v4 = vmax.f32 %v3860_v62, 0.0  ;;  %v2199_v9 = vpop.permute.xlu0 %2198 }
 0x318   :  { %v4547_v6 = vrot.slane %v4533_v3, %v12830_v24  ;;  %v4548_v47 = vcombine.high %v4540_v30, %v4540_v30  ;;  %v11020_v8 = vrot.slane %v4540_v30, 9  ;;  %v4550_v50 = vcombine.high %v4054_v19, %v4054_v19  ;;  %2353 = vst.msk [vmem:[#allocation3 + $0x130] sm:$0xff] %vm16115_vm13, %v2199_v9  ;;  %v2201_v20 = vpop.permute.xlu1 %2200  ;;  %vm16117_vm13 = vmmov %vm16116_vm12 }
 0x319   :  { %v4513_v16 = vrot.slane %v4499_v56, %v12830_v24  ;;  %v4514_v36 = vcombine.high %v4506_v59, %v4506_v59  ;;  %v10892_v32 = vrot.slane %v4506_v59, 9  ;;  %v4557_v43 = vrot.slane %v4054_v19, %v12830_v24  ;;  %2354 = vst.msk [vmem:[#allocation3 + $0x138] sm:$0xff] %vm16113_vm4, %v2201_v20  ;;  %1825 = vrot.lane.b32.xlu0 %v13654_v13, %s16067_s24  ;;  %vm16118_vm4 = vmmov %vm16116_vm12  ;;  %v13786_v56 = vld [vmem:[#allocation2 + $0x272] sm:$0xff] }
 0x31a   :  { %v4549_v45 = vcombine.high %v4547_v6, %v4547_v6  ;;  %v11021_v57 = vrot.slane %v4548_v47, 9  ;;  %v11022_v53 = vrot.slane %v4547_v6, 9  ;;  %v6439_v17 = vmax.f32 %v4540_v30, %v11020_v8  ;;  %1827 = vrot.lane.b32.xlu1 %v13656_v31, %s16067_s24 }
 0x31b   :  { %v4515_v49 = vcombine.high %v4513_v16, %v4513_v16  ;;  %v10893_v63 = vrot.slane %v4514_v36, 9  ;;  %v10894_v54 = vrot.slane %v4513_v16, 9  ;;  %v5927_v12 = vmax.f32 %v4506_v59, %v10892_v32  ;;  %v2581_v34 = vpop.permute.xlu0 %2580 }
 0x31c   :  { %v11023_v42 = vrot.slane %v4549_v45, 9  ;;  %v6440_v14 = vmax.f32 %v4548_v47, %v11021_v57  ;;  %v6441_v58 = vmax.f32 %v4547_v6, %v11022_v53  ;;  %v4564_v13 = vrot.slane %v4550_v50, %v12830_v24  ;;  %2737 = vst.msk [vmem:[#allocation3 + $0x120] sm:$0xff] %vm16116_vm12, %v2581_v34  ;;  %v2583_v21 = vpop.permute.xlu1 %2582  ;;  %vm16119_vm12 = vmmov %vm16118_vm4  ;;  %v13791_v50 = vld [vmem:[#allocation2 + $0x27a] sm:$0xff] }
 0x31d   :  { %v10895_v5 = vrot.slane %v4515_v49, 9  ;;  %v5928_v7 = vmax.f32 %v4514_v36, %v10893_v63  ;;  %v5929_v31 = vmax.f32 %v4513_v16, %v10894_v54  ;;  %v6567_v11 = vmax.f32 %v5927_v12, %v6439_v17  ;;  %2738 = vst.msk [vmem:[#allocation3 + $0x128] sm:$0xff] %vm16117_vm13, %v2583_v21  ;;  %1829 = vrot.lane.b32.xlu0 %v13762_v35, %s16067_s24 }
 0x31e   :  { %v6442_v38 = vmax.f32 %v4549_v45, %v11023_v42  ;;  %v4565_v48 = vcombine.high %v4557_v43, %v4557_v43  ;;  %1831 = vrot.lane.b32.xlu1 %v13764_v55, %s16067_s24  ;;  %v4566_v15 = vcombine.high %v4564_v13, %v4564_v13  ;;  %v11024_v44 = vrot.slane %v4557_v43, 9 }
 0x31f   :  { %v5930_v23 = vmax.f32 %v4515_v49, %v10895_v5  ;;  %v6568_v25 = vmax.f32 %v5928_v7, %v6440_v14  ;;  %v6569_v26 = vmax.f32 %v5929_v31, %v6441_v58  ;;  %v2585_v18 = vpop.permute.xlu0 %2584  ;;  %v7105_v52 = vrot.slane %v6567_v11, %v12857_v41 }
 0x320   :  { %v11026_v29 = vrot.slane %v4564_v13, 9  ;;  %2739 = vst.msk [vmem:[#allocation3 + $0x130] sm:$0xff] %vm16118_vm4, %v2585_v18  ;;  %v2587_v37 = vpop.permute.xlu1 %2586  ;;  %v4516_v19 = vcombine.high %v13749_v4, %v13749_v4  ;;  %v11025_v27 = vrot.slane %v4565_v48, 9  ;;  %v4523_v51 = vrot.slane %v13749_v4, %v12830_v24  ;;  %v118_v18 = vld [vmem:[%s16063_s29 + $0x1c8] sm:$0xff] }
 0x321   :  { %v6570_v62 = vmax.f32 %v5930_v23, %v6442_v38  ;;  %v7109_v3 = vrot.slane %v6568_v25, %v12857_v41  ;;  %v7113_v30 = vrot.slane %v6569_v26, %v12857_v41  ;;  %2740 = vst.msk [vmem:[#allocation3 + $0x138] sm:$0xff] %vm16119_vm12, %v2587_v37  ;;  %2210 = vrot.lane.b32.xlu0 %v13692_v61, %s16068_s28  ;;  %vm16120_vm13 = vcmask 1041409   ;;  %v117_v25 = vld [vmem:[%s16063_s29 + $0x1c0] sm:$0xff]  ;;  %v374_v37 = vld [vmem:[#allocation2 + $0x270] sm:$0xff] }
 0x322   :  { %2212 = vrot.lane.b32.xlu1 %v13695_v33, %s16068_s28  ;;  %v11027_v6 = vrot.slane %v4566_v15, 9  ;;  %v4530_v47 = vrot.slane %v4516_v19, %v12830_v24  ;;  %v6443_v20 = vmax.f32 %v4557_v43, %v11024_v44  ;;  %v4531_v16 = vcombine.high %v4523_v51, %v4523_v51  ;;  %318 = vst.msk [vmem:[#allocation2 + $0x2e9] sm:$0xff] %vm151_vm0, %v117_v25 }
 0x323   :  { %v7117_v59 = vrot.slane %v6570_v62, %v12857_v41  ;;  %v7496_v9 = vsel %vm16120_vm13, %v7109_v3, %v7105_v52  ;;  %v2966_v8 = vpop.permute.xlu0 %2965  ;;  %v10896_v4 = vrot.slane %v4523_v51, 9  ;;  %vm16121_vm4 = vcmask 195752   ;;  %319 = vst.msk [vmem:[#allocation2 + $0x2f1] sm:$0xff] %vm151_vm0, %v118_v18  ;;  %v375_v62 = vld [vmem:[#allocation2 + $0x278] sm:$0xff]  ;;  %438 = vst.msk [vmem:[#allocation3 + $0x180] sm:$0xff] %vm151_vm0, %v374_v37 }
 0x324   :  { %v7497_v61 = vsel %vm7456_vm5, %v7113_v30, %v7496_v9  ;;  %3122 = vst.msk [vmem:[#allocation3 + $0x120] sm:$0xff] %vm16121_vm4, %v2966_v8  ;;  %v2968_v33 = vpop.permute.xlu1 %2967  ;;  %v6445_v36 = vmax.f32 %v4564_v13, %v11026_v29  ;;  %v4532_v32 = vcombine.high %v4530_v47, %v4530_v47  ;;  %v10898_v45 = vrot.slane %v4530_v47, 9  ;;  %vm16123_vm13 = vmmov %vm16121_vm4  ;;  %v13836_v29 = vld [vmem:[#allocation2 + $0x289] sm:$0xff]  ;;  %v13838_v30 = vld [vmem:[#allocation2 + $0x291] sm:$0xff] }
 0x325   :  { %vm16122_vm12 = vcmask 1043459   ;;  %3123 = vst.msk [vmem:[#allocation3 + $0x128] sm:$0xff] %vm16123_vm13, %v2968_v33  ;;  %2214 = vrot.lane.b32.xlu0 %v13786_v56, %s16068_s28  ;;  %v6444_v53 = vmax.f32 %v4565_v48, %v11025_v27  ;;  %v10897_v17 = vrot.slane %v4531_v16, 9  ;;  %v5931_v49 = vmax.f32 %v4523_v51, %v10896_v4  ;;  %v8325_v33 = vld [vmem:[#allocation4 + $0x92] sm:$0xff] }
 0x326   :  { %v7498_v57 = vsel %vm16122_vm12, %v7117_v59, %v7497_v61  ;;  %2216 = vrot.lane.b32.xlu1 %v13791_v50, %s16068_s28  ;;  %v6446_v43 = vmax.f32 %v4566_v15, %v11027_v6  ;;  %v10899_v63 = vrot.slane %v4532_v32, 9  ;;  %v5933_v54 = vmax.f32 %v4530_v47, %v10898_v45  ;;  %vm16124_vm12 = vmmov %vm16121_vm4  ;;  %439 = vst.msk [vmem:[#allocation3 + $0x188] sm:$0xff] %vm151_vm0, %v375_v62 }
 0x327   :  { %v2970_v12 = vpop.permute.xlu0 %2969  ;;  %v5932_v34 = vmax.f32 %v4531_v16, %v10897_v17  ;;  %v6571_v42 = vmax.f32 %v5931_v49, %v6443_v20  ;;  %8341 = vst.msk [vmem:[#allocation5 + $0x78] sm:$0xff] %vm6772_vm2, %v8325_v33  ;;  %v13875_v17 = vld [vmem:[#allocation2 + $0x292] sm:$0xff]  ;;  %vm16125_vm13 = vcmask 146552  }
 0x328   :  { %3124 = vst.msk [vmem:[#allocation3 + $0x130] sm:$0xff] %vm16121_vm4, %v2970_v12  ;;  %v2972_v14 = vpop.permute.xlu1 %2971  ;;  %v5934_v58 = vmax.f32 %v4532_v32, %v10899_v63  ;;  %v6573_v13 = vmax.f32 %v5933_v54, %v6445_v36  ;;  %vm16126_vm4 = vmmov %vm16125_vm13 }
 0x329   :  { %3125 = vst.msk [vmem:[#allocation3 + $0x138] sm:$0xff] %vm16124_vm12, %v2972_v14  ;;  %2596 = vrot.lane.b32.xlu0 %v13728_v40, %s16069_s27  ;;  %v6572_v21 = vmax.f32 %v5932_v34, %v6444_v53  ;;  %v7121_v5 = vrot.slane %v6571_v42, %v12857_v41  ;;  %v13848_v9 = vld [vmem:[#allocation2 + $0x2e8] sm:$0xff]  ;;  %v13912_v14 = vld [vmem:[%s16027_s3] ss:$0 sm:$0xff]  ;;  %vm16127_vm12 = vmmov %vm16126_vm4 }
 0x32a   :  { %2598 = vrot.lane.b32.xlu1 %v13731_v28, %s16069_s27  ;;  %v6574_v7 = vmax.f32 %v5934_v58, %v6446_v43  ;;  %v7129_v23 = vrot.slane %v6573_v13, %v12857_v41  ;;  %v13851_v47 = vld [vmem:[#allocation2 + $0x2f0] sm:$0xff]  ;;  %448 = vst.msk [vmem:[#allocation3 + $0x1d0] sm:$0xff] %vm151_vm0, %v13848_v9 }
 0x32b   :  { %v3351_v31 = vpop.permute.xlu0 %3350  ;;  %v7125_v11 = vrot.slane %v6572_v21, %v12857_v41  ;;  %v7499_v38 = vsel %vm7460_vm7, %v7121_v5, %v7498_v57  ;;  %449 = vst.msk [vmem:[#allocation3 + $0x1d8] sm:$0xff] %vm151_vm0, %v13851_v47  ;;  %v13872_v57 = vld [vmem:[#allocation2 + $0x28a] sm:$0xff] }
 0x32c   :  { %3507 = vst.msk [vmem:[#allocation3 + $0x120] sm:$0xff] %vm3470_vm15, %v3351_v31  ;;  %v3353_v48 = vpop.permute.xlu1 %3352  ;;  %v7133_v40 = vrot.slane %v6574_v7, %v12857_v41  ;;  %v13915_v5 = vld [vmem:[#allocation2 + $0x2a8] sm:$0xff] }
 0x32d   :  { %3508 = vst.msk [vmem:[#allocation3 + $0x128] sm:$0xff] %vm3470_vm15, %v3353_v48  ;;  %2600 = vrot.lane.b32.xlu0 %v13485_v2, %s16069_s27  ;;  %v7500_v28 = vsel %vm7462_vm3, %v7125_v11, %v7499_v38 }
 0x32e   :  { %2602 = vrot.lane.b32.xlu1 %v13489_v22, %s16069_s27  ;;  %v7501_v26 = vsel %vm7464_vm6, %v7129_v23, %v7500_v28  ;;  %v120_v28 = vld [vmem:[%s16063_s29 + $0x1d8] sm:$0xff] }
 0x32f   :  { %v663_v15 = vpop.permute.xlu0 %662  ;;  %v7502_v52 = vsel %vm7466_vm14, %v7133_v40, %v7501_v26  ;;  %v119_v40 = vld [vmem:[%s16063_s29 + $0x1d0] sm:$0xff]  ;;  %321 = vst.msk [vmem:[#allocation2 + $0x309] sm:$0xff] %vm151_vm0, %v120_v28 }
 0x330   :  { %815 = vst.msk [vmem:[#allocation3 + $0x140] sm:$0xff] %vm774_vm8, %v663_v15  ;;  %v665_v44 = vpop.permute.xlu1 %664 }
 0x331   :  { %7595 = vst.msk [vmem:[#allocation4 + $0x61] sm:$0xff] %vm6772_vm2, %v7502_v52  ;;  %2981 = vrot.lane.b32.xlu0 %v13762_v35, %s11581_s30 }
 0x332   :  { %816 = vst.msk [vmem:[#allocation3 + $0x148] sm:$0xff] %vm774_vm8, %v665_v44  ;;  %2983 = vrot.lane.b32.xlu1 %v13764_v55, %s11581_s30 }
 0x333   :  { %v3355_v3 = vpop.permute.xlu0 %3354  ;;  %v3571_v19 = vld [vmem:[#allocation3 + $0x120] sm:$0xff]  ;;  %320 = vst.msk [vmem:[#allocation2 + $0x301] sm:$0xff] %vm151_vm0, %v119_v40 }
 0x334   :  { %3509 = vst.msk [vmem:[#allocation3 + $0x130] sm:$0xff] %vm3470_vm15, %v3355_v3  ;;  %v3357_v27 = vpop.permute.xlu1 %3356  ;;  %v3572_v51 = vld [vmem:[#allocation3 + $0x128] sm:$0xff] }
 0x335   :  { %3510 = vst.msk [vmem:[#allocation3 + $0x138] sm:$0xff] %vm3470_vm15, %v3357_v27  ;;  %2985 = vrot.lane.b32.xlu0 %v13836_v29, %s11581_s30  ;;  %v3617_v59 = vpack.c.bf16 %v3572_v51, %v3571_v19 }
 0x336   :  { %2987 = vrot.lane.b32.xlu1 %v13838_v30, %s11581_s30 }
 0x337   :  { %11415 = vmatprep.mubr.msk.bf16.mxu0 %vm3638_vm1, %v3617_v59  ;;  %v667_v6 = vpop.permute.xlu0 %666 }
 0x338   :  { %817 = vst.msk [vmem:[#allocation3 + $0x150] sm:$0xff] %vm774_vm8, %v667_v6  ;;  %v669_v8 = vpop.permute.xlu1 %668  ;;  %v8322_v61 = vld [vmem:[#allocation4 + $0x62] sm:$0xff] }
 0x339   :  { %818 = vst.msk [vmem:[#allocation3 + $0x158] sm:$0xff] %vm774_vm8, %v669_v8  ;;  %3366 = vrot.lane.b32.xlu0 %v13786_v56, %s11583_s25  ;;  %v7612_v20 = vld [vmem:[#allocation4 + $0x60] sm:$0xff] }
 0x33a   :  { %3368 = vrot.lane.b32.xlu1 %v13791_v50, %s11583_s25  ;;  %8338 = vst.msk [vmem:[#allocation5 + $0x48] sm:$0xff] %vm6772_vm2, %v8322_v61  ;;  %7628 = vst.msk [vmem:[#allocation5 + $0x60] sm:$0xff] %vm6772_vm2, %v7612_v20  ;;  %v13947_v20 = vld [vmem:[#allocation2 + $0x2a1] sm:$0xff] }
 0x33b   :  { %v1048_v16 = vpop.permute.xlu0 %1047  ;;  %v3573_v4 = vld [vmem:[#allocation3 + $0x130] sm:$0xff] }
 0x33c   :  { %1200 = vst.msk [vmem:[#allocation3 + $0x140] sm:$0xff] %vm1159_vm9, %v1048_v16  ;;  %v1050_v36 = vpop.permute.xlu1 %1049  ;;  %v3574_v32 = vld [vmem:[#allocation3 + $0x138] sm:$0xff] }
 0x33d   :  { %1201 = vst.msk [vmem:[#allocation3 + $0x148] sm:$0xff] %vm1159_vm9, %v1050_v36  ;;  %678 = vrot.lane.b32.xlu0 %v13762_v35, %s11576_s21  ;;  %v3618_v45 = vpack.c.bf16 %v3574_v32, %v3573_v4 }
 0x33e   :  { %680 = vrot.lane.b32.xlu1 %v13764_v55, %s11576_s21 }
 0x33f   :  { %11416 = vmatmul.mubr.msk.bf16.gmra.mrb[36].mxu0 %vm3638_vm1, %v3618_v45  ;;  %v1052_v53 = vpop.permute.xlu0 %1051  ;;  %v13949_v45 = vld [vmem:[#allocation2 + $0x2a9] sm:$0xff] }
 0x340   :  { %1202 = vst.msk [vmem:[#allocation3 + $0x150] sm:$0xff] %vm1159_vm9, %v1052_v53  ;;  %v1054_v49 = vpop.permute.xlu1 %1053 }
 0x341   :  { %1203 = vst.msk [vmem:[#allocation3 + $0x158] sm:$0xff] %vm1159_vm9, %v1054_v49  ;;  %3370 = vrot.lane.b32.xlu0 %v13872_v57, %s11583_s25 }
 0x342   :  { %3372 = vrot.lane.b32.xlu1 %v13875_v17, %s11583_s25 }
 0x343   :  { %v1433_v35 = vpop.permute.xlu0 %1432 }
 0x344   :  { %1585 = vst.msk [vmem:[#allocation3 + $0x140] sm:$0xff] %vm1544_vm10, %v1433_v35  ;;  %v1435_v55 = vpop.permute.xlu1 %1434 }
 0x345   :  { %1586 = vst.msk [vmem:[#allocation3 + $0x148] sm:$0xff] %vm1544_vm10, %v1435_v55  ;;  %682 = vrot.lane.b32.xlu0 %v13836_v29, %s11576_s21 }
 0x346   :  { %684 = vrot.lane.b32.xlu1 %v13838_v30, %s11576_s21 }
 0x347   :  { %v1437_v43 = vpop.permute.xlu0 %1436 }
 0x348   :  { %1587 = vst.msk [vmem:[#allocation3 + $0x150] sm:$0xff] %vm1544_vm10, %v1437_v43  ;;  %v1439_v63 = vpop.permute.xlu1 %1438 }
 0x349   :  { %1588 = vst.msk [vmem:[#allocation3 + $0x158] sm:$0xff] %vm1544_vm10, %v1439_v63  ;;  %1063 = vrot.lane.b32.xlu0 %v13786_v56, %s11575_s20 }
 0x34a   :  { %1065 = vrot.lane.b32.xlu1 %v13791_v50, %s11575_s20  ;;  %v13907_v50 = vld [vmem:[#allocation2 + $0x2a0] sm:$0xff] }
 0x34b   :  { %v1818_v54 = vpop.permute.xlu0 %1817 }
 0x34c   :  { %1970 = vst.msk [vmem:[#allocation3 + $0x140] sm:$0xff] %vm16059_vm11, %v1818_v54  ;;  %v1820_v12 = vpop.permute.xlu1 %1819 }
 0x34d   :  { %1971 = vst.msk [vmem:[#allocation3 + $0x148] sm:$0xff] %vm16059_vm11, %v1820_v12  ;;  %1067 = vrot.lane.b32.xlu0 %v13872_v57, %s11575_s20 }
 0x34e   :  { %1069 = vrot.lane.b32.xlu1 %v13875_v17, %s11575_s20 }
 0x34f   :  { %v1822_v34 = vpop.permute.xlu0 %1821 }
 0x350   :  { %1972 = vst.msk [vmem:[#allocation3 + $0x150] sm:$0xff] %vm16059_vm11, %v1822_v34  ;;  %v1824_v42 = vpop.permute.xlu1 %1823 }
 0x351   :  { %1973 = vst.msk [vmem:[#allocation3 + $0x158] sm:$0xff] %vm16059_vm11, %v1824_v42  ;;  %1448 = vrot.lane.b32.xlu0 %v13485_v2, %s16066_s22 }
 0x352   :  { %1450 = vrot.lane.b32.xlu1 %v13489_v22, %s16066_s22  ;;  %v11405_v56 = vpop.f32.mrb[24].mxu0 }
 0x353   :  { %v3881_v58 = vadd.f32 %v13912_v14, %v11405_v56  ;;  %v3872_v13 = vpop.f32.mrb[25].mxu0  ;;  %v2203_v21 = vpop.permute.xlu0 %2202 }
 0x354   :  { %v3873_v7 = vadd.f32 %v13912_v14, %v3872_v13  ;;  %2355 = vst.msk [vmem:[#allocation3 + $0x140] sm:$0xff] %vm16125_vm13, %v2203_v21  ;;  %v2205_v2 = vpop.permute.xlu1 %2204  ;;  %v11406_v22 = vpop.f32.mrb[26].mxu0  ;;  %vm16128_vm13 = vmmov %vm16126_vm4 }
 0x355   :  { %v4057_v31 = vmax.f32 %v3881_v58, 0.0  ;;  %2356 = vst.msk [vmem:[#allocation3 + $0x148] sm:$0xff] %vm16126_vm4, %v2205_v2  ;;  %v3884_v11 = vadd.f32 %v13912_v14, %v11406_v22  ;;  %v3875_v38 = vpop.f32.mrb[27].mxu0  ;;  %1452 = vrot.lane.b32.xlu0 %v13907_v50, %s16066_s22  ;;  %vm16129_vm4 = vcmask 171152  }
 0x356   :  { %v4055_v48 = vmax.f32 %v3873_v7, 0.0  ;;  %v3876_v23 = vadd.f32 %v13912_v14, %v3875_v38  ;;  %1454 = vrot.lane.b32.xlu1 %v13915_v5, %s16066_s22 }
 0x357   :  { %v4601_v25 = vcombine.high %v4057_v31, %v4057_v31  ;;  %v4608_v26 = vrot.slane %v4057_v31, %v12830_v24  ;;  %v4058_v15 = vmax.f32 %v3884_v11, 0.0  ;;  %v2207_v18 = vpop.permute.xlu0 %2206 }
 0x358   :  { %v4567_v52 = vcombine.high %v4055_v48, %v4055_v48  ;;  %v4574_v44 = vrot.slane %v4055_v48, %v12830_v24  ;;  %v13936_v37 = vmax.f32 %v3876_v23, 0.0  ;;  %2357 = vst.msk [vmem:[#allocation3 + $0x150] sm:$0xff] %vm16127_vm12, %v2207_v18  ;;  %v2209_v62 = vpop.permute.xlu1 %2208  ;;  %vm16130_vm12 = vmmov %vm16129_vm4 }
 0x359   :  { %v4615_v3 = vrot.slane %v4601_v25, %v12830_v24  ;;  %v4616_v19 = vcombine.high %v4608_v26, %v4608_v26  ;;  %v11028_v27 = vrot.slane %v4608_v26, 9  ;;  %v4618_v51 = vcombine.high %v4058_v15, %v4058_v15  ;;  %2358 = vst.msk [vmem:[#allocation3 + $0x158] sm:$0xff] %vm16128_vm13, %v2209_v62  ;;  %1833 = vrot.lane.b32.xlu0 %v13836_v29, %s16067_s24  ;;  %vm16131_vm13 = vmmov %vm16129_vm4  ;;  %v13973_v62 = vld [vmem:[#allocation2 + $0x2aa] sm:$0xff] }
 0x35a   :  { %v4581_v59 = vrot.slane %v4567_v52, %v12830_v24  ;;  %v4582_v6 = vcombine.high %v4574_v44, %v4574_v44  ;;  %v10900_v8 = vrot.slane %v4574_v44, 9  ;;  %v4625_v61 = vrot.slane %v4058_v15, %v12830_v24  ;;  %1835 = vrot.lane.b32.xlu1 %v13838_v30, %s16067_s24  ;;  %v13969_v15 = vld [vmem:[#allocation2 + $0x2a2] sm:$0xff] }
 0x35b   :  { %v4617_v16 = vcombine.high %v4615_v3, %v4615_v3  ;;  %v11029_v4 = vrot.slane %v4616_v19, 9  ;;  %v11030_v33 = vrot.slane %v4615_v3, 9  ;;  %v6447_v36 = vmax.f32 %v4608_v26, %v11028_v27  ;;  %v2589_v32 = vpop.permute.xlu0 %2588 }
 0x35c   :  { %v4583_v53 = vcombine.high %v4581_v59, %v4581_v59  ;;  %v10901_v29 = vrot.slane %v4582_v6, 9  ;;  %v10902_v49 = vrot.slane %v4581_v59, 9  ;;  %v5935_v35 = vmax.f32 %v4574_v44, %v10900_v8  ;;  %2741 = vst.msk [vmem:[#allocation3 + $0x140] sm:$0xff] %vm16129_vm4, %v2589_v32  ;;  %v2591_v55 = vpop.permute.xlu1 %2590 }
 0x35d   :  { %v11031_v43 = vrot.slane %v4617_v16, 9  ;;  %v6448_v63 = vmax.f32 %v4616_v19, %v11029_v4  ;;  %v6449_v54 = vmax.f32 %v4615_v3, %v11030_v33  ;;  %v4632_v30 = vrot.slane %v4618_v51, %v12830_v24  ;;  %2742 = vst.msk [vmem:[#allocation3 + $0x148] sm:$0xff] %vm16130_vm12, %v2591_v55  ;;  %1837 = vrot.lane.b32.xlu0 %v13947_v20, %s16067_s24 }
 0x35e   :  { %v10903_v12 = vrot.slane %v4583_v53, 9  ;;  %v5936_v34 = vmax.f32 %v4582_v6, %v10901_v29  ;;  %v5937_v42 = vmax.f32 %v4581_v59, %v10902_v49  ;;  %v6575_v56 = vmax.f32 %v5935_v35, %v6447_v36  ;;  %1839 = vrot.lane.b32.xlu1 %v13949_v45, %s16067_s24 }
 0x35f   :  { %v6450_v58 = vmax.f32 %v4617_v16, %v11031_v43  ;;  %v4633_v13 = vcombine.high %v4625_v61, %v4625_v61  ;;  %v2593_v21 = vpop.permute.xlu0 %2592  ;;  %v4634_v31 = vcombine.high %v4632_v30, %v4632_v30  ;;  %v11032_v48 = vrot.slane %v4625_v61, 9 }
 0x360   :  { %v5938_v7 = vmax.f32 %v4583_v53, %v10903_v12  ;;  %v6576_v2 = vmax.f32 %v5936_v34, %v6448_v63  ;;  %v6577_v22 = vmax.f32 %v5937_v42, %v6449_v54  ;;  %2743 = vst.msk [vmem:[#allocation3 + $0x150] sm:$0xff] %vm16131_vm13, %v2593_v21  ;;  %v2595_v11 = vpop.permute.xlu1 %2594  ;;  %v7137_v38 = vrot.slane %v6575_v56, %v12857_v41 }
 0x361   :  { %v11034_v23 = vrot.slane %v4632_v30, 9  ;;  %2744 = vst.msk [vmem:[#allocation3 + $0x158] sm:$0xff] %vm16129_vm4, %v2595_v11  ;;  %2218 = vrot.lane.b32.xlu0 %v13872_v57, %s16068_s28  ;;  %v4584_v26 = vcombine.high %v13936_v37, %v13936_v37  ;;  %v11033_v18 = vrot.slane %v4633_v13, 9  ;;  %v4591_v52 = vrot.slane %v13936_v37, %v12830_v24 }
 0x362   :  { %v6578_v40 = vmax.f32 %v5938_v7, %v6450_v58  ;;  %v7141_v28 = vrot.slane %v6576_v2, %v12857_v41  ;;  %v7145_v25 = vrot.slane %v6577_v22, %v12857_v41  ;;  %2220 = vrot.lane.b32.xlu1 %v13875_v17, %s16068_s28  ;;  %vm16132_vm12 = vcmask 1041409  }
 0x363   :  { %v2974_v44 = vpop.permute.xlu0 %2973  ;;  %v11035_v19 = vrot.slane %v4634_v31, 9  ;;  %v4598_v27 = vrot.slane %v4584_v26, %v12830_v24  ;;  %vm16133_vm13 = vcmask 195752   ;;  %v6451_v59 = vmax.f32 %v4625_v61, %v11032_v48  ;;  %v14023_v26 = vld [vmem:[#allocation2 + $0x2c1] sm:$0xff] }
 0x364   :  { %v7149_v57 = vrot.slane %v6578_v40, %v12857_v41  ;;  %v7503_v3 = vsel %vm16132_vm12, %v7141_v28, %v7137_v38  ;;  %3126 = vst.msk [vmem:[#allocation3 + $0x140] sm:$0xff] %vm16133_vm13, %v2974_v44  ;;  %v2976_v51 = vpop.permute.xlu1 %2975  ;;  %v4599_v6 = vcombine.high %v4591_v52, %v4591_v52  ;;  %v10904_v8 = vrot.slane %v4591_v52, 9  ;;  %vm16134_vm4 = vmmov %vm16133_vm13  ;;  %v378_v40 = vld [vmem:[#allocation2 + $0x2a0] sm:$0xff]  ;;  %v379_v28 = vld [vmem:[#allocation2 + $0x2a8] sm:$0xff] }
 0x365   :  { %v7504_v17 = vsel %vm7456_vm5, %v7145_v25, %v7503_v3  ;;  %3127 = vst.msk [vmem:[#allocation3 + $0x148] sm:$0xff] %vm16134_vm4, %v2976_v51  ;;  %2222 = vrot.lane.b32.xlu0 %v13969_v15, %s16068_s28  ;;  %v6453_v37 = vmax.f32 %v4632_v30, %v11034_v23  ;;  %v4600_v16 = vcombine.high %v4598_v27, %v4598_v27  ;;  %v10906_v4 = vrot.slane %v4598_v27, 9  ;;  %vm16136_vm13 = vmmov %vm16134_vm4  ;;  %v14021_v23 = vld [vmem:[#allocation2 + $0x2b9] sm:$0xff] }
 0x366   :  { %vm16135_vm12 = vcmask 1043459   ;;  %2224 = vrot.lane.b32.xlu1 %v13973_v62, %s16068_s28  ;;  %v6452_v36 = vmax.f32 %v4633_v13, %v11033_v18  ;;  %v10905_v32 = vrot.slane %v4599_v6, 9  ;;  %v5939_v53 = vmax.f32 %v4591_v52, %v10904_v8  ;;  %442 = vst.msk [vmem:[#allocation3 + $0x1a0] sm:$0xff] %vm151_vm0, %v378_v40  ;;  %443 = vst.msk [vmem:[#allocation3 + $0x1a8] sm:$0xff] %vm151_vm0, %v379_v28 }
 0x367   :  { %v7505_v33 = vsel %vm16135_vm12, %v7149_v57, %v7504_v17  ;;  %v2978_v29 = vpop.permute.xlu0 %2977  ;;  %v6454_v61 = vmax.f32 %v4634_v31, %v11035_v19  ;;  %v10907_v49 = vrot.slane %v4600_v16, 9  ;;  %v5941_v35 = vmax.f32 %v4598_v27, %v10906_v4  ;;  %v122_v31 = vld [vmem:[%s16063_s29 + $0x1e8] sm:$0xff] }
 0x368   :  { %3128 = vst.msk [vmem:[#allocation3 + $0x150] sm:$0xff] %vm16136_vm13, %v2978_v29  ;;  %v2980_v55 = vpop.permute.xlu1 %2979  ;;  %v5940_v43 = vmax.f32 %v4599_v6, %v10905_v32  ;;  %v6579_v63 = vmax.f32 %v5939_v53, %v6451_v59  ;;  %v14062_v32 = vld [vmem:[#allocation2 + $0x2c2] sm:$0xff]  ;;  %vm16137_vm12 = vcmask 146552  }
 0x369   :  { %3129 = vst.msk [vmem:[#allocation3 + $0x158] sm:$0xff] %vm16134_vm4, %v2980_v55  ;;  %2604 = vrot.lane.b32.xlu0 %v13907_v50, %s16069_s27  ;;  %v5942_v54 = vmax.f32 %v4600_v16, %v10907_v49  ;;  %v6581_v30 = vmax.f32 %v5941_v35, %v6453_v37  ;;  %vm16138_vm13 = vmmov %vm16137_vm12 }
 0x36a   :  { %2606 = vrot.lane.b32.xlu1 %v13915_v5, %s16069_s27  ;;  %v6580_v12 = vmax.f32 %v5940_v43, %v6452_v36  ;;  %v7153_v34 = vrot.slane %v6579_v63, %v12857_v41  ;;  %v121_v5 = vld [vmem:[%s16063_s29 + $0x1e0] sm:$0xff]  ;;  %323 = vst.msk [vmem:[#allocation2 + $0x321] sm:$0xff] %vm151_vm0, %v122_v31  ;;  %vm16139_vm4 = vmmov %vm16137_vm12 }
 0x36b   :  { %v3359_v42 = vpop.permute.xlu0 %3358  ;;  %v6582_v56 = vmax.f32 %v5942_v54, %v6454_v61  ;;  %v7161_v50 = vrot.slane %v6581_v30, %v12857_v41  ;;  %322 = vst.msk [vmem:[#allocation2 + $0x319] sm:$0xff] %vm151_vm0, %v121_v5  ;;  %v124_v5 = vld [vmem:[%s16063_s29 + $0x1f8] sm:$0xff] }
 0x36c   :  { %3511 = vst.msk [vmem:[#allocation3 + $0x140] sm:$0xff] %vm3470_vm15, %v3359_v42  ;;  %v3361_v58 = vpop.permute.xlu1 %3360  ;;  %v7157_v13 = vrot.slane %v6580_v12, %v12857_v41  ;;  %v7506_v21 = vsel %vm7460_vm7, %v7153_v34, %v7505_v33  ;;  %v14059_v33 = vld [vmem:[#allocation2 + $0x2ba] sm:$0xff] }
 0x36d   :  { %3512 = vst.msk [vmem:[#allocation3 + $0x148] sm:$0xff] %vm3470_vm15, %v3361_v58  ;;  %2608 = vrot.lane.b32.xlu0 %v13666_v39, %s16069_s27  ;;  %v7165_v7 = vrot.slane %v6582_v56, %v12857_v41  ;;  %v14097_v12 = vld [vmem:[#allocation2 + $0x2d8] sm:$0xff] }
 0x36e   :  { %2610 = vrot.lane.b32.xlu1 %v13669_v0, %s16069_s27  ;;  %v7507_v2 = vsel %vm7462_vm3, %v7157_v13, %v7506_v21  ;;  %325 = vst.msk [vmem:[#allocation2 + $0x339] sm:$0xff] %vm151_vm0, %v124_v5 }
 0x36f   :  { %v671_v22 = vpop.permute.xlu0 %670  ;;  %v7508_v11 = vsel %vm7464_vm6, %v7161_v50, %v7507_v2  ;;  %v123_v50 = vld [vmem:[%s16063_s29 + $0x1f0] sm:$0xff] }
 0x370   :  { %819 = vst.msk [vmem:[#allocation3 + $0x160] sm:$0xff] %vm774_vm8, %v671_v22  ;;  %v673_v38 = vpop.permute.xlu1 %672  ;;  %v7509_v48 = vsel %vm7466_vm14, %v7165_v7, %v7508_v11 }
 0x371   :  { %820 = vst.msk [vmem:[#allocation3 + $0x168] sm:$0xff] %vm774_vm8, %v673_v38  ;;  %2989 = vrot.lane.b32.xlu0 %v13947_v20, %s11581_s30 }
 0x372   :  { %7596 = vst.msk [vmem:[#allocation4 + $0x71] sm:$0xff] %vm6772_vm2, %v7509_v48  ;;  %2991 = vrot.lane.b32.xlu1 %v13949_v45, %s11581_s30  ;;  %v14033_v3 = vld [vmem:[#allocation2 + $0x318] sm:$0xff]  ;;  %v14036_v27 = vld [vmem:[#allocation2 + $0x320] sm:$0xff] }
 0x373   :  { %v3363_v25 = vpop.permute.xlu0 %3362  ;;  %v3575_v18 = vld [vmem:[#allocation3 + $0x140] sm:$0xff]  ;;  %452 = vst.msk [vmem:[#allocation3 + $0x1f0] sm:$0xff] %vm151_vm0, %v14033_v3  ;;  %453 = vst.msk [vmem:[#allocation3 + $0x1f8] sm:$0xff] %vm151_vm0, %v14036_v27 }
 0x374   :  { %3513 = vst.msk [vmem:[#allocation3 + $0x150] sm:$0xff] %vm3470_vm15, %v3363_v25  ;;  %v3365_v52 = vpop.permute.xlu1 %3364  ;;  %v3576_v44 = vld [vmem:[#allocation3 + $0x148] sm:$0xff] }
 0x375   :  { %3514 = vst.msk [vmem:[#allocation3 + $0x158] sm:$0xff] %vm3470_vm15, %v3365_v52  ;;  %2993 = vrot.lane.b32.xlu0 %v14021_v23, %s11581_s30  ;;  %v3619_v57 = vpack.c.bf16 %v3576_v44, %v3575_v18 }
 0x376   :  { %2995 = vrot.lane.b32.xlu1 %v14023_v26, %s11581_s30  ;;  %324 = vst.msk [vmem:[#allocation2 + $0x331] sm:$0xff] %vm151_vm0, %v123_v50 }
 0x377   :  { %11419 = vmatprep.mubr.msk.bf16.mxu0 %vm3638_vm1, %v3619_v57  ;;  %v675_v19 = vpop.permute.xlu0 %674 }
 0x378   :  { %821 = vst.msk [vmem:[#allocation3 + $0x170] sm:$0xff] %vm774_vm8, %v675_v19  ;;  %v677_v51 = vpop.permute.xlu1 %676 }
 0x379   :  { %822 = vst.msk [vmem:[#allocation3 + $0x178] sm:$0xff] %vm774_vm8, %v677_v51  ;;  %3374 = vrot.lane.b32.xlu0 %v13969_v15, %s11583_s25  ;;  %v14046_v17 = vld [vmem:[#allocation4 + $0x72] sm:$0xff] }
 0x37a   :  { %3376 = vrot.lane.b32.xlu1 %v13973_v62, %s11583_s25  ;;  %8339 = vst.msk [vmem:[#allocation5 + $0x58] sm:$0xff] %vm6772_vm2, %v14046_v17  ;;  %v7613_v59 = vld [vmem:[#allocation4 + $0x70] sm:$0xff] }
 0x37b   :  { %v1056_v6 = vpop.permute.xlu0 %1055  ;;  %v3577_v8 = vld [vmem:[#allocation3 + $0x150] sm:$0xff]  ;;  %7629 = vst.msk [vmem:[#allocation5 + $0x70] sm:$0xff] %vm6772_vm2, %v7613_v59 }
 0x37c   :  { %1204 = vst.msk [vmem:[#allocation3 + $0x160] sm:$0xff] %vm1159_vm9, %v1056_v6  ;;  %v1058_v37 = vpop.permute.xlu1 %1057  ;;  %v3578_v16 = vld [vmem:[#allocation3 + $0x158] sm:$0xff] }
 0x37d   :  { %1205 = vst.msk [vmem:[#allocation3 + $0x168] sm:$0xff] %vm1159_vm9, %v1058_v37  ;;  %686 = vrot.lane.b32.xlu0 %v13947_v20, %s11576_s21  ;;  %v3620_v4 = vpack.c.bf16 %v3578_v16, %v3577_v8  ;;  %v14129_v59 = vld [vmem:[#allocation2 + $0x2d1] sm:$0xff] }
 0x37e   :  { %688 = vrot.lane.b32.xlu1 %v13949_v45, %s11576_s21 }
 0x37f   :  { %11420 = vmatmul.mubr.msk.bf16.gmra.mrb[40].mxu0 %vm3638_vm1, %v3620_v4  ;;  %v1060_v36 = vpop.permute.xlu0 %1059 }
 0x380   :  { %1206 = vst.msk [vmem:[#allocation3 + $0x170] sm:$0xff] %vm1159_vm9, %v1060_v36  ;;  %v1062_v53 = vpop.permute.xlu1 %1061  ;;  %v14131_v36 = vld [vmem:[#allocation2 + $0x2d9] sm:$0xff] }
 0x381   :  { %1207 = vst.msk [vmem:[#allocation3 + $0x178] sm:$0xff] %vm1159_vm9, %v1062_v53  ;;  %3378 = vrot.lane.b32.xlu0 %v14059_v33, %s11583_s25 }
 0x382   :  { %3380 = vrot.lane.b32.xlu1 %v14062_v32, %s11583_s25 }
 0x383   :  { %v1441_v20 = vpop.permute.xlu0 %1440 }
 0x384   :  { %1589 = vst.msk [vmem:[#allocation3 + $0x160] sm:$0xff] %vm1544_vm10, %v1441_v20  ;;  %v1443_v45 = vpop.permute.xlu1 %1442 }
 0x385   :  { %1590 = vst.msk [vmem:[#allocation3 + $0x168] sm:$0xff] %vm1544_vm10, %v1443_v45  ;;  %690 = vrot.lane.b32.xlu0 %v14021_v23, %s11576_s21 }
 0x386   :  { %692 = vrot.lane.b32.xlu1 %v14023_v26, %s11576_s21 }
 0x387   :  { %v1445_v29 = vpop.permute.xlu0 %1444 }
 0x388   :  { %1591 = vst.msk [vmem:[#allocation3 + $0x170] sm:$0xff] %vm1544_vm10, %v1445_v29  ;;  %v1447_v61 = vpop.permute.xlu1 %1446 }
 0x389   :  { %1592 = vst.msk [vmem:[#allocation3 + $0x178] sm:$0xff] %vm1544_vm10, %v1447_v61  ;;  %1071 = vrot.lane.b32.xlu0 %v13969_v15, %s11575_s20 }
 0x38a   :  { %1073 = vrot.lane.b32.xlu1 %v13973_v62, %s11575_s20  ;;  %v14094_v62 = vld [vmem:[#allocation2 + $0x2d0] sm:$0xff] }
 0x38b   :  { %v1826_v49 = vpop.permute.xlu0 %1825 }
 0x38c   :  { %1974 = vst.msk [vmem:[#allocation3 + $0x160] sm:$0xff] %vm16059_vm11, %v1826_v49  ;;  %v1828_v35 = vpop.permute.xlu1 %1827 }
 0x38d   :  { %1975 = vst.msk [vmem:[#allocation3 + $0x168] sm:$0xff] %vm16059_vm11, %v1828_v35  ;;  %1075 = vrot.lane.b32.xlu0 %v14059_v33, %s11575_s20 }
 0x38e   :  { %1077 = vrot.lane.b32.xlu1 %v14062_v32, %s11575_s20 }
 0x38f   :  { %v1830_v55 = vpop.permute.xlu0 %1829 }
 0x390   :  { %1976 = vst.msk [vmem:[#allocation3 + $0x170] sm:$0xff] %vm16059_vm11, %v1830_v55  ;;  %v1832_v43 = vpop.permute.xlu1 %1831 }
 0x391   :  { %1977 = vst.msk [vmem:[#allocation3 + $0x178] sm:$0xff] %vm16059_vm11, %v1832_v43  ;;  %1456 = vrot.lane.b32.xlu0 %v13666_v39, %s16066_s22 }
 0x392   :  { %1458 = vrot.lane.b32.xlu1 %v13669_v0, %s16066_s22  ;;  %v11409_v15 = vpop.f32.mrb[28].mxu0 }
 0x393   :  { %v3897_v63 = vadd.f32 %v13912_v14, %v11409_v15  ;;  %v3888_v54 = vpop.f32.mrb[29].mxu0  ;;  %v2211_v30 = vpop.permute.xlu0 %2210 }
 0x394   :  { %v3889_v34 = vadd.f32 %v13912_v14, %v3888_v54  ;;  %2359 = vst.msk [vmem:[#allocation3 + $0x160] sm:$0xff] %vm16137_vm12, %v2211_v30  ;;  %v2213_v42 = vpop.permute.xlu1 %2212  ;;  %v11410_v56 = vpop.f32.mrb[30].mxu0  ;;  %vm16140_vm12 = vmmov %vm16139_vm4 }
 0x395   :  { %v4061_v58 = vmax.f32 %v3897_v63, 0.0  ;;  %2360 = vst.msk [vmem:[#allocation3 + $0x168] sm:$0xff] %vm16138_vm13, %v2213_v42  ;;  %v3900_v39 = vadd.f32 %v13912_v14, %v11410_v56  ;;  %v3891_v0 = vpop.f32.mrb[31].mxu0  ;;  %1460 = vrot.lane.b32.xlu0 %v14094_v62, %s16066_s22  ;;  %vm16141_vm13 = vcmask 171152  }
 0x396   :  { %v4059_v13 = vmax.f32 %v3889_v34, 0.0  ;;  %v3892_v21 = vadd.f32 %v13912_v14, %v3891_v0  ;;  %1462 = vrot.lane.b32.xlu1 %v14097_v12, %s16066_s22 }
 0x397   :  { %v4669_v7 = vcombine.high %v4061_v58, %v4061_v58  ;;  %v4676_v2 = vrot.slane %v4061_v58, %v12830_v24  ;;  %v4062_v22 = vmax.f32 %v3900_v39, 0.0  ;;  %v2215_v31 = vpop.permute.xlu0 %2214 }
 0x398   :  { %v4635_v11 = vcombine.high %v4059_v13, %v4059_v13  ;;  %v4642_v38 = vrot.slane %v4059_v13, %v12830_v24  ;;  %v14118_v48 = vmax.f32 %v3892_v21, 0.0  ;;  %2361 = vst.msk [vmem:[#allocation3 + $0x170] sm:$0xff] %vm16139_vm4, %v2215_v31  ;;  %v2217_v40 = vpop.permute.xlu1 %2216  ;;  %vm16142_vm4 = vmmov %vm16141_vm13  ;;  %v14151_v31 = vld [vmem:[#allocation2 + $0x2d2] sm:$0xff] }
 0x399   :  { %v4683_v28 = vrot.slane %v4669_v7, %v12830_v24  ;;  %v4684_v25 = vcombine.high %v4676_v2, %v4676_v2  ;;  %v11036_v18 = vrot.slane %v4676_v2, 9  ;;  %v4686_v52 = vcombine.high %v4062_v22, %v4062_v22  ;;  %2362 = vst.msk [vmem:[#allocation3 + $0x178] sm:$0xff] %vm16140_vm12, %v2217_v40  ;;  %1841 = vrot.lane.b32.xlu0 %v14021_v23, %s16067_s24  ;;  %vm16143_vm12 = vmmov %vm16142_vm4 }
 0x39a   :  { %v4649_v44 = vrot.slane %v4635_v11, %v12830_v24  ;;  %v4650_v57 = vcombine.high %v4642_v38, %v4642_v38  ;;  %v10908_v19 = vrot.slane %v4642_v38, 9  ;;  %v4693_v51 = vrot.slane %v4062_v22, %v12830_v24  ;;  %1843 = vrot.lane.b32.xlu1 %v14023_v26, %s16067_s24 }
 0x39b   :  { %v4685_v6 = vcombine.high %v4683_v28, %v4683_v28  ;;  %v11037_v8 = vrot.slane %v4684_v25, 9  ;;  %v11038_v37 = vrot.slane %v4683_v28, 9  ;;  %v6455_v16 = vmax.f32 %v4676_v2, %v11036_v18  ;;  %v2597_v4 = vpop.permute.xlu0 %2596 }
 0x39c   :  { %v4651_v53 = vcombine.high %v4649_v44, %v4649_v44  ;;  %v10909_v23 = vrot.slane %v4650_v57, 9  ;;  %v10910_v20 = vrot.slane %v4649_v44, 9  ;;  %v5943_v45 = vmax.f32 %v4642_v38, %v10908_v19  ;;  %2745 = vst.msk [vmem:[#allocation3 + $0x160] sm:$0xff] %vm16141_vm13, %v2597_v4  ;;  %v2599_v29 = vpop.permute.xlu1 %2598  ;;  %vm16144_vm13 = vmmov %vm16142_vm4 }
 0x39d   :  { %v11039_v61 = vrot.slane %v4685_v6, 9  ;;  %v6456_v49 = vmax.f32 %v4684_v25, %v11037_v8  ;;  %v6457_v35 = vmax.f32 %v4683_v28, %v11038_v37  ;;  %v4700_v26 = vrot.slane %v4686_v52, %v12830_v24  ;;  %2746 = vst.msk [vmem:[#allocation3 + $0x168] sm:$0xff] %vm16142_vm4, %v2599_v29  ;;  %1845 = vrot.lane.b32.xlu0 %v14129_v59, %s16067_s24  ;;  %v14155_v28 = vld [vmem:[#allocation2 + $0x2da] sm:$0xff] }
 0x39e   :  { %v10911_v55 = vrot.slane %v4651_v53, 9  ;;  %v5944_v43 = vmax.f32 %v4650_v57, %v10909_v23  ;;  %v5945_v15 = vmax.f32 %v4649_v44, %v10910_v20  ;;  %v6583_v63 = vmax.f32 %v5943_v45, %v6455_v16  ;;  %1847 = vrot.lane.b32.xlu1 %v14131_v36, %s16067_s24 }
 0x39f   :  { %v6458_v54 = vmax.f32 %v4685_v6, %v11039_v61  ;;  %v4701_v30 = vcombine.high %v4693_v51, %v4693_v51  ;;  %v2601_v34 = vpop.permute.xlu0 %2600  ;;  %v4702_v39 = vcombine.high %v4700_v26, %v4700_v26  ;;  %v11040_v21 = vrot.slane %v4693_v51, 9 }
 0x3a0   :  { %v5946_v42 = vmax.f32 %v4651_v53, %v10911_v55  ;;  %v6584_v56 = vmax.f32 %v5944_v43, %v6456_v49  ;;  %v6585_v58 = vmax.f32 %v5945_v15, %v6457_v35  ;;  %2747 = vst.msk [vmem:[#allocation3 + $0x170] sm:$0xff] %vm16143_vm12, %v2601_v34  ;;  %v2603_v0 = vpop.permute.xlu1 %2602  ;;  %v7169_v13 = vrot.slane %v6583_v63, %v12857_v41 }
 0x3a1   :  { %v11042_v50 = vrot.slane %v4700_v26, 9  ;;  %2748 = vst.msk [vmem:[#allocation3 + $0x178] sm:$0xff] %vm16144_vm13, %v2603_v0  ;;  %2226 = vrot.lane.b32.xlu0 %v14059_v33, %s16068_s28  ;;  %v4652_v22 = vcombine.high %v14118_v48, %v14118_v48  ;;  %v11041_v11 = vrot.slane %v4701_v30, 9  ;;  %v4659_v38 = vrot.slane %v14118_v48, %v12830_v24 }
 0x3a2   :  { %v6586_v5 = vmax.f32 %v5946_v42, %v6458_v54  ;;  %v7173_v7 = vrot.slane %v6584_v56, %v12857_v41  ;;  %v7177_v2 = vrot.slane %v6585_v58, %v12857_v41  ;;  %2228 = vrot.lane.b32.xlu1 %v14062_v32, %s16068_s28  ;;  %vm16145_vm4 = vcmask 1041409  }
 0x3a3   :  { %v2982_v40 = vpop.permute.xlu0 %2981  ;;  %v11043_v18 = vrot.slane %v4702_v39, 9  ;;  %v4666_v52 = vrot.slane %v4652_v22, %v12830_v24  ;;  %vm16146_vm12 = vcmask 195752   ;;  %v6459_v57 = vmax.f32 %v4693_v51, %v11040_v21  ;;  %v14195_v21 = vld [vmem:[#allocation2 + $0x2e9] sm:$0xff]  ;;  %v383_v22 = vld [vmem:[#allocation2 + $0x2d8] sm:$0xff] }
 0x3a4   :  { %v7181_v33 = vrot.slane %v6586_v5, %v12857_v41  ;;  %v7510_v25 = vsel %vm16145_vm4, %v7173_v7, %v7169_v13  ;;  %3130 = vst.msk [vmem:[#allocation3 + $0x160] sm:$0xff] %vm16146_vm12, %v2982_v40  ;;  %v2984_v44 = vpop.permute.xlu1 %2983  ;;  %v4667_v19 = vcombine.high %v4659_v38, %v4659_v38  ;;  %v10912_v6 = vrot.slane %v4659_v38, 9  ;;  %vm16147_vm13 = vmmov %vm16146_vm12  ;;  %v14197_v7 = vld [vmem:[#allocation2 + $0x2f1] sm:$0xff] }
 0x3a5   :  { %v7511_v32 = vsel %vm7456_vm5, %v7177_v2, %v7510_v25  ;;  %3131 = vst.msk [vmem:[#allocation3 + $0x168] sm:$0xff] %vm16147_vm13, %v2984_v44  ;;  %2230 = vrot.lane.b32.xlu0 %v14151_v31, %s16068_s28  ;;  %v6461_v48 = vmax.f32 %v4700_v26, %v11042_v50  ;;  %v4668_v8 = vcombine.high %v4666_v52, %v4666_v52  ;;  %v10914_v37 = vrot.slane %v4666_v52, 9  ;;  %vm16149_vm13 = vmmov %vm16146_vm12  ;;  %v382_v50 = vld [vmem:[#allocation2 + $0x2d0] sm:$0xff] }
 0x3a6   :  { %vm16148_vm4 = vcmask 1043459   ;;  %2232 = vrot.lane.b32.xlu1 %v14155_v28, %s16068_s28  ;;  %v6460_v4 = vmax.f32 %v4701_v30, %v11041_v11  ;;  %v10913_v53 = vrot.slane %v4667_v19, 9  ;;  %v5947_v23 = vmax.f32 %v4659_v38, %v10912_v6  ;;  %446 = vst.msk [vmem:[#allocation3 + $0x1c0] sm:$0xff] %vm151_vm0, %v382_v50  ;;  %447 = vst.msk [vmem:[#allocation3 + $0x1c8] sm:$0xff] %vm151_vm0, %v383_v22  ;;  %v14224_v6 = vld [vmem:[#allocation2 + $0x2ea] sm:$0xff] }
 0x3a7   :  { %v7512_v16 = vsel %vm16148_vm4, %v7181_v33, %v7511_v32  ;;  %v2986_v20 = vpop.permute.xlu0 %2985  ;;  %v6462_v51 = vmax.f32 %v4702_v39, %v11043_v18  ;;  %v10915_v45 = vrot.slane %v4668_v8, 9  ;;  %v5949_v29 = vmax.f32 %v4666_v52, %v10914_v37 }
 0x3a8   :  { %3132 = vst.msk [vmem:[#allocation3 + $0x170] sm:$0xff] %vm16146_vm12, %v2986_v20  ;;  %v2988_v61 = vpop.permute.xlu1 %2987  ;;  %v5948_v49 = vmax.f32 %v4667_v19, %v10913_v53  ;;  %v6587_v35 = vmax.f32 %v5947_v23, %v6459_v57  ;;  %vm16150_vm4 = vcmask 146552  }
 0x3a9   :  { %3133 = vst.msk [vmem:[#allocation3 + $0x178] sm:$0xff] %vm16149_vm13, %v2988_v61  ;;  %2612 = vrot.lane.b32.xlu0 %v14094_v62, %s16069_s27  ;;  %v5950_v26 = vmax.f32 %v4668_v8, %v10915_v45  ;;  %v6589_v55 = vmax.f32 %v5949_v29, %v6461_v48  ;;  %v14227_v8 = vld [vmem:[#allocation2 + $0x2f2] sm:$0xff]  ;;  %vm16151_vm12 = vmmov %vm16150_vm4 }
 0x3aa   :  { %2614 = vrot.lane.b32.xlu1 %v14097_v12, %s16069_s27  ;;  %v6588_v43 = vmax.f32 %v5948_v49, %v6460_v4  ;;  %v7185_v15 = vrot.slane %v6587_v35, %v12857_v41  ;;  %v14262_v49 = vld [vmem:[#allocation2 + $0x308] sm:$0xff]  ;;  %vm16152_vm13 = vmmov %vm16150_vm4 }
 0x3ab   :  { %v3367_v63 = vpop.permute.xlu0 %3366  ;;  %v6590_v54 = vmax.f32 %v5950_v26, %v6462_v51  ;;  %v7193_v62 = vrot.slane %v6589_v55, %v12857_v41 }
 0x3ac   :  { %3515 = vst.msk [vmem:[#allocation3 + $0x160] sm:$0xff] %vm3470_vm15, %v3367_v63  ;;  %v3369_v30 = vpop.permute.xlu1 %3368  ;;  %v7189_v34 = vrot.slane %v6588_v43, %v12857_v41  ;;  %v7513_v42 = vsel %vm7460_vm7, %v7185_v15, %v7512_v16 }
 0x3ad   :  { %3516 = vst.msk [vmem:[#allocation3 + $0x168] sm:$0xff] %vm3470_vm15, %v3369_v30  ;;  %2616 = vrot.lane.b32.xlu0 %v13848_v9, %s16069_s27  ;;  %v7197_v12 = vrot.slane %v6590_v54, %v12857_v41 }
 0x3ae   :  { %2618 = vrot.lane.b32.xlu1 %v13851_v47, %s16069_s27  ;;  %v7514_v56 = vsel %vm7462_vm3, %v7189_v34, %v7513_v42 }
 0x3af   :  { %v679_v58 = vpop.permute.xlu0 %678  ;;  %v7515_v39 = vsel %vm7464_vm6, %v7193_v62, %v7514_v56 }
 0x3b0   :  { %823 = vst.msk [vmem:[#allocation3 + $0x180] sm:$0xff] %vm774_vm8, %v679_v58  ;;  %v681_v0 = vpop.permute.xlu1 %680  ;;  %v7516_v13 = vsel %vm7466_vm14, %v7197_v12, %v7515_v39 }
 0x3b1   :  { %824 = vst.msk [vmem:[#allocation3 + $0x188] sm:$0xff] %vm774_vm8, %v681_v0  ;;  %2997 = vrot.lane.b32.xlu0 %v14129_v59, %s11581_s30 }
 0x3b2   :  { %7597 = vst.msk [vmem:[#allocation4 + $0x81] sm:$0xff] %vm6772_vm2, %v7516_v13  ;;  %2999 = vrot.lane.b32.xlu1 %v14131_v36, %s11581_s30 }
 0x3b3   :  { %v3371_v5 = vpop.permute.xlu0 %3370  ;;  %v3579_v2 = vld [vmem:[#allocation3 + $0x160] sm:$0xff] }
 0x3b4   :  { %3517 = vst.msk [vmem:[#allocation3 + $0x170] sm:$0xff] %vm3470_vm15, %v3371_v5  ;;  %v3373_v11 = vpop.permute.xlu1 %3372  ;;  %v3580_v38 = vld [vmem:[#allocation3 + $0x168] sm:$0xff] }
 0x3b5   :  { %3518 = vst.msk [vmem:[#allocation3 + $0x178] sm:$0xff] %vm3470_vm15, %v3373_v11  ;;  %3001 = vrot.lane.b32.xlu0 %v14195_v21, %s11581_s30  ;;  %v3621_v40 = vpack.c.bf16 %v3580_v38, %v3579_v2  ;;  %v14286_v11 = vld [vmem:[#allocation2 + $0x301] sm:$0xff] }
 0x3b6   :  { %3003 = vrot.lane.b32.xlu1 %v14197_v7, %s11581_s30 }
 0x3b7   :  { %11423 = vmatprep.mubr.msk.bf16.mxu0 %vm3638_vm1, %v3621_v40  ;;  %v683_v33 = vpop.permute.xlu0 %682 }
 0x3b8   :  { %825 = vst.msk [vmem:[#allocation3 + $0x190] sm:$0xff] %vm774_vm8, %v683_v33  ;;  %v685_v25 = vpop.permute.xlu1 %684 }
 0x3b9   :  { %826 = vst.msk [vmem:[#allocation3 + $0x198] sm:$0xff] %vm774_vm8, %v685_v25  ;;  %3382 = vrot.lane.b32.xlu0 %v14151_v31, %s11583_s25  ;;  %v14212_v18 = vld [vmem:[#allocation4 + $0x82] sm:$0xff] }
 0x3ba   :  { %3384 = vrot.lane.b32.xlu1 %v14155_v28, %s11583_s25  ;;  %8340 = vst.msk [vmem:[#allocation5 + $0x68] sm:$0xff] %vm6772_vm2, %v14212_v18 }
 0x3bb   :  { %v1064_v52 = vpop.permute.xlu0 %1063  ;;  %v3581_v44 = vld [vmem:[#allocation3 + $0x170] sm:$0xff] }
 0x3bc   :  { %1208 = vst.msk [vmem:[#allocation3 + $0x180] sm:$0xff] %vm1159_vm9, %v1064_v52  ;;  %v1066_v32 = vpop.permute.xlu1 %1065  ;;  %v3582_v57 = vld [vmem:[#allocation3 + $0x178] sm:$0xff] }
 0x3bd   :  { %1209 = vst.msk [vmem:[#allocation3 + $0x188] sm:$0xff] %vm1159_vm9, %v1066_v32  ;;  %694 = vrot.lane.b32.xlu0 %v14129_v59, %s11576_s21  ;;  %v3622_v19 = vpack.c.bf16 %v3582_v57, %v3581_v44  ;;  %v14288_v44 = vld [vmem:[#allocation2 + $0x309] sm:$0xff] }
 0x3be   :  { %696 = vrot.lane.b32.xlu1 %v14131_v36, %s11576_s21 }
 0x3bf   :  { %11424 = vmatmul.mubr.msk.bf16.gmra.mrb[44].mxu0 %vm3638_vm1, %v3622_v19  ;;  %v1068_v48 = vpop.permute.xlu0 %1067 }
 0x3c0   :  { %1210 = vst.msk [vmem:[#allocation3 + $0x190] sm:$0xff] %vm1159_vm9, %v1068_v48  ;;  %v1070_v37 = vpop.permute.xlu1 %1069 }
 0x3c1   :  { %1211 = vst.msk [vmem:[#allocation3 + $0x198] sm:$0xff] %vm1159_vm9, %v1070_v37  ;;  %3386 = vrot.lane.b32.xlu0 %v14224_v6, %s11583_s25 }
 0x3c2   :  { %3388 = vrot.lane.b32.xlu1 %v14227_v8, %s11583_s25 }
 0x3c3   :  { %v1449_v59 = vpop.permute.xlu0 %1448 }
 0x3c4   :  { %1593 = vst.msk [vmem:[#allocation3 + $0x180] sm:$0xff] %vm1544_vm10, %v1449_v59  ;;  %v1451_v36 = vpop.permute.xlu1 %1450 }
 0x3c5   :  { %1594 = vst.msk [vmem:[#allocation3 + $0x188] sm:$0xff] %vm1544_vm10, %v1451_v36  ;;  %698 = vrot.lane.b32.xlu0 %v14195_v21, %s11576_s21 }
 0x3c6   :  { %700 = vrot.lane.b32.xlu1 %v14197_v7, %s11576_s21 }
 0x3c7   :  { %v1453_v16 = vpop.permute.xlu0 %1452 }
 0x3c8   :  { %1595 = vst.msk [vmem:[#allocation3 + $0x190] sm:$0xff] %vm1544_vm10, %v1453_v16  ;;  %v1455_v4 = vpop.permute.xlu1 %1454 }
 0x3c9   :  { %1596 = vst.msk [vmem:[#allocation3 + $0x198] sm:$0xff] %vm1544_vm10, %v1455_v4  ;;  %1079 = vrot.lane.b32.xlu0 %v14151_v31, %s11575_s20 }
 0x3ca   :  { %1081 = vrot.lane.b32.xlu1 %v14155_v28, %s11575_s20  ;;  %v14259_v28 = vld [vmem:[#allocation2 + $0x300] sm:$0xff] }
 0x3cb   :  { %v1834_v53 = vpop.permute.xlu0 %1833 }
 0x3cc   :  { %1978 = vst.msk [vmem:[#allocation3 + $0x180] sm:$0xff] %vm16059_vm11, %v1834_v53  ;;  %v1836_v23 = vpop.permute.xlu1 %1835 }
 0x3cd   :  { %1979 = vst.msk [vmem:[#allocation3 + $0x188] sm:$0xff] %vm16059_vm11, %v1836_v23  ;;  %1083 = vrot.lane.b32.xlu0 %v14224_v6, %s11575_s20 }
 0x3ce   :  { %1085 = vrot.lane.b32.xlu1 %v14227_v8, %s11575_s20 }
 0x3cf   :  { %v1838_v20 = vpop.permute.xlu0 %1837 }
 0x3d0   :  { %1980 = vst.msk [vmem:[#allocation3 + $0x190] sm:$0xff] %vm16059_vm11, %v1838_v20  ;;  %v1840_v51 = vpop.permute.xlu1 %1839 }
 0x3d1   :  { %1981 = vst.msk [vmem:[#allocation3 + $0x198] sm:$0xff] %vm16059_vm11, %v1840_v51  ;;  %1464 = vrot.lane.b32.xlu0 %v13848_v9, %s16066_s22 }
 0x3d2   :  { %1466 = vrot.lane.b32.xlu1 %v13851_v47, %s16066_s22  ;;  %v11413_v31 = vpop.f32.mrb[32].mxu0 }
 0x3d3   :  { %v3913_v45 = vadd.f32 %v13912_v14, %v11413_v31  ;;  %v3904_v29 = vpop.f32.mrb[33].mxu0  ;;  %v2219_v61 = vpop.permute.xlu0 %2218 }
 0x3d4   :  { %v3905_v35 = vadd.f32 %v13912_v14, %v3904_v29  ;;  %2363 = vst.msk [vmem:[#allocation3 + $0x180] sm:$0xff] %vm16150_vm4, %v2219_v61  ;;  %v2221_v26 = vpop.permute.xlu1 %2220  ;;  %v11414_v55 = vpop.f32.mrb[34].mxu0 }
 0x3d5   :  { %v4065_v43 = vmax.f32 %v3913_v45, 0.0  ;;  %2364 = vst.msk [vmem:[#allocation3 + $0x188] sm:$0xff] %vm16151_vm12, %v2221_v26  ;;  %v3916_v9 = vadd.f32 %v13912_v14, %v11414_v55  ;;  %v3907_v47 = vpop.f32.mrb[35].mxu0  ;;  %1468 = vrot.lane.b32.xlu0 %v14259_v28, %s16066_s22  ;;  %vm16153_vm12 = vcmask 171152  }
 0x3d6   :  { %v4063_v15 = vmax.f32 %v3905_v35, 0.0  ;;  %v3908_v63 = vadd.f32 %v13912_v14, %v3907_v47  ;;  %1470 = vrot.lane.b32.xlu1 %v14262_v49, %s16066_s22 }
 0x3d7   :  { %v4737_v54 = vcombine.high %v4065_v43, %v4065_v43  ;;  %v4744_v30 = vrot.slane %v4065_v43, %v12830_v24  ;;  %v4066_v34 = vmax.f32 %v3916_v9, 0.0  ;;  %v2223_v42 = vpop.permute.xlu0 %2222 }
 0x3d8   :  { %v4703_v62 = vcombine.high %v4063_v15, %v4063_v15  ;;  %v4710_v12 = vrot.slane %v4063_v15, %v12830_v24  ;;  %v14275_v56 = vmax.f32 %v3908_v63, 0.0  ;;  %2365 = vst.msk [vmem:[#allocation3 + $0x190] sm:$0xff] %vm16152_vm13, %v2223_v42  ;;  %v2225_v58 = vpop.permute.xlu1 %2224  ;;  %vm16154_vm13 = vmmov %vm16153_vm12 }
 0x3d9   :  { %v4751_v39 = vrot.slane %v4737_v54, %v12830_v24  ;;  %v4752_v0 = vcombine.high %v4744_v30, %v4744_v30  ;;  %v11044_v14 = vrot.slane %v4744_v30, 9  ;;  %v4754_v13 = vcombine.high %v4066_v34, %v4066_v34  ;;  %2366 = vst.msk [vmem:[#allocation3 + $0x198] sm:$0xff] %vm16150_vm4, %v2225_v58  ;;  %1849 = vrot.lane.b32.xlu0 %v14195_v21, %s16067_s24  ;;  %vm16155_vm4 = vmmov %vm16153_vm12 }
 0x3da   :  { %v4717_v50 = vrot.slane %v4703_v62, %v12830_v24  ;;  %v4718_v5 = vcombine.high %v4710_v12, %v4710_v12  ;;  %v10916_v2 = vrot.slane %v4710_v12, 9  ;;  %v4761_v22 = vrot.slane %v4066_v34, %v12830_v24  ;;  %1851 = vrot.lane.b32.xlu1 %v14197_v7, %s16067_s24 }
 0x3db   :  { %v4753_v38 = vcombine.high %v4751_v39, %v4751_v39  ;;  %v11045_v40 = vrot.slane %v4752_v0, 9  ;;  %v11046_v33 = vrot.slane %v4751_v39, 9  ;;  %v6463_v25 = vmax.f32 %v4744_v30, %v11044_v14  ;;  %v2605_v52 = vpop.permute.xlu0 %2604  ;;  %v14308_v30 = vld [vmem:[#allocation2 + $0x302] sm:$0xff] }
 0x3dc   :  { %v4719_v32 = vcombine.high %v4717_v50, %v4717_v50  ;;  %v10917_v21 = vrot.slane %v4718_v5, 9  ;;  %v10918_v57 = vrot.slane %v4717_v50, 9  ;;  %v5951_v19 = vmax.f32 %v4710_v12, %v10916_v2  ;;  %2749 = vst.msk [vmem:[#allocation3 + $0x180] sm:$0xff] %vm16153_vm12, %v2605_v52  ;;  %v2607_v48 = vpop.permute.xlu1 %2606  ;;  %vm16156_vm12 = vmmov %vm16155_vm4  ;;  %v14312_v12 = vld [vmem:[#allocation2 + $0x30a] sm:$0xff] }
 0x3dd   :  { %v11047_v37 = vrot.slane %v4753_v38, 9  ;;  %v6464_v59 = vmax.f32 %v4752_v0, %v11045_v40  ;;  %v6465_v36 = vmax.f32 %v4751_v39, %v11046_v33  ;;  %v4768_v7 = vrot.slane %v4754_v13, %v12830_v24  ;;  %2750 = vst.msk [vmem:[#allocation3 + $0x188] sm:$0xff] %vm16154_vm13, %v2607_v48  ;;  %1853 = vrot.lane.b32.xlu0 %v14286_v11, %s16067_s24 }
 0x3de   :  { %v10919_v16 = vrot.slane %v4719_v32, 9  ;;  %v5952_v4 = vmax.f32 %v4718_v5, %v10917_v21  ;;  %v5953_v53 = vmax.f32 %v4717_v50, %v10918_v57  ;;  %v6591_v23 = vmax.f32 %v5951_v19, %v6463_v25  ;;  %1855 = vrot.lane.b32.xlu1 %v14288_v44, %s16067_s24 }
 0x3df   :  { %v6466_v20 = vmax.f32 %v4753_v38, %v11047_v37  ;;  %v4769_v51 = vcombine.high %v4761_v22, %v4761_v22  ;;  %v2609_v31 = vpop.permute.xlu0 %2608  ;;  %v4770_v35 = vcombine.high %v4768_v7, %v4768_v7  ;;  %v11048_v43 = vrot.slane %v4761_v22, 9 }
 0x3e0   :  { %v5954_v45 = vmax.f32 %v4719_v32, %v10919_v16  ;;  %v6592_v29 = vmax.f32 %v5952_v4, %v6464_v59  ;;  %v6593_v61 = vmax.f32 %v5953_v53, %v6465_v36  ;;  %2751 = vst.msk [vmem:[#allocation3 + $0x190] sm:$0xff] %vm16155_vm4, %v2609_v31  ;;  %v2611_v26 = vpop.permute.xlu1 %2610  ;;  %v7201_v55 = vrot.slane %v6591_v23, %v12857_v41 }
 0x3e1   :  { %v11050_v9 = vrot.slane %v4768_v7, 9  ;;  %2752 = vst.msk [vmem:[#allocation3 + $0x198] sm:$0xff] %vm16156_vm12, %v2611_v26  ;;  %2234 = vrot.lane.b32.xlu0 %v14224_v6, %s16068_s28  ;;  %v4720_v54 = vcombine.high %v14275_v56, %v14275_v56  ;;  %v11049_v34 = vrot.slane %v4769_v51, 9  ;;  %v4727_v42 = vrot.slane %v14275_v56, %v12830_v24  ;;  %v14352_v26 = vld [vmem:[#allocation2 + $0x319] sm:$0xff] }
 0x3e2   :  { %v6594_v47 = vmax.f32 %v5954_v45, %v6466_v20  ;;  %v7205_v15 = vrot.slane %v6592_v29, %v12857_v41  ;;  %v7209_v63 = vrot.slane %v6593_v61, %v12857_v41  ;;  %2236 = vrot.lane.b32.xlu1 %v14227_v8, %s16068_s28  ;;  %vm16157_vm13 = vcmask 1041409  }
 0x3e3   :  { %v2990_v62 = vpop.permute.xlu0 %2989  ;;  %v11051_v39 = vrot.slane %v4770_v35, 9  ;;  %v4734_v0 = vrot.slane %v4720_v54, %v12830_v24  ;;  %vm16158_vm4 = vcmask 195752   ;;  %v6467_v13 = vmax.f32 %v4761_v22, %v11048_v43  ;;  %v387_v43 = vld [vmem:[#allocation2 + $0x308] sm:$0xff] }
 0x3e4   :  { %v7213_v6 = vrot.slane %v6594_v47, %v12857_v41  ;;  %v7517_v58 = vsel %vm16157_vm13, %v7205_v15, %v7201_v55  ;;  %3134 = vst.msk [vmem:[#allocation3 + $0x180] sm:$0xff] %vm16158_vm4, %v2990_v62  ;;  %v2992_v14 = vpop.permute.xlu1 %2991  ;;  %v4735_v50 = vcombine.high %v4727_v42, %v4727_v42  ;;  %v10920_v5 = vrot.slane %v4727_v42, 9  ;;  %vm16159_vm12 = vmmov %vm16158_vm4  ;;  %v386_v55 = vld [vmem:[#allocation2 + $0x300] sm:$0xff] }
 0x3e5   :  { %v7518_v8 = vsel %vm7456_vm5, %v7209_v63, %v7517_v58  ;;  %3135 = vst.msk [vmem:[#allocation3 + $0x188] sm:$0xff] %vm16159_vm12, %v2992_v14  ;;  %2238 = vrot.lane.b32.xlu0 %v14308_v30, %s16068_s28  ;;  %v6469_v56 = vmax.f32 %v4768_v7, %v11050_v9  ;;  %v4736_v2 = vcombine.high %v4734_v0, %v4734_v0  ;;  %v10922_v38 = vrot.slane %v4734_v0, 9  ;;  %vm16161_vm12 = vmmov %vm16158_vm4  ;;  %v14354_v47 = vld [vmem:[#allocation2 + $0x321] sm:$0xff] }
 0x3e6   :  { %vm16160_vm13 = vcmask 1043459   ;;  %2240 = vrot.lane.b32.xlu1 %v14312_v12, %s16068_s28  ;;  %v6468_v33 = vmax.f32 %v4769_v51, %v11049_v34  ;;  %v10921_v25 = vrot.slane %v4735_v50, 9  ;;  %v5955_v52 = vmax.f32 %v4727_v42, %v10920_v5  ;;  %450 = vst.msk [vmem:[#allocation3 + $0x1e0] sm:$0xff] %vm151_vm0, %v386_v55  ;;  %451 = vst.msk [vmem:[#allocation3 + $0x1e8] sm:$0xff] %vm151_vm0, %v387_v43  ;;  %v14384_v5 = vld [vmem:[#allocation2 + $0x322] sm:$0xff] }
 0x3e7   :  { %v7519_v40 = vsel %vm16160_vm13, %v7213_v6, %v7518_v8  ;;  %v2994_v32 = vpop.permute.xlu0 %2993  ;;  %v6470_v22 = vmax.f32 %v4770_v35, %v11051_v39  ;;  %v10923_v21 = vrot.slane %v4736_v2, 9  ;;  %v5957_v57 = vmax.f32 %v4734_v0, %v10922_v38 }
 0x3e8   :  { %3136 = vst.msk [vmem:[#allocation3 + $0x190] sm:$0xff] %vm16158_vm4, %v2994_v32  ;;  %v2996_v19 = vpop.permute.xlu1 %2995  ;;  %v5956_v48 = vmax.f32 %v4735_v50, %v10921_v25  ;;  %v6595_v37 = vmax.f32 %v5955_v52, %v6467_v13  ;;  %v14381_v13 = vld [vmem:[#allocation2 + $0x31a] sm:$0xff]  ;;  %vm16162_vm0 = vcmask 146552  }
 0x3e9   :  { %3137 = vst.msk [vmem:[#allocation3 + $0x198] sm:$0xff] %vm16161_vm12, %v2996_v19  ;;  %2620 = vrot.lane.b32.xlu0 %v14259_v28, %s16069_s27  ;;  %v5958_v59 = vmax.f32 %v4736_v2, %v10923_v21  ;;  %v6597_v36 = vmax.f32 %v5957_v57, %v6469_v56  ;;  %v14421_v32 = vld [vmem:[%s16027_s3] ss:$0 sm:$0xff]  ;;  %v14424_v19 = vld [vmem:[#allocation2 + $0x338] sm:$0xff]  ;;  %vm16163_vm13 = vmmov %vm16162_vm0 }
 0x3ea   :  { %2622 = vrot.lane.b32.xlu1 %v14262_v49, %s16069_s27  ;;  %v6596_v7 = vmax.f32 %v5956_v48, %v6468_v33  ;;  %v7217_v16 = vrot.slane %v6595_v37, %v12857_v41  ;;  %vm16164_vm4 = vmmov %vm16162_vm0 }
 0x3eb   :  { %v3375_v4 = vpop.permute.xlu0 %3374  ;;  %v6598_v53 = vmax.f32 %v5958_v59, %v6470_v22  ;;  %v7225_v28 = vrot.slane %v6597_v36, %v12857_v41  ;;  %vm16165_vm12 = vmmov %vm16162_vm0 }
 0x3ec   :  { %3519 = vst.msk [vmem:[#allocation3 + $0x180] sm:$0xff] %vm3470_vm15, %v3375_v4  ;;  %v3377_v23 = vpop.permute.xlu1 %3376  ;;  %v7221_v20 = vrot.slane %v6596_v7, %v12857_v41  ;;  %v7520_v51 = vsel %vm7460_vm7, %v7217_v16, %v7519_v40 }
 0x3ed   :  { %3520 = vst.msk [vmem:[#allocation3 + $0x188] sm:$0xff] %vm3470_vm15, %v3377_v23  ;;  %2624 = vrot.lane.b32.xlu0 %v14033_v3, %s16069_s27  ;;  %v7229_v49 = vrot.slane %v6598_v53, %v12857_v41 }
 0x3ee   :  { %2626 = vrot.lane.b32.xlu1 %v14036_v27, %s16069_s27  ;;  %v7521_v31 = vsel %vm7462_vm3, %v7221_v20, %v7520_v51 }
 0x3ef   :  { %v687_v45 = vpop.permute.xlu0 %686  ;;  %v7522_v29 = vsel %vm7464_vm6, %v7225_v28, %v7521_v31 }
 0x3f0   :  { %827 = vst.msk [vmem:[#allocation3 + $0x1a0] sm:$0xff] %vm774_vm8, %v687_v45  ;;  %v689_v61 = vpop.permute.xlu1 %688  ;;  %v7523_v35 = vsel %vm7466_vm14, %v7229_v49, %v7522_v29 }
 0x3f1   :  { %828 = vst.msk [vmem:[#allocation3 + $0x1a8] sm:$0xff] %vm774_vm8, %v689_v61  ;;  %3005 = vrot.lane.b32.xlu0 %v14286_v11, %s11581_s30 }
 0x3f2   :  { %7598 = vst.msk [vmem:[#allocation4 + $0xb1] sm:$0xff] %vm6772_vm2, %v7523_v35  ;;  %3007 = vrot.lane.b32.xlu1 %v14288_v44, %s11581_s30 }
 0x3f3   :  { %v3379_v9 = vpop.permute.xlu0 %3378  ;;  %v3583_v15 = vld [vmem:[#allocation3 + $0x180] sm:$0xff] }
 0x3f4   :  { %3521 = vst.msk [vmem:[#allocation3 + $0x190] sm:$0xff] %vm3470_vm15, %v3379_v9  ;;  %v3381_v63 = vpop.permute.xlu1 %3380  ;;  %v3584_v54 = vld [vmem:[#allocation3 + $0x188] sm:$0xff] }
 0x3f5   :  { %3522 = vst.msk [vmem:[#allocation3 + $0x198] sm:$0xff] %vm3470_vm15, %v3381_v63  ;;  %3009 = vrot.lane.b32.xlu0 %v14352_v26, %s11581_s30  ;;  %v3623_v34 = vpack.c.bf16 %v3584_v54, %v3583_v15  ;;  %v14448_v63 = vld [vmem:[#allocation2 + $0x331] sm:$0xff] }
 0x3f6   :  { %3011 = vrot.lane.b32.xlu1 %v14354_v47, %s11581_s30 }
 0x3f7   :  { %11427 = vmatprep.mubr.msk.bf16.mxu0 %vm3638_vm1, %v3623_v34  ;;  %v691_v42 = vpop.permute.xlu0 %690 }
 0x3f8   :  { %829 = vst.msk [vmem:[#allocation3 + $0x1b0] sm:$0xff] %vm774_vm8, %v691_v42  ;;  %v693_v62 = vpop.permute.xlu1 %692 }
 0x3f9   :  { %830 = vst.msk [vmem:[#allocation3 + $0x1b8] sm:$0xff] %vm774_vm8, %v693_v62  ;;  %3390 = vrot.lane.b32.xlu0 %v14308_v30, %s11583_s25  ;;  %v14369_v6 = vld [vmem:[#allocation4 + $0xb0] sm:$0xff] }
 0x3fa   :  { %3392 = vrot.lane.b32.xlu1 %v14312_v12, %s11583_s25  ;;  %7631 = vst.msk [vmem:[#allocation5 + $0x90] sm:$0xff] %vm6772_vm2, %v14369_v6 }
 0x3fb   :  { %v1072_v58 = vpop.permute.xlu0 %1071  ;;  %v3585_v39 = vld [vmem:[#allocation3 + $0x190] sm:$0xff] }
 0x3fc   :  { %1212 = vst.msk [vmem:[#allocation3 + $0x1a0] sm:$0xff] %vm1159_vm9, %v1072_v58  ;;  %v1074_v0 = vpop.permute.xlu1 %1073  ;;  %v3586_v14 = vld [vmem:[#allocation3 + $0x198] sm:$0xff] }
 0x3fd   :  { %1213 = vst.msk [vmem:[#allocation3 + $0x1a8] sm:$0xff] %vm1159_vm9, %v1074_v0  ;;  %702 = vrot.lane.b32.xlu0 %v14286_v11, %s11576_s21  ;;  %v3624_v8 = vpack.c.bf16 %v3586_v14, %v3585_v39  ;;  %v14450_v39 = vld [vmem:[#allocation2 + $0x339] sm:$0xff] }
 0x3fe   :  { %704 = vrot.lane.b32.xlu1 %v14288_v44, %s11576_s21 }
 0x3ff   :  { %11428 = vmatmul.mubr.msk.bf16.gmra.mrb[48].mxu0 %vm3638_vm1, %v3624_v8  ;;  %v1076_v50 = vpop.permute.xlu0 %1075 }
 0x400   :  { %1214 = vst.msk [vmem:[#allocation3 + $0x1b0] sm:$0xff] %vm1159_vm9, %v1076_v50  ;;  %v1078_v56 = vpop.permute.xlu1 %1077 }
 0x401   :  { %1215 = vst.msk [vmem:[#allocation3 + $0x1b8] sm:$0xff] %vm1159_vm9, %v1078_v56  ;;  %3394 = vrot.lane.b32.xlu0 %v14381_v13, %s11583_s25 }
 0x402   :  { %3396 = vrot.lane.b32.xlu1 %v14384_v5, %s11583_s25 }
 0x403   :  { %v1457_v11 = vpop.permute.xlu0 %1456 }
 0x404   :  { %1597 = vst.msk [vmem:[#allocation3 + $0x1a0] sm:$0xff] %vm1544_vm10, %v1457_v11  ;;  %v1459_v44 = vpop.permute.xlu1 %1458 }
 0x405   :  { %1598 = vst.msk [vmem:[#allocation3 + $0x1a8] sm:$0xff] %vm1544_vm10, %v1459_v44  ;;  %706 = vrot.lane.b32.xlu0 %v14352_v26, %s11576_s21 }
 0x406   :  { %708 = vrot.lane.b32.xlu1 %v14354_v47, %s11576_s21  ;;  %s11587_s21 = smov 32  }
 0x407   :  { %v1461_v2 = vpop.permute.xlu0 %1460 }
 0x408   :  { %1599 = vst.msk [vmem:[#allocation3 + $0x1b0] sm:$0xff] %vm1544_vm10, %v1461_v2  ;;  %v1463_v38 = vpop.permute.xlu1 %1462 }
 0x409   :  { %1600 = vst.msk [vmem:[#allocation3 + $0x1b8] sm:$0xff] %vm1544_vm10, %v1463_v38  ;;  %1087 = vrot.lane.b32.xlu0 %v14308_v30, %s11575_s20 }
 0x40a   :  { %1089 = vrot.lane.b32.xlu1 %v14312_v12, %s11575_s20  ;;  %v14416_v12 = vld [vmem:[#allocation2 + $0x330] sm:$0xff] }
 0x40b   :  { %v1842_v40 = vpop.permute.xlu0 %1841 }
 0x40c   :  { %1982 = vst.msk [vmem:[#allocation3 + $0x1a0] sm:$0xff] %vm16059_vm11, %v1842_v40  ;;  %v1844_v33 = vpop.permute.xlu1 %1843 }
 0x40d   :  { %1983 = vst.msk [vmem:[#allocation3 + $0x1a8] sm:$0xff] %vm16059_vm11, %v1844_v33  ;;  %1091 = vrot.lane.b32.xlu0 %v14381_v13, %s11575_s20 }
 0x40e   :  { %1093 = vrot.lane.b32.xlu1 %v14384_v5, %s11575_s20 }
 0x40f   :  { %v1846_v25 = vpop.permute.xlu0 %1845 }
 0x410   :  { %1984 = vst.msk [vmem:[#allocation3 + $0x1b0] sm:$0xff] %vm16059_vm11, %v1846_v25  ;;  %v1848_v52 = vpop.permute.xlu1 %1847 }
 0x411   :  { %1985 = vst.msk [vmem:[#allocation3 + $0x1b8] sm:$0xff] %vm16059_vm11, %v1848_v52  ;;  %1472 = vrot.lane.b32.xlu0 %v14033_v3, %s16066_s22 }
 0x412   :  { %1474 = vrot.lane.b32.xlu1 %v14036_v27, %s16066_s22  ;;  %v11417_v30 = vpop.f32.mrb[36].mxu0 }
 0x413   :  { %v3929_v22 = vadd.f32 %v14421_v32, %v11417_v30  ;;  %v3920_v21 = vpop.f32.mrb[37].mxu0  ;;  %v2227_v57 = vpop.permute.xlu0 %2226 }
 0x414   :  { %v3921_v48 = vadd.f32 %v14421_v32, %v3920_v21  ;;  %2367 = vst.msk [vmem:[#allocation3 + $0x1a0] sm:$0xff] %vm16162_vm0, %v2227_v57  ;;  %v2229_v3 = vpop.permute.xlu1 %2228  ;;  %v11418_v27 = vpop.f32.mrb[38].mxu0  ;;  %vm16166_vm0 = vcmask 171152  }
 0x415   :  { %v4069_v37 = vmax.f32 %v3929_v22, 0.0  ;;  %2368 = vst.msk [vmem:[#allocation3 + $0x1a8] sm:$0xff] %vm16163_vm13, %v2229_v3  ;;  %v3932_v59 = vadd.f32 %v14421_v32, %v11418_v27  ;;  %v3923_v36 = vpop.f32.mrb[39].mxu0  ;;  %1476 = vrot.lane.b32.xlu0 %v14416_v12, %s16066_s22  ;;  %vm16167_vm13 = vmmov %vm16166_vm0 }
 0x416   :  { %v4067_v7 = vmax.f32 %v3921_v48, 0.0  ;;  %v3924_v16 = vadd.f32 %v14421_v32, %v3923_v36  ;;  %1478 = vrot.lane.b32.xlu1 %v14424_v19, %s16066_s22  ;;  %s11591_s22 = smov 96  }
 0x417   :  { %v4805_v4 = vcombine.high %v4069_v37, %v4069_v37  ;;  %v4812_v53 = vrot.slane %v4069_v37, %v12830_v24  ;;  %v4070_v23 = vmax.f32 %v3932_v59, 0.0  ;;  %v2231_v20 = vpop.permute.xlu0 %2230 }
 0x418   :  { %v4771_v51 = vcombine.high %v4067_v7, %v4067_v7  ;;  %v4778_v28 = vrot.slane %v4067_v7, %v12830_v24  ;;  %v14437_v49 = vmax.f32 %v3924_v16, 0.0  ;;  %2369 = vst.msk [vmem:[#allocation3 + $0x1b0] sm:$0xff] %vm16164_vm4, %v2231_v20  ;;  %v2233_v31 = vpop.permute.xlu1 %2232  ;;  %vm16168_vm4 = vmmov %vm16166_vm0 }
 0x419   :  { %v4819_v45 = vrot.slane %v4805_v4, %v12830_v24  ;;  %v4820_v29 = vcombine.high %v4812_v53, %v4812_v53  ;;  %v11052_v61 = vrot.slane %v4812_v53, 9  ;;  %v4822_v35 = vcombine.high %v4070_v23, %v4070_v23  ;;  %2370 = vst.msk [vmem:[#allocation3 + $0x1b8] sm:$0xff] %vm16165_vm12, %v2233_v31  ;;  %1857 = vrot.lane.b32.xlu0 %v14352_v26, %s16067_s24  ;;  %vm16169_vm12 = vmmov %vm16166_vm0 }
 0x41a   :  { %v4785_v55 = vrot.slane %v4771_v51, %v12830_v24  ;;  %v4786_v43 = vcombine.high %v4778_v28, %v4778_v28  ;;  %v10924_v9 = vrot.slane %v4778_v28, 9  ;;  %v4829_v15 = vrot.slane %v4070_v23, %v12830_v24  ;;  %1859 = vrot.lane.b32.xlu1 %v14354_v47, %s16067_s24 }
 0x41b   :  { %v4821_v54 = vcombine.high %v4819_v45, %v4819_v45  ;;  %v11053_v34 = vrot.slane %v4820_v29, 9  ;;  %v11054_v42 = vrot.slane %v4819_v45, 9  ;;  %v6471_v62 = vmax.f32 %v4812_v53, %v11052_v61  ;;  %v2613_v58 = vpop.permute.xlu0 %2612  ;;  %v14470_v53 = vld [vmem:[#allocation2 + $0x332] sm:$0xff] }
 0x41c   :  { %v4787_v0 = vcombine.high %v4785_v55, %v4785_v55  ;;  %v10925_v26 = vrot.slane %v4786_v43, 9  ;;  %v10926_v14 = vrot.slane %v4785_v55, 9  ;;  %v5959_v8 = vmax.f32 %v4778_v28, %v10924_v9  ;;  %2753 = vst.msk [vmem:[#allocation3 + $0x1a0] sm:$0xff] %vm16166_vm0, %v2613_v58  ;;  %v2615_v50 = vpop.permute.xlu1 %2614  ;;  %v14474_v28 = vld [vmem:[#allocation2 + $0x33a] sm:$0xff] }
 0x41d   :  { %v11055_v56 = vrot.slane %v4821_v54, 9  ;;  %v6472_v11 = vmax.f32 %v4820_v29, %v11053_v34  ;;  %v6473_v44 = vmax.f32 %v4819_v45, %v11054_v42  ;;  %v4836_v47 = vrot.slane %v4822_v35, %v12830_v24  ;;  %2754 = vst.msk [vmem:[#allocation3 + $0x1a8] sm:$0xff] %vm16167_vm13, %v2615_v50  ;;  %1861 = vrot.lane.b32.xlu0 %v14448_v63, %s16067_s24 }
 0x41e   :  { %v10927_v2 = vrot.slane %v4787_v0, 9  ;;  %v5960_v38 = vmax.f32 %v4786_v43, %v10925_v26  ;;  %v5961_v40 = vmax.f32 %v4785_v55, %v10926_v14  ;;  %v6599_v33 = vmax.f32 %v5959_v8, %v6471_v62  ;;  %1863 = vrot.lane.b32.xlu1 %v14450_v39, %s16067_s24  ;;  %s11589_s24 = smov 64  }
 0x41f   :  { %v6474_v25 = vmax.f32 %v4821_v54, %v11055_v56  ;;  %v4837_v52 = vcombine.high %v4829_v15, %v4829_v15  ;;  %v2617_v30 = vpop.permute.xlu0 %2616  ;;  %v4838_v48 = vcombine.high %v4836_v47, %v4836_v47  ;;  %v11056_v37 = vrot.slane %v4829_v15, 9 }
 0x420   :  { %v5962_v22 = vmax.f32 %v4787_v0, %v10927_v2  ;;  %v6600_v21 = vmax.f32 %v5960_v38, %v6472_v11  ;;  %v6601_v57 = vmax.f32 %v5961_v40, %v6473_v44  ;;  %2755 = vst.msk [vmem:[#allocation3 + $0x1b0] sm:$0xff] %vm16168_vm4, %v2617_v30  ;;  %v2619_v3 = vpop.permute.xlu1 %2618  ;;  %v7233_v27 = vrot.slane %v6599_v33, %v12857_v41  ;;  %v2443_v33 = vld [vmem:[#allocation2 + $0x350] sm:$0xff] }
 0x421   :  { %v11058_v59 = vrot.slane %v4836_v47, 9  ;;  %2756 = vst.msk [vmem:[#allocation3 + $0x1b8] sm:$0xff] %vm16169_vm12, %v2619_v3  ;;  %2242 = vrot.lane.b32.xlu0 %v14381_v13, %s16068_s28  ;;  %v4788_v4 = vcombine.high %v14437_v49, %v14437_v49  ;;  %v11057_v23 = vrot.slane %v4837_v52, 9  ;;  %v4795_v20 = vrot.slane %v14437_v49, %v12830_v24 }
 0x422   :  { %v6602_v36 = vmax.f32 %v5962_v22, %v6474_v25  ;;  %v7237_v7 = vrot.slane %v6600_v21, %v12857_v41  ;;  %v7241_v16 = vrot.slane %v6601_v57, %v12857_v41  ;;  %2244 = vrot.lane.b32.xlu1 %v14384_v5, %s16068_s28  ;;  %vm16170_vm0 = vcmask 1041409  }
 0x423   :  { %v2998_v51 = vpop.permute.xlu0 %2997  ;;  %v11059_v45 = vrot.slane %v4838_v48, 9  ;;  %v4802_v29 = vrot.slane %v4788_v4, %v12830_v24  ;;  %vm16171_vm13 = vcmask 195752   ;;  %v6475_v35 = vmax.f32 %v4829_v15, %v11056_v37  ;;  %v2827_v37 = vld [vmem:[#allocation2 + $0x349] sm:$0xff]  ;;  %v6655_v4 = vld [vmem:[%s16029_s5] sm:$0xff] }
 0x424   :  { %v7245_v13 = vrot.slane %v6602_v36, %v12857_v41  ;;  %v7524_v31 = vsel %vm16170_vm0, %v7237_v7, %v7233_v27  ;;  %3138 = vst.msk [vmem:[#allocation3 + $0x1a0] sm:$0xff] %vm16171_vm13, %v2998_v51  ;;  %v3000_v61 = vpop.permute.xlu1 %2999  ;;  %v4803_v55 = vcombine.high %v4795_v20, %v4795_v20  ;;  %v10928_v43 = vrot.slane %v4795_v20, 9  ;;  %vm16172_vm4 = vmmov %vm16171_vm13 }
 0x425   :  { %v7525_v5 = vsel %vm7456_vm5, %v7241_v16, %v7524_v31  ;;  %3139 = vst.msk [vmem:[#allocation3 + $0x1a8] sm:$0xff] %vm16172_vm4, %v3000_v61  ;;  %2246 = vrot.lane.b32.xlu0 %v14470_v53, %s16068_s28  ;;  %v6477_v49 = vmax.f32 %v4836_v47, %v11058_v59  ;;  %v4804_v9 = vcombine.high %v4802_v29, %v4802_v29  ;;  %v10930_v54 = vrot.slane %v4802_v29, 9  ;;  %vm16174_vm0 = vmmov %vm16172_vm4  ;;  %v2442_v47 = vld [vmem:[#allocation2 + $0x348] sm:$0xff]  ;;  %v2828_v59 = vld [vmem:[#allocation2 + $0x351] sm:$0xff] }
 0x426   :  { %vm16173_vm12 = vcmask 1043459   ;;  %2248 = vrot.lane.b32.xlu1 %v14474_v28, %s16068_s28  ;;  %v6476_v42 = vmax.f32 %v4837_v52, %v11057_v23  ;;  %v10929_v62 = vrot.slane %v4803_v55, 9  ;;  %v5963_v58 = vmax.f32 %v4795_v20, %v10928_v43  ;;  %vm16175_vm13 = vmmov %vm16174_vm0  ;;  %v6658_v43 = vld [vmem:[%s16029_s5 + $0x18] sm:$0xff]  ;;  %s11586_s28 = smov 16  }
 0x427   :  { %v7526_v34 = vsel %vm16173_vm12, %v7245_v13, %v7525_v5  ;;  %v3002_v0 = vpop.permute.xlu0 %3001  ;;  %v6478_v15 = vmax.f32 %v4838_v48, %v11059_v45  ;;  %v10931_v26 = vrot.slane %v4804_v9, 9  ;;  %v5965_v14 = vmax.f32 %v4802_v29, %v10930_v54  ;;  %v6728_v45 = vld [vmem:[%s16028_s4 + $0x8] sm:$0xff]  ;;  %v7606_v29 = vld [vmem:[#allocation4] sm:$0xff] }
 0x428   :  { %3140 = vst.msk [vmem:[#allocation3 + $0x1b0] sm:$0xff] %vm16174_vm0, %v3002_v0  ;;  %v3004_v8 = vpop.permute.xlu1 %3003  ;;  %v5964_v50 = vmax.f32 %v4803_v55, %v10929_v62  ;;  %v6603_v56 = vmax.f32 %v5963_v58, %v6475_v35  ;;  %v11585_v16 = vmov 0   ;;  %vm6673_vm4 = vcmp.gt.f32.partialorder %v6655_v4, 0.005  ;;  %v6657_v55 = vld [vmem:[%s16029_s5 + $0x10] sm:$0xff] }
 0x429   :  { %3141 = vst.msk [vmem:[#allocation3 + $0x1b8] sm:$0xff] %vm16175_vm13, %v3004_v8  ;;  %2628 = vrot.lane.b32.xlu0 %v14416_v12, %s16069_s27  ;;  %v5966_v11 = vmax.f32 %v4804_v9, %v10931_v26  ;;  %v6605_v44 = vmax.f32 %v5965_v14, %v6477_v49  ;;  %8429 = vmatprep.subr.bf16.mxu1 %v11585_v16  ;;  %v11108_v13 = vsel %vm6673_vm4, 1.0, %v11574_v1  ;;  %v6729_v49 = vld [vmem:[%s16028_s4 + $0x10] sm:$0xff]  ;;  %vm6675_vm0 = vcmp.gt.f32.partialorder %v6657_v55, 0.005 }
 0x42a   :  { %2630 = vrot.lane.b32.xlu1 %v14424_v19, %s16069_s27  ;;  %v6604_v2 = vmax.f32 %v5964_v50, %v6476_v42  ;;  %v7249_v38 = vrot.slane %v6603_v56, %v12857_v41  ;;  %7622 = vst.msk [vmem:[#allocation5] sm:$0xff] %vm6772_vm2, %v7606_v29  ;;  %vm6676_vm13 = vcmp.gt.f32.partialorder %v6658_v43, 0.005  ;;  %v11110_v42 = vsel %vm6675_vm0, 1.0, %v11574_v1  ;;  %v3212_v0 = vld [vmem:[#allocation2 + $0x34a] sm:$0xff]  ;;  %v6659_v56 = vld [vmem:[%s16029_s5 + $0x20] sm:$0xff] }
 0x42b   :  { %v3383_v40 = vpop.permute.xlu0 %3382  ;;  %v6606_v25 = vmax.f32 %v5966_v11, %v6478_v15  ;;  %v7257_v12 = vrot.slane %v6605_v44, %v12857_v41  ;;  %v11111_v62 = vsel %vm6676_vm13, 1.0, %v11574_v1  ;;  %v3213_v15 = vld [vmem:[#allocation2 + $0x352] sm:$0xff]  ;;  %v6747_v26 = vmul.f32 %v11110_v42, %v6729_v49 }
 0x42c   :  { %3523 = vst.msk [vmem:[#allocation3 + $0x1a0] sm:$0xff] %vm3470_vm15, %v3383_v40  ;;  %v3385_v52 = vpop.permute.xlu1 %3384  ;;  %v7253_v30 = vrot.slane %v6604_v2, %v12857_v41  ;;  %v7527_v22 = vsel %vm7460_vm7, %v7249_v38, %v7526_v34  ;;  %v6730_v34 = vld [vmem:[%s16028_s4 + $0x18] sm:$0xff]  ;;  %vm6677_vm4 = vcmp.gt.f32.partialorder %v6659_v56, 0.005  ;;  %v6731_v2 = vld [vmem:[%s16028_s4 + $0x20] sm:$0xff]  ;;  %v6665_v43 = vld [vmem:[%s16029_s5 + $0x50] sm:$0xff] }
 0x42d   :  { %3524 = vst.msk [vmem:[#allocation3 + $0x1a8] sm:$0xff] %vm3470_vm15, %v3385_v52  ;;  %2632 = vrot.lane.b32.xlu0 %v2442_v47, %s16069_s27  ;;  %v7261_v19 = vrot.slane %v6606_v25, %v12857_v41  ;;  %v6748_v14 = vmul.f32 %v11111_v62, %v6730_v34  ;;  %v7638_v40 = vld [vmem:[#allocation4 + $0x1] sm:$0xff]  ;;  %v6666_v49 = vld [vmem:[%s16029_s5 + $0x58] sm:$0xff] }
 0x42e   :  { %2634 = vrot.lane.b32.xlu1 %v2443_v33, %s16069_s27  ;;  %v7528_v21 = vsel %vm7462_vm3, %v7253_v30, %v7527_v22  ;;  %v11112_v33 = vsel %vm6677_vm4, 1.0, %v11574_v1  ;;  %v6732_v52 = vld [vmem:[%s16028_s4 + $0x28] sm:$0xff]  ;;  %v6738_v42 = vld [vmem:[%s16028_s4 + $0x58] sm:$0xff]  ;;  %v6739_v56 = vld [vmem:[%s16028_s4 + $0x60] sm:$0xff] }
 0x42f   :  { %v695_v57 = vpop.permute.xlu0 %694  ;;  %v7529_v48 = vsel %vm7464_vm6, %v7257_v12, %v7528_v21  ;;  %v6764_v47 = vpack.c.bf16 %v6748_v14, %v6747_v26  ;;  %v6749_v30 = vmul.f32 %v11112_v33, %v6731_v2  ;;  %v6661_v12 = vld [vmem:[%s16029_s5 + $0x30] sm:$0xff]  ;;  %v7833_v26 = vld [vmem:[#allocation4 + $0x20] sm:$0xff] }
 0x430   :  { %831 = vst.msk [vmem:[#allocation3 + $0x1c0] sm:$0xff] %vm774_vm8, %v695_v57  ;;  %v697_v3 = vpop.permute.xlu1 %696  ;;  %v7530_v27 = vsel %vm7466_vm14, %v7261_v19, %v7529_v48  ;;  %v6662_v19 = vld [vmem:[%s16029_s5 + $0x38] sm:$0xff]  ;;  %v6733_v21 = vld [vmem:[%s16028_s4 + $0x30] sm:$0xff]  ;;  %vm6679_vm0 = vcmp.gt.f32.partialorder %v6661_v12, 0.005 }
 0x431   :  { %832 = vst.msk [vmem:[#allocation3 + $0x1c8] sm:$0xff] %vm774_vm8, %v697_v3  ;;  %3013 = vrot.lane.b32.xlu0 %v14448_v63, %s11581_s30  ;;  %v6656_v63 = vld [vmem:[%s16029_s5 + $0x8] sm:$0xff]  ;;  %vm6680_vm13 = vcmp.gt.f32.partialorder %v6662_v19, 0.005  ;;  %v6734_v48 = vld [vmem:[%s16028_s4 + $0x38] sm:$0xff] }
 0x432   :  { %7599 = vst.msk [vmem:[#allocation4 + $0xc1] sm:$0xff] %vm6772_vm2, %v7530_v27  ;;  %3015 = vrot.lane.b32.xlu1 %v14450_v39, %s11581_s30  ;;  %vm6674_vm12 = vcmp.gt.f32.partialorder %v6656_v63, 0.005  ;;  %v6727_v39 = vld [vmem:[%s16028_s4] sm:$0xff]  ;;  %v6742_v19 = vld [vmem:[%s16028_s4 + $0x78] sm:$0xff] }
 0x433   :  { %v3387_v36 = vpop.permute.xlu0 %3386  ;;  %v3587_v7 = vld [vmem:[#allocation3 + $0x1a0] sm:$0xff]  ;;  %v11109_v31 = vsel %vm6674_vm12, 1.0, %v11574_v1  ;;  %v6745_v61 = vmul.f32 %v11108_v13, %v6727_v39 }
 0x434   :  { %3525 = vst.msk [vmem:[#allocation3 + $0x1b0] sm:$0xff] %vm3470_vm15, %v3387_v36  ;;  %v3389_v23 = vpop.permute.xlu1 %3388  ;;  %v3588_v20 = vld [vmem:[#allocation3 + $0x1a8] sm:$0xff]  ;;  %v6746_v5 = vmul.f32 %v11109_v31, %v6728_v45  ;;  %v7639_v36 = vld [vmem:[#allocation4 + $0x11] sm:$0xff]  ;;  %v6735_v39 = vld [vmem:[%s16028_s4 + $0x40] sm:$0xff] }
 0x435   :  { %3526 = vst.msk [vmem:[#allocation3 + $0x1b8] sm:$0xff] %vm3470_vm15, %v3389_v23  ;;  %3017 = vrot.lane.b32.xlu0 %v2827_v37, %s11581_s30  ;;  %v3625_v51 = vpack.c.bf16 %v3588_v20, %v3587_v7  ;;  %v11114_v37 = vsel %vm6679_vm0, 1.0, %v11574_v1  ;;  %v7735_v7 = vld [vmem:[#allocation4 + $0x2] sm:$0xff]  ;;  %vm6683_vm0 = vcmp.gt.f32.partialorder %v6665_v43, 0.005 }
 0x436   :  { %3019 = vrot.lane.b32.xlu1 %v2828_v59, %s11581_s30  ;;  %v6763_v54 = vpack.c.bf16 %v6746_v5, %v6745_v61  ;;  %v11115_v59 = vsel %vm6680_vm13, 1.0, %v11574_v1  ;;  %v6751_v4 = vmul.f32 %v11114_v37, %v6733_v21  ;;  %v6663_v23 = vld [vmem:[%s16029_s5 + $0x40] sm:$0xff]  ;;  %v6664_v20 = vld [vmem:[%s16029_s5 + $0x48] sm:$0xff]  ;;  %v7736_v5 = vld [vmem:[#allocation4 + $0x12] sm:$0xff]  ;;  %vm6684_vm13 = vcmp.gt.f32.partialorder %v6666_v49, 0.005 }
 0x437   :  { %11431 = vmatprep.mubr.msk.bf16.mxu0 %vm3638_vm1, %v3625_v51  ;;  %v699_v35 = vpop.permute.xlu0 %698  ;;  %v6752_v63 = vmul.f32 %v11115_v59, %v6734_v48  ;;  %vm6681_vm4 = vcmp.gt.f32.partialorder %v6663_v23, 0.005  ;;  %v6736_v31 = vld [vmem:[%s16028_s4 + $0x48] sm:$0xff]  ;;  %s11590_s30 = smov 80  }
 0x438   :  { %833 = vst.msk [vmem:[#allocation3 + $0x1d0] sm:$0xff] %vm774_vm8, %v699_v35  ;;  %v701_v9 = vpop.permute.xlu1 %700  ;;  %8430 = vmatpush1.bf16.msra.mxu1 %v6763_v54  ;;  %v11116_v29 = vsel %vm6681_vm4, 1.0, %v11574_v1 }
 0x439   :  { %834 = vst.msk [vmem:[#allocation3 + $0x1d8] sm:$0xff] %vm774_vm8, %v701_v9  ;;  %3398 = vrot.lane.b32.xlu0 %v14470_v53, %s11583_s25  ;;  %v14551_v58 = vld [vmem:[#allocation4 + $0xc2] sm:$0xff]  ;;  %8431 = vmatprep.subr.bf16.mxu1 %v11585_v16  ;;  %v6766_v13 = vpack.c.bf16 %v6752_v63, %v6751_v4  ;;  %v6753_v35 = vmul.f32 %v11116_v29, %v6735_v39  ;;  %v6737_v9 = vld [vmem:[%s16028_s4 + $0x50] sm:$0xff] }
 0x43a   :  { %3400 = vrot.lane.b32.xlu1 %v14474_v28, %s11583_s25  ;;  %8342 = vst.msk [vmem:[#allocation5 + $0x88] sm:$0xff] %vm6772_vm2, %v14551_v58  ;;  %v7616_v8 = vld [vmem:[#allocation4 + $0xc0] sm:$0xff]  ;;  %v6660_v28 = vld [vmem:[%s16029_s5 + $0x28] sm:$0xff] }
 0x43b   :  { %v1080_v50 = vpop.permute.xlu0 %1079  ;;  %v3589_v53 = vld [vmem:[#allocation3 + $0x1b0] sm:$0xff]  ;;  %7632 = vst.msk [vmem:[#allocation5 + $0xa0] sm:$0xff] %vm6772_vm2, %v7616_v8  ;;  %vm6678_vm12 = vcmp.gt.f32.partialorder %v6660_v28, 0.005 }
 0x43c   :  { %1216 = vst.msk [vmem:[#allocation3 + $0x1c0] sm:$0xff] %vm1159_vm9, %v1080_v50  ;;  %v1082_v11 = vpop.permute.xlu1 %1081  ;;  %v3590_v44 = vld [vmem:[#allocation3 + $0x1b8] sm:$0xff]  ;;  %v11113_v25 = vsel %vm6678_vm12, 1.0, %v11574_v1  ;;  %8432 = vmatpush1.bf16.msra.mxu1 %v6764_v47  ;;  %vm6682_vm12 = vcmp.gt.f32.partialorder %v6664_v20, 0.005  ;;  %v6667_v50 = vld [vmem:[%s16029_s5 + $0x60] sm:$0xff] }
 0x43d   :  { %1217 = vst.msk [vmem:[#allocation3 + $0x1c8] sm:$0xff] %vm1159_vm9, %v1082_v11  ;;  %3402 = vrot.lane.b32.xlu0 %v3212_v0, %s11583_s25  ;;  %v3626_v38 = vpack.c.bf16 %v3590_v44, %v3589_v53  ;;  %v6750_v22 = vmul.f32 %v11113_v25, %v6732_v52  ;;  %8433 = vmatprep.subr.bf16.mxu1 %v11585_v16  ;;  %v11117_v61 = vsel %vm6682_vm12, 1.0, %v11574_v1  ;;  %v11118_v0 = vsel %vm6683_vm0, 1.0, %v11574_v1  ;;  %v6668_v53 = vld [vmem:[%s16029_s5 + $0x68] sm:$0xff]  ;;  %v6669_v25 = vld [vmem:[%s16029_s5 + $0x70] sm:$0xff]  ;;  %v6670_v52 = vld [vmem:[%s16029_s5 + $0x78] sm:$0xff] }
 0x43e   :  { %3404 = vrot.lane.b32.xlu1 %v3213_v15, %s11583_s25  ;;  %v6754_v55 = vmul.f32 %v11117_v61, %v6736_v31  ;;  %v11119_v15 = vsel %vm6684_vm13, 1.0, %v11574_v1  ;;  %v6755_v14 = vmul.f32 %v11118_v0, %v6737_v9  ;;  %vm6685_vm4 = vcmp.gt.f32.partialorder %v6667_v50, 0.005  ;;  %v6740_v11 = vld [vmem:[%s16028_s4 + $0x68] sm:$0xff]  ;;  %s11592_s25 = smov 112  }
 0x43f   :  { %11432 = vmatmul.mubr.msk.bf16.gmra.mrb[52].mxu0 %vm3638_vm1, %v3626_v38  ;;  %v1084_v57 = vpop.permute.xlu0 %1083  ;;  %v6765_v27 = vpack.c.bf16 %v6750_v22, %v6749_v30  ;;  %v6756_v8 = vmul.f32 %v11119_v15, %v6738_v42  ;;  %vm6686_vm12 = vcmp.gt.f32.partialorder %v6668_v53, 0.005  ;;  %v11120_v47 = vsel %vm6685_vm4, 1.0, %v11574_v1  ;;  %v14654_v38 = vld [vmem:[#allocation4 + $0x21] sm:$0xff]  ;;  %v6741_v30 = vld [vmem:[%s16028_s4 + $0x70] sm:$0xff] }
 0x440   :  { %1218 = vst.msk [vmem:[#allocation3 + $0x1d0] sm:$0xff] %vm1159_vm9, %v1084_v57  ;;  %v1086_v3 = vpop.permute.xlu1 %1085  ;;  %v6767_v34 = vpack.c.bf16 %v6754_v55, %v6753_v35  ;;  %v11121_v2 = vsel %vm6686_vm12, 1.0, %v11574_v1  ;;  %vm6687_vm0 = vcmp.gt.f32.partialorder %v6669_v25, 0.005  ;;  %vm6688_vm13 = vcmp.gt.f32.partialorder %v6670_v52, 0.005 }
 0x441   :  { %1219 = vst.msk [vmem:[#allocation3 + $0x1d8] sm:$0xff] %vm1159_vm9, %v1086_v3  ;;  %7670 = vrot.lane.b32.xlu0 %v7638_v40, %s11586_s28  ;;  %8434 = vmatpush1.bf16.msra.mxu1 %v6765_v27  ;;  %v6757_v40 = vmul.f32 %v11120_v47, %v6739_v56  ;;  %v6758_v33 = vmul.f32 %v11121_v2, %v6740_v11  ;;  %v11122_v57 = vsel %vm6687_vm0, 1.0, %v11574_v1  ;;  %v11123_v48 = vsel %vm6688_vm13, 1.0, %v11574_v1  ;;  %v14676_v3 = vld [vmem:[#allocation4 + $0x22] sm:$0xff] }
 0x442   :  { %7672 = vrot.lane.b32.xlu1 %v7639_v36, %s11586_s28  ;;  %8435 = vmatprep.subr.bf16.mxu1 %v11585_v16  ;;  %v6759_v27 = vmul.f32 %v11122_v57, %v6741_v30  ;;  %v6760_v37 = vmul.f32 %v11123_v48, %v6742_v19  ;;  %vm16176_vm4 = vcmask 146552   ;;  %v6671_v30 = vld [vmem:[%s16029_s5 + $0x80] sm:$0xff]  ;;  %v6672_v57 = vld [vmem:[%s16029_s5 + $0x88] sm:$0xff] }
 0x443   :  { %v1465_v51 = vpop.permute.xlu0 %1464  ;;  %v6769_v12 = vpack.c.bf16 %v6758_v33, %v6757_v40  ;;  %vm16177_vm12 = vmmov %vm16176_vm4 }
 0x444   :  { %1601 = vst.msk [vmem:[#allocation3 + $0x1c0] sm:$0xff] %vm1544_vm10, %v1465_v51  ;;  %v1467_v45 = vpop.permute.xlu1 %1466  ;;  %v6770_v63 = vpack.c.bf16 %v6760_v37, %v6759_v27  ;;  %vm16178_vm0 = vmmov %vm16176_vm4 }
 0x445   :  { %1602 = vst.msk [vmem:[#allocation3 + $0x1c8] sm:$0xff] %vm1544_vm10, %v1467_v45  ;;  %7767 = vrot.lane.b32.xlu0 %v7735_v7, %s11587_s21  ;;  %8436 = vmatpush1.bf16.msra.mxu1 %v6766_v13  ;;  %vm16179_vm13 = vmmov %vm16178_vm0 }
 0x446   :  { %7769 = vrot.lane.b32.xlu1 %v7736_v5, %s11587_s21  ;;  %8437 = vmatprep.subr.bf16.mxu1 %v11585_v16 }
 0x447   :  { %v1469_v54 = vpop.permute.xlu0 %1468 }
 0x448   :  { %1603 = vst.msk [vmem:[#allocation3 + $0x1d0] sm:$0xff] %vm1544_vm10, %v1469_v54  ;;  %v1471_v62 = vpop.permute.xlu1 %1470 }
 0x449   :  { %1604 = vst.msk [vmem:[#allocation3 + $0x1d8] sm:$0xff] %vm1544_vm10, %v1471_v62  ;;  %7864 = vrot.lane.b32.xlu0 %v12959_v46, %s11588_s2  ;;  %8438 = vmatpush1.bf16.msra.mxu1 %v6767_v34  ;;  %v6768_v46 = vpack.c.bf16 %v6756_v8, %v6755_v14 }
 0x44a   :  { %7866 = vrot.lane.b32.xlu1 %v7833_v26, %s11588_s2  ;;  %8439 = vmatprep.subr.bf16.mxu1 %v11585_v16 }
 0x44b   :  { %v1850_v28 = vpop.permute.xlu0 %1849 }
 0x44c   :  { %1986 = vst.msk [vmem:[#allocation3 + $0x1c0] sm:$0xff] %vm16059_vm11, %v1850_v28  ;;  %v1852_v44 = vpop.permute.xlu1 %1851 }
 0x44d   :  { %1987 = vst.msk [vmem:[#allocation3 + $0x1c8] sm:$0xff] %vm16059_vm11, %v1852_v44  ;;  %7961 = vrot.lane.b32.xlu0 %v7639_v36, %s11589_s24  ;;  %8440 = vmatpush1.bf16.msra.mxu1 %v6768_v46 }
 0x44e   :  { %7963 = vrot.lane.b32.xlu1 %v14654_v38, %s11589_s24  ;;  %8441 = vmatprep.subr.bf16.mxu1 %v11585_v16 }
 0x44f   :  { %v1854_v22 = vpop.permute.xlu0 %1853 }
 0x450   :  { %1988 = vst.msk [vmem:[#allocation3 + $0x1d0] sm:$0xff] %vm16059_vm11, %v1854_v22  ;;  %v1856_v21 = vpop.permute.xlu1 %1855 }
 0x451   :  { %1989 = vst.msk [vmem:[#allocation3 + $0x1d8] sm:$0xff] %vm16059_vm11, %v1856_v21  ;;  %8058 = vrot.lane.b32.xlu0 %v7736_v5, %s11590_s30  ;;  %8442 = vmatpush1.bf16.msra.mxu1 %v6769_v12 }
 0x452   :  { %v11421_v59 = vpop.f32.mrb[40].mxu0  ;;  %8060 = vrot.lane.b32.xlu1 %v14676_v3, %s11590_s30  ;;  %8443 = vmatprep.subr.bf16.mxu1 %v11585_v16 }
 0x453   :  { %v3945_v36 = vadd.f32 %v14421_v32, %v11421_v59  ;;  %v3936_v7 = vpop.f32.mrb[41].mxu0  ;;  %v2235_v4 = vpop.permute.xlu0 %2234 }
 0x454   :  { %v3937_v23 = vadd.f32 %v14421_v32, %v3936_v7  ;;  %2371 = vst.msk [vmem:[#allocation3 + $0x1c0] sm:$0xff] %vm16176_vm4, %v2235_v4  ;;  %v2237_v20 = vpop.permute.xlu1 %2236  ;;  %v11422_v39 = vpop.f32.mrb[42].mxu0  ;;  %vm16180_vm4 = vcmask 171152  }
 0x455   :  { %v4073_v51 = vmax.f32 %v3945_v36, 0.0  ;;  %2372 = vst.msk [vmem:[#allocation3 + $0x1c8] sm:$0xff] %vm16177_vm12, %v2237_v20  ;;  %v3948_v13 = vadd.f32 %v14421_v32, %v11422_v39  ;;  %v3939_v31 = vpop.f32.mrb[43].mxu0  ;;  %8156 = vrot.lane.b32.xlu0 %v7833_v26, %s11591_s22  ;;  %8444 = vmatpush1.bf16.msra.mxu1 %v6770_v63  ;;  %vm16181_vm12 = vmmov %vm16180_vm4 }
 0x456   :  { %v4071_v45 = vmax.f32 %v3937_v23, 0.0  ;;  %v3940_v29 = vadd.f32 %v14421_v32, %v3939_v31  ;;  %8158 = vrot.lane.b32.xlu1 %v13308_v10, %s11591_s22  ;;  %8445 = vmatprep.subr.bf16.mxu1 %v11585_v16  ;;  %v14700_v16 = vld [vmem:[#allocation4 + $0x31] sm:$0xff] }
 0x457   :  { %v4873_v61 = vcombine.high %v4073_v51, %v4073_v51  ;;  %v4880_v5 = vrot.slane %v4073_v51, %v12830_v24  ;;  %v4074_v35 = vmax.f32 %v3948_v13, 0.0  ;;  %v2239_v55 = vpop.permute.xlu0 %2238  ;;  %v7738_v51 = vld [vmem:[#allocation4 + $0x32] sm:$0xff] }
 0x458   :  { %v4839_v43 = vcombine.high %v4071_v45, %v4071_v45  ;;  %v4846_v49 = vrot.slane %v4071_v45, %v12830_v24  ;;  %v14693_v9 = vmax.f32 %v3940_v29, 0.0  ;;  %2373 = vst.msk [vmem:[#allocation3 + $0x1d0] sm:$0xff] %vm16178_vm0, %v2239_v55  ;;  %v2241_v54 = vpop.permute.xlu1 %2240  ;;  %vm16182_vm0 = vmmov %vm16180_vm4 }
 0x459   :  { %v4887_v32 = vrot.slane %v4873_v61, %v12830_v24  ;;  %v4888_v34 = vcombine.high %v4880_v5, %v4880_v5  ;;  %v11060_v42 = vrot.slane %v4880_v5, 9  ;;  %v4890_v62 = vcombine.high %v4074_v35, %v4074_v35  ;;  %2374 = vst.msk [vmem:[#allocation3 + $0x1d8] sm:$0xff] %vm16179_vm13, %v2241_v54  ;;  %8253 = vrot.lane.b32.xlu0 %v14654_v38, %s11592_s25 }
 0x45a   :  { %v4853_v0 = vrot.slane %v4839_v43, %v12830_v24  ;;  %v4854_v15 = vcombine.high %v4846_v49, %v4846_v49  ;;  %v10932_v26 = vrot.slane %v4846_v49, 9  ;;  %v4897_v14 = vrot.slane %v4074_v35, %v12830_v24  ;;  %8255 = vrot.lane.b32.xlu1 %v14700_v16, %s11592_s25 }
 0x45b   :  { %v4889_v8 = vcombine.high %v4887_v32, %v4887_v32  ;;  %v11061_v50 = vrot.slane %v4888_v34, 9  ;;  %v11062_v53 = vrot.slane %v4887_v32, 9  ;;  %v6479_v56 = vmax.f32 %v4880_v5, %v11060_v42  ;;  %v2621_v28 = vpop.permute.xlu0 %2620 }
 0x45c   :  { %v4855_v46 = vcombine.high %v4853_v0, %v4853_v0  ;;  %v10933_v11 = vrot.slane %v4854_v15, 9  ;;  %v10934_v44 = vrot.slane %v4853_v0, 9  ;;  %v5967_v47 = vmax.f32 %v4846_v49, %v10932_v26  ;;  %2757 = vst.msk [vmem:[#allocation3 + $0x1c0] sm:$0xff] %vm16180_vm4, %v2621_v28  ;;  %v2623_v2 = vpop.permute.xlu1 %2622  ;;  %vm16183_vm4 = vmmov %vm16182_vm0  ;;  %v7835_v26 = vld [vmem:[#allocation4 + $0x40] sm:$0xff] }
 0x45d   :  { %v11063_v40 = vrot.slane %v4889_v8, 9  ;;  %v6480_v33 = vmax.f32 %v4888_v34, %v11061_v50  ;;  %v6481_v25 = vmax.f32 %v4887_v32, %v11062_v53  ;;  %v4904_v52 = vrot.slane %v4890_v62, %v12830_v24  ;;  %2758 = vst.msk [vmem:[#allocation3 + $0x1c8] sm:$0xff] %vm16181_vm12, %v2623_v2  ;;  %7674 = vrot.lane.b32.xlu0 %v14654_v38, %s11586_s28 }
 0x45e   :  { %v10935_v22 = vrot.slane %v4855_v46, 9  ;;  %v5968_v12 = vmax.f32 %v4854_v15, %v10933_v11  ;;  %v5969_v19 = vmax.f32 %v4853_v0, %v10934_v44  ;;  %v6607_v21 = vmax.f32 %v5967_v47, %v6479_v56  ;;  %7676 = vrot.lane.b32.xlu1 %v14700_v16, %s11586_s28 }
 0x45f   :  { %v6482_v48 = vmax.f32 %v4889_v8, %v11063_v40  ;;  %v4905_v27 = vcombine.high %v4897_v14, %v4897_v14  ;;  %v4906_v37 = vcombine.high %v4904_v52, %v4904_v52  ;;  %v11064_v59 = vrot.slane %v4897_v14, 9  ;;  %v2625_v38 = vpop.permute.xlu0 %2624 }
 0x460   :  { %v5970_v36 = vmax.f32 %v4855_v46, %v10935_v22  ;;  %v6608_v7 = vmax.f32 %v5968_v12, %v6480_v33  ;;  %v6609_v4 = vmax.f32 %v5969_v19, %v6481_v25  ;;  %2759 = vst.msk [vmem:[#allocation3 + $0x1d0] sm:$0xff] %vm16182_vm0, %v2625_v38  ;;  %v2627_v63 = vpop.permute.xlu1 %2626  ;;  %vm6689_vm13 = vcmp.gt.f32.partialorder %v6671_v30, 0.005  ;;  %v7932_v30 = vld [vmem:[#allocation4 + $0x41] sm:$0xff] }
 0x461   :  { %v7265_v23 = vrot.slane %v6607_v21, %v12857_v41  ;;  %v11065_v20 = vrot.slane %v4905_v27, 9  ;;  %v11066_v39 = vrot.slane %v4904_v52, 9  ;;  %2760 = vst.msk [vmem:[#allocation3 + $0x1d8] sm:$0xff] %vm16183_vm4, %v2627_v63  ;;  %7771 = vrot.lane.b32.xlu0 %v14676_v3, %s11587_s21  ;;  %vm6690_vm12 = vcmp.gt.f32.partialorder %v6672_v57, 0.005  ;;  %v6743_v3 = vld [vmem:[%s16028_s4 + $0x80] sm:$0xff] }
 0x462   :  { %v6610_v13 = vmax.f32 %v5970_v36, %v6482_v48  ;;  %v7269_v31 = vrot.slane %v6608_v7, %v12857_v41  ;;  %v7273_v45 = vrot.slane %v6609_v4, %v12857_v41  ;;  %v4856_v29 = vcombine.high %v14693_v9, %v14693_v9  ;;  %7773 = vrot.lane.b32.xlu1 %v7738_v51, %s11587_s21 }
 0x463   :  { %v11067_v61 = vrot.slane %v4906_v37, 9  ;;  %v6483_v5 = vmax.f32 %v4897_v14, %v11064_v59  ;;  %v6485_v35 = vmax.f32 %v4904_v52, %v11066_v39  ;;  %v4863_v55 = vrot.slane %v14693_v9, %v12830_v24  ;;  %v3006_v43 = vpop.permute.xlu0 %3005  ;;  %v6744_v9 = vld [vmem:[%s16028_s4 + $0x88] sm:$0xff]  ;;  %s11594_s4 = smov [#allocation8]  }
 0x464   :  { %v7277_v49 = vrot.slane %v6610_v13, %v12857_v41  ;;  %vm16184_vm0 = vcmask 1041409   ;;  %v4870_v32 = vrot.slane %v4856_v29, %v12830_v24  ;;  %vm16185_vm4 = vcmask 195752   ;;  %v3008_v34 = vpop.permute.xlu1 %3007 }
 0x465   :  { %v7531_v54 = vsel %vm16184_vm0, %v7269_v31, %v7265_v23  ;;  %3142 = vst.msk [vmem:[#allocation3 + $0x1c0] sm:$0xff] %vm16185_vm4, %v3006_v43  ;;  %v11124_v42 = vsel %vm6689_vm13, 1.0, %v11574_v1  ;;  %v4871_v0 = vcombine.high %v4863_v55, %v4863_v55  ;;  %v10936_v15 = vrot.slane %v4863_v55, 9  ;;  %vm16186_vm11 = vmmov %vm16185_vm4  ;;  %7868 = vrot.lane.b32.xlu0 %v13308_v10, %s11588_s2 }
 0x466   :  { %v7532_v62 = vsel %vm7456_vm5, %v7273_v45, %v7531_v54  ;;  %3143 = vst.msk [vmem:[#allocation3 + $0x1c8] sm:$0xff] %vm16186_vm11, %v3008_v34  ;;  %v11125_v14 = vsel %vm6690_vm12, 1.0, %v11574_v1  ;;  %v4872_v8 = vcombine.high %v4870_v32, %v4870_v32  ;;  %v10938_v50 = vrot.slane %v4870_v32, 9  ;;  %7870 = vrot.lane.b32.xlu1 %v7835_v26, %s11588_s2  ;;  %vm16188_vm11 = vmmov %vm16185_vm4 }
 0x467   :  { %vm16187_vm13 = vcmask 1043459   ;;  %v6761_v56 = vmul.f32 %v11124_v42, %v6743_v3  ;;  %v6484_v28 = vmax.f32 %v4905_v27, %v11065_v20  ;;  %v10937_v46 = vrot.slane %v4871_v0, 9  ;;  %v3010_v44 = vpop.permute.xlu0 %3009  ;;  %vm16189_vm12 = vmmov %vm16185_vm4 }
 0x468   :  { %v7533_v53 = vsel %vm16187_vm13, %v7277_v49, %v7532_v62  ;;  %v5971_v11 = vmax.f32 %v4863_v55, %v10936_v15  ;;  %v6762_v47 = vmul.f32 %v11125_v14, %v6744_v9  ;;  %v6486_v2 = vmax.f32 %v4906_v37, %v11067_v61  ;;  %3144 = vst.msk [vmem:[#allocation3 + $0x1d0] sm:$0xff] %vm16188_vm11, %v3010_v44  ;;  %v3012_v10 = vpop.permute.xlu1 %3011  ;;  %v8224_v61 = vld [vmem:[#allocation4 + $0x51] sm:$0xff]  ;;  %v7934_v14 = vld [vmem:[#allocation4 + $0x61] sm:$0xff] }
 0x469   :  { %v10939_v40 = vrot.slane %v4872_v8, 9  ;;  %v5973_v33 = vmax.f32 %v4870_v32, %v10938_v50  ;;  %v5972_v25 = vmax.f32 %v4871_v0, %v10937_v46  ;;  %3145 = vst.msk [vmem:[#allocation3 + $0x1d8] sm:$0xff] %vm16189_vm12, %v3012_v10  ;;  %7965 = vrot.lane.b32.xlu0 %v14700_v16, %s11589_s24  ;;  %v8029_v16 = vld [vmem:[#allocation4 + $0x42] sm:$0xff]  ;;  %v8129_v46 = vld [vmem:[#allocation4 + $0x70] sm:$0xff]  ;;  %vm16194_vm4 = vcmask 146552  }
 0x46a   :  { %v6611_v52 = vmax.f32 %v5971_v11, %v6483_v5  ;;  %v6771_v22 = vpack.c.bf16 %v6762_v47, %v6761_v56  ;;  %7967 = vrot.lane.b32.xlu1 %v7932_v30, %s11589_s24  ;;  %v7837_v0 = vld [vmem:[#allocation4 + $0x60] sm:$0xff]  ;;  %vm16195_vm13 = vmmov %vm16194_vm4 }
 0x46b   :  { %v5974_v12 = vmax.f32 %v4872_v8, %v10939_v40  ;;  %v6613_v19 = vmax.f32 %v5973_v33, %v6485_v35  ;;  %v6612_v21 = vmax.f32 %v5972_v25, %v6484_v28  ;;  %v3391_v48 = vpop.permute.xlu0 %3390  ;;  %vm16196_vm11 = vmmov %vm16194_vm4 }
 0x46c   :  { %v7281_v57 = vrot.slane %v6611_v52, %v12857_v41  ;;  %8446 = vmatpush1.bf16.msra.mxu1 %v6771_v22  ;;  %3527 = vst.msk [vmem:[#allocation3 + $0x1c0] sm:$0xff] %vm3470_vm15, %v3391_v48  ;;  %v3393_v37 = vpop.permute.xlu1 %3392  ;;  %vm16197_vm12 = vmmov %vm16194_vm4 }
 0x46d   :  { %v6614_v27 = vmax.f32 %v5974_v12, %v6486_v2  ;;  %v7285_v59 = vrot.slane %v6612_v21, %v12857_v41  ;;  %3528 = vst.msk [vmem:[#allocation3 + $0x1c8] sm:$0xff] %vm3470_vm15, %v3393_v37  ;;  %8062 = vrot.lane.b32.xlu0 %v7738_v51, %s11590_s30  ;;  %v7289_v36 = vrot.slane %v6613_v19, %v12857_v41  ;;  %v8127_v51 = vld [vmem:[#allocation4 + $0x50] sm:$0xff]  ;;  %v14823_v2 = vld [vmem:[%s16027_s3] ss:$0 sm:$0xff] }
 0x46e   :  { %v7534_v38 = vsel %vm7460_vm7, %v7281_v57, %v7533_v53  ;;  %8064 = vrot.lane.b32.xlu1 %v8029_v16, %s11590_s30  ;;  %v8031_v53 = vld [vmem:[#allocation4 + $0x62] sm:$0xff] }
 0x46f   :  { %v7293_v7 = vrot.slane %v6614_v27, %v12857_v41  ;;  %v7535_v4 = vsel %vm7462_vm3, %v7285_v59, %v7534_v38  ;;  %v703_v63 = vpop.permute.xlu0 %702 }
 0x470   :  { %v7536_v23 = vsel %vm7464_vm6, %v7289_v36, %v7535_v4  ;;  %835 = vst.msk [vmem:[#allocation3 + $0x1e0] sm:$0xff] %vm774_vm8, %v703_v63  ;;  %v705_v20 = vpop.permute.xlu1 %704 }
 0x471   :  { %v7537_v39 = vsel %vm7466_vm14, %v7293_v7, %v7536_v23  ;;  %836 = vst.msk [vmem:[#allocation3 + $0x1e8] sm:$0xff] %vm774_vm8, %v705_v20  ;;  %8160 = vrot.lane.b32.xlu0 %v7835_v26, %s11591_s22 }
 0x472   :  { %7600 = vst.msk [vmem:[#allocation4 + $0xd1] sm:$0xff] %vm6772_vm2, %v7537_v39  ;;  %8162 = vrot.lane.b32.xlu1 %v8127_v51, %s11591_s22 }
 0x473   :  { %v3395_v13 = vpop.permute.xlu0 %3394  ;;  %v3591_v31 = vld [vmem:[#allocation3 + $0x1c0] sm:$0xff] }
 0x474   :  { %3529 = vst.msk [vmem:[#allocation3 + $0x1d0] sm:$0xff] %vm3470_vm15, %v3395_v13  ;;  %v3397_v45 = vpop.permute.xlu1 %3396  ;;  %v3592_v29 = vld [vmem:[#allocation3 + $0x1c8] sm:$0xff] }
 0x475   :  { %3530 = vst.msk [vmem:[#allocation3 + $0x1d8] sm:$0xff] %vm3470_vm15, %v3397_v45  ;;  %8257 = vrot.lane.b32.xlu0 %v7932_v30, %s11592_s25  ;;  %v3627_v5 = vpack.c.bf16 %v3592_v29, %v3591_v31 }
 0x476   :  { %8259 = vrot.lane.b32.xlu1 %v8224_v61, %s11592_s25 }
 0x477   :  { %11435 = vmatprep.mubr.msk.bf16.mxu0 %vm3638_vm1, %v3627_v5  ;;  %v707_v35 = vpop.permute.xlu0 %706 }
 0x478   :  { %837 = vst.msk [vmem:[#allocation3 + $0x1f0] sm:$0xff] %vm774_vm8, %v707_v35  ;;  %v709_v55 = vpop.permute.xlu1 %708 }
 0x479   :  { %838 = vst.msk [vmem:[#allocation3 + $0x1f8] sm:$0xff] %vm774_vm8, %v709_v55  ;;  %7678 = vrot.lane.b32.xlu0 %v7932_v30, %s11586_s28  ;;  %v14781_v43 = vld [vmem:[#allocation4 + $0xd0] sm:$0xff]  ;;  %vm16190_vm8 = vcmask 121952  }
 0x47a   :  { %v14783_v3 = vld [vmem:[#allocation4 + $0xd2] sm:$0xff]  ;;  %7680 = vrot.lane.b32.xlu1 %v8224_v61, %s11586_s28  ;;  %7633 = vst.msk [vmem:[#allocation5 + $0xb0] sm:$0xff] %vm6772_vm2, %v14781_v43  ;;  %vm16192_vm0 = vmmov %vm16190_vm8 }
 0x47b   :  { %8343 = vst.msk [vmem:[#allocation5 + $0x98] sm:$0xff] %vm6772_vm2, %v14783_v3  ;;  %v1088_v49 = vpop.permute.xlu0 %1087  ;;  %v3593_v54 = vld [vmem:[#allocation3 + $0x1d0] sm:$0xff] }
 0x47c   :  { %1220 = vst.msk [vmem:[#allocation3 + $0x1e0] sm:$0xff] %vm1159_vm9, %v1088_v49  ;;  %v1090_v32 = vpop.permute.xlu1 %1089  ;;  %v3594_v34 = vld [vmem:[#allocation3 + $0x1d8] sm:$0xff] }
 0x47d   :  { %1221 = vst.msk [vmem:[#allocation3 + $0x1e8] sm:$0xff] %vm1159_vm9, %v1090_v32  ;;  %7775 = vrot.lane.b32.xlu0 %v8029_v16, %s11587_s21  ;;  %v3628_v42 = vpack.c.bf16 %v3594_v34, %v3593_v54 }
 0x47e   :  { %7777 = vrot.lane.b32.xlu1 %v13676_v60, %s11587_s21 }
 0x47f   :  { %11436 = vmatmul.mubr.msk.bf16.gmra.mrb[56].mxu0 %vm3638_vm1, %v3628_v42  ;;  %v1092_v9 = vpop.permute.xlu0 %1091 }
 0x480   :  { %1222 = vst.msk [vmem:[#allocation3 + $0x1f0] sm:$0xff] %vm1159_vm9, %v1092_v9  ;;  %v1094_v62 = vpop.permute.xlu1 %1093 }
 0x481   :  { %1223 = vst.msk [vmem:[#allocation3 + $0x1f8] sm:$0xff] %vm1159_vm9, %v1094_v62  ;;  %7872 = vrot.lane.b32.xlu0 %v8127_v51, %s11588_s2  ;;  %vm16191_vm9 = vmmov %vm16190_vm8 }
 0x482   :  { %7874 = vrot.lane.b32.xlu1 %v7837_v0, %s11588_s2 }
 0x483   :  { %v1473_v15 = vpop.permute.xlu0 %1472 }
 0x484   :  { %1605 = vst.msk [vmem:[#allocation3 + $0x1e0] sm:$0xff] %vm1544_vm10, %v1473_v15  ;;  %v1475_v26 = vpop.permute.xlu1 %1474  ;;  %v7839_v15 = vld [vmem:[#allocation4 + $0x80] sm:$0xff] }
 0x485   :  { %1606 = vst.msk [vmem:[#allocation3 + $0x1e8] sm:$0xff] %vm1544_vm10, %v1475_v26  ;;  %7969 = vrot.lane.b32.xlu0 %v8224_v61, %s11589_s24 }
 0x486   :  { %7971 = vrot.lane.b32.xlu1 %v7934_v14, %s11589_s24 }
 0x487   :  { %v1477_v8 = vpop.permute.xlu0 %1476 }
 0x488   :  { %1607 = vst.msk [vmem:[#allocation3 + $0x1f0] sm:$0xff] %vm1544_vm10, %v1477_v8  ;;  %v1479_v50 = vpop.permute.xlu1 %1478 }
 0x489   :  { %1608 = vst.msk [vmem:[#allocation3 + $0x1f8] sm:$0xff] %vm1544_vm10, %v1479_v50  ;;  %8066 = vrot.lane.b32.xlu0 %v13676_v60, %s11590_s30  ;;  %vm16193_vm10 = vmmov %vm16192_vm0  ;;  %v14816_v60 = vld [vmem:[#allocation4 + $0x71] sm:$0xff] }
 0x48a   :  { %8068 = vrot.lane.b32.xlu1 %v8031_v53, %s11590_s30 }
 0x48b   :  { %v1858_v56 = vpop.permute.xlu0 %1857 }
 0x48c   :  { %1990 = vst.msk [vmem:[#allocation3 + $0x1e0] sm:$0xff] %vm16190_vm8, %v1858_v56  ;;  %v1860_v28 = vpop.permute.xlu1 %1859  ;;  %vm16198_vm8 = vcmask 171152  }
 0x48d   :  { %1991 = vst.msk [vmem:[#allocation3 + $0x1e8] sm:$0xff] %vm16191_vm9, %v1860_v28  ;;  %8164 = vrot.lane.b32.xlu0 %v7837_v0, %s11591_s22  ;;  %vm16199_vm9 = vmmov %vm16198_vm8 }
 0x48e   :  { %8166 = vrot.lane.b32.xlu1 %v8129_v46, %s11591_s22 }
 0x48f   :  { %v1862_v11 = vpop.permute.xlu0 %1861 }
 0x490   :  { %1992 = vst.msk [vmem:[#allocation3 + $0x1f0] sm:$0xff] %vm16192_vm0, %v1862_v11  ;;  %v1864_v44 = vpop.permute.xlu1 %1863  ;;  %vm16200_vm0 = vmmov %vm16198_vm8 }
 0x491   :  { %1993 = vst.msk [vmem:[#allocation3 + $0x1f8] sm:$0xff] %vm16193_vm10, %v1864_v44  ;;  %8261 = vrot.lane.b32.xlu0 %v7934_v14, %s11592_s25  ;;  %vm16201_vm10 = vmmov %vm16200_vm0 }
 0x492   :  { %v11425_v47 = vpop.f32.mrb[44].mxu0  ;;  %8263 = vrot.lane.b32.xlu1 %v14816_v60, %s11592_s25 }
 0x493   :  { %v3961_v40 = vadd.f32 %v14823_v2, %v11425_v47  ;;  %v3952_v33 = vpop.f32.mrb[45].mxu0  ;;  %v2243_v10 = vpop.permute.xlu0 %2242 }
 0x494   :  { %v3953_v25 = vadd.f32 %v14823_v2, %v3952_v33  ;;  %2375 = vst.msk [vmem:[#allocation3 + $0x1e0] sm:$0xff] %vm16194_vm4, %v2243_v10  ;;  %v2245_v52 = vpop.permute.xlu1 %2244  ;;  %v11426_v30 = vpop.f32.mrb[46].mxu0  ;;  %vm16202_vm4 = vcmask 1041409  }
 0x495   :  { %v4077_v22 = vmax.f32 %v3961_v40, 0.0  ;;  %2376 = vst.msk [vmem:[#allocation3 + $0x1e8] sm:$0xff] %vm16195_vm13, %v2245_v52  ;;  %v3964_v12 = vadd.f32 %v14823_v2, %v11426_v30  ;;  %v3955_v19 = vpop.f32.mrb[47].mxu0  ;;  %7682 = vrot.lane.b32.xlu0 %v7934_v14, %s11586_s28  ;;  %v7936_v52 = vld [vmem:[#allocation4 + $0x81] sm:$0xff]  ;;  %vm16203_vm13 = vcmask 195752  }
 0x496   :  { %v4075_v21 = vmax.f32 %v3953_v25, 0.0  ;;  %v3956_v57 = vadd.f32 %v14823_v2, %v3955_v19  ;;  %7684 = vrot.lane.b32.xlu1 %v14816_v60, %s11586_s28 }
 0x497   :  { %v4941_v48 = vcombine.high %v4077_v22, %v4077_v22  ;;  %v4948_v27 = vrot.slane %v4077_v22, %v12830_v24  ;;  %v4078_v37 = vmax.f32 %v3964_v12, 0.0  ;;  %v2247_v59 = vpop.permute.xlu0 %2246 }
 0x498   :  { %v4907_v38 = vcombine.high %v4075_v21, %v4075_v21  ;;  %v4914_v16 = vrot.slane %v4075_v21, %v12830_v24  ;;  %v14836_v36 = vmax.f32 %v3956_v57, 0.0  ;;  %2377 = vst.msk [vmem:[#allocation3 + $0x1f0] sm:$0xff] %vm16196_vm11, %v2247_v59  ;;  %v2249_v7 = vpop.permute.xlu1 %2248  ;;  %vm16204_vm11 = vmmov %vm16203_vm13 }
 0x499   :  { %v4955_v4 = vrot.slane %v4941_v48, %v12830_v24  ;;  %v4956_v63 = vcombine.high %v4948_v27, %v4948_v27  ;;  %v11068_v23 = vrot.slane %v4948_v27, 9  ;;  %v4958_v20 = vcombine.high %v4078_v37, %v4078_v37  ;;  %2378 = vst.msk [vmem:[#allocation3 + $0x1f8] sm:$0xff] %vm16197_vm12, %v2249_v7  ;;  %7779 = vrot.lane.b32.xlu0 %v8031_v53, %s11587_s21 }
 0x49a   :  { %v4921_v39 = vrot.slane %v4907_v38, %v12830_v24  ;;  %v4922_v51 = vcombine.high %v4914_v16, %v4914_v16  ;;  %v10940_v13 = vrot.slane %v4914_v16, 9  ;;  %v4965_v31 = vrot.slane %v4078_v37, %v12830_v24  ;;  %7781 = vrot.lane.b32.xlu1 %v14046_v17, %s11587_s21 }
 0x49b   :  { %v4957_v45 = vcombine.high %v4955_v4, %v4955_v4  ;;  %v11069_v29 = vrot.slane %v4956_v63, 9  ;;  %v11070_v61 = vrot.slane %v4955_v4, 9  ;;  %v6487_v5 = vmax.f32 %v4948_v27, %v11068_v23  ;;  %v2629_v35 = vpop.permute.xlu0 %2628 }
 0x49c   :  { %v4923_v55 = vcombine.high %v4921_v39, %v4921_v39  ;;  %v10941_v49 = vrot.slane %v4922_v51, 9  ;;  %v10942_v54 = vrot.slane %v4921_v39, 9  ;;  %v5975_v32 = vmax.f32 %v4914_v16, %v10940_v13  ;;  %2761 = vst.msk [vmem:[#allocation3 + $0x1e0] sm:$0xff] %vm16198_vm8, %v2629_v35  ;;  %v2631_v34 = vpop.permute.xlu1 %2630  ;;  %vm16206_vm8 = vmmov %vm16204_vm11 }
 0x49d   :  { %v11071_v42 = vrot.slane %v4957_v45, 9  ;;  %v6488_v9 = vmax.f32 %v4956_v63, %v11069_v29  ;;  %v6489_v62 = vmax.f32 %v4955_v4, %v11070_v61  ;;  %v4972_v0 = vrot.slane %v4958_v20, %v12830_v24  ;;  %2762 = vst.msk [vmem:[#allocation3 + $0x1e8] sm:$0xff] %vm16199_vm9, %v2631_v34  ;;  %7876 = vrot.lane.b32.xlu0 %v8129_v46, %s11588_s2  ;;  %vm16207_vm9 = vmmov %vm16206_vm8 }
 0x49e   :  { %v10943_v26 = vrot.slane %v4923_v55, 9  ;;  %v5976_v14 = vmax.f32 %v4922_v51, %v10941_v49  ;;  %v5977_v8 = vmax.f32 %v4921_v39, %v10942_v54  ;;  %v6615_v50 = vmax.f32 %v5975_v32, %v6487_v5  ;;  %7878 = vrot.lane.b32.xlu1 %v7839_v15, %s11588_s2 }
 0x49f   :  { %v6490_v53 = vmax.f32 %v4957_v45, %v11071_v42  ;;  %v4973_v56 = vcombine.high %v4965_v31, %v4965_v31  ;;  %v2633_v28 = vpop.permute.xlu0 %2632  ;;  %v4974_v40 = vcombine.high %v4972_v0, %v4972_v0  ;;  %v11072_v46 = vrot.slane %v4965_v31, 9 }
 0x4a0   :  { %v5978_v11 = vmax.f32 %v4923_v55, %v10943_v26  ;;  %v6616_v44 = vmax.f32 %v5976_v14, %v6488_v9  ;;  %v6617_v47 = vmax.f32 %v5977_v8, %v6489_v62  ;;  %2763 = vst.msk [vmem:[#allocation3 + $0x1f0] sm:$0xff] %vm16200_vm0, %v2633_v28  ;;  %v2635_v33 = vpop.permute.xlu1 %2634  ;;  %v7297_v10 = vrot.slane %v6615_v50, %v12857_v41  ;;  %v8228_v9 = vld [vmem:[#allocation4 + $0x91] sm:$0xff]  ;;  %v7646_v8 = vld [vmem:[#allocation4 + $0xa1] sm:$0xff] }
 0x4a1   :  { %v11074_v25 = vrot.slane %v4972_v0, 9  ;;  %2764 = vst.msk [vmem:[#allocation3 + $0x1f8] sm:$0xff] %vm16201_vm10, %v2635_v33  ;;  %7973 = vrot.lane.b32.xlu0 %v14816_v60, %s11589_s24  ;;  %v4924_v19 = vcombine.high %v14836_v36, %v14836_v36  ;;  %v11073_v21 = vrot.slane %v4973_v56, 9  ;;  %v4931_v57 = vrot.slane %v14836_v36, %v12830_v24  ;;  %v7614_v33 = vld [vmem:[#allocation4 + $0xa0] sm:$0xff] }
 0x4a2   :  { %v6618_v30 = vmax.f32 %v5978_v11, %v6490_v53  ;;  %v7301_v22 = vrot.slane %v6616_v44, %v12857_v41  ;;  %v7305_v12 = vrot.slane %v6617_v47, %v12857_v41  ;;  %7975 = vrot.lane.b32.xlu1 %v7936_v52, %s11589_s24  ;;  %v11075_v37 = vrot.slane %v4974_v40, 9  ;;  %v7647_v47 = vld [vmem:[#allocation4 + $0xb1] sm:$0xff]  ;;  %7630 = vst.msk [vmem:[#allocation5 + $0x80] sm:$0xff] %vm6772_vm2, %v7614_v33 }
 0x4a3   :  { %v3014_v48 = vpop.permute.xlu0 %3013  ;;  %v4938_v59 = vrot.slane %v4924_v19, %v12830_v24  ;;  %v6491_v7 = vmax.f32 %v4965_v31, %v11072_v46  ;;  %v4939_v4 = vcombine.high %v4931_v57, %v4931_v57  ;;  %v10944_v63 = vrot.slane %v4931_v57, 9  ;;  %v8131_v31 = vld [vmem:[#allocation4 + $0x90] sm:$0xff] }
 0x4a4   :  { %v7309_v27 = vrot.slane %v6618_v30, %v12857_v41  ;;  %v7538_v60 = vsel %vm16202_vm4, %v7301_v22, %v7297_v10  ;;  %3146 = vst.msk [vmem:[#allocation3 + $0x1e0] sm:$0xff] %vm16203_vm13, %v3014_v48  ;;  %v3016_v38 = vpop.permute.xlu1 %3015  ;;  %v6493_v36 = vmax.f32 %v4972_v0, %v11074_v25  ;;  %vm16205_vm12 = vcmask 1043459   ;;  %v7744_v30 = vld [vmem:[#allocation4 + $0xb2] sm:$0xff]  ;;  %v7841_v48 = vld [vmem:[#allocation4 + $0xc0] sm:$0xff] }
 0x4a5   :  { %v7539_v16 = vsel %vm7456_vm5, %v7305_v12, %v7538_v60  ;;  %3147 = vst.msk [vmem:[#allocation3 + $0x1e8] sm:$0xff] %vm16204_vm11, %v3016_v38  ;;  %8070 = vrot.lane.b32.xlu0 %v14046_v17, %s11590_s30  ;;  %v4940_v23 = vcombine.high %v4938_v59, %v4938_v59  ;;  %v10946_v20 = vrot.slane %v4938_v59, 9  ;;  %v6492_v51 = vmax.f32 %v4973_v56, %v11073_v21  ;;  %v7938_v38 = vld [vmem:[#allocation4 + $0xc1] sm:$0xff] }
 0x4a6   :  { %v7540_v39 = vsel %vm16205_vm12, %v7309_v27, %v7539_v16  ;;  %8072 = vrot.lane.b32.xlu1 %v14212_v18, %s11590_s30  ;;  %v10945_v13 = vrot.slane %v4939_v4, 9  ;;  %v5979_v45 = vmax.f32 %v4931_v57, %v10944_v63  ;;  %v6494_v61 = vmax.f32 %v4974_v40, %v11075_v37  ;;  %v7743_v40 = vld [vmem:[#allocation4 + $0xa2] sm:$0xff] }
 0x4a7   :  { %v3018_v29 = vpop.permute.xlu0 %3017  ;;  %v10947_v5 = vrot.slane %v4940_v23, 9  ;;  %v5981_v35 = vmax.f32 %v4938_v59, %v10946_v20  ;;  %vm7718_vm0 = vcmask 261248   ;;  %vm7912_vm10 = vcmask 523648   ;;  %v8230_v20 = vld [vmem:[#allocation4 + $0xd1] sm:$0xff] }
 0x4a8   :  { %3148 = vst.msk [vmem:[#allocation3 + $0x1f0] sm:$0xff] %vm16206_vm8, %v3018_v29  ;;  %v3020_v55 = vpop.permute.xlu1 %3019  ;;  %v5980_v17 = vmax.f32 %v4939_v4, %v10945_v13  ;;  %v6619_v49 = vmax.f32 %v5979_v45, %v6491_v7  ;;  %vm8009_vm4 = vcmask 654848   ;;  %vm8204_vm13 = vcmask 917248  }
 0x4a9   :  { %3149 = vst.msk [vmem:[#allocation3 + $0x1f8] sm:$0xff] %vm16207_vm9, %v3020_v55  ;;  %8168 = vrot.lane.b32.xlu0 %v7839_v15, %s11591_s22  ;;  %v5982_v54 = vmax.f32 %v4940_v23, %v10947_v5  ;;  %v6621_v32 = vmax.f32 %v5981_v35, %v6493_v36  ;;  %vm8301_vm11 = vcmask 1048448   ;;  %v8357_v55 = vld [vmem:[#allocation5 + $0x38] sm:$0xff]  ;;  %vm16208_vm12 = vcmask 1041409  }
 0x4aa   :  { %8170 = vrot.lane.b32.xlu1 %v8131_v31, %s11591_s22  ;;  %v6620_v18 = vmax.f32 %v5980_v17, %v6492_v51  ;;  %v7313_v34 = vrot.slane %v6619_v49, %v12857_v41  ;;  %vm16209_vm8 = vcmask 1043459   ;;  %vm16210_vm9 = vmmov %vm16208_vm12 }
 0x4ab   :  { %v3399_v42 = vpop.permute.xlu0 %3398  ;;  %v6622_v62 = vmax.f32 %v5982_v54, %v6494_v61  ;;  %v7321_v15 = vrot.slane %v6621_v32, %v12857_v41 }
 0x4ac   :  { %3531 = vst.msk [vmem:[#allocation3 + $0x1e0] sm:$0xff] %vm3470_vm15, %v3399_v42  ;;  %v3401_v0 = vpop.permute.xlu1 %3400  ;;  %v7317_v26 = vrot.slane %v6620_v18, %v12857_v41  ;;  %v7541_v14 = vsel %vm7460_vm7, %v7313_v34, %v7540_v39 }
 0x4ad   :  { %3532 = vst.msk [vmem:[#allocation3 + $0x1e8] sm:$0xff] %vm3470_vm15, %v3401_v0  ;;  %8265 = vrot.lane.b32.xlu0 %v7936_v52, %s11592_s25  ;;  %v7325_v50 = vrot.slane %v6622_v62, %v12857_v41 }
 0x4ae   :  { %8267 = vrot.lane.b32.xlu1 %v8228_v9, %s11592_s25  ;;  %v7542_v53 = vsel %vm7462_vm3, %v7317_v26, %v7541_v14  ;;  %v8355_v9 = vld [vmem:[#allocation5 + $0x28] sm:$0xff] }
 0x4af   :  { %v3403_v56 = vpop.permute.xlu0 %3402  ;;  %v7543_v28 = vsel %vm7464_vm6, %v7321_v15, %v7542_v53  ;;  %v8385_v26 = vpack.c.bf16 %v8357_v55, %v8355_v9 }
 0x4b0   :  { %3533 = vst.msk [vmem:[#allocation3 + $0x1f0] sm:$0xff] %vm3470_vm15, %v3403_v56  ;;  %v3405_v11 = vpop.permute.xlu1 %3404  ;;  %v7544_v44 = vsel %vm7466_vm14, %v7325_v50, %v7543_v28 }
 0x4b1   :  { %3534 = vst.msk [vmem:[#allocation3 + $0x1f8] sm:$0xff] %vm3470_vm15, %v3405_v11  ;;  %7686 = vrot.lane.b32.xlu0 %v7646_v8, %s11586_s28  ;;  %vm7815_vm15 = vcmask 392448  }
 0x4b2   :  { %7601 = vst.msk [vmem:[#allocation4 + $0xe1] sm:$0xff] %vm6772_vm2, %v7544_v44  ;;  %7688 = vrot.lane.b32.xlu1 %v7647_v47, %s11586_s28 }
 0x4b3   :  { %v7671_v10 = vpop.permute.xlu0 %7670  ;;  %v3595_v46 = vld [vmem:[#allocation3 + $0x1e0] sm:$0xff] }
 0x4b4   :  { %7719 = vst.msk [vmem:[#allocation5] sm:$0xff] %vm7718_vm0, %v7671_v10  ;;  %v7673_v25 = vpop.permute.xlu1 %7672  ;;  %v3596_v52 = vld [vmem:[#allocation3 + $0x1e8] sm:$0xff] }
 0x4b5   :  { %7720 = vst.msk [vmem:[#allocation5 + $0x10] sm:$0xff] %vm7718_vm0, %v7673_v25  ;;  %7783 = vrot.lane.b32.xlu0 %v7743_v40, %s11587_s21  ;;  %v3629_v22 = vpack.c.bf16 %v3596_v52, %v3595_v46 }
 0x4b6   :  { %7785 = vrot.lane.b32.xlu1 %v7744_v30, %s11587_s21 }
 0x4b7   :  { %11439 = vmatprep.mubr.msk.bf16.mxu0 %vm3638_vm1, %v3629_v22  ;;  %v7768_v12 = vpop.permute.xlu0 %7767  ;;  %v3597_v19 = vld [vmem:[#allocation3 + $0x1f0] sm:$0xff] }
 0x4b8   :  { %7816 = vst.msk [vmem:[#allocation5] sm:$0xff] %vm7815_vm15, %v7768_v12  ;;  %v7770_v21 = vpop.permute.xlu1 %7769  ;;  %v3598_v57 = vld [vmem:[#allocation3 + $0x1f8] sm:$0xff] }
 0x4b9   :  { %7817 = vst.msk [vmem:[#allocation5 + $0x10] sm:$0xff] %vm7815_vm15, %v7770_v21  ;;  %7880 = vrot.lane.b32.xlu0 %v14369_v6, %s11588_s2  ;;  %v3630_v27 = vpack.c.bf16 %v3598_v57, %v3597_v19  ;;  %v14905_v60 = vld [vmem:[#allocation4 + $0xe0] sm:$0xff] }
 0x4ba   :  { %v14907_v37 = vld [vmem:[#allocation4 + $0xe2] sm:$0xff]  ;;  %7882 = vrot.lane.b32.xlu1 %v7841_v48, %s11588_s2  ;;  %7634 = vst.msk [vmem:[#allocation5 + $0xc0] sm:$0xff] %vm6772_vm2, %v14905_v60 }
 0x4bb   :  { %8344 = vst.msk [vmem:[#allocation5 + $0xa8] sm:$0xff] %vm6772_vm2, %v14907_v37  ;;  %11440 = vmatmul.mubr.msk.bf16.gmra.mrb[60].mxu0 %vm3638_vm1, %v3630_v27  ;;  %v7865_v59 = vpop.permute.xlu0 %7864  ;;  %vm8106_vm1 = vcmask 786048   ;;  %v14962_v33 = vld [vmem:[#allocation4 + $0xe1] sm:$0xff] }
 0x4bc   :  { %7913 = vst.msk [vmem:[#allocation5] sm:$0xff] %vm7912_vm10, %v7865_v59  ;;  %v7867_v6 = vpop.permute.xlu1 %7866 }
 0x4bd   :  { %7914 = vst.msk [vmem:[#allocation5 + $0x10] sm:$0xff] %vm7912_vm10, %v7867_v6  ;;  %7977 = vrot.lane.b32.xlu0 %v7647_v47, %s11589_s24 }
 0x4be   :  { %7979 = vrot.lane.b32.xlu1 %v7938_v38, %s11589_s24 }
 0x4bf   :  { %v7962_v16 = vpop.permute.xlu0 %7961 }
 0x4c0   :  { %8010 = vst.msk [vmem:[#allocation5] sm:$0xff] %vm8009_vm4, %v7962_v16  ;;  %v7964_v7 = vpop.permute.xlu1 %7963 }
 0x4c1   :  { %8011 = vst.msk [vmem:[#allocation5 + $0x10] sm:$0xff] %vm8009_vm4, %v7964_v7  ;;  %8074 = vrot.lane.b32.xlu0 %v7744_v30, %s11590_s30 }
 0x4c2   :  { %8076 = vrot.lane.b32.xlu1 %v14551_v58, %s11590_s30 }
 0x4c3   :  { %v8059_v4 = vpop.permute.xlu0 %8058 }
 0x4c4   :  { %8107 = vst.msk [vmem:[#allocation5] sm:$0xff] %vm8106_vm1, %v8059_v4  ;;  %v8061_v63 = vpop.permute.xlu1 %8060 }
 0x4c5   :  { %8108 = vst.msk [vmem:[#allocation5 + $0x10] sm:$0xff] %vm8106_vm1, %v8061_v63  ;;  %8172 = vrot.lane.b32.xlu0 %v7841_v48, %s11591_s22 }
 0x4c6   :  { %8174 = vrot.lane.b32.xlu1 %v14781_v43, %s11591_s22 }
 0x4c7   :  { %v8157_v36 = vpop.permute.xlu0 %8156 }
 0x4c8   :  { %8205 = vst.msk [vmem:[#allocation5] sm:$0xff] %vm8204_vm13, %v8157_v36  ;;  %v8159_v23 = vpop.permute.xlu1 %8158 }
 0x4c9   :  { %8206 = vst.msk [vmem:[#allocation5 + $0x10] sm:$0xff] %vm8204_vm13, %v8159_v23  ;;  %8269 = vrot.lane.b32.xlu0 %v7938_v38, %s11592_s25 }
 0x4ca   :  { %8271 = vrot.lane.b32.xlu1 %v8230_v20, %s11592_s25 }
 0x4cb   :  { %v8254_v39 = vpop.permute.xlu0 %8253 }
 0x4cc   :  { %8302 = vst.msk [vmem:[#allocation5] sm:$0xff] %vm8301_vm11, %v8254_v39  ;;  %v8256_v51 = vpop.permute.xlu1 %8255 }
 0x4cd   :  { %8303 = vst.msk [vmem:[#allocation5 + $0x10] sm:$0xff] %vm8301_vm11, %v8256_v51  ;;  %7690 = vrot.lane.b32.xlu0 %v7938_v38, %s11586_s28 }
 0x4ce   :  { %7692 = vrot.lane.b32.xlu1 %v8230_v20, %s11586_s28 }
 0x4cf   :  { %v7675_v13 = vpop.permute.xlu0 %7674 }
 0x4d0   :  { %7721 = vst.msk [vmem:[#allocation5 + $0x20] sm:$0xff] %vm7718_vm0, %v7675_v13  ;;  %v7677_v45 = vpop.permute.xlu1 %7676 }
 0x4d1   :  { %7722 = vst.msk [vmem:[#allocation5 + $0x30] sm:$0xff] %vm7718_vm0, %v7677_v45  ;;  %7787 = vrot.lane.b32.xlu0 %v14551_v58, %s11587_s21 }
 0x4d2   :  { %v11429_v29 = vpop.f32.mrb[48].mxu0  ;;  %7789 = vrot.lane.b32.xlu1 %v14783_v3, %s11587_s21 }
 0x4d3   :  { %v3977_v31 = vadd.f32 %v14823_v2, %v11429_v29  ;;  %v3968_v61 = vpop.f32.mrb[49].mxu0  ;;  %v7772_v5 = vpop.permute.xlu0 %7771  ;;  %v8350_v35 = vld [vmem:[#allocation5] sm:$0xff] }
 0x4d4   :  { %v3969_v17 = vadd.f32 %v14823_v2, %v3968_v61  ;;  %v11430_v49 = vpop.f32.mrb[50].mxu0  ;;  %7818 = vst.msk [vmem:[#allocation5 + $0x20] sm:$0xff] %vm7815_vm15, %v7772_v5  ;;  %v7774_v54 = vpop.permute.xlu1 %7773  ;;  %v8352_v32 = vld [vmem:[#allocation5 + $0x10] sm:$0xff] }
 0x4d5   :  { %v4081_v18 = vmax.f32 %v3977_v31, 0.0  ;;  %v3980_v58 = vadd.f32 %v14823_v2, %v11430_v49  ;;  %7819 = vst.msk [vmem:[#allocation5 + $0x30] sm:$0xff] %vm7815_vm15, %v7774_v54  ;;  %v3971_v34 = vpop.f32.mrb[51].mxu0  ;;  %7884 = vrot.lane.b32.xlu0 %v14781_v43, %s11588_s2  ;;  %v8382_v42 = vpack.c.bf16 %v8352_v32, %v8350_v35 }
 0x4d6   :  { %v4079_v62 = vmax.f32 %v3969_v17, 0.0  ;;  %v3972_v0 = vadd.f32 %v14823_v2, %v3971_v34  ;;  %7886 = vrot.lane.b32.xlu1 %v14905_v60, %s11588_s2 }
 0x4d7   :  { %v5009_v14 = vcombine.high %v4081_v18, %v4081_v18  ;;  %v5016_v15 = vrot.slane %v4081_v18, %v12830_v24  ;;  %v4082_v8 = vmax.f32 %v3980_v58, 0.0  ;;  %8462 = vmatmul.mubr.bf16.vlgmr.msra.gmra.mrb[0].mxu1 %v8382_v42  ;;  %v7869_v50 = vpop.permute.xlu0 %7868 }
 0x4d8   :  { %v4975_v53 = vcombine.high %v4079_v62, %v4079_v62  ;;  %v4982_v56 = vrot.slane %v4079_v62, %v12830_v24  ;;  %v14955_v28 = vmax.f32 %v3972_v0, 0.0  ;;  %7915 = vst.msk [vmem:[#allocation5 + $0x20] sm:$0xff] %vm7912_vm10, %v7869_v50  ;;  %v7871_v43 = vpop.permute.xlu1 %7870  ;;  %11128 = vmatprep.mubr.msk.bf16.mxu1 %vm6772_vm2, %v8385_v26 }
 0x4d9   :  { %v5023_v11 = vrot.slane %v5009_v14, %v12830_v24  ;;  %v5024_v44 = vcombine.high %v5016_v15, %v5016_v15  ;;  %v11076_v47 = vrot.slane %v5016_v15, 9  ;;  %v5026_v40 = vcombine.high %v4082_v8, %v4082_v8  ;;  %7916 = vst.msk [vmem:[#allocation5 + $0x30] sm:$0xff] %vm7912_vm10, %v7871_v43  ;;  %7981 = vrot.lane.b32.xlu0 %v8230_v20, %s11589_s24 }
 0x4da   :  { %v4989_v10 = vrot.slane %v4975_v53, %v12830_v24  ;;  %v4990_v46 = vcombine.high %v4982_v56, %v4982_v56  ;;  %v10948_v25 = vrot.slane %v4982_v56, 9  ;;  %v5033_v52 = vrot.slane %v4082_v8, %v12830_v24  ;;  %7983 = vrot.lane.b32.xlu1 %v14962_v33, %s11589_s24 }
 0x4db   :  { %v5025_v30 = vcombine.high %v5023_v11, %v5023_v11  ;;  %v11077_v22 = vrot.slane %v5024_v44, 9  ;;  %v11078_v12 = vrot.slane %v5023_v11, 9  ;;  %v6495_v19 = vmax.f32 %v5016_v15, %v11076_v47  ;;  %v7966_v21 = vpop.permute.xlu0 %7965 }
 0x4dc   :  { %v4991_v57 = vcombine.high %v4989_v10, %v4989_v10  ;;  %v10949_v48 = vrot.slane %v4990_v46, 9  ;;  %v10950_v27 = vrot.slane %v4989_v10, 9  ;;  %v5983_v59 = vmax.f32 %v4982_v56, %v10948_v25  ;;  %8012 = vst.msk [vmem:[#allocation5 + $0x20] sm:$0xff] %vm8009_vm4, %v7966_v21  ;;  %v7968_v6 = vpop.permute.xlu1 %7967 }
 0x4dd   :  { %v11079_v38 = vrot.slane %v5025_v30, 9  ;;  %v6496_v16 = vmax.f32 %v5024_v44, %v11077_v22  ;;  %v6497_v7 = vmax.f32 %v5023_v11, %v11078_v12  ;;  %v5040_v4 = vrot.slane %v5026_v40, %v12830_v24  ;;  %8013 = vst.msk [vmem:[#allocation5 + $0x30] sm:$0xff] %vm8009_vm4, %v7968_v6  ;;  %8078 = vrot.lane.b32.xlu0 %v14783_v3, %s11590_s30 }
 0x4de   :  { %v10951_v63 = vrot.slane %v4991_v57, 9  ;;  %v5984_v36 = vmax.f32 %v4990_v46, %v10949_v48  ;;  %v5985_v23 = vmax.f32 %v4989_v10, %v10950_v27  ;;  %v6623_v20 = vmax.f32 %v5983_v59, %v6495_v19  ;;  %8080 = vrot.lane.b32.xlu1 %v14907_v37, %s11590_s30 }
 0x4df   :  { %v6498_v39 = vmax.f32 %v5025_v30, %v11079_v38  ;;  %v5041_v51 = vcombine.high %v5033_v52, %v5033_v52  ;;  %v8063_v13 = vpop.permute.xlu0 %8062  ;;  %v5042_v61 = vcombine.high %v5040_v4, %v5040_v4  ;;  %v11080_v3 = vrot.slane %v5033_v52, 9 }
 0x4e0   :  { %v5986_v45 = vmax.f32 %v4991_v57, %v10951_v63  ;;  %v6624_v29 = vmax.f32 %v5984_v36, %v6496_v16  ;;  %v6625_v31 = vmax.f32 %v5985_v23, %v6497_v7  ;;  %8109 = vst.msk [vmem:[#allocation5 + $0x20] sm:$0xff] %vm8106_vm1, %v8063_v13  ;;  %v8065_v5 = vpop.permute.xlu1 %8064  ;;  %v7329_v35 = vrot.slane %v6623_v20, %v12857_v41  ;;  %v8361_v63 = vld [vmem:[#allocation5 + $0x58] sm:$0xff] }
 0x4e1   :  { %v11082_v55 = vrot.slane %v5040_v4, 9  ;;  %8110 = vst.msk [vmem:[#allocation5 + $0x30] sm:$0xff] %vm8106_vm1, %v8065_v5  ;;  %8176 = vrot.lane.b32.xlu0 %v14905_v60, %s11591_s22  ;;  %v4992_v32 = vcombine.high %v14955_v28, %v14955_v28  ;;  %v11081_v18 = vrot.slane %v5041_v51, 9  ;;  %v4999_v58 = vrot.slane %v14955_v28, %v12830_v24 }
 0x4e2   :  { %v6626_v17 = vmax.f32 %v5986_v45, %v6498_v39  ;;  %v7333_v49 = vrot.slane %v6624_v29, %v12857_v41  ;;  %v7337_v54 = vrot.slane %v6625_v31, %v12857_v41  ;;  %v11083_v62 = vrot.slane %v5042_v61, 9 }
 0x4e3   :  { %v8161_v34 = vpop.permute.xlu0 %8160  ;;  %v5006_v60 = vrot.slane %v4992_v32, %v12830_v24  ;;  %v6499_v14 = vmax.f32 %v5033_v52, %v11080_v3  ;;  %v5007_v15 = vcombine.high %v4999_v58, %v4999_v58  ;;  %v10952_v8 = vrot.slane %v4999_v58, 9 }
 0x4e4   :  { %v7341_v42 = vrot.slane %v6626_v17, %v12857_v41  ;;  %v7545_v9 = vsel %vm16208_vm12, %v7333_v49, %v7329_v35  ;;  %8207 = vst.msk [vmem:[#allocation5 + $0x20] sm:$0xff] %vm8204_vm13, %v8161_v34  ;;  %v8163_v0 = vpop.permute.xlu1 %8162  ;;  %v6501_v50 = vmax.f32 %v5040_v4, %v11082_v55  ;;  %v6500_v43 = vmax.f32 %v5041_v51, %v11081_v18  ;;  %v8359_v51 = vld [vmem:[#allocation5 + $0x48] sm:$0xff]  ;;  %vm16211_vm12 = vmmov %vm16209_vm8 }
 0x4e5   :  { %v7546_v26 = vsel %vm7456_vm5, %v7337_v54, %v7545_v9  ;;  %8208 = vst.msk [vmem:[#allocation5 + $0x30] sm:$0xff] %vm8204_vm13, %v8163_v0  ;;  %8273 = vrot.lane.b32.xlu0 %v14962_v33, %s11592_s25  ;;  %v5008_v53 = vcombine.high %v5006_v60, %v5006_v60  ;;  %v10954_v56 = vrot.slane %v5006_v60, 9  ;;  %v10953_v11 = vrot.slane %v5007_v15, 9 }
 0x4e6   :  { %v7547_v28 = vsel %vm16209_vm8, %v7341_v42, %v7546_v26  ;;  %v5987_v44 = vmax.f32 %v4999_v58, %v10952_v8  ;;  %v6502_v40 = vmax.f32 %v5042_v61, %v11083_v62  ;;  %v8387_v13 = vpack.c.bf16 %v8361_v63, %v8359_v51  ;;  %v8363_v62 = vld [vmem:[#allocation5 + $0x68] sm:$0xff] }
 0x4e7   :  { %v8258_v47 = vpop.permute.xlu0 %8257  ;;  %v10955_v10 = vrot.slane %v5008_v53, 9  ;;  %v5989_v46 = vmax.f32 %v5006_v60, %v10954_v56  ;;  %v5988_v52 = vmax.f32 %v5007_v15, %v10953_v11  ;;  %v8365_v60 = vld [vmem:[#allocation5 + $0x78] sm:$0xff]  ;;  %vm9416_vm8 = vcmask 259072  }
 0x4e8   :  { %8304 = vst.msk [vmem:[#allocation5 + $0x20] sm:$0xff] %vm8301_vm11, %v8258_v47  ;;  %v8260_v25 = vpop.permute.xlu1 %8259  ;;  %v6627_v30 = vmax.f32 %v5987_v44, %v6499_v14  ;;  %v8389_v15 = vpack.c.bf16 %v8365_v60, %v8363_v62 }
 0x4e9   :  { %8305 = vst.msk [vmem:[#allocation5 + $0x30] sm:$0xff] %vm8301_vm11, %v8260_v25  ;;  %7694 = vrot.lane.b32.xlu0 %v14962_v33, %s11586_s28  ;;  %v5990_v22 = vmax.f32 %v5008_v53, %v10955_v10  ;;  %v6629_v12 = vmax.f32 %v5989_v46, %v6501_v50  ;;  %v6628_v19 = vmax.f32 %v5988_v52, %v6500_v43 }
 0x4ea   :  { %v7345_v21 = vrot.slane %v6627_v30, %v12857_v41  ;;  %9418 = vst.msk [vmem:[#allocation6 + $0x8] sm:$0x3f] %vm9416_vm8, %v11574_v1  ;;  %9417 = vst.msk [vmem:[#allocation6] sm:$0x3f] %vm9416_vm8, %v11574_v1 }
 0x4eb   :  { %v7679_v57 = vpop.permute.xlu0 %7678  ;;  %v6630_v48 = vmax.f32 %v5990_v22, %v6502_v40  ;;  %v7349_v59 = vrot.slane %v6628_v19, %v12857_v41  ;;  %v7353_v33 = vrot.slane %v6629_v12, %v12857_v41  ;;  %9419 = vst.msk [vmem:[#allocation6 + $0x10] sm:$0x3f] %vm9416_vm8, %v11574_v1  ;;  %9420 = vst.msk [vmem:[#allocation6 + $0x18] sm:$0x3f] %vm9416_vm8, %v11574_v1 }
 0x4ec   :  { %7723 = vst.msk [vmem:[#allocation5 + $0x40] sm:$0xff] %vm7718_vm0, %v7679_v57  ;;  %v7681_v27 = vpop.permute.xlu1 %7680  ;;  %v7548_v6 = vsel %vm7460_vm7, %v7345_v21, %v7547_v28 }
 0x4ed   :  { %7724 = vst.msk [vmem:[#allocation5 + $0x50] sm:$0xff] %vm7718_vm0, %v7681_v27  ;;  %7791 = vrot.lane.b32.xlu0 %v14907_v37, %s11587_s21  ;;  %v7357_v38 = vrot.slane %v6630_v48, %v12857_v41  ;;  %v7549_v16 = vsel %vm7462_vm3, %v7349_v59, %v7548_v6 }
 0x4ee   :  { %v7550_v36 = vsel %vm7464_vm6, %v7353_v33, %v7549_v16  ;;  %9421 = vst.msk [vmem:[#allocation6 + $0x20] sm:$0x3f] %vm9416_vm8, %v11574_v1  ;;  %9422 = vst.msk [vmem:[#allocation6 + $0x28] sm:$0x3f] %vm9416_vm8, %v11574_v1 }
 0x4ef   :  { %v7776_v7 = vpop.permute.xlu0 %7775  ;;  %v8354_v4 = vld [vmem:[#allocation5 + $0x20] sm:$0xff]  ;;  %v7551_v39 = vsel %vm7466_vm14, %v7357_v38, %v7550_v36  ;;  %9423 = vst.msk [vmem:[#allocation6 + $0x30] sm:$0x3f] %vm9416_vm8, %v11574_v1  ;;  %9424 = vst.msk [vmem:[#allocation6 + $0x38] sm:$0x3f] %vm9416_vm8, %v11574_v1 }
 0x4f0   :  { %7820 = vst.msk [vmem:[#allocation5 + $0x40] sm:$0xff] %vm7815_vm15, %v7776_v7  ;;  %v7778_v23 = vpop.permute.xlu1 %7777  ;;  %v8356_v20 = vld [vmem:[#allocation5 + $0x30] sm:$0xff] }
 0x4f1   :  { %7821 = vst.msk [vmem:[#allocation5 + $0x50] sm:$0xff] %vm7815_vm15, %v7778_v23  ;;  %v8384_v37 = vpack.c.bf16 %v8356_v20, %v8354_v4 }
 0x4f2   :  { %7602 = vst.msk [vmem:[#allocation4 + $0xf1] sm:$0xff] %vm6772_vm2, %v7551_v39 }
 0x4f3   :  { %8470 = vmatmul.mubr.bf16.gmra.mrb[4].mxu1 %v8384_v37  ;;  %v7873_v45 = vpop.permute.xlu0 %7872  ;;  %9425 = vst.msk [vmem:[#allocation6 + $0x40] sm:$0x3f] %vm9416_vm8, %v11574_v1  ;;  %9426 = vst.msk [vmem:[#allocation6 + $0x48] sm:$0x3f] %vm9416_vm8, %v11574_v1 }
 0x4f4   :  { %7917 = vst.msk [vmem:[#allocation5 + $0x40] sm:$0xff] %vm7912_vm10, %v7873_v45  ;;  %v7875_v29 = vpop.permute.xlu1 %7874  ;;  %11129 = vmatprep.mubr.msk.bf16.mxu1 %vm6772_vm2, %v8387_v13 }
 0x4f5   :  { %7918 = vst.msk [vmem:[#allocation5 + $0x50] sm:$0xff] %vm7912_vm10, %v7875_v29 }
 0x4f6   :  { %9427 = vst.msk [vmem:[#allocation6 + $0x50] sm:$0x3f] %vm9416_vm8, %v11574_v1  ;;  %9428 = vst.msk [vmem:[#allocation6 + $0x58] sm:$0x3f] %vm9416_vm8, %v11574_v1 }
 0x4f7   :  { %v7970_v31 = vpop.permute.xlu0 %7969  ;;  %vm16212_vm8 = vmmov %vm16210_vm9 }
 0x4f8   :  { %8014 = vst.msk [vmem:[#allocation5 + $0x40] sm:$0xff] %vm8009_vm4, %v7970_v31  ;;  %v7972_v61 = vpop.permute.xlu1 %7971 }
 0x4f9   :  { %v7844_v5 = vld [vmem:[#allocation4 + $0xf0] sm:$0xff]  ;;  %8015 = vst.msk [vmem:[#allocation5 + $0x50] sm:$0xff] %vm8009_vm4, %v7972_v61 }
 0x4fa   :  { %v8038_v35 = vld [vmem:[#allocation4 + $0xf2] sm:$0xff]  ;;  %7888 = vrot.lane.b32.xlu0 %v7844_v5, %s11588_s2  ;;  %8178 = vrot.lane.b32.xlu1 %v7844_v5, %s11591_s22  ;;  %7635 = vst.msk [vmem:[#allocation5 + $0xd0] sm:$0xff] %vm6772_vm2, %v7844_v5 }
 0x4fb   :  { %8345 = vst.msk [vmem:[#allocation5 + $0xb8] sm:$0xff] %vm6772_vm2, %v8038_v35  ;;  %v8067_v3 = vpop.permute.xlu0 %8066  ;;  %v7941_v17 = vld [vmem:[#allocation4 + $0xf1] sm:$0xff] }
 0x4fc   :  { %8111 = vst.msk [vmem:[#allocation5 + $0x40] sm:$0xff] %vm8106_vm1, %v8067_v3  ;;  %v8069_v55 = vpop.permute.xlu1 %8068 }
 0x4fd   :  { %8112 = vst.msk [vmem:[#allocation5 + $0x50] sm:$0xff] %vm8106_vm1, %v8069_v55 }
 0x4fe   :  { %7985 = vrot.lane.b32.xlu0 %v7941_v17, %s11589_s24  ;;  %8275 = vrot.lane.b32.xlu1 %v7941_v17, %s11592_s25 }
 0x4ff   :  { %v8165_v49 = vpop.permute.xlu0 %8164 }
 0x500   :  { %8209 = vst.msk [vmem:[#allocation5 + $0x40] sm:$0xff] %vm8204_vm13, %v8165_v49  ;;  %v8167_v54 = vpop.permute.xlu1 %8166 }
 0x501   :  { %8210 = vst.msk [vmem:[#allocation5 + $0x50] sm:$0xff] %vm8204_vm13, %v8167_v54 }
 0x502   :  { %8082 = vrot.lane.b32.xlu0 %v8038_v35, %s11590_s30  ;;  %7696 = vrot.lane.b32.xlu1 %v7941_v17, %s11586_s28 }
 0x503   :  { %v8262_v32 = vpop.permute.xlu0 %8261 }
 0x504   :  { %8306 = vst.msk [vmem:[#allocation5 + $0x40] sm:$0xff] %vm8301_vm11, %v8262_v32  ;;  %v8264_v18 = vpop.permute.xlu1 %8263 }
 0x505   :  { %8307 = vst.msk [vmem:[#allocation5 + $0x50] sm:$0xff] %vm8301_vm11, %v8264_v18 }
 0x506   :  { %7793 = vrot.lane.b32.xlu1 %v8038_v35, %s11587_s21 }
 0x507   :  { %v7683_v58 = vpop.permute.xlu0 %7682 }
 0x508   :  { %7725 = vst.msk [vmem:[#allocation5 + $0x60] sm:$0xff] %vm7718_vm0, %v7683_v58  ;;  %v7685_v34 = vpop.permute.xlu1 %7684 }
 0x509   :  { %7726 = vst.msk [vmem:[#allocation5 + $0x70] sm:$0xff] %vm7718_vm0, %v7685_v34 }
 0x50b   :  { %v7780_v42 = vpop.permute.xlu0 %7779  ;;  %v8358_v9 = vld [vmem:[#allocation5 + $0x40] sm:$0xff] }
 0x50c   :  { %7822 = vst.msk [vmem:[#allocation5 + $0x60] sm:$0xff] %vm7815_vm15, %v7780_v42  ;;  %v7782_v0 = vpop.permute.xlu1 %7781  ;;  %v8360_v26 = vld [vmem:[#allocation5 + $0x50] sm:$0xff] }
 0x50d   :  { %7823 = vst.msk [vmem:[#allocation5 + $0x70] sm:$0xff] %vm7815_vm15, %v7782_v0  ;;  %v8386_v14 = vpack.c.bf16 %v8360_v26, %v8358_v9 }
 0x50f   :  { %8478 = vmatmul.mubr.bf16.gmra.mrb[8].mxu1 %v8386_v14  ;;  %v7877_v8 = vpop.permute.xlu0 %7876 }
 0x510   :  { %7919 = vst.msk [vmem:[#allocation5 + $0x60] sm:$0xff] %vm7912_vm10, %v7877_v8  ;;  %v7879_v50 = vpop.permute.xlu1 %7878  ;;  %11130 = vmatprep.mubr.msk.bf16.mxu1 %vm6772_vm2, %v8389_v15 }
 0x511   :  { %7920 = vst.msk [vmem:[#allocation5 + $0x70] sm:$0xff] %vm7912_vm10, %v7879_v50 }
 0x512   :  { %v11433_v53 = vpop.f32.mrb[52].mxu0 }
 0x513   :  { %v3993_v56 = vadd.f32 %v14823_v2, %v11433_v53  ;;  %v3984_v28 = vpop.f32.mrb[53].mxu0  ;;  %v7974_v43 = vpop.permute.xlu0 %7973 }
 0x514   :  { %v3985_v11 = vadd.f32 %v14823_v2, %v3984_v28  ;;  %v11434_v44 = vpop.f32.mrb[54].mxu0  ;;  %8016 = vst.msk [vmem:[#allocation5 + $0x60] sm:$0xff] %vm8009_vm4, %v7974_v43  ;;  %v7976_v47 = vpop.permute.xlu1 %7975 }
 0x515   :  { %v4085_v40 = vmax.f32 %v3993_v56, 0.0  ;;  %v3996_v10 = vadd.f32 %v14823_v2, %v11434_v44  ;;  %8017 = vst.msk [vmem:[#allocation5 + $0x70] sm:$0xff] %vm8009_vm4, %v7976_v47  ;;  %v3987_v46 = vpop.f32.mrb[55].mxu0 }
 0x516   :  { %v4083_v25 = vmax.f32 %v3985_v11, 0.0  ;;  %v3988_v52 = vadd.f32 %v14823_v2, %v3987_v46 }
 0x517   :  { %v5077_v30 = vcombine.high %v4085_v40, %v4085_v40  ;;  %v5084_v22 = vrot.slane %v4085_v40, %v12830_v24  ;;  %v4086_v12 = vmax.f32 %v3996_v10, 0.0  ;;  %v8071_v19 = vpop.permute.xlu0 %8070 }
 0x518   :  { %v5043_v21 = vcombine.high %v4083_v25, %v4083_v25  ;;  %v5050_v57 = vrot.slane %v4083_v25, %v12830_v24  ;;  %v4084_v48 = vmax.f32 %v3988_v52, 0.0  ;;  %8113 = vst.msk [vmem:[#allocation5 + $0x60] sm:$0xff] %vm8106_vm1, %v8071_v19  ;;  %v8073_v27 = vpop.permute.xlu1 %8072 }
 0x519   :  { %v5091_v59 = vrot.slane %v5077_v30, %v12830_v24  ;;  %v5092_v6 = vcombine.high %v5084_v22, %v5084_v22  ;;  %v11084_v33 = vrot.slane %v5084_v22, 9  ;;  %v5094_v38 = vcombine.high %v4086_v12, %v4086_v12  ;;  %8114 = vst.msk [vmem:[#allocation5 + $0x70] sm:$0xff] %vm8106_vm1, %v8073_v27 }
 0x51a   :  { %v5057_v2 = vrot.slane %v5043_v21, %v12830_v24  ;;  %v5058_v16 = vcombine.high %v5050_v57, %v5050_v57  ;;  %v10956_v7 = vrot.slane %v5050_v57, 9  ;;  %v5101_v4 = vrot.slane %v4086_v12, %v12830_v24 }
 0x51b   :  { %v5093_v63 = vcombine.high %v5091_v59, %v5091_v59  ;;  %v11085_v36 = vrot.slane %v5092_v6, 9  ;;  %v11086_v23 = vrot.slane %v5091_v59, 9  ;;  %v6503_v20 = vmax.f32 %v5084_v22, %v11084_v33  ;;  %v8169_v39 = vpop.permute.xlu0 %8168 }
 0x51c   :  { %v5059_v37 = vcombine.high %v5057_v2, %v5057_v2  ;;  %v10957_v51 = vrot.slane %v5058_v16, 9  ;;  %v10958_v13 = vrot.slane %v5057_v2, 9  ;;  %v5991_v45 = vmax.f32 %v5050_v57, %v10956_v7  ;;  %8211 = vst.msk [vmem:[#allocation5 + $0x60] sm:$0xff] %vm8204_vm13, %v8169_v39  ;;  %v8171_v29 = vpop.permute.xlu1 %8170 }
 0x51d   :  { %v11087_v31 = vrot.slane %v5093_v63, 9  ;;  %v6504_v61 = vmax.f32 %v5092_v6, %v11085_v36  ;;  %v6505_v5 = vmax.f32 %v5091_v59, %v11086_v23  ;;  %v5108_v35 = vrot.slane %v5094_v38, %v12830_v24  ;;  %8212 = vst.msk [vmem:[#allocation5 + $0x70] sm:$0xff] %vm8204_vm13, %v8171_v29  ;;  %v8369_v6 = vld [vmem:[#allocation5 + $0x98] sm:$0xff]  ;;  %v8367_v23 = vld [vmem:[#allocation5 + $0x88] sm:$0xff] }
 0x51e   :  { %v10959_v3 = vrot.slane %v5059_v37, 9  ;;  %v5992_v55 = vmax.f32 %v5058_v16, %v10957_v51  ;;  %v5993_v17 = vmax.f32 %v5057_v2, %v10958_v13  ;;  %v6631_v49 = vmax.f32 %v5991_v45, %v6503_v20 }
 0x51f   :  { %v6506_v54 = vmax.f32 %v5093_v63, %v11087_v31  ;;  %v5109_v32 = vcombine.high %v5101_v4, %v5101_v4  ;;  %v8266_v18 = vpop.permute.xlu0 %8265  ;;  %v5110_v9 = vcombine.high %v5108_v35, %v5108_v35  ;;  %v11088_v0 = vrot.slane %v5101_v4, 9 }
 0x520   :  { %v5994_v58 = vmax.f32 %v5059_v37, %v10959_v3  ;;  %v6632_v34 = vmax.f32 %v5992_v55, %v6504_v61  ;;  %v6633_v42 = vmax.f32 %v5993_v17, %v6505_v5  ;;  %8308 = vst.msk [vmem:[#allocation5 + $0x60] sm:$0xff] %vm8301_vm11, %v8266_v18  ;;  %v8268_v62 = vpop.permute.xlu1 %8267  ;;  %v7361_v60 = vrot.slane %v6631_v49, %v12857_v41 }
 0x521   :  { %v11090_v26 = vrot.slane %v5108_v35, 9  ;;  %8309 = vst.msk [vmem:[#allocation5 + $0x70] sm:$0xff] %vm8301_vm11, %v8268_v62  ;;  %v5060_v50 = vcombine.high %v4084_v48, %v4084_v48  ;;  %v11089_v53 = vrot.slane %v5109_v32, 9  ;;  %v5067_v56 = vrot.slane %v4084_v48, %v12830_v24 }
 0x522   :  { %v6634_v14 = vmax.f32 %v5994_v58, %v6506_v54  ;;  %v7365_v15 = vrot.slane %v6632_v34, %v12857_v41  ;;  %v7369_v8 = vrot.slane %v6633_v42, %v12857_v41  ;;  %v11091_v44 = vrot.slane %v5110_v9, 9  ;;  %v8333_v42 = vld [vmem:[#allocation4 + $0x132] sm:$0xff] }
 0x523   :  { %v7687_v28 = vpop.permute.xlu0 %7686  ;;  %v5074_v47 = vrot.slane %v5060_v50, %v12830_v24  ;;  %v6507_v46 = vmax.f32 %v5101_v4, %v11088_v0  ;;  %v5075_v25 = vcombine.high %v5067_v56, %v5067_v56  ;;  %v10960_v52 = vrot.slane %v5067_v56, 9  ;;  %8349 = vst.msk [vmem:[#allocation5 + $0xf8] sm:$0xff] %vm6772_vm2, %v8333_v42 }
 0x524   :  { %v7373_v43 = vrot.slane %v6634_v14, %v12857_v41  ;;  %v7552_v11 = vsel %vm16210_vm9, %v7365_v15, %v7361_v60  ;;  %7727 = vst.msk [vmem:[#allocation5 + $0x80] sm:$0xff] %vm7718_vm0, %v7687_v28  ;;  %v7689_v40 = vpop.permute.xlu1 %7688  ;;  %v6509_v30 = vmax.f32 %v5108_v35, %v11090_v26  ;;  %v6508_v21 = vmax.f32 %v5109_v32, %v11089_v53 }
 0x525   :  { %v7553_v10 = vsel %vm7456_vm5, %v7369_v8, %v7552_v11  ;;  %7728 = vst.msk [vmem:[#allocation5 + $0x90] sm:$0xff] %vm7718_vm0, %v7689_v40  ;;  %v5076_v22 = vcombine.high %v5074_v47, %v5074_v47  ;;  %v10962_v12 = vrot.slane %v5074_v47, 9  ;;  %v10961_v57 = vrot.slane %v5075_v25, 9 }
 0x526   :  { %v7554_v19 = vsel %vm16211_vm12, %v7373_v43, %v7553_v10  ;;  %v5995_v48 = vmax.f32 %v5067_v56, %v10960_v52  ;;  %v6510_v33 = vmax.f32 %v5110_v9, %v11091_v44  ;;  %v8391_v37 = vpack.c.bf16 %v8369_v6, %v8367_v23  ;;  %v8373_v56 = vld [vmem:[#allocation5 + $0xb8] sm:$0xff]  ;;  %v8371_v44 = vld [vmem:[#allocation5 + $0xa8] sm:$0xff] }
 0x527   :  { %v7784_v27 = vpop.permute.xlu0 %7783  ;;  %v8362_v59 = vld [vmem:[#allocation5 + $0x60] sm:$0xff]  ;;  %v10963_v38 = vrot.slane %v5076_v22, 9  ;;  %v5997_v2 = vmax.f32 %v5074_v47, %v10962_v12  ;;  %v5996_v4 = vmax.f32 %v5075_v25, %v10961_v57  ;;  %v8393_v47 = vpack.c.bf16 %v8373_v56, %v8371_v44 }
 0x528   :  { %7824 = vst.msk [vmem:[#allocation5 + $0x80] sm:$0xff] %vm7815_vm15, %v7784_v27  ;;  %v7786_v16 = vpop.permute.xlu1 %7785  ;;  %v8364_v7 = vld [vmem:[#allocation5 + $0x70] sm:$0xff]  ;;  %v6635_v63 = vmax.f32 %v5995_v48, %v6507_v46  ;;  %v15128_v12 = vld [vmem:[%s16027_s3] ss:$0 sm:$0xff] }
 0x529   :  { %7825 = vst.msk [vmem:[#allocation5 + $0x90] sm:$0xff] %vm7815_vm15, %v7786_v16  ;;  %v8388_v36 = vpack.c.bf16 %v8364_v7, %v8362_v59  ;;  %v5998_v20 = vmax.f32 %v5076_v22, %v10963_v38  ;;  %v6637_v39 = vmax.f32 %v5997_v2, %v6509_v30  ;;  %v6636_v51 = vmax.f32 %v5996_v4, %v6508_v21 }
 0x52a   :  { %v7377_v13 = vrot.slane %v6635_v63, %v12857_v41 }
 0x52b   :  { %8486 = vmatmul.mubr.bf16.gmra.mrb[12].mxu1 %v8388_v36  ;;  %v7881_v45 = vpop.permute.xlu0 %7880  ;;  %v6638_v29 = vmax.f32 %v5998_v20, %v6510_v33  ;;  %v7381_v61 = vrot.slane %v6636_v51, %v12857_v41  ;;  %v7385_v35 = vrot.slane %v6637_v39, %v12857_v41 }
 0x52c   :  { %7921 = vst.msk [vmem:[#allocation5 + $0x80] sm:$0xff] %vm7912_vm10, %v7881_v45  ;;  %v7883_v31 = vpop.permute.xlu1 %7882  ;;  %11131 = vmatprep.mubr.msk.bf16.mxu1 %vm6772_vm2, %v8391_v37  ;;  %v7555_v5 = vsel %vm7460_vm7, %v7377_v13, %v7554_v19 }
 0x52d   :  { %7922 = vst.msk [vmem:[#allocation5 + $0x90] sm:$0xff] %vm7912_vm10, %v7883_v31  ;;  %v7389_v3 = vrot.slane %v6638_v29, %v12857_v41  ;;  %v7556_v55 = vsel %vm7462_vm3, %v7381_v61, %v7555_v5 }
 0x52e   :  { %v7557_v49 = vsel %vm7464_vm6, %v7385_v35, %v7556_v55 }
 0x52f   :  { %v7978_v17 = vpop.permute.xlu0 %7977  ;;  %v7558_v32 = vsel %vm7466_vm14, %v7389_v3, %v7557_v49 }
 0x530   :  { %8018 = vst.msk [vmem:[#allocation5 + $0x80] sm:$0xff] %vm8009_vm4, %v7978_v17  ;;  %v7980_v54 = vpop.permute.xlu1 %7979 }
 0x531   :  { %8019 = vst.msk [vmem:[#allocation5 + $0x90] sm:$0xff] %vm8009_vm4, %v7980_v54 }
 0x532   :  { %7603 = vst.msk [vmem:[#allocation4 + $0x101] sm:$0xff] %vm6772_vm2, %v7558_v32 }
 0x533   :  { %v8075_v18 = vpop.permute.xlu0 %8074 }
 0x534   :  { %8115 = vst.msk [vmem:[#allocation5 + $0x80] sm:$0xff] %vm8106_vm1, %v8075_v18  ;;  %v8077_v58 = vpop.permute.xlu1 %8076 }
 0x535   :  { %8116 = vst.msk [vmem:[#allocation5 + $0x90] sm:$0xff] %vm8106_vm1, %v8077_v58 }
 0x537   :  { %v8173_v34 = vpop.permute.xlu0 %8172 }
 0x538   :  { %8213 = vst.msk [vmem:[#allocation5 + $0x80] sm:$0xff] %vm8204_vm13, %v8173_v34  ;;  %v8175_v9 = vpop.permute.xlu1 %8174 }
 0x539   :  { %v8136_v62 = vld [vmem:[#allocation4 + $0x100] sm:$0xff]  ;;  %8214 = vst.msk [vmem:[#allocation5 + $0x90] sm:$0xff] %vm8204_vm13, %v8175_v9 }
 0x53a   :  { %v8039_v60 = vld [vmem:[#allocation4 + $0x102] sm:$0xff]  ;;  %8180 = vrot.lane.b32.xlu0 %v8136_v62, %s11591_s22  ;;  %7890 = vrot.lane.b32.xlu1 %v8136_v62, %s11588_s2  ;;  %7636 = vst.msk [vmem:[#allocation5 + $0xe0] sm:$0xff] %vm6772_vm2, %v8136_v62 }
 0x53b   :  { %8346 = vst.msk [vmem:[#allocation5 + $0xc8] sm:$0xff] %vm6772_vm2, %v8039_v60  ;;  %v8270_v0 = vpop.permute.xlu0 %8269  ;;  %v8233_v14 = vld [vmem:[#allocation4 + $0x101] sm:$0xff] }
 0x53c   :  { %8310 = vst.msk [vmem:[#allocation5 + $0x80] sm:$0xff] %vm8301_vm11, %v8270_v0  ;;  %v8272_v26 = vpop.permute.xlu1 %8271 }
 0x53d   :  { %8311 = vst.msk [vmem:[#allocation5 + $0x90] sm:$0xff] %vm8301_vm11, %v8272_v26 }
 0x53e   :  { %8277 = vrot.lane.b32.xlu0 %v8233_v14, %s11592_s25  ;;  %7987 = vrot.lane.b32.xlu1 %v8233_v14, %s11589_s24 }
 0x53f   :  { %v7691_v15 = vpop.permute.xlu0 %7690 }
 0x540   :  { %7729 = vst.msk [vmem:[#allocation5 + $0xa0] sm:$0xff] %vm7718_vm0, %v7691_v15  ;;  %v7693_v8 = vpop.permute.xlu1 %7692 }
 0x541   :  { %7730 = vst.msk [vmem:[#allocation5 + $0xb0] sm:$0xff] %vm7718_vm0, %v7693_v8 }
 0x542   :  { %7698 = vrot.lane.b32.xlu0 %v8233_v14, %s11586_s28  ;;  %8084 = vrot.lane.b32.xlu1 %v8039_v60, %s11590_s30 }
 0x543   :  { %v7788_v50 = vpop.permute.xlu0 %7787  ;;  %v8366_v53 = vld [vmem:[#allocation5 + $0x80] sm:$0xff] }
 0x544   :  { %7826 = vst.msk [vmem:[#allocation5 + $0xa0] sm:$0xff] %vm7815_vm15, %v7788_v50  ;;  %v7790_v28 = vpop.permute.xlu1 %7789  ;;  %v8368_v43 = vld [vmem:[#allocation5 + $0x90] sm:$0xff] }
 0x545   :  { %7827 = vst.msk [vmem:[#allocation5 + $0xb0] sm:$0xff] %vm7815_vm15, %v7790_v28  ;;  %v8390_v11 = vpack.c.bf16 %v8368_v43, %v8366_v53 }
 0x546   :  { %7795 = vrot.lane.b32.xlu0 %v8039_v60, %s11587_s21 }
 0x547   :  { %8494 = vmatmul.mubr.bf16.gmra.mrb[16].mxu1 %v8390_v11  ;;  %v7885_v40 = vpop.permute.xlu0 %7884 }
 0x548   :  { %7923 = vst.msk [vmem:[#allocation5 + $0xa0] sm:$0xff] %vm7912_vm10, %v7885_v40  ;;  %v7887_v10 = vpop.permute.xlu1 %7886  ;;  %11132 = vmatprep.mubr.msk.bf16.mxu1 %vm6772_vm2, %v8393_v47 }
 0x549   :  { %7924 = vst.msk [vmem:[#allocation5 + $0xb0] sm:$0xff] %vm7912_vm10, %v7887_v10 }
 0x54b   :  { %v7982_v46 = vpop.permute.xlu0 %7981 }
 0x54c   :  { %8020 = vst.msk [vmem:[#allocation5 + $0xa0] sm:$0xff] %vm8009_vm4, %v7982_v46  ;;  %v7984_v25 = vpop.permute.xlu1 %7983 }
 0x54d   :  { %8021 = vst.msk [vmem:[#allocation5 + $0xb0] sm:$0xff] %vm8009_vm4, %v7984_v25 }
 0x54f   :  { %v8079_v52 = vpop.permute.xlu0 %8078 }
 0x550   :  { %8117 = vst.msk [vmem:[#allocation5 + $0xa0] sm:$0xff] %vm8106_vm1, %v8079_v52  ;;  %v8081_v30 = vpop.permute.xlu1 %8080 }
 0x551   :  { %8118 = vst.msk [vmem:[#allocation5 + $0xb0] sm:$0xff] %vm8106_vm1, %v8081_v30 }
 0x552   :  { %v11437_v22 = vpop.f32.mrb[56].mxu0 }
 0x553   :  { %v4009_v19 = vadd.f32 %v15128_v12, %v11437_v22  ;;  %v4000_v21 = vpop.f32.mrb[57].mxu0  ;;  %v8177_v57 = vpop.permute.xlu0 %8176 }
 0x554   :  { %v4001_v48 = vadd.f32 %v15128_v12, %v4000_v21  ;;  %v11438_v27 = vpop.f32.mrb[58].mxu0  ;;  %8215 = vst.msk [vmem:[#allocation5 + $0xa0] sm:$0xff] %vm8204_vm13, %v8177_v57 }
 0x555   :  { %v4089_v59 = vmax.f32 %v4009_v19, 0.0  ;;  %v4012_v6 = vadd.f32 %v15128_v12, %v11438_v27  ;;  %v4003_v33 = vpop.f32.mrb[59].mxu0 }
 0x556   :  { %v4087_v38 = vmax.f32 %v4001_v48, 0.0  ;;  %v4004_v2 = vadd.f32 %v15128_v12, %v4003_v33 }
 0x557   :  { %v5145_v16 = vcombine.high %v4089_v59, %v4089_v59  ;;  %v5152_v7 = vrot.slane %v4089_v59, %v12830_v24  ;;  %v4090_v4 = vmax.f32 %v4012_v6, 0.0  ;;  %v8274_v63 = vpop.permute.xlu0 %8273 }
 0x558   :  { %v5111_v36 = vcombine.high %v4087_v38, %v4087_v38  ;;  %v5118_v23 = vrot.slane %v4087_v38, %v12830_v24  ;;  %v4088_v20 = vmax.f32 %v4004_v2, 0.0  ;;  %8312 = vst.msk [vmem:[#allocation5 + $0xa0] sm:$0xff] %vm8301_vm11, %v8274_v63 }
 0x559   :  { %v5159_v39 = vrot.slane %v5145_v16, %v12830_v24  ;;  %v5160_v37 = vcombine.high %v5152_v7, %v5152_v7  ;;  %v11092_v51 = vrot.slane %v5152_v7, 9  ;;  %v5162_v13 = vcombine.high %v4090_v4, %v4090_v4 }
 0x55a   :  { %v5125_v45 = vrot.slane %v5111_v36, %v12830_v24  ;;  %v5126_v29 = vcombine.high %v5118_v23, %v5118_v23  ;;  %v10964_v31 = vrot.slane %v5118_v23, 9  ;;  %v5169_v61 = vrot.slane %v4090_v4, %v12830_v24 }
 0x55b   :  { %v5161_v5 = vcombine.high %v5159_v39, %v5159_v39  ;;  %v11093_v35 = vrot.slane %v5160_v37, 9  ;;  %v11094_v3 = vrot.slane %v5159_v39, 9  ;;  %v6511_v55 = vmax.f32 %v5152_v7, %v11092_v51  ;;  %v7695_v17 = vpop.permute.xlu0 %7694 }
 0x55c   :  { %v5127_v49 = vcombine.high %v5125_v45, %v5125_v45  ;;  %v10965_v54 = vrot.slane %v5126_v29, 9  ;;  %v10966_v32 = vrot.slane %v5125_v45, 9  ;;  %v5999_v18 = vmax.f32 %v5118_v23, %v10964_v31  ;;  %7731 = vst.msk [vmem:[#allocation5 + $0xc0] sm:$0xff] %vm7718_vm0, %v7695_v17 }
 0x55d   :  { %v11095_v58 = vrot.slane %v5161_v5, 9  ;;  %v6512_v34 = vmax.f32 %v5160_v37, %v11093_v35  ;;  %v6513_v42 = vmax.f32 %v5159_v39, %v11094_v3  ;;  %v5176_v9 = vrot.slane %v5162_v13, %v12830_v24 }
 0x55e   :  { %v10967_v62 = vrot.slane %v5127_v49, 9  ;;  %v6000_v60 = vmax.f32 %v5126_v29, %v10965_v54  ;;  %v6001_v0 = vmax.f32 %v5125_v45, %v10966_v32  ;;  %v6639_v26 = vmax.f32 %v5999_v18, %v6511_v55 }
 0x55f   :  { %v6514_v14 = vmax.f32 %v5161_v5, %v11095_v58  ;;  %v5177_v15 = vcombine.high %v5169_v61, %v5169_v61  ;;  %v7792_v8 = vpop.permute.xlu0 %7791  ;;  %v5178_v28 = vcombine.high %v5176_v9, %v5176_v9  ;;  %v11096_v11 = vrot.slane %v5169_v61, 9 }
 0x560   :  { %v6002_v50 = vmax.f32 %v5127_v49, %v10967_v62  ;;  %v6640_v53 = vmax.f32 %v6000_v60, %v6512_v34  ;;  %v6641_v56 = vmax.f32 %v6001_v0, %v6513_v42  ;;  %7828 = vst.msk [vmem:[#allocation5 + $0xc0] sm:$0xff] %vm7815_vm15, %v7792_v8  ;;  %v7393_v43 = vrot.slane %v6639_v26, %v12857_v41 }
 0x561   :  { %v11098_v44 = vrot.slane %v5176_v9, 9  ;;  %v5128_v46 = vcombine.high %v4088_v20, %v4088_v20  ;;  %v11097_v25 = vrot.slane %v5177_v15, 9  ;;  %v5135_v52 = vrot.slane %v4088_v20, %v12830_v24 }
 0x562   :  { %v6642_v47 = vmax.f32 %v6002_v50, %v6514_v14  ;;  %v7397_v40 = vrot.slane %v6640_v53, %v12857_v41  ;;  %v7401_v10 = vrot.slane %v6641_v56, %v12857_v41  ;;  %v11099_v19 = vrot.slane %v5178_v28, 9 }
 0x563   :  { %v5142_v21 = vrot.slane %v5128_v46, %v12830_v24  ;;  %v6515_v48 = vmax.f32 %v5169_v61, %v11096_v11  ;;  %v5143_v27 = vcombine.high %v5135_v52, %v5135_v52  ;;  %v10968_v59 = vrot.slane %v5135_v52, 9 }
 0x564   :  { %v7405_v30 = vrot.slane %v6642_v47, %v12857_v41  ;;  %v7559_v22 = vsel %vm16210_vm9, %v7397_v40, %v7393_v43  ;;  %v6517_v6 = vmax.f32 %v5176_v9, %v11098_v44  ;;  %v6516_v16 = vmax.f32 %v5177_v15, %v11097_v25  ;;  %v8370_v9 = vld [vmem:[#allocation5 + $0xa0] sm:$0xff]  ;;  %v8375_v15 = vld [vmem:[#allocation5 + $0xc8] sm:$0xff]  ;;  %vm16213_vm9 = vmmov %vm16211_vm12 }
 0x565   :  { %v7560_v57 = vsel %vm7456_vm5, %v7401_v10, %v7559_v22  ;;  %v5144_v33 = vcombine.high %v5142_v21, %v5142_v21  ;;  %v10970_v38 = vrot.slane %v5142_v21, 9  ;;  %v10969_v7 = vrot.slane %v5143_v27, 9 }
 0x566   :  { %v7561_v2 = vsel %vm16211_vm12, %v7405_v30, %v7560_v57  ;;  %v6003_v4 = vmax.f32 %v5135_v52, %v10968_v59  ;;  %v6518_v63 = vmax.f32 %v5178_v28, %v11099_v19  ;;  %vm9622_vm12 = vcmask 257024  }
 0x567   :  { %v10971_v36 = vrot.slane %v5144_v33, 9  ;;  %v6005_v23 = vmax.f32 %v5142_v21, %v10970_v38  ;;  %v6004_v20 = vmax.f32 %v5143_v27, %v10969_v7 }
 0x568   :  { %v6643_v39 = vmax.f32 %v6003_v4, %v6515_v48 }
 0x569   :  { %v6006_v37 = vmax.f32 %v5144_v33, %v10971_v36  ;;  %v6645_v51 = vmax.f32 %v6005_v23, %v6517_v6  ;;  %v6644_v13 = vmax.f32 %v6004_v20, %v6516_v16 }
 0x56a   :  { %v7409_v45 = vrot.slane %v6643_v39, %v12857_v41 }
 0x56b   :  { %v6646_v29 = vmax.f32 %v6006_v37, %v6518_v63  ;;  %v7413_v5 = vrot.slane %v6644_v13, %v12857_v41  ;;  %v7417_v3 = vrot.slane %v6645_v51, %v12857_v41 }
 0x56c   :  { %v7889_v31 = vpop.permute.xlu0 %7888  ;;  %v8179_v61 = vpop.permute.xlu1 %8178  ;;  %v7562_v35 = vsel %vm7460_vm7, %v7409_v45, %v7561_v2 }
 0x56d   :  { %7925 = vst.msk [vmem:[#allocation5 + $0xc0] sm:$0xff] %vm7912_vm10, %v7889_v31  ;;  %v7421_v55 = vrot.slane %v6646_v29, %v12857_v41  ;;  %v7563_v17 = vsel %vm7462_vm3, %v7413_v5, %v7562_v35 }
 0x56e   :  { %8216 = vst.msk [vmem:[#allocation5 + $0xb0] sm:$0xff] %vm8204_vm13, %v8179_v61  ;;  %v7564_v49 = vsel %vm7464_vm6, %v7417_v3, %v7563_v17 }
 0x56f   :  { %v7565_v18 = vsel %vm7466_vm14, %v7421_v55, %v7564_v49 }
 0x570   :  { %v7986_v54 = vpop.permute.xlu0 %7985  ;;  %v8276_v32 = vpop.permute.xlu1 %8275  ;;  %7604 = vst.msk [vmem:[#allocation4 + $0x111] sm:$0xff] %vm6772_vm2, %v7565_v18 }
 0x571   :  { %8022 = vst.msk [vmem:[#allocation5 + $0xc0] sm:$0xff] %vm8009_vm4, %v7986_v54 }
 0x572   :  { %8313 = vst.msk [vmem:[#allocation5 + $0xb0] sm:$0xff] %vm8301_vm11, %v8276_v32 }
 0x574   :  { %v8083_v58 = vpop.permute.xlu0 %8082  ;;  %v7697_v34 = vpop.permute.xlu1 %7696 }
 0x575   :  { %8119 = vst.msk [vmem:[#allocation5 + $0xc0] sm:$0xff] %vm8106_vm1, %v8083_v58 }
 0x576   :  { %7732 = vst.msk [vmem:[#allocation5 + $0xd0] sm:$0xff] %vm7718_vm0, %v7697_v34 }
 0x577   :  { %v7846_v60 = vld [vmem:[#allocation4 + $0x110] sm:$0xff] }
 0x578   :  { %v7794_v42 = vpop.permute.xlu1 %7793  ;;  %v8040_v26 = vld [vmem:[#allocation4 + $0x112] sm:$0xff]  ;;  %7892 = vrot.lane.b32.xlu0 %v7846_v60, %s11588_s2  ;;  %8182 = vrot.lane.b32.xlu1 %v7846_v60, %s11591_s22  ;;  %7637 = vst.msk [vmem:[#allocation5 + $0xf0] sm:$0xff] %vm6772_vm2, %v7846_v60 }
 0x579   :  { %v8372_v62 = vld [vmem:[#allocation5 + $0xb0] sm:$0xff]  ;;  %7829 = vst.msk [vmem:[#allocation5 + $0xd0] sm:$0xff] %vm7815_vm15, %v7794_v42 }
 0x57a   :  { %v8392_v0 = vpack.c.bf16 %v8372_v62, %v8370_v9  ;;  %8347 = vst.msk [vmem:[#allocation5 + $0xd8] sm:$0xff] %vm6772_vm2, %v8040_v26  ;;  %v7943_v14 = vld [vmem:[#allocation4 + $0x111] sm:$0xff] }
 0x57c   :  { %8502 = vmatmul.mubr.bf16.gmra.mrb[20].mxu1 %v8392_v0  ;;  %7989 = vrot.lane.b32.xlu0 %v7943_v14, %s11589_s24 }
 0x57d   :  { %8279 = vrot.lane.b32.xlu1 %v7943_v14, %s11592_s25 }
 0x580   :  { %8086 = vrot.lane.b32.xlu0 %v8040_v26, %s11590_s30 }
 0x581   :  { %v8377_v8 = vld [vmem:[#allocation5 + $0xd8] sm:$0xff]  ;;  %7700 = vrot.lane.b32.xlu1 %v7943_v14, %s11586_s28 }
 0x582   :  { %v8395_v50 = vpack.c.bf16 %v8377_v8, %v8375_v15 }
 0x584   :  { %11133 = vmatprep.mubr.msk.bf16.mxu1 %vm6772_vm2, %v8395_v50 }
 0x585   :  { %7797 = vrot.lane.b32.xlu1 %v8040_v26, %s11587_s21 }
 0x58e   :  { %v11441_v53 = vpop.f32.mrb[60].mxu0 }
 0x58f   :  { %v4025_v56 = vadd.f32 %v15128_v12, %v11441_v53  ;;  %v4016_v28 = vpop.f32.mrb[61].mxu0 }
 0x590   :  { %v4017_v43 = vadd.f32 %v15128_v12, %v4016_v28  ;;  %v11442_v11 = vpop.f32.mrb[62].mxu0 }
 0x591   :  { %v4093_v44 = vmax.f32 %v4025_v56, 0.0  ;;  %v4028_v47 = vadd.f32 %v15128_v12, %v11442_v11  ;;  %v4019_v40 = vpop.f32.mrb[63].mxu0 }
 0x592   :  { %v4091_v10 = vmax.f32 %v4017_v43, 0.0  ;;  %v4020_v46 = vadd.f32 %v15128_v12, %v4019_v40 }
 0x593   :  { %v5213_v25 = vcombine.high %v4093_v44, %v4093_v44  ;;  %v5220_v52 = vrot.slane %v4093_v44, %v12830_v24  ;;  %v4094_v30 = vmax.f32 %v4028_v47, 0.0 }
 0x594   :  { %v5179_v22 = vcombine.high %v4091_v10, %v4091_v10  ;;  %v5186_v19 = vrot.slane %v4091_v10, %v12830_v24  ;;  %v4092_v21 = vmax.f32 %v4020_v46, 0.0 }
 0x595   :  { %v5227_v57 = vrot.slane %v5213_v25, %v12830_v24  ;;  %v5228_v48 = vcombine.high %v5220_v52, %v5220_v52  ;;  %v11100_v27 = vrot.slane %v5220_v52, 9  ;;  %v5230_v59 = vcombine.high %v4094_v30, %v4094_v30 }
 0x596   :  { %v5193_v6 = vrot.slane %v5179_v22, %v12830_v24  ;;  %v5194_v33 = vcombine.high %v5186_v19, %v5186_v19  ;;  %v10972_v38 = vrot.slane %v5186_v19, 9  ;;  %v5237_v2 = vrot.slane %v4094_v30, %v12830_v24 }
 0x597   :  { %v5229_v12 = vcombine.high %v5227_v57, %v5227_v57  ;;  %v11101_v16 = vrot.slane %v5228_v48, 9  ;;  %v11102_v7 = vrot.slane %v5227_v57, 9  ;;  %v6519_v4 = vmax.f32 %v5220_v52, %v11100_v27 }
 0x598   :  { %v5195_v63 = vcombine.high %v5193_v6, %v5193_v6  ;;  %v10973_v36 = vrot.slane %v5194_v33, 9  ;;  %v10974_v23 = vrot.slane %v5193_v6, 9  ;;  %v6007_v20 = vmax.f32 %v5186_v19, %v10972_v38  ;;  %v9958_v19 = vld [vmem:[#allocation6 + $0x2a] sm:$0xf] }
 0x599   :  { %v11103_v39 = vrot.slane %v5229_v12, 9  ;;  %v6520_v37 = vmax.f32 %v5228_v48, %v11101_v16  ;;  %v6521_v51 = vmax.f32 %v5227_v57, %v11102_v7  ;;  %v5244_v13 = vrot.slane %v5230_v59, %v12830_v24  ;;  %9966 = vst.msk [vmem:[#allocation7 + $0x2c] sm:$0xf] %vm9622_vm12, %v9958_v19  ;;  %v9647_v19 = vld [vmem:[#allocation6 + $0x1] sm:$0xf] }
 0x59a   :  { %v10975_v45 = vrot.slane %v5195_v63, 9  ;;  %v6008_v29 = vmax.f32 %v5194_v33, %v10973_v36  ;;  %v6009_v31 = vmax.f32 %v5193_v6, %v10974_v23  ;;  %v6647_v61 = vmax.f32 %v6007_v20, %v6519_v4  ;;  %v15203_v6 = vld [vmem:[%s16030_s6] ss:$0 sm:$0xff] }
 0x59b   :  { %v6522_v5 = vmax.f32 %v5229_v12, %v11103_v39  ;;  %v5245_v35 = vcombine.high %v5237_v2, %v5237_v2  ;;  %v5246_v49 = vcombine.high %v5244_v13, %v5244_v13  ;;  %v11104_v32 = vrot.slane %v5237_v2, 9 }
 0x59c   :  { %v6010_v3 = vmax.f32 %v5195_v63, %v10975_v45  ;;  %v6648_v55 = vmax.f32 %v6008_v29, %v6520_v37  ;;  %v6649_v17 = vmax.f32 %v6009_v31, %v6521_v51  ;;  %v7425_v54 = vrot.slane %v6647_v61, %v12857_v41 }
 0x59d   :  { %v11106_v18 = vrot.slane %v5244_v13, 9  ;;  %v5196_v9 = vcombine.high %v4092_v21, %v4092_v21  ;;  %v11105_v62 = vrot.slane %v5245_v35, 9  ;;  %v5203_v60 = vrot.slane %v4092_v21, %v12830_v24 }
 0x59e   :  { %v6650_v58 = vmax.f32 %v6010_v3, %v6522_v5  ;;  %v7429_v34 = vrot.slane %v6648_v55, %v12857_v41  ;;  %v7433_v42 = vrot.slane %v6649_v17, %v12857_v41  ;;  %v11107_v14 = vrot.slane %v5246_v49, 9 }
 0x59f   :  { %v5210_v15 = vrot.slane %v5196_v9, %v12830_v24  ;;  %v6523_v50 = vmax.f32 %v5237_v2, %v11104_v32  ;;  %v5211_v53 = vcombine.high %v5203_v60, %v5203_v60  ;;  %v10976_v56 = vrot.slane %v5203_v60, 9 }
 0x5a0   :  { %v7437_v0 = vrot.slane %v6650_v58, %v12857_v41  ;;  %v7566_v26 = vsel %vm16212_vm8, %v7429_v34, %v7425_v54  ;;  %v6525_v28 = vmax.f32 %v5244_v13, %v11106_v18  ;;  %v6524_v47 = vmax.f32 %v5245_v35, %v11105_v62 }
 0x5a1   :  { %v7567_v8 = vsel %vm7456_vm5, %v7433_v42, %v7566_v26  ;;  %v5212_v43 = vcombine.high %v5210_v15, %v5210_v15  ;;  %v10978_v11 = vrot.slane %v5210_v15, 9  ;;  %v10977_v40 = vrot.slane %v5211_v53, 9 }
 0x5a2   :  { %v7568_v44 = vsel %vm16213_vm9, %v7437_v0, %v7567_v8  ;;  %v6011_v10 = vmax.f32 %v5203_v60, %v10976_v56  ;;  %v6526_v46 = vmax.f32 %v5246_v49, %v11107_v14 }
 0x5a3   :  { %v10979_v25 = vrot.slane %v5212_v43, 9  ;;  %v6013_v52 = vmax.f32 %v5210_v15, %v10978_v11  ;;  %v6012_v30 = vmax.f32 %v5211_v53, %v10977_v40 }
 0x5a4   :  { %v6651_v22 = vmax.f32 %v6011_v10, %v6523_v50 }
 0x5a5   :  { %v6014_v21 = vmax.f32 %v5212_v43, %v10979_v25  ;;  %v6653_v57 = vmax.f32 %v6013_v52, %v6525_v28  ;;  %v6652_v48 = vmax.f32 %v6012_v30, %v6524_v47 }
 0x5a6   :  { %v7441_v27 = vrot.slane %v6651_v22, %v12857_v41 }
 0x5a7   :  { %v6654_v59 = vmax.f32 %v6014_v21, %v6526_v46  ;;  %v7445_v33 = vrot.slane %v6652_v48, %v12857_v41  ;;  %v7449_v2 = vrot.slane %v6653_v57, %v12857_v41 }
 0x5a8   :  { %v7569_v38 = vsel %vm7460_vm7, %v7441_v27, %v7568_v44  ;;  %vm16216_vm7 = vmmov %vm16212_vm8 }
 0x5a9   :  { %v7453_v16 = vrot.slane %v6654_v59, %v12857_v41  ;;  %v7570_v7 = vsel %vm7462_vm3, %v7445_v33, %v7569_v38 }
 0x5aa   :  { %v8463_v12 = vpop.f32.mrb[0].mxu1  ;;  %v7571_v36 = vsel %vm7464_vm6, %v7449_v2, %v7570_v7  ;;  %vm16215_vm6 = vmmov %vm16213_vm9 }
 0x5ab   :  { %v8464_v4 = vadd.f32 %v15203_v6, %v8463_v12  ;;  %v8465_v63 = vpop.f32.mrb[1].mxu1  ;;  %v7572_v39 = vsel %vm7466_vm14, %v7453_v16, %v7571_v36  ;;  %vm16214_vm14 = vmmov %vm16212_vm8  ;;  %v8139_v12 = vld [vmem:[#allocation4 + $0x130] sm:$0xff] }
 0x5ac   :  { %v8181_v23 = vpop.permute.xlu0 %8180  ;;  %v7891_v20 = vpop.permute.xlu1 %7890  ;;  %7605 = vst.msk [vmem:[#allocation4 + $0x121] sm:$0xff] %vm6772_vm2, %v7572_v39  ;;  %v8236_v16 = vld [vmem:[#allocation4 + $0x131] sm:$0xff]  ;;  %vm16217_vm3 = vmmov %vm16215_vm6 }
 0x5ad   :  { %8217 = vst.msk [vmem:[#allocation5 + $0xc0] sm:$0xff] %vm8204_vm13, %v8181_v23  ;;  %v8526_v37 = vmax.f32 %v8464_v4, 0.0  ;;  %v8466_v51 = vpop.f32.mrb[2].mxu1  ;;  %vm16218_vm8 = vmmov %vm16216_vm7 }
 0x5ae   :  { %7926 = vst.msk [vmem:[#allocation5 + $0xd0] sm:$0xff] %vm7912_vm10, %v7891_v20  ;;  %v8467_v13 = vadd.f32 %v15203_v6, %v8466_v51  ;;  %v8468_v45 = vpop.f32.mrb[3].mxu1  ;;  %vm16219_vm9 = vmmov %vm16217_vm3 }
 0x5af   :  { %v8558_v29 = vcombine.high %v8526_v37, %v8526_v37  ;;  %v8565_v31 = vrot.slane %v8526_v37, %v12830_v24 }
 0x5b0   :  { %v8278_v61 = vpop.permute.xlu0 %8277  ;;  %v7988_v5 = vpop.permute.xlu1 %7987  ;;  %v8527_v35 = vmax.f32 %v8467_v13, 0.0 }
 0x5b1   :  { %8314 = vst.msk [vmem:[#allocation5 + $0xc0] sm:$0xff] %vm8301_vm11, %v8278_v61  ;;  %v8572_v3 = vrot.slane %v8558_v29, %v12830_v24  ;;  %v8573_v55 = vcombine.high %v8565_v31, %v8565_v31  ;;  %v11135_v17 = vrot.slane %v8565_v31, 9 }
 0x5b2   :  { %8023 = vst.msk [vmem:[#allocation5 + $0xd0] sm:$0xff] %vm8009_vm4, %v7988_v5  ;;  %v8575_v49 = vcombine.high %v8527_v35, %v8527_v35  ;;  %v8582_v54 = vrot.slane %v8527_v35, %v12830_v24 }
 0x5b3   :  { %v8574_v32 = vcombine.high %v8572_v3, %v8572_v3  ;;  %v11136_v18 = vrot.slane %v8573_v55, 9  ;;  %v11137_v58 = vrot.slane %v8572_v3, 9  ;;  %v8990_v26 = vmax.f32 %v8565_v31, %v11135_v17  ;;  %v8138_v14 = vld [vmem:[#allocation4 + $0x120] sm:$0xff] }
 0x5b4   :  { %v8589_v34 = vrot.slane %v8575_v49, %v12830_v24  ;;  %v8590_v42 = vcombine.high %v8582_v54, %v8582_v54  ;;  %v11167_v9 = vrot.slane %v8582_v54, 9  ;;  %v7699_v62 = vpop.permute.xlu0 %7698  ;;  %v8085_v60 = vpop.permute.xlu1 %8084  ;;  %v8041_v15 = vld [vmem:[#allocation4 + $0x122] sm:$0xff]  ;;  %8184 = vrot.lane.b32.xlu0 %v8138_v14, %s11591_s22  ;;  %7894 = vrot.lane.b32.xlu1 %v8138_v14, %s11588_s2 }
 0x5b5   :  { %v11138_v0 = vrot.slane %v8574_v32, 9  ;;  %7733 = vst.msk [vmem:[#allocation5 + $0xe0] sm:$0xff] %vm7718_vm0, %v7699_v62  ;;  %v8991_v28 = vmax.f32 %v8573_v55, %v11136_v18  ;;  %v8992_v43 = vmax.f32 %v8572_v3, %v11137_v58  ;;  %v8235_v46 = vld [vmem:[#allocation4 + $0x121] sm:$0xff] }
 0x5b6   :  { %8120 = vst.msk [vmem:[#allocation5 + $0xd0] sm:$0xff] %vm8106_vm1, %v8085_v60  ;;  %v8591_v8 = vcombine.high %v8589_v34, %v8589_v34  ;;  %v11168_v50 = vrot.slane %v8590_v42, 9  ;;  %v11169_v53 = vrot.slane %v8589_v34, 9  ;;  %v9118_v56 = vmax.f32 %v8582_v54, %v11167_v9 }
 0x5b7   :  { %8348 = vst.msk [vmem:[#allocation5 + $0xe8] sm:$0xff] %vm6772_vm2, %v8041_v15  ;;  %v8993_v25 = vmax.f32 %v8574_v32, %v11138_v0 }
 0x5b8   :  { %v11170_v11 = vrot.slane %v8591_v8, 9  ;;  %v9119_v44 = vmax.f32 %v8590_v42, %v11168_v50  ;;  %v9120_v47 = vmax.f32 %v8589_v34, %v11169_v53  ;;  %v9150_v40 = vmax.f32 %v8990_v26, %v9118_v56  ;;  %v7796_v10 = vpop.permute.xlu0 %7795  ;;  %8281 = vrot.lane.b32.xlu0 %v8235_v46, %s11592_s25  ;;  %7991 = vrot.lane.b32.xlu1 %v8235_v46, %s11589_s24 }
 0x5b9   :  { %7830 = vst.msk [vmem:[#allocation5 + $0xe0] sm:$0xff] %vm7815_vm15, %v7796_v10 }
 0x5ba   :  { %v9121_v52 = vmax.f32 %v8591_v8, %v11170_v11  ;;  %v9151_v30 = vmax.f32 %v8991_v28, %v9119_v44  ;;  %v9152_v22 = vmax.f32 %v8992_v43, %v9120_v47  ;;  %v9464_v57 = vrot.slane %v9150_v40, %v12857_v41 }
 0x5bc   :  { %v9153_v21 = vmax.f32 %v8993_v25, %v9121_v52  ;;  %v9468_v48 = vrot.slane %v9151_v30, %v12857_v41  ;;  %v9472_v27 = vrot.slane %v9152_v22, %v12857_v41  ;;  %9663 = vrot.lane.b32.xlu0 %v9647_v19, %s11587_s21  ;;  %8088 = vrot.lane.b32.xlu1 %v8041_v15, %s11590_s30 }
 0x5be   :  { %v9476_v59 = vrot.slane %v9153_v21, %v12857_v41  ;;  %v9589_v33 = vsel %vm16214_vm14, %v9468_v48, %v9464_v57 }
 0x5bf   :  { %v9590_v38 = vsel %vm7456_vm5, %v9472_v27, %v9589_v33 }
 0x5c0   :  { %v9591_v2 = vsel %vm16215_vm6, %v9476_v59, %v9590_v38  ;;  %8186 = vrot.lane.b32.xlu1 %v8139_v12, %s11591_s22  ;;  %v9631_v38 = vld [vmem:[#allocation6] sm:$0xf] }
 0x5c1   :  { %9623 = vst.msk [vmem:[#allocation6 + $0x9] sm:$0xf] %vm9622_vm12, %v9591_v2  ;;  %9639 = vst.msk [vmem:[#allocation7] sm:$0xf] %vm9622_vm12, %v9631_v38 }
 0x5c4   :  { %8283 = vrot.lane.b32.xlu1 %v8236_v16, %s11592_s25 }
 0x5c6   :  { %v8471_v7 = vpop.f32.mrb[4].mxu1 }
 0x5c7   :  { %v8472_v4 = vadd.f32 %v15203_v6, %v8471_v7  ;;  %v8473_v63 = vpop.f32.mrb[5].mxu1 }
 0x5c8   :  { %v8474_v36 = vpop.f32.mrb[6].mxu1  ;;  %v9648_v23 = vld [vmem:[#allocation6 + $0x9] sm:$0xf] }
 0x5c9   :  { %v8528_v20 = vmax.f32 %v8472_v4, 0.0  ;;  %v8475_v39 = vadd.f32 %v15203_v6, %v8474_v36  ;;  %v8476_v37 = vpop.f32.mrb[7].mxu1  ;;  %v9632_v51 = vld [vmem:[#allocation6 + $0x8] sm:$0xf]  ;;  %9665 = vrot.lane.b32.xlu1 %v9648_v23, %s11587_s21 }
 0x5ca   :  { %v9794_v13 = vld [vmem:[#allocation6 + $0x9] sm:$0xf]  ;;  %9640 = vst.msk [vmem:[#allocation7 + $0xc] sm:$0xf] %vm9622_vm12, %v9632_v51 }
 0x5cb   :  { %v8592_v45 = vcombine.high %v8528_v20, %v8528_v20  ;;  %v8599_v29 = vrot.slane %v8528_v20, %v12830_v24  ;;  %v8529_v31 = vmax.f32 %v8475_v39, 0.0  ;;  %9802 = vst.msk [vmem:[#allocation7 + $0x4] sm:$0xf] %vm9622_vm12, %v9794_v13  ;;  %v9810_v4 = vld [vmem:[#allocation6 + $0xa] sm:$0xf] }
 0x5cd   :  { %v8606_v61 = vrot.slane %v8592_v45, %v12830_v24  ;;  %v8607_v5 = vcombine.high %v8599_v29, %v8599_v29  ;;  %v11139_v35 = vrot.slane %v8599_v29, 9  ;;  %v8609_v3 = vcombine.high %v8529_v31, %v8529_v31 }
 0x5ce   :  { %v8616_v55 = vrot.slane %v8529_v31, %v12830_v24 }
 0x5cf   :  { %v8608_v17 = vcombine.high %v8606_v61, %v8606_v61  ;;  %v11140_v49 = vrot.slane %v8607_v5, 9  ;;  %v11141_v54 = vrot.slane %v8606_v61, 9  ;;  %v8623_v32 = vrot.slane %v8609_v3, %v12830_v24 }
 0x5d0   :  { %v8624_v18 = vcombine.high %v8616_v55, %v8616_v55  ;;  %v11171_v58 = vrot.slane %v8616_v55, 9  ;;  %v8994_v42 = vmax.f32 %v8599_v29, %v11139_v35 }
 0x5d1   :  { %v11142_v34 = vrot.slane %v8608_v17, 9  ;;  %v8625_v9 = vcombine.high %v8623_v32, %v8623_v32  ;;  %v11173_v60 = vrot.slane %v8623_v32, 9  ;;  %v8995_v26 = vmax.f32 %v8607_v5, %v11140_v49 }
 0x5d2   :  { %v11172_v62 = vrot.slane %v8624_v18, 9  ;;  %v9122_v0 = vmax.f32 %v8616_v55, %v11171_v58  ;;  %v8996_v14 = vmax.f32 %v8606_v61, %v11141_v54 }
 0x5d3   :  { %v11174_v15 = vrot.slane %v8625_v9, 9  ;;  %v9124_v50 = vmax.f32 %v8623_v32, %v11173_v60  ;;  %v8997_v56 = vmax.f32 %v8608_v17, %v11142_v34 }
 0x5d4   :  { %v9123_v8 = vmax.f32 %v8624_v18, %v11172_v62  ;;  %v9154_v53 = vmax.f32 %v8994_v42, %v9122_v0 }
 0x5d5   :  { %v9125_v28 = vmax.f32 %v8625_v9, %v11174_v15  ;;  %v9156_v11 = vmax.f32 %v8996_v14, %v9124_v50 }
 0x5d6   :  { %v9155_v43 = vmax.f32 %v8995_v26, %v9123_v8  ;;  %v9480_v47 = vrot.slane %v9154_v53, %v12857_v41 }
 0x5d7   :  { %v9157_v44 = vmax.f32 %v8997_v56, %v9125_v28  ;;  %v9488_v10 = vrot.slane %v9156_v11, %v12857_v41 }
 0x5d8   :  { %v9484_v40 = vrot.slane %v9155_v43, %v12857_v41 }
 0x5d9   :  { %v9492_v46 = vrot.slane %v9157_v44, %v12857_v41 }
 0x5da   :  { %v9592_v25 = vsel %vm16216_vm7, %v9484_v40, %v9480_v47 }
 0x5db   :  { %v9593_v52 = vsel %vm7456_vm5, %v9488_v10, %v9592_v25  ;;  %v8381_v25 = vld [vmem:[#allocation5 + $0xf8] sm:$0xff] }
 0x5dc   :  { %v9594_v30 = vsel %vm16217_vm3, %v9492_v46, %v9593_v52  ;;  %v8379_v46 = vld [vmem:[#allocation5 + $0xe8] sm:$0xff] }
 0x5dd   :  { %9624 = vst.msk [vmem:[#allocation6 + $0x11] sm:$0xf] %vm9622_vm12, %v9594_v30 }
 0x5e2   :  { %v8479_v22 = vpop.f32.mrb[8].mxu1 }
 0x5e3   :  { %v8480_v19 = vadd.f32 %v15203_v6, %v8479_v22  ;;  %v8481_v21 = vpop.f32.mrb[9].mxu1  ;;  %v8374_v22 = vld [vmem:[#allocation5 + $0xc0] sm:$0xff] }
 0x5e4   :  { %v8482_v57 = vpop.f32.mrb[10].mxu1  ;;  %v9649_v48 = vld [vmem:[#allocation6 + $0x11] sm:$0xf] }
 0x5e5   :  { %v8530_v27 = vmax.f32 %v8480_v19, 0.0  ;;  %v8483_v59 = vadd.f32 %v15203_v6, %v8482_v57  ;;  %9667 = vrot.lane.b32.xlu0 %v9649_v48, %s11587_s21  ;;  %v8484_v33 = vpop.f32.mrb[11].mxu1  ;;  %v9633_v7 = vld [vmem:[#allocation6 + $0x10] sm:$0xf]  ;;  %v8397_v57 = vpack.c.bf16 %v8381_v25, %v8379_v46 }
 0x5e6   :  { %9641 = vst.msk [vmem:[#allocation7 + $0x18] sm:$0xf] %vm9622_vm12, %v9633_v7  ;;  %v9795_v63 = vld [vmem:[#allocation6 + $0x11] sm:$0xf] }
 0x5e7   :  { %v8626_v2 = vcombine.high %v8530_v27, %v8530_v27  ;;  %v8633_v12 = vrot.slane %v8530_v27, %v12830_v24  ;;  %v8531_v16 = vmax.f32 %v8483_v59, 0.0  ;;  %v9955_v36 = vld [vmem:[#allocation6 + $0x12] sm:$0xf]  ;;  %9803 = vst.msk [vmem:[#allocation7 + $0x10] sm:$0xf] %vm9622_vm12, %v9795_v63 }
 0x5e8   :  { %9963 = vst.msk [vmem:[#allocation7 + $0x8] sm:$0xf] %vm9622_vm12, %v9955_v36 }
 0x5e9   :  { %v8640_v23 = vrot.slane %v8626_v2, %v12830_v24  ;;  %v8641_v20 = vcombine.high %v8633_v12, %v8633_v12  ;;  %v11143_v39 = vrot.slane %v8633_v12, 9  ;;  %v8643_v37 = vcombine.high %v8531_v16, %v8531_v16  ;;  %9826 = vrot.lane.b32.xlu0 %v9810_v4, %s11587_s21  ;;  %v9696_v4 = vld [vmem:[#allocation6 + $0x2] sm:$0xf] }
 0x5ea   :  { %v8650_v51 = vrot.slane %v8531_v16, %v12830_v24  ;;  %v7893_v35 = vpop.permute.xlu0 %7892  ;;  %v8183_v3 = vpop.permute.xlu1 %8182 }
 0x5eb   :  { %v8642_v13 = vcombine.high %v8640_v23, %v8640_v23  ;;  %v11144_v45 = vrot.slane %v8641_v20, 9  ;;  %v11145_v29 = vrot.slane %v8640_v23, 9  ;;  %v8657_v31 = vrot.slane %v8643_v37, %v12830_v24  ;;  %7927 = vst.msk [vmem:[#allocation5 + $0xe0] sm:$0xff] %vm7912_vm10, %v7893_v35 }
 0x5ec   :  { %v8658_v61 = vcombine.high %v8650_v51, %v8650_v51  ;;  %v11175_v5 = vrot.slane %v8650_v51, 9  ;;  %v8998_v17 = vmax.f32 %v8633_v12, %v11143_v39  ;;  %8218 = vst.msk [vmem:[#allocation5 + $0xd0] sm:$0xff] %vm8204_vm13, %v8183_v3 }
 0x5ed   :  { %v11146_v55 = vrot.slane %v8642_v13, 9  ;;  %v8659_v49 = vcombine.high %v8657_v31, %v8657_v31  ;;  %v11177_v32 = vrot.slane %v8657_v31, 9  ;;  %v8999_v58 = vmax.f32 %v8641_v20, %v11144_v45 }
 0x5ee   :  { %v11176_v54 = vrot.slane %v8658_v61, 9  ;;  %v9126_v18 = vmax.f32 %v8650_v51, %v11175_v5  ;;  %v9000_v34 = vmax.f32 %v8640_v23, %v11145_v29  ;;  %v7990_v0 = vpop.permute.xlu0 %7989  ;;  %v9811_v51 = vld [vmem:[#allocation6 + $0x12] sm:$0xf] }
 0x5ef   :  { %v11178_v42 = vrot.slane %v8659_v49, 9  ;;  %v9128_v62 = vmax.f32 %v8657_v31, %v11177_v32  ;;  %v8280_v26 = vpop.permute.xlu1 %8279  ;;  %8024 = vst.msk [vmem:[#allocation5 + $0xe0] sm:$0xff] %vm8009_vm4, %v7990_v0  ;;  %v9001_v14 = vmax.f32 %v8642_v13, %v11146_v55 }
 0x5f0   :  { %v9127_v9 = vmax.f32 %v8658_v61, %v11176_v54  ;;  %v9158_v60 = vmax.f32 %v8998_v17, %v9126_v18  ;;  %8315 = vst.msk [vmem:[#allocation5 + $0xd0] sm:$0xff] %vm8301_vm11, %v8280_v26  ;;  %v9698_v54 = vld [vmem:[#allocation6 + $0x12] sm:$0xf] }
 0x5f1   :  { %v9129_v15 = vmax.f32 %v8659_v49, %v11178_v42  ;;  %v9160_v50 = vmax.f32 %v9000_v34, %v9128_v62 }
 0x5f2   :  { %v9159_v8 = vmax.f32 %v8999_v58, %v9127_v9  ;;  %v9496_v56 = vrot.slane %v9158_v60, %v12857_v41  ;;  %v8087_v11 = vpop.permute.xlu0 %8086 }
 0x5f3   :  { %v9161_v53 = vmax.f32 %v9001_v14, %v9129_v15  ;;  %v9504_v43 = vrot.slane %v9160_v50, %v12857_v41  ;;  %v7701_v44 = vpop.permute.xlu1 %7700  ;;  %8121 = vst.msk [vmem:[#allocation5 + $0xe0] sm:$0xff] %vm8106_vm1, %v8087_v11 }
 0x5f4   :  { %v9500_v28 = vrot.slane %v9159_v8, %v12857_v41  ;;  %7734 = vst.msk [vmem:[#allocation5 + $0xf0] sm:$0xff] %vm7718_vm0, %v7701_v44  ;;  %v9859_v8 = vld [vmem:[#allocation6 + $0x10] sm:$0xf]  ;;  %vm16221_vm0 = vmmov %vm16217_vm3 }
 0x5f5   :  { %v9508_v47 = vrot.slane %v9161_v53, %v12857_v41 }
 0x5f6   :  { %v9595_v40 = vsel %vm16218_vm8, %v9500_v28, %v9496_v56  ;;  %vm9687_vm8 = vcmask 519424  }
 0x5f7   :  { %v9596_v10 = vsel %vm7456_vm5, %v9504_v43, %v9595_v40  ;;  %v7798_v30 = vpop.permute.xlu1 %7797  ;;  %v8376_v19 = vld [vmem:[#allocation5 + $0xd0] sm:$0xff] }
 0x5f8   :  { %v9597_v52 = vsel %vm16219_vm9, %v9508_v47, %v9596_v10  ;;  %7831 = vst.msk [vmem:[#allocation5 + $0xf0] sm:$0xff] %vm7815_vm15, %v7798_v30  ;;  %v8394_v21 = vpack.c.bf16 %v8376_v19, %v8374_v22 }
 0x5f9   :  { %9625 = vst.msk [vmem:[#allocation6 + $0x19] sm:$0xf] %vm9622_vm12, %v9597_v52 }
 0x5fa   :  { %8510 = vmatmul.mubr.bf16.gmra.mrb[24].mxu1 %v8394_v21 }
 0x5fb   :  { %11134 = vmatprep.mubr.msk.bf16.mxu1 %vm6772_vm2, %v8397_v57  ;;  %vm16220_vm2 = vmmov %vm16216_vm7 }
 0x5fe   :  { %v8487_v48 = vpop.f32.mrb[12].mxu1 }
 0x5ff   :  { %v8488_v27 = vadd.f32 %v15203_v6, %v8487_v48  ;;  %v8489_v59 = vpop.f32.mrb[13].mxu1  ;;  %v9198_v48 = vld [vmem:[%s16032_s8 + $0x80] sm:$0xff] }
 0x600   :  { %v8490_v33 = vpop.f32.mrb[14].mxu1  ;;  %v9812_v38 = vld [vmem:[#allocation6 + $0x1a] sm:$0xf]  ;;  %vm9234_vm15 = vcmp.gt.f32.partialorder %v9198_v48, 0.005  ;;  %v9344_v48 = vld [vmem:[%s16031_s7 + $0x90] sm:$0xff] }
 0x601   :  { %v9650_v2 = vld [vmem:[#allocation6 + $0x19] sm:$0xf]  ;;  %v8532_v12 = vmax.f32 %v8488_v27, 0.0  ;;  %v8491_v16 = vadd.f32 %v15203_v6, %v8490_v33  ;;  %9830 = vrot.lane.b32.xlu0 %v9812_v38, %s11587_s21  ;;  %v8492_v7 = vpop.f32.mrb[15].mxu1  ;;  %v9745_v38 = vld [vmem:[#allocation6 + $0x8] sm:$0xf] }
 0x602   :  { %9669 = vrot.lane.b32.xlu1 %v9650_v2, %s11587_s21  ;;  %v9796_v63 = vld [vmem:[#allocation6 + $0x19] sm:$0xf]  ;;  %v9697_v2 = vld [vmem:[#allocation6 + $0xa] sm:$0xf]  ;;  %v9342_v7 = vld [vmem:[%s16031_s7 + $0x80] sm:$0xff] }
 0x603   :  { %v8660_v36 = vcombine.high %v8532_v12, %v8532_v12  ;;  %v8667_v23 = vrot.slane %v8532_v12, %v12830_v24  ;;  %v8533_v20 = vmax.f32 %v8491_v16, 0.0  ;;  %9804 = vst.msk [vmem:[#allocation7 + $0x1c] sm:$0xf] %vm9622_vm12, %v9796_v63  ;;  %v9634_v39 = vld [vmem:[#allocation6 + $0x18] sm:$0xf]  ;;  %v9199_v16 = vld [vmem:[%s16032_s8 + $0x88] sm:$0xff] }
 0x604   :  { %v9956_v37 = vld [vmem:[#allocation6 + $0x1a] sm:$0xf]  ;;  %9642 = vst.msk [vmem:[#allocation7 + $0x24] sm:$0xf] %vm9622_vm12, %v9634_v39  ;;  %vm9235_vm14 = vcmp.gt.f32.partialorder %v9199_v16, 0.005 }
 0x605   :  { %9964 = vst.msk [vmem:[#allocation7 + $0x14] sm:$0xf] %vm9622_vm12, %v9956_v37  ;;  %v8674_v13 = vrot.slane %v8660_v36, %v12830_v24  ;;  %v8675_v45 = vcombine.high %v8667_v23, %v8667_v23  ;;  %v11147_v29 = vrot.slane %v8667_v23, 9  ;;  %v8677_v31 = vcombine.high %v8533_v20, %v8533_v20  ;;  %9712 = vrot.lane.b32.xlu0 %v9696_v4, %s11589_s24  ;;  %v9343_v36 = vld [vmem:[%s16031_s7 + $0x88] sm:$0xff] }
 0x606   :  { %9828 = vrot.lane.b32.xlu1 %v9811_v51, %s11587_s21  ;;  %v8684_v61 = vrot.slane %v8533_v20, %v12830_v24  ;;  %v9183_v20 = vld [vmem:[%s16032_s8 + $0x8] sm:$0xff]  ;;  %v11215_v39 = vsel %vm9234_vm15, 1.0, %v11574_v1  ;;  %v11216_v37 = vsel %vm9235_vm14, 1.0, %v11574_v1  ;;  %vm16222_vm14 = vcmask 1041409  }
 0x607   :  { %v8676_v5 = vcombine.high %v8674_v13, %v8674_v13  ;;  %v11148_v35 = vrot.slane %v8675_v45, 9  ;;  %v11149_v3 = vrot.slane %v8674_v13, 9  ;;  %v8691_v55 = vrot.slane %v8677_v31, %v12830_v24 }
 0x608   :  { %v8692_v17 = vcombine.high %v8684_v61, %v8684_v61  ;;  %v11179_v49 = vrot.slane %v8684_v61, 9  ;;  %v9002_v18 = vmax.f32 %v8667_v23, %v11147_v29  ;;  %v9182_v23 = vld [vmem:[%s16032_s8] sm:$0xff]  ;;  %vm9219_vm7 = vcmp.gt.f32.partialorder %v9183_v20, 0.005 }
 0x609   :  { %v11150_v32 = vrot.slane %v8676_v5, 9  ;;  %9716 = vrot.lane.b32.xlu0 %v9698_v54, %s11589_s24  ;;  %v8693_v58 = vcombine.high %v8691_v55, %v8691_v55  ;;  %v11181_v42 = vrot.slane %v8691_v55, 9  ;;  %v9003_v62 = vmax.f32 %v8675_v45, %v11148_v35 }
 0x60a   :  { %v11180_v34 = vrot.slane %v8692_v17, 9  ;;  %v9130_v9 = vmax.f32 %v8684_v61, %v11179_v49  ;;  %v9004_v60 = vmax.f32 %v8674_v13, %v11149_v3  ;;  %vm9218_vm6 = vcmp.gt.f32.partialorder %v9182_v23, 0.005 }
 0x60b   :  { %v11182_v0 = vrot.slane %v8693_v58, 9  ;;  %v9132_v14 = vmax.f32 %v8691_v55, %v11181_v42  ;;  %v9005_v50 = vmax.f32 %v8676_v5, %v11150_v32  ;;  %v9378_v5 = vmul.f32 %v11215_v39, %v9342_v7  ;;  %v9747_v32 = vld [vmem:[#allocation6 + $0x18] sm:$0xf] }
 0x60c   :  { %v9131_v26 = vmax.f32 %v8692_v17, %v11180_v34  ;;  %v9162_v15 = vmax.f32 %v9002_v18, %v9130_v9  ;;  %v9379_v35 = vmul.f32 %v11216_v37, %v9343_v36  ;;  %v11199_v3 = vsel %vm9218_vm6, 1.0, %v11574_v1  ;;  %v9699_v18 = vld [vmem:[#allocation6 + $0x1a] sm:$0xf]  ;;  %v9203_v36 = vld [vmem:[%s16032_s8 + $0xa8] sm:$0xff] }
 0x60d   :  { %9875 = vrot.lane.b32.xlu0 %v9859_v8, %s11589_s24  ;;  %v9133_v53 = vmax.f32 %v8693_v58, %v11182_v0  ;;  %v9164_v28 = vmax.f32 %v9004_v60, %v9132_v14  ;;  %v9327_v60 = vld [vmem:[%s16031_s7 + $0x8] sm:$0xff]  ;;  %v9200_v0 = vld [vmem:[%s16032_s8 + $0x90] sm:$0xff]  ;;  %v11200_v8 = vsel %vm9219_vm7, 1.0, %v11574_v1  ;;  %v9329_v37 = vld [vmem:[%s16031_s7 + $0x18] sm:$0xff]  ;;  %vm9239_vm15 = vcmp.gt.f32.partialorder %v9203_v36, 0.005 }
 0x60e   :  { %v9163_v56 = vmax.f32 %v9003_v62, %v9131_v26  ;;  %v9512_v11 = vrot.slane %v9162_v15, %v12857_v41  ;;  %v9406_v9 = vpack.c.bf16 %v9379_v35, %v9378_v5  ;;  %v9326_v62 = vld [vmem:[%s16031_s7] sm:$0xff]  ;;  %vm9236_vm3 = vcmp.gt.f32.partialorder %v9200_v0, 0.005  ;;  %v9347_v35 = vld [vmem:[%s16031_s7 + $0xa8] sm:$0xff] }
 0x60f   :  { %v9165_v43 = vmax.f32 %v9005_v50, %v9133_v53  ;;  %v9520_v47 = vrot.slane %v9164_v28, %v12857_v41  ;;  %v9346_v5 = vld [vmem:[%s16031_s7 + $0xa0] sm:$0xff]  ;;  %vm16223_vm6 = vcmask 1043459  }
 0x610   :  { %v9516_v44 = vrot.slane %v9163_v56, %v12857_v41  ;;  %11321 = vmatprep.subr.bf16.mxu1 %v9406_v9  ;;  %v9330_v9 = vld [vmem:[%s16031_s7 + $0x20] sm:$0xff] }
 0x611   :  { %v9524_v40 = vrot.slane %v9165_v43, %v12857_v41  ;;  %v9201_v43 = vld [vmem:[%s16032_s8 + $0x98] sm:$0xff] }
 0x612   :  { %v9598_v10 = vsel %vm16220_vm2, %v9516_v44, %v9512_v11  ;;  %v9184_v11 = vld [vmem:[%s16032_s8 + $0x10] sm:$0xff]  ;;  %vm9237_vm9 = vcmp.gt.f32.partialorder %v9201_v43, 0.005 }
 0x613   :  { %v9599_v46 = vsel %vm7456_vm5, %v9520_v47, %v9598_v10  ;;  %v9907_v47 = vld [vmem:[#allocation6 + $0x11] sm:$0xf]  ;;  %v9363_v10 = vmul.f32 %v11200_v8, %v9327_v60  ;;  %vm9220_vm2 = vcmp.gt.f32.partialorder %v9184_v11, 0.005  ;;  %v11218_v23 = vsel %vm9237_vm9, 1.0, %v11574_v1  ;;  %v9349_v11 = vld [vmem:[%s16031_s7 + $0xb8] sm:$0xff] }
 0x614   :  { %v9600_v25 = vsel %vm16221_vm0, %v9524_v40, %v9599_v46  ;;  %v9362_v40 = vmul.f32 %v11199_v3, %v9326_v62  ;;  %v11201_v39 = vsel %vm9220_vm2, 1.0, %v11574_v1  ;;  %v9186_v3 = vld [vmem:[%s16032_s8 + $0x20] sm:$0xff]  ;;  %v9331_v62 = vld [vmem:[%s16031_s7 + $0x28] sm:$0xff]  ;;  %v9204_v60 = vld [vmem:[%s16032_s8 + $0xb0] sm:$0xff] }
 0x615   :  { %9626 = vst.msk [vmem:[#allocation6 + $0x21] sm:$0xf] %vm9622_vm12, %v9600_v25  ;;  %v9348_v8 = vld [vmem:[%s16031_s7 + $0xb0] sm:$0xff] }
 0x61a   :  { %v8495_v52 = vpop.f32.mrb[16].mxu1 }
 0x61b   :  { %v8496_v30 = vadd.f32 %v15203_v6, %v8495_v52  ;;  %v8497_v22 = vpop.f32.mrb[17].mxu1 }
 0x61c   :  { %v8498_v19 = vpop.f32.mrb[18].mxu1  ;;  %v9861_v21 = vld [vmem:[#allocation6 + $0x20] sm:$0xf] }
 0x61d   :  { %v9813_v57 = vld [vmem:[#allocation6 + $0x22] sm:$0xf]  ;;  %v8534_v27 = vmax.f32 %v8496_v30, 0.0  ;;  %v8499_v59 = vadd.f32 %v15203_v6, %v8498_v19  ;;  %9879 = vrot.lane.b32.xlu0 %v9861_v21, %s11589_s24  ;;  %v8500_v33 = vpop.f32.mrb[19].mxu1  ;;  %v9860_v21 = vld [vmem:[#allocation6 + $0x18] sm:$0xf] }
 0x61e   :  { %9832 = vrot.lane.b32.xlu1 %v9813_v57, %s11587_s21  ;;  %v9797_v12 = vld [vmem:[#allocation6 + $0x21] sm:$0xf]  ;;  %v9862_v57 = vld [vmem:[#allocation6 + $0x28] sm:$0xf]  ;;  %v11217_v33 = vsel %vm9236_vm3, 1.0, %v11574_v1 }
 0x61f   :  { %v8694_v4 = vcombine.high %v8534_v27, %v8534_v27  ;;  %v8701_v6 = vrot.slane %v8534_v27, %v12830_v24  ;;  %v8535_v63 = vmax.f32 %v8499_v59, 0.0  ;;  %9805 = vst.msk [vmem:[#allocation7 + $0x28] sm:$0xf] %vm9622_vm12, %v9797_v12  ;;  %v9957_v31 = vld [vmem:[#allocation6 + $0x22] sm:$0xf]  ;;  %v9185_v27 = vld [vmem:[%s16032_s8 + $0x18] sm:$0xff]  ;;  %v9398_v59 = vpack.c.bf16 %v9363_v10, %v9362_v40 }
 0x620   :  { %9965 = vst.msk [vmem:[#allocation7 + $0x20] sm:$0xf] %vm9622_vm12, %v9957_v31  ;;  %v9380_v20 = vmul.f32 %v11217_v33, %v9344_v48  ;;  %v9651_v31 = vld [vmem:[#allocation6 + $0x31] sm:$0xf]  ;;  %vm9240_vm3 = vcmp.gt.f32.partialorder %v9204_v60, 0.005 }
 0x621   :  { %v8708_v51 = vrot.slane %v8694_v4, %v12830_v24  ;;  %v8709_v13 = vcombine.high %v8701_v6, %v8701_v6  ;;  %v11151_v45 = vrot.slane %v8701_v6, 9  ;;  %v8711_v29 = vcombine.high %v8535_v63, %v8535_v63  ;;  %9761 = vrot.lane.b32.xlu0 %v9745_v38, %s11591_s22  ;;  %v9345_v38 = vld [vmem:[%s16031_s7 + $0x98] sm:$0xff]  ;;  %v9909_v4 = vld [vmem:[#allocation6 + $0x21] sm:$0xf]  ;;  %11322 = vmatpush3.bf16.msra.mxu1 %v9398_v59 }
 0x622   :  { %9714 = vrot.lane.b32.xlu1 %v9697_v2, %s11589_s24  ;;  %v8718_v61 = vrot.slane %v8535_v63, %v12830_v24  ;;  %v9202_v63 = vld [vmem:[%s16032_s8 + $0xa0] sm:$0xff] }
 0x623   :  { %v8710_v55 = vcombine.high %v8708_v51, %v8708_v51  ;;  %v11152_v17 = vrot.slane %v8709_v13, 9  ;;  %v11153_v49 = vrot.slane %v8708_v51, 9  ;;  %v9006_v54 = vmax.f32 %v8701_v6, %v11151_v45  ;;  %v9328_v6 = vld [vmem:[%s16031_s7 + $0x10] sm:$0xff]  ;;  %v9350_v33 = vld [vmem:[%s16031_s7 + $0xc0] sm:$0xff] }
 0x624   :  { %v8725_v58 = vrot.slane %v8711_v29, %v12830_v24  ;;  %v8726_v34 = vcombine.high %v8718_v61, %v8718_v61  ;;  %v11183_v42 = vrot.slane %v8718_v61, 9  ;;  %vm9238_vm0 = vcmp.gt.f32.partialorder %v9202_v63, 0.005 }
 0x625   :  { %v11154_v26 = vrot.slane %v8710_v55, 9  ;;  %v9007_v14 = vmax.f32 %v8709_v13, %v11152_v17  ;;  %v9008_v15 = vmax.f32 %v8708_v51, %v11153_v49  ;;  %9765 = vrot.lane.b32.xlu0 %v9747_v32, %s11591_s22  ;;  %v9364_v49 = vmul.f32 %v11201_v39, %v9328_v6  ;;  %v9334_v6 = vld [vmem:[%s16031_s7 + $0x40] sm:$0xff]  ;;  %v9335_v39 = vld [vmem:[%s16031_s7 + $0x48] sm:$0xff] }
 0x626   :  { %9718 = vrot.lane.b32.xlu1 %v9699_v18, %s11589_s24  ;;  %v8727_v50 = vcombine.high %v8725_v58, %v8725_v58  ;;  %v11184_v53 = vrot.slane %v8726_v34, 9  ;;  %v11185_v56 = vrot.slane %v8725_v58, 9  ;;  %v9134_v28 = vmax.f32 %v8718_v61, %v11183_v42  ;;  %v8185_v22 = vpop.permute.xlu0 %8184  ;;  %v7895_v19 = vpop.permute.xlu1 %7894 }
 0x627   :  { %v9009_v44 = vmax.f32 %v8710_v55, %v11154_v26  ;;  %8219 = vst.msk [vmem:[#allocation5 + $0xe0] sm:$0xff] %vm8204_vm13, %v8185_v22  ;;  %v9381_v61 = vmul.f32 %v11218_v23, %v9345_v38  ;;  %v11219_v26 = vsel %vm9238_vm0, 1.0, %v11574_v1  ;;  %v9351_v38 = vld [vmem:[%s16031_s7 + $0xc8] sm:$0xff] }
 0x628   :  { %v11186_v46 = vrot.slane %v8727_v50, 9  ;;  %v9135_v25 = vmax.f32 %v8726_v34, %v11184_v53  ;;  %v9136_v52 = vmax.f32 %v8725_v58, %v11185_v56  ;;  %v9166_v30 = vmax.f32 %v9006_v54, %v9134_v28  ;;  %7928 = vst.msk [vmem:[#allocation5 + $0xf0] sm:$0xff] %vm7912_vm10, %v7895_v19  ;;  %v9187_v54 = vld [vmem:[%s16032_s8 + $0x28] sm:$0xff]  ;;  %v9746_v58 = vld [vmem:[#allocation6 + $0x10] sm:$0xf]  ;;  %v9333_v19 = vld [vmem:[%s16031_s7 + $0x38] sm:$0xff] }
 0x629   :  { %9923 = vrot.lane.b32.xlu0 %v9907_v47, %s11591_s22  ;;  %vm9221_vm10 = vcmp.gt.f32.partialorder %v9185_v27, 0.005  ;;  %v9407_v34 = vpack.c.bf16 %v9381_v61, %v9380_v20  ;;  %v9382_v28 = vmul.f32 %v11219_v26, %v9346_v5  ;;  %v9189_v47 = vld [vmem:[%s16032_s8 + $0x38] sm:$0xff]  ;;  %vm9223_vm7 = vcmp.gt.f32.partialorder %v9187_v54, 0.005  ;;  %v9352_v61 = vld [vmem:[%s16031_s7 + $0xd0] sm:$0xff] }
 0x62a   :  { %9877 = vrot.lane.b32.xlu1 %v9860_v21, %s11589_s24  ;;  %v9137_v2 = vmax.f32 %v8727_v50, %v11186_v46  ;;  %v9167_v12 = vmax.f32 %v9007_v14, %v9135_v25  ;;  %v9168_v16 = vmax.f32 %v9008_v15, %v9136_v52  ;;  %v9528_v7 = vrot.slane %v9166_v30, %v12857_v41  ;;  %v8282_v29 = vpop.permute.xlu0 %8281  ;;  %v7992_v55 = vpop.permute.xlu1 %7991  ;;  %v9205_v15 = vld [vmem:[%s16032_s8 + $0xb8] sm:$0xff]  ;;  %v9332_v46 = vld [vmem:[%s16031_s7 + $0x30] sm:$0xff]  ;;  %v9748_v25 = vld [vmem:[#allocation6 + $0x20] sm:$0xf] }
 0x62b   :  { %8316 = vst.msk [vmem:[#allocation5 + $0xe0] sm:$0xff] %vm8301_vm11, %v8282_v29  ;;  %v11202_v17 = vsel %vm9221_vm10, 1.0, %v11574_v1  ;;  %v11220_v14 = vsel %vm9239_vm15, 1.0, %v11574_v1  ;;  %11323 = vmatprep.subr.bf16.mxu1 %v9407_v34  ;;  %v11204_v30 = vsel %vm9223_vm7, 1.0, %v11574_v1  ;;  %vm9241_vm9 = vcmp.gt.f32.partialorder %v9205_v15, 0.005 }
 0x62c   :  { %v9169_v51 = vmax.f32 %v9009_v44, %v9137_v2  ;;  %v9532_v13 = vrot.slane %v9167_v12, %v12857_v41  ;;  %v9536_v45 = vrot.slane %v9168_v16, %v12857_v41  ;;  %8025 = vst.msk [vmem:[#allocation5 + $0xf0] sm:$0xff] %vm8009_vm4, %v7992_v55  ;;  %v9365_v42 = vmul.f32 %v11202_v17, %v9329_v37  ;;  %v9188_v44 = vld [vmem:[%s16032_s8 + $0x30] sm:$0xff]  ;;  %v9206_v21 = vld [vmem:[%s16032_s8 + $0xc0] sm:$0xff]  ;;  %v9353_v5 = vld [vmem:[%s16031_s7 + $0xd8] sm:$0xff] }
 0x62d   :  { %9927 = vrot.lane.b32.xlu0 %v9909_v4, %s11591_s22  ;;  %vm9222_vm4 = vcmp.gt.f32.partialorder %v9186_v3, 0.005  ;;  %v9383_v43 = vmul.f32 %v11220_v14, %v9347_v35  ;;  %v9367_v48 = vmul.f32 %v11204_v30, %v9331_v62  ;;  %v11221_v27 = vsel %vm9240_vm3, 1.0, %v11574_v1  ;;  %v9191_v4 = vld [vmem:[%s16032_s8 + $0x48] sm:$0xff]  ;;  %v9208_v37 = vld [vmem:[%s16032_s8 + $0xd0] sm:$0xff]  ;;  %v9193_v17 = vld [vmem:[%s16032_s8 + $0x58] sm:$0xff] }
 0x62e   :  { %9881 = vrot.lane.b32.xlu1 %v9862_v57, %s11589_s24  ;;  %v9540_v32 = vrot.slane %v9169_v51, %v12857_v41  ;;  %v9601_v18 = vsel %vm16222_vm14, %v9532_v13, %v9528_v7  ;;  %v9664_v53 = vpop.permute.xlu0 %9663  ;;  %v9399_v56 = vpack.c.bf16 %v9365_v42, %v9364_v49  ;;  %v8089_v40 = vpop.permute.xlu1 %8088  ;;  %v11203_v10 = vsel %vm9222_vm4, 1.0, %v11574_v1  ;;  %v9207_v57 = vld [vmem:[%s16032_s8 + $0xc8] sm:$0xff]  ;;  %v9190_v7 = vld [vmem:[%s16032_s8 + $0x40] sm:$0xff]  ;;  %v9209_v51 = vld [vmem:[%s16032_s8 + $0xd8] sm:$0xff] }
 0x62f   :  { %v9602_v0 = vsel %vm7456_vm5, %v9536_v45, %v9601_v18  ;;  %9688 = vst.msk [vmem:[#allocation7] sm:$0xf] %vm9687_vm8, %v9664_v53  ;;  %v9408_v52 = vpack.c.bf16 %v9383_v43, %v9382_v28  ;;  %v9366_v22 = vmul.f32 %v11203_v10, %v9330_v9  ;;  %v11222_v59 = vsel %vm9241_vm9, 1.0, %v11574_v1  ;;  %v9908_v13 = vld [vmem:[#allocation6 + $0x19] sm:$0xf]  ;;  %v9192_v35 = vld [vmem:[%s16032_s8 + $0x50] sm:$0xff] }
 0x630   :  { %v9603_v50 = vsel %vm16223_vm6, %v9540_v32, %v9602_v0  ;;  %8122 = vst.msk [vmem:[#allocation5 + $0xf0] sm:$0xff] %vm8106_vm1, %v8089_v40  ;;  %11324 = vmatpush3.bf16.msra.mxu1 %v9399_v56  ;;  %vm9224_vm1 = vcmp.gt.f32.partialorder %v9188_v44, 0.005  ;;  %v9384_v2 = vmul.f32 %v11221_v27, %v9348_v8  ;;  %v9385_v12 = vmul.f32 %v11222_v59, %v9349_v11  ;;  %v9910_v49 = vld [vmem:[#allocation6 + $0x29] sm:$0xf]  ;;  %v9336_v34 = vld [vmem:[%s16031_s7 + $0x50] sm:$0xff] }
 0x631   :  { %9627 = vst.msk [vmem:[#allocation6 + $0x39] sm:$0xf] %vm9622_vm12, %v9603_v50  ;;  %9671 = vrot.lane.b32.xlu0 %v9651_v31, %s11587_s21  ;;  %11325 = vmatprep.subr.bf16.mxu1 %v9408_v52  ;;  %vm9225_vm2 = vcmp.gt.f32.partialorder %v9189_v47, 0.005  ;;  %v11205_v16 = vsel %vm9224_vm1, 1.0, %v11574_v1  ;;  %v9400_v36 = vpack.c.bf16 %v9367_v48, %v9366_v22  ;;  %v9337_v42 = vld [vmem:[%s16031_s7 + $0x58] sm:$0xff] }
 0x632   :  { %9763 = vrot.lane.b32.xlu1 %v9746_v58, %s11591_s22  ;;  %v8187_v63 = vpop.permute.xlu1 %8186  ;;  %v11206_v23 = vsel %vm9225_vm2, 1.0, %v11574_v1  ;;  %v9368_v20 = vmul.f32 %v11205_v16, %v9332_v46  ;;  %vm9242_vm10 = vcmp.gt.f32.partialorder %v9206_v21, 0.005  ;;  %v9409_v45 = vpack.c.bf16 %v9385_v12, %v9384_v2  ;;  %v9210_v9 = vld [vmem:[%s16032_s8 + $0xe0] sm:$0xff]  ;;  %v9211_v62 = vld [vmem:[%s16032_s8 + $0xe8] sm:$0xff]  ;;  %v9213_v48 = vld [vmem:[%s16032_s8 + $0xf8] sm:$0xff] }
 0x633   :  { %8220 = vst.msk [vmem:[#allocation5 + $0xf0] sm:$0xff] %vm8204_vm13, %v8187_v63  ;;  %v9369_v29 = vmul.f32 %v11206_v23, %v9333_v19  ;;  %vm9243_vm0 = vcmp.gt.f32.partialorder %v9207_v57, 0.005  ;;  %v11223_v31 = vsel %vm9242_vm10, 1.0, %v11574_v1  ;;  %vm9226_vm13 = vcmp.gt.f32.partialorder %v9190_v7, 0.005 }
 0x634   :  { %11326 = vmatpush3.bf16.msra.mxu1 %v9400_v36  ;;  %v11224_v3 = vsel %vm9243_vm0, 1.0, %v11574_v1  ;;  %v9386_v55 = vmul.f32 %v11223_v31, %v9350_v33  ;;  %vm9227_vm15 = vcmp.gt.f32.partialorder %v9191_v4, 0.005  ;;  %v11207_v18 = vsel %vm9226_vm13, 1.0, %v11574_v1  ;;  %v9354_v15 = vld [vmem:[%s16031_s7 + $0xe0] sm:$0xff]  ;;  %v9355_v56 = vld [vmem:[%s16031_s7 + $0xe8] sm:$0xff] }
 0x635   :  { %11327 = vmatprep.subr.bf16.mxu1 %v9409_v45  ;;  %v9401_v54 = vpack.c.bf16 %v9369_v29, %v9368_v20  ;;  %v9387_v32 = vmul.f32 %v11224_v3, %v9351_v38  ;;  %v11208_v58 = vsel %vm9227_vm15, 1.0, %v11574_v1  ;;  %v9370_v0 = vmul.f32 %v11207_v18, %v9334_v6  ;;  %v9194_v28 = vld [vmem:[%s16032_s8 + $0x60] sm:$0xff]  ;;  %v9195_v47 = vld [vmem:[%s16032_s8 + $0x68] sm:$0xff]  ;;  %v9212_v57 = vld [vmem:[%s16032_s8 + $0xf0] sm:$0xff] }
 0x636   :  { %9767 = vrot.lane.b32.xlu1 %v9748_v25, %s11591_s22  ;;  %v8284_v60 = vpop.permute.xlu1 %8283  ;;  %v9371_v26 = vmul.f32 %v11208_v58, %v9335_v39  ;;  %vm9244_vm14 = vcmp.gt.f32.partialorder %v9208_v37, 0.005  ;;  %vm9245_vm4 = vcmp.gt.f32.partialorder %v9209_v51, 0.005  ;;  %vm9228_vm6 = vcmp.gt.f32.partialorder %v9192_v35, 0.005 }
 0x637   :  { %8317 = vst.msk [vmem:[#allocation5 + $0xf0] sm:$0xff] %vm8301_vm11, %v8284_v60  ;;  %v9410_v8 = vpack.c.bf16 %v9387_v32, %v9386_v55  ;;  %v11225_v50 = vsel %vm9244_vm14, 1.0, %v11574_v1  ;;  %v11226_v53 = vsel %vm9245_vm4, 1.0, %v11574_v1  ;;  %vm9229_vm11 = vcmp.gt.f32.partialorder %v9193_v17, 0.005  ;;  %v9338_v40 = vld [vmem:[%s16031_s7 + $0x60] sm:$0xff] }
 0x638   :  { %v9636_v14 = vld [vmem:[#allocation6 + $0x38] sm:$0xf]  ;;  %11328 = vmatpush3.bf16.msra.mxu1 %v9401_v54  ;;  %v9402_v43 = vpack.c.bf16 %v9371_v26, %v9370_v0  ;;  %v9388_v11 = vmul.f32 %v11225_v50, %v9352_v61  ;;  %v9389_v44 = vmul.f32 %v11226_v53, %v9353_v5  ;;  %v9339_v10 = vld [vmem:[%s16031_s7 + $0x68] sm:$0xff]  ;;  %v11209_v46 = vsel %vm9228_vm6, 1.0, %v11574_v1  ;;  %v9196_v2 = vld [vmem:[%s16032_s8 + $0x70] sm:$0xff] }
 0x639   :  { %9644 = vst.msk [vmem:[#allocation7 + $0x3c] sm:$0xf] %vm9622_vm12, %v9636_v14  ;;  %11329 = vmatprep.subr.bf16.mxu1 %v9410_v8  ;;  %v11210_v25 = vsel %vm9229_vm11, 1.0, %v11574_v1  ;;  %vm9246_vm7 = vcmp.gt.f32.partialorder %v9210_v9, 0.005  ;;  %v9372_v22 = vmul.f32 %v11209_v46, %v9336_v34  ;;  %v8378_v12 = vld [vmem:[#allocation5 + $0xe0] sm:$0xff] }
 0x63a   :  { %9925 = vrot.lane.b32.xlu1 %v9908_v13, %s11591_s22  ;;  %vm9247_vm3 = vcmp.gt.f32.partialorder %v9211_v62, 0.005  ;;  %v9411_v30 = vpack.c.bf16 %v9389_v44, %v9388_v11  ;;  %v9373_v19 = vmul.f32 %v11210_v25, %v9337_v42  ;;  %v11227_v21 = vsel %vm9246_vm7, 1.0, %v11574_v1  ;;  %v9798_v27 = vld [vmem:[#allocation6 + $0x39] sm:$0xf]  ;;  %v9356_v63 = vld [vmem:[%s16031_s7 + $0xf0] sm:$0xff] }
 0x63b   :  { %v9666_v52 = vpop.permute.xlu1 %9665  ;;  %v9652_v59 = vld [vmem:[#allocation6 + $0x39] sm:$0xf]  ;;  %v11228_v33 = vsel %vm9247_vm3, 1.0, %v11574_v1  ;;  %v9390_v38 = vmul.f32 %v11227_v21, %v9354_v15  ;;  %vm9230_vm9 = vcmp.gt.f32.partialorder %v9194_v28, 0.005  ;;  %v9340_v29 = vld [vmem:[%s16031_s7 + $0x70] sm:$0xff] }
 0x63c   :  { %9689 = vst.msk [vmem:[#allocation7 + $0xc] sm:$0xf] %vm9687_vm8, %v9666_v52  ;;  %vm9231_vm1 = vcmp.gt.f32.partialorder %v9195_v47, 0.005  ;;  %11330 = vmatpush3.bf16.msra.mxu1 %v9402_v43  ;;  %v9403_v16 = vpack.c.bf16 %v9373_v19, %v9372_v22  ;;  %v9391_v7 = vmul.f32 %v11228_v33, %v9355_v56  ;;  %v11211_v4 = vsel %vm9230_vm9, 1.0, %v11574_v1  ;;  %v9357_v36 = vld [vmem:[%s16031_s7 + $0xf8] sm:$0xff] }
 0x63d   :  { %9806 = vst.msk [vmem:[#allocation7 + $0x34] sm:$0xf] %vm9622_vm12, %v9798_v27  ;;  %v11212_v6 = vsel %vm9231_vm1, 1.0, %v11574_v1  ;;  %v9197_v23 = vld [vmem:[%s16032_s8 + $0x78] sm:$0xff]  ;;  %11331 = vmatprep.subr.bf16.mxu1 %v9411_v30  ;;  %v9374_v20 = vmul.f32 %v11211_v4, %v9338_v40  ;;  %vm9248_vm2 = vcmp.gt.f32.partialorder %v9212_v57, 0.005 }
 0x63e   :  { %9929 = vrot.lane.b32.xlu1 %v9910_v49, %s11591_s22  ;;  %v9375_v39 = vmul.f32 %v11212_v6, %v9339_v10  ;;  %vm9249_vm10 = vcmp.gt.f32.partialorder %v9213_v48, 0.005  ;;  %v8380_v37 = vld [vmem:[#allocation5 + $0xf0] sm:$0xff]  ;;  %v9412_v51 = vpack.c.bf16 %v9391_v7, %v9390_v38  ;;  %v11229_v13 = vsel %vm9248_vm2, 1.0, %v11574_v1  ;;  %v9341_v35 = vld [vmem:[%s16031_s7 + $0x78] sm:$0xff] }
 0x63f   :  { %v11230_v45 = vsel %vm9249_vm10, 1.0, %v11574_v1  ;;  %vm9232_vm0 = vcmp.gt.f32.partialorder %v9196_v2, 0.005  ;;  %v8396_v31 = vpack.c.bf16 %v8380_v37, %v8378_v12  ;;  %v9392_v61 = vmul.f32 %v11229_v13, %v9356_v63  ;;  %v15585_v34 = vld [vmem:[%s16030_s6] ss:$0 sm:$0xff]  ;;  %s10807_s6 = sshll.u32 %s11594_s4, 4  ;;  %s10808_s6 = int_to_ptr.vmem [resolvable:$true] %s10807_s6 }
 0x640   :  { %v9393_v5 = vmul.f32 %v11230_v45, %v9357_v36  ;;  %11332 = vmatpush3.bf16.msra.mxu1 %v9403_v16  ;;  %v9404_v3 = vpack.c.bf16 %v9375_v39, %v9374_v20  ;;  %vm9233_vm13 = vcmp.gt.f32.partialorder %v9197_v23, 0.005  ;;  %v11213_v55 = vsel %vm9232_vm0, 1.0, %v11574_v1  ;;  %v9635_v45 = vld [vmem:[#allocation6 + $0x30] sm:$0xf]  ;;  %p11555_p1 = scmp.lt.s32.totalorder %s10808_s6, %s10808_s6 }
 0x641   :  { %8518 = vmatmul.mubr.bf16.gmra.mrb[28].mxu1 %v8396_v31  ;;  %11333 = vmatprep.subr.bf16.mxu1 %v9412_v51  ;;  %v11214_v49 = vsel %vm9233_vm13, 1.0, %v11574_v1  ;;  %v9376_v54 = vmul.f32 %v11213_v55, %v9340_v29  ;;  %vm16224_vm15 = vcmask 1041409   ;;  %vm16225_vm14 = vcmask 1043459   ;;  %9643 = vst.msk [vmem:[#allocation7 + $0x30] sm:$0xf] %vm9622_vm12, %v9635_v45 }
 0x642   :  { %9673 = vrot.lane.b32.xlu1 %v9652_v59, %s11587_s21  ;;  %v9413_v17 = vpack.c.bf16 %v9393_v5, %v9392_v61  ;;  %v9377_v32 = vmul.f32 %v11214_v49, %v9341_v35  ;;  %v9814_v35 = vld [vmem:[#allocation6 + $0x3a] sm:$0xf]  ;;  %vm9736_vm4 = vcmask 781824   ;;  %vm9785_vm6 = vcmask 1044224   ;;  %vm16226_vm11 = vmmov %vm16224_vm15 }
 0x643   :  { %vm16227_vm7 = vmmov %vm16225_vm14 }
 0x644   :  { %11334 = vmatpush3.bf16.msra.mxu1 %v9404_v3  ;;  %v9405_v18 = vpack.c.bf16 %v9377_v32, %v9376_v54  ;;  %vm16228_vm3 = vmmov %vm16226_vm11 }
 0x645   :  { %11335 = vmatprep.subr.bf16.mxu1 %v9413_v17  ;;  %vm16229_vm9 = vmmov %vm16227_vm7 }
 0x648   :  { %11336 = vmatpush3.bf16.msra.mxu1 %v9405_v18 }
 0x64f   :  { %v8503_v58 = vpop.f32.mrb[20].mxu1 }
 0x650   :  { %v8504_v42 = vadd.f32 %v15585_v34, %v8503_v58  ;;  %v8505_v9 = vpop.f32.mrb[21].mxu1 }
 0x651   :  { %v8506_v62 = vpop.f32.mrb[22].mxu1 }
 0x652   :  { %v8536_v60 = vmax.f32 %v8504_v42, 0.0  ;;  %v8507_v0 = vadd.f32 %v15585_v34, %v8506_v62  ;;  %v8508_v26 = vpop.f32.mrb[23].mxu1 }
 0x654   :  { %v8728_v14 = vcombine.high %v8536_v60, %v8536_v60  ;;  %v8735_v15 = vrot.slane %v8536_v60, %v12830_v24  ;;  %v8537_v8 = vmax.f32 %v8507_v0, 0.0 }
 0x656   :  { %v8742_v50 = vrot.slane %v8728_v14, %v12830_v24  ;;  %v8743_v53 = vcombine.high %v8735_v15, %v8735_v15  ;;  %v11155_v56 = vrot.slane %v8735_v15, 9  ;;  %v8745_v28 = vcombine.high %v8537_v8, %v8537_v8 }
 0x657   :  { %v8752_v43 = vrot.slane %v8537_v8, %v12830_v24  ;;  %v9668_v40 = vpop.permute.xlu0 %9667 }
 0x658   :  { %v8744_v11 = vcombine.high %v8742_v50, %v8742_v50  ;;  %v11156_v44 = vrot.slane %v8743_v53, 9  ;;  %v11157_v47 = vrot.slane %v8742_v50, 9  ;;  %v8759_v10 = vrot.slane %v8745_v28, %v12830_v24  ;;  %9690 = vst.msk [vmem:[#allocation7 + $0x18] sm:$0xf] %vm9687_vm8, %v9668_v40 }
 0x659   :  { %v8760_v46 = vcombine.high %v8752_v43, %v8752_v43  ;;  %v11187_v25 = vrot.slane %v8752_v43, 9  ;;  %v9010_v30 = vmax.f32 %v8735_v15, %v11155_v56 }
 0x65a   :  { %v11158_v52 = vrot.slane %v8744_v11, 9  ;;  %v8761_v22 = vcombine.high %v8759_v10, %v8759_v10  ;;  %v11189_v21 = vrot.slane %v8759_v10, 9  ;;  %v9011_v48 = vmax.f32 %v8743_v53, %v11156_v44 }
 0x65b   :  { %v11188_v19 = vrot.slane %v8760_v46, 9  ;;  %v9138_v57 = vmax.f32 %v8752_v43, %v11187_v25  ;;  %v9012_v27 = vmax.f32 %v8742_v50, %v11157_v47  ;;  %v9827_v59 = vpop.permute.xlu0 %9826  ;;  %v9962_v25 = vld [vmem:[#allocation6 + $0x5a] sm:$0xf] }
 0x65c   :  { %v11190_v33 = vrot.slane %v8761_v22, 9  ;;  %v9140_v2 = vmax.f32 %v8759_v10, %v11189_v21  ;;  %9850 = vst.msk [vmem:[#allocation7 + $0x4] sm:$0xf] %vm9687_vm8, %v9827_v59  ;;  %v9013_v16 = vmax.f32 %v8744_v11, %v11158_v52 }
 0x65d   :  { %v9139_v38 = vmax.f32 %v8760_v46, %v11188_v19  ;;  %v9170_v12 = vmax.f32 %v9010_v30, %v9138_v57  ;;  %9970 = vst.msk [vmem:[#allocation7 + $0x5c] sm:$0xf] %vm9622_vm12, %v9962_v25 }
 0x65e   :  { %v9141_v7 = vmax.f32 %v8761_v22, %v11190_v33  ;;  %v9172_v6 = vmax.f32 %v9012_v27, %v9140_v2 }
 0x65f   :  { %v9171_v4 = vmax.f32 %v9011_v48, %v9139_v38  ;;  %v9544_v36 = vrot.slane %v9170_v12, %v12857_v41 }
 0x660   :  { %v9173_v63 = vmax.f32 %v9013_v16, %v9141_v7  ;;  %v9552_v20 = vrot.slane %v9172_v6, %v12857_v41 }
 0x661   :  { %v9548_v23 = vrot.slane %v9171_v4, %v12857_v41 }
 0x662   :  { %v9556_v39 = vrot.slane %v9173_v63, %v12857_v41 }
 0x663   :  { %v9604_v37 = vsel %vm16224_vm15, %v9548_v23, %v9544_v36 }
 0x664   :  { %v9605_v51 = vsel %vm7456_vm5, %v9552_v20, %v9604_v37 }
 0x665   :  { %v9606_v13 = vsel %vm16225_vm14, %v9556_v39, %v9605_v51 }
 0x666   :  { %9628 = vst.msk [vmem:[#allocation6 + $0x41] sm:$0xf] %vm9622_vm12, %v9606_v13 }
 0x66d   :  { %v9653_v29 = vld [vmem:[#allocation6 + $0x41] sm:$0xf] }
 0x66e   :  { %v9637_v31 = vld [vmem:[#allocation6 + $0x40] sm:$0xf]  ;;  %9675 = vrot.lane.b32.xlu0 %v9653_v29, %s11587_s21 }
 0x66f   :  { %9645 = vst.msk [vmem:[#allocation7 + $0x48] sm:$0xf] %vm9622_vm12, %v9637_v31  ;;  %v9799_v61 = vld [vmem:[#allocation6 + $0x41] sm:$0xf] }
 0x670   :  { %9807 = vst.msk [vmem:[#allocation7 + $0x40] sm:$0xf] %vm9622_vm12, %v9799_v61  ;;  %v9959_v5 = vld [vmem:[#allocation6 + $0x42] sm:$0xf] }
 0x671   :  { %9967 = vst.msk [vmem:[#allocation7 + $0x38] sm:$0xf] %vm9622_vm12, %v9959_v5 }
 0x672   :  { %9834 = vrot.lane.b32.xlu0 %v9814_v35, %s11587_s21 }
 0x673   :  { %v9831_v3 = vpop.permute.xlu0 %9830 }
 0x674   :  { %v9670_v55 = vpop.permute.xlu1 %9669  ;;  %9852 = vst.msk [vmem:[#allocation7 + $0x1c] sm:$0xf] %vm9687_vm8, %v9831_v3 }
 0x675   :  { %9691 = vst.msk [vmem:[#allocation7 + $0x24] sm:$0xf] %vm9687_vm8, %v9670_v55 }
 0x677   :  { %v9713_v17 = vpop.permute.xlu0 %9712 }
 0x678   :  { %v9829_v49 = vpop.permute.xlu1 %9828  ;;  %9737 = vst.msk [vmem:[#allocation7] sm:$0xf] %vm9736_vm4, %v9713_v17 }
 0x679   :  { %9851 = vst.msk [vmem:[#allocation7 + $0x10] sm:$0xf] %vm9687_vm8, %v9829_v49 }
 0x67b   :  { %v9717_v54 = vpop.permute.xlu0 %9716 }
 0x67c   :  { %9739 = vst.msk [vmem:[#allocation7 + $0x18] sm:$0xf] %vm9736_vm4, %v9717_v54 }
 0x67f   :  { %v9876_v32 = vpop.permute.xlu0 %9875 }
 0x680   :  { %9899 = vst.msk [vmem:[#allocation7 + $0x4] sm:$0xf] %vm9736_vm4, %v9876_v32 }
 0x68f   :  { %v9880_v18 = vpop.permute.xlu0 %9879 }
 0x690   :  { %v9833_v58 = vpop.permute.xlu1 %9832  ;;  %9901 = vst.msk [vmem:[#allocation7 + $0x1c] sm:$0xf] %vm9736_vm4, %v9880_v18 }
 0x691   :  { %9853 = vst.msk [vmem:[#allocation7 + $0x28] sm:$0xf] %vm9687_vm8, %v9833_v58 }
 0x693   :  { %v9762_v42 = vpop.permute.xlu0 %9761 }
 0x694   :  { %v9715_v9 = vpop.permute.xlu1 %9714  ;;  %9786 = vst.msk [vmem:[#allocation7] sm:$0xf] %vm9785_vm6, %v9762_v42 }
 0x695   :  { %9738 = vst.msk [vmem:[#allocation7 + $0xc] sm:$0xf] %vm9736_vm4, %v9715_v9 }
 0x697   :  { %v9766_v62 = vpop.permute.xlu0 %9765 }
 0x698   :  { %v9719_v60 = vpop.permute.xlu1 %9718  ;;  %9788 = vst.msk [vmem:[#allocation7 + $0x18] sm:$0xf] %vm9785_vm6, %v9766_v62 }
 0x699   :  { %9740 = vst.msk [vmem:[#allocation7 + $0x24] sm:$0xf] %vm9736_vm4, %v9719_v60 }
 0x69b   :  { %v9924_v0 = vpop.permute.xlu0 %9923 }
 0x69c   :  { %v9878_v26 = vpop.permute.xlu1 %9877  ;;  %9947 = vst.msk [vmem:[#allocation7 + $0x4] sm:$0xf] %vm9785_vm6, %v9924_v0 }
 0x69d   :  { %9900 = vst.msk [vmem:[#allocation7 + $0x10] sm:$0xf] %vm9736_vm4, %v9878_v26 }
 0x69f   :  { %v9928_v14 = vpop.permute.xlu0 %9927 }
 0x6a0   :  { %v9882_v15 = vpop.permute.xlu1 %9881  ;;  %9949 = vst.msk [vmem:[#allocation7 + $0x1c] sm:$0xf] %vm9785_vm6, %v9928_v14 }
 0x6a1   :  { %9902 = vst.msk [vmem:[#allocation7 + $0x28] sm:$0xf] %vm9736_vm4, %v9882_v15 }
 0x6a3   :  { %v9672_v50 = vpop.permute.xlu0 %9671 }
 0x6a4   :  { %v9764_v8 = vpop.permute.xlu1 %9763  ;;  %9692 = vst.msk [vmem:[#allocation7 + $0x30] sm:$0xf] %vm9687_vm8, %v9672_v50 }
 0x6a5   :  { %9787 = vst.msk [vmem:[#allocation7 + $0xc] sm:$0xf] %vm9785_vm6, %v9764_v8 }
 0x6a8   :  { %v9768_v53 = vpop.permute.xlu1 %9767 }
 0x6a9   :  { %9789 = vst.msk [vmem:[#allocation7 + $0x24] sm:$0xf] %vm9785_vm6, %v9768_v53  ;;  %v9700_v53 = vld [vmem:[#allocation6 + $0x32] sm:$0xf] }
 0x6ac   :  { %v9926_v56 = vpop.permute.xlu1 %9925  ;;  %v11528_v11 = vld [vmem:[#allocation7] ss:$12 sps:$4 sm:$0xff]  }
 0x6ad   :  { %9948 = vst.msk [vmem:[#allocation7 + $0x10] sm:$0xf] %vm9785_vm6, %v9926_v56 }
 0x6b0   :  { %v9930_v28 = vpop.permute.xlu1 %9929  ;;  %v11531_v47 = vld [vmem:[#allocation7 + $0x18] ss:$12 sps:$4 sm:$0xff]  }
 0x6b1   :  { %9950 = vst.msk [vmem:[#allocation7 + $0x28] sm:$0xf] %vm9785_vm6, %v9930_v28  ;;  %v10027_v10 = vpack.c.bf16 %v11531_v47, %v11528_v11  ;;  %v9815_v11 = vld [vmem:[#allocation6 + $0x42] sm:$0xf] }
 0x6b2   :  { %v9863_v47 = vld [vmem:[#allocation6 + $0x40] sm:$0xf] }
 0x6b4   :  { %v9674_v43 = vpop.permute.xlu1 %9673  ;;  %v11530_v44 = vld [vmem:[#allocation7 + $0x4] ss:$12 sps:$4 sm:$0xff]  }
 0x6b5   :  { %9693 = vst.msk [vmem:[#allocation7 + $0x3c] sm:$0xf] %vm9687_vm8, %v9674_v43 }
 0x6b8   :  { %v11533_v40 = vld [vmem:[#allocation7 + $0x1c] ss:$12 sps:$4 sm:$0xff]  }
 0x6b9   :  { %v10028_v46 = vpack.c.bf16 %v11533_v40, %v11530_v44  ;;  %v9702_v44 = vld [vmem:[#allocation6 + $0x42] sm:$0xf] }
 0x6bb   :  { %10079 = vmatprep.mubr.bf16.mxu1 %v10028_v46 }
 0x6bc   :  { %10080 = vmatmul.mubr.bf16.vlgmr.msra.gmra.mrb[32].mxu1 %v10027_v10 }
 0x6cd   :  { %v8511_v52 = vpop.f32.mrb[24].mxu1 }
 0x6ce   :  { %v8512_v30 = vadd.f32 %v15585_v34, %v8511_v52  ;;  %v8513_v22 = vpop.f32.mrb[25].mxu1 }
 0x6cf   :  { %v8514_v19 = vpop.f32.mrb[26].mxu1 }
 0x6d0   :  { %v8538_v21 = vmax.f32 %v8512_v30, 0.0  ;;  %v8515_v57 = vadd.f32 %v15585_v34, %v8514_v19  ;;  %v8516_v48 = vpop.f32.mrb[27].mxu1 }
 0x6d2   :  { %v8762_v27 = vcombine.high %v8538_v21, %v8538_v21  ;;  %v8769_v59 = vrot.slane %v8538_v21, %v12830_v24  ;;  %v8539_v33 = vmax.f32 %v8515_v57, 0.0 }
 0x6d4   :  { %v8776_v38 = vrot.slane %v8762_v27, %v12830_v24  ;;  %v8777_v2 = vcombine.high %v8769_v59, %v8769_v59  ;;  %v11159_v12 = vrot.slane %v8769_v59, 9  ;;  %v8779_v16 = vcombine.high %v8539_v33, %v8539_v33 }
 0x6d5   :  { %v8786_v7 = vrot.slane %v8539_v33, %v12830_v24 }
 0x6d6   :  { %v8778_v4 = vcombine.high %v8776_v38, %v8776_v38  ;;  %v11160_v6 = vrot.slane %v8777_v2, 9  ;;  %v11161_v63 = vrot.slane %v8776_v38, 9  ;;  %v8793_v36 = vrot.slane %v8779_v16, %v12830_v24 }
 0x6d7   :  { %v8794_v23 = vcombine.high %v8786_v7, %v8786_v7  ;;  %v11191_v20 = vrot.slane %v8786_v7, 9  ;;  %v9014_v37 = vmax.f32 %v8769_v59, %v11159_v12 }
 0x6d8   :  { %v11162_v39 = vrot.slane %v8778_v4, 9  ;;  %v8795_v51 = vcombine.high %v8793_v36, %v8793_v36  ;;  %v11193_v45 = vrot.slane %v8793_v36, 9  ;;  %v9015_v31 = vmax.f32 %v8777_v2, %v11160_v6 }
 0x6d9   :  { %v11192_v13 = vrot.slane %v8794_v23, 9  ;;  %v9142_v29 = vmax.f32 %v8786_v7, %v11191_v20  ;;  %v9016_v61 = vmax.f32 %v8776_v38, %v11161_v63 }
 0x6da   :  { %v11194_v5 = vrot.slane %v8795_v51, 9  ;;  %v9144_v3 = vmax.f32 %v8793_v36, %v11193_v45  ;;  %v9017_v17 = vmax.f32 %v8778_v4, %v11162_v39 }
 0x6db   :  { %v9143_v35 = vmax.f32 %v8794_v23, %v11192_v13  ;;  %v9174_v55 = vmax.f32 %v9014_v37, %v9142_v29 }
 0x6dc   :  { %v9145_v49 = vmax.f32 %v8795_v51, %v11194_v5  ;;  %v9176_v32 = vmax.f32 %v9016_v61, %v9144_v3 }
 0x6dd   :  { %v9175_v54 = vmax.f32 %v9015_v31, %v9143_v35  ;;  %v9560_v42 = vrot.slane %v9174_v55, %v12857_v41 }
 0x6de   :  { %v9177_v58 = vmax.f32 %v9017_v17, %v9145_v49  ;;  %v9568_v62 = vrot.slane %v9176_v32, %v12857_v41 }
 0x6df   :  { %v9564_v9 = vrot.slane %v9175_v54, %v12857_v41 }
 0x6e0   :  { %v9676_v18 = vpop.permute.xlu0 %9675  ;;  %v9572_v60 = vrot.slane %v9177_v58, %v12857_v41 }
 0x6e1   :  { %9694 = vst.msk [vmem:[#allocation7 + $0x48] sm:$0xf] %vm9687_vm8, %v9676_v18  ;;  %v9607_v0 = vsel %vm16226_vm11, %v9564_v9, %v9560_v42 }
 0x6e2   :  { %v9608_v26 = vsel %vm7456_vm5, %v9568_v62, %v9607_v0 }
 0x6e3   :  { %v9609_v15 = vsel %vm16227_vm7, %v9572_v60, %v9608_v26  ;;  %v9701_v26 = vld [vmem:[#allocation6 + $0x3a] sm:$0xf] }
 0x6e4   :  { %v9835_v14 = vpop.permute.xlu0 %9834  ;;  %9629 = vst.msk [vmem:[#allocation6 + $0x49] sm:$0xf] %vm9622_vm12, %v9609_v15 }
 0x6e5   :  { %9854 = vst.msk [vmem:[#allocation7 + $0x34] sm:$0xf] %vm9687_vm8, %v9835_v14 }
 0x6eb   :  { %v9816_v8 = vld [vmem:[#allocation6 + $0x4a] sm:$0xf] }
 0x6ec   :  { %v9654_v50 = vld [vmem:[#allocation6 + $0x49] sm:$0xf]  ;;  %9838 = vrot.lane.b32.xlu0 %v9816_v8, %s11587_s21  ;;  %v9911_v8 = vld [vmem:[#allocation6 + $0x41] sm:$0xf] }
 0x6ed   :  { %9677 = vrot.lane.b32.xlu1 %v9654_v50, %s11587_s21  ;;  %v9800_v56 = vld [vmem:[#allocation6 + $0x49] sm:$0xf] }
 0x6ee   :  { %v9638_v28 = vld [vmem:[#allocation6 + $0x48] sm:$0xf]  ;;  %9808 = vst.msk [vmem:[#allocation7 + $0x4c] sm:$0xf] %vm9622_vm12, %v9800_v56 }
 0x6ef   :  { %v9960_v43 = vld [vmem:[#allocation6 + $0x4a] sm:$0xf]  ;;  %9646 = vst.msk [vmem:[#allocation7 + $0x54] sm:$0xf] %vm9622_vm12, %v9638_v28  ;;  %v9750_v28 = vld [vmem:[#allocation6 + $0x40] sm:$0xf] }
 0x6f0   :  { %9968 = vst.msk [vmem:[#allocation7 + $0x44] sm:$0xf] %vm9622_vm12, %v9960_v43  ;;  %9720 = vrot.lane.b32.xlu0 %v9700_v53, %s11589_s24  ;;  %v9751_v14 = vld [vmem:[#allocation6 + $0x48] sm:$0xf]  ;;  %v9866_v53 = vld [vmem:[#allocation6 + $0x58] sm:$0xf] }
 0x6f1   :  { %9836 = vrot.lane.b32.xlu1 %v9815_v11, %s11587_s21  ;;  %v9703_v15 = vld [vmem:[#allocation6 + $0x4a] sm:$0xf]  ;;  %v9214_v43 = vld [vmem:[%s16032_s8 + $0x100] sm:$0xff] }
 0x6f2   :  { %v9864_v50 = vld [vmem:[#allocation6 + $0x48] sm:$0xf] }
 0x6f3   :  { %v9215_v11 = vld [vmem:[%s16032_s8 + $0x108] sm:$0xff] }
 0x6f4   :  { %9724 = vrot.lane.b32.xlu0 %v9702_v44, %s11589_s24  ;;  %v9358_v44 = vld [vmem:[%s16031_s7 + $0x100] sm:$0xff] }
 0x6f8   :  { %9883 = vrot.lane.b32.xlu0 %v9863_v47, %s11589_s24  ;;  %v9359_v47 = vld [vmem:[%s16031_s7 + $0x108] sm:$0xff] }
 0x714   :  { %v8519_v40 = vpop.f32.mrb[28].mxu1 }
 0x715   :  { %v8520_v10 = vadd.f32 %v15585_v34, %v8519_v40  ;;  %v8521_v46 = vpop.f32.mrb[29].mxu1 }
 0x716   :  { %v8522_v25 = vpop.f32.mrb[30].mxu1 }
 0x717   :  { %v8540_v52 = vmax.f32 %v8520_v10, 0.0  ;;  %v8523_v30 = vadd.f32 %v15585_v34, %v8522_v25  ;;  %v8524_v22 = vpop.f32.mrb[31].mxu1 }
 0x718   :  { %v9912_v22 = vld [vmem:[#allocation6 + $0x49] sm:$0xf] }
 0x719   :  { %v8796_v19 = vcombine.high %v8540_v52, %v8540_v52  ;;  %v8803_v21 = vrot.slane %v8540_v52, %v12830_v24  ;;  %v8541_v57 = vmax.f32 %v8523_v30, 0.0 }
 0x71b   :  { %v8810_v48 = vrot.slane %v8796_v19, %v12830_v24  ;;  %v8811_v27 = vcombine.high %v8803_v21, %v8803_v21  ;;  %v11163_v59 = vrot.slane %v8803_v21, 9  ;;  %v8813_v33 = vcombine.high %v8541_v57, %v8541_v57  ;;  %v9914_v19 = vld [vmem:[#allocation6 + $0x59] sm:$0xf] }
 0x71c   :  { %v8820_v38 = vrot.slane %v8541_v57, %v12830_v24  ;;  %v9217_v57 = vld [vmem:[%s16032_s8 + $0x118] sm:$0xff] }
 0x71d   :  { %v8812_v2 = vcombine.high %v8810_v48, %v8810_v48  ;;  %v11164_v12 = vrot.slane %v8811_v27, 9  ;;  %v11165_v16 = vrot.slane %v8810_v48, 9  ;;  %v8827_v7 = vrot.slane %v8813_v33, %v12830_v24 }
 0x71e   :  { %v8828_v4 = vcombine.high %v8820_v38, %v8820_v38  ;;  %v11195_v6 = vrot.slane %v8820_v38, 9  ;;  %v9018_v63 = vmax.f32 %v8803_v21, %v11163_v59  ;;  %v9216_v21 = vld [vmem:[%s16032_s8 + $0x110] sm:$0xff]  ;;  %vm9253_vm2 = vcmp.gt.f32.partialorder %v9217_v57, 0.005  ;;  %v11542_v57 = vld [vmem:[#allocation7 + $0x38] ss:$12 sps:$4 sm:$0xff]  }
 0x71f   :  { %v11166_v34 = vrot.slane %v8812_v2, 9  ;;  %v8829_v36 = vcombine.high %v8827_v7, %v8827_v7  ;;  %v11197_v20 = vrot.slane %v8827_v7, 9  ;;  %v9019_v37 = vmax.f32 %v8811_v27, %v11164_v12  ;;  %v9361_v27 = vld [vmem:[%s16031_s7 + $0x118] sm:$0xff] }
 0x720   :  { %v11196_v23 = vrot.slane %v8828_v4, 9  ;;  %v9146_v39 = vmax.f32 %v8820_v38, %v11195_v6  ;;  %v9020_v51 = vmax.f32 %v8810_v48, %v11165_v16  ;;  %vm9252_vm1 = vcmp.gt.f32.partialorder %v9216_v21, 0.005  ;;  %v9360_v48 = vld [vmem:[%s16031_s7 + $0x110] sm:$0xff]  ;;  %v10317_v16 = vld [vmem:[%s16035_s11 + $0x40] sm:$0xff]  ;;  %v10382_v6 = vld [vmem:[%s16034_s10 + $0x48] sm:$0xff] }
 0x721   :  { %v11198_v13 = vrot.slane %v8829_v36, 9  ;;  %v9148_v29 = vmax.f32 %v8827_v7, %v11197_v20  ;;  %v9021_v61 = vmax.f32 %v8812_v2, %v11166_v34  ;;  %v11233_v59 = vsel %vm9252_vm1, 1.0, %v11574_v1  ;;  %v10318_v7 = vld [vmem:[%s16035_s11 + $0x48] sm:$0xff]  ;;  %v10319_v34 = vld [vmem:[%s16035_s11 + $0x50] sm:$0xff] }
 0x722   :  { %v9147_v45 = vmax.f32 %v8828_v4, %v11196_v23  ;;  %v9178_v31 = vmax.f32 %v9018_v63, %v9146_v39  ;;  %v11234_v33 = vsel %vm9253_vm2, 1.0, %v11574_v1  ;;  %v9396_v38 = vmul.f32 %v11233_v59, %v9360_v48  ;;  %v10381_v4 = vld [vmem:[%s16034_s10 + $0x40] sm:$0xff]  ;;  %v10320_v39 = vld [vmem:[%s16035_s11 + $0x58] sm:$0xff]  ;;  %v10314_v59 = vld [vmem:[%s16035_s11 + $0x28] sm:$0xff] }
 0x723   :  { %v9149_v5 = vmax.f32 %v8829_v36, %v11198_v13  ;;  %v9180_v3 = vmax.f32 %v9020_v51, %v9148_v29  ;;  %v9397_v2 = vmul.f32 %v11234_v33, %v9361_v27  ;;  %vm10333_vm10 = vcmp.gt.f32.partialorder %v10317_v16, 0.005  ;;  %v10384_v29 = vld [vmem:[%s16034_s10 + $0x58] sm:$0xff]  ;;  %v10313_v27 = vld [vmem:[%s16035_s11 + $0x20] sm:$0xff] }
 0x724   :  { %v9179_v35 = vmax.f32 %v9019_v37, %v9147_v45  ;;  %v9576_v17 = vrot.slane %v9178_v31, %v12857_v41  ;;  %vm10334_vm0 = vcmp.gt.f32.partialorder %v10318_v7, 0.005  ;;  %v11262_v23 = vsel %vm10333_vm10, 1.0, %v11574_v1  ;;  %v10383_v37 = vld [vmem:[%s16034_s10 + $0x50] sm:$0xff]  ;;  %v10377_v33 = vld [vmem:[%s16034_s10 + $0x20] sm:$0xff]  ;;  %v10316_v7 = vld [vmem:[%s16035_s11 + $0x38] sm:$0xff] }
 0x725   :  { %v9181_v55 = vmax.f32 %v9021_v61, %v9149_v5  ;;  %v9584_v54 = vrot.slane %v9180_v3, %v12857_v41  ;;  %v9415_v12 = vpack.c.bf16 %v9397_v2, %v9396_v38  ;;  %v11263_v20 = vsel %vm10334_vm0, 1.0, %v11574_v1  ;;  %v10378_v38 = vld [vmem:[%s16034_s10 + $0x28] sm:$0xff]  ;;  %v10315_v2 = vld [vmem:[%s16035_s11 + $0x30] sm:$0xff] }
 0x726   :  { %v9580_v49 = vrot.slane %v9179_v35, %v12857_v41  ;;  %vm10335_vm13 = vcmp.gt.f32.partialorder %v10319_v34, 0.005  ;;  %v10397_v51 = vmul.f32 %v11262_v23, %v10381_v4  ;;  %v10398_v13 = vmul.f32 %v11263_v20, %v10382_v6  ;;  %v10379_v4 = vld [vmem:[%s16034_s10 + $0x30] sm:$0xff] }
 0x727   :  { %v9588_v32 = vrot.slane %v9181_v55, %v12857_v41  ;;  %v9749_v41 = vld [vmem:[#allocation6 + $0x38] sm:$0xf]  ;;  %vm10336_vm15 = vcmp.gt.f32.partialorder %v10320_v39, 0.005  ;;  %v11264_v45 = vsel %vm10335_vm13, 1.0, %v11574_v1  ;;  %vm16230_vm10 = vcmask 1041409  }
 0x728   :  { %v9610_v18 = vsel %vm16228_vm3, %v9580_v49, %v9576_v17  ;;  %v11265_v31 = vsel %vm10336_vm15, 1.0, %v11574_v1  ;;  %v10399_v61 = vmul.f32 %v11264_v45, %v10383_v37  ;;  %v10409_v5 = vpack.c.bf16 %v10398_v13, %v10397_v51  ;;  %v10309_v13 = vld [vmem:[%s16035_s11] sm:$0xff]  ;;  %v10310_v45 = vld [vmem:[%s16035_s11 + $0x8] sm:$0xff]  ;;  %vm16231_vm0 = vmmov %vm16230_vm10 }
 0x729   :  { %v9611_v58 = vsel %vm7456_vm5, %v9584_v54, %v9610_v18  ;;  %vm9250_vm5 = vcmp.gt.f32.partialorder %v9214_v43, 0.005  ;;  %v10400_v35 = vmul.f32 %v11265_v31, %v10384_v29  ;;  %vm10329_vm14 = vcmp.gt.f32.partialorder %v10313_v27, 0.005 }
 0x72a   :  { %v9612_v42 = vsel %vm16229_vm9, %v9588_v32, %v9611_v58  ;;  %v11231_v40 = vsel %vm9250_vm5, 1.0, %v11574_v1  ;;  %11468 = vmatpush3.bf16.msra.mxu0 %v10409_v5  ;;  %vm10331_vm11 = vcmp.gt.f32.partialorder %v10315_v2, 0.005  ;;  %vm10332_vm7 = vcmp.gt.f32.partialorder %v10316_v7, 0.005 }
 0x72b   :  { %9630 = vst.msk [vmem:[#allocation6 + $0x51] sm:$0xf] %vm9622_vm12, %v9612_v42  ;;  %v9394_v46 = vmul.f32 %v11231_v40, %v9358_v44  ;;  %v10410_v17 = vpack.c.bf16 %v10400_v35, %v10399_v61  ;;  %11469 = vmatprep.subr.bf16.mxu0 %v11574_v1  ;;  %v11261_v23 = vsel %vm10332_vm7, 1.0, %v11574_v1  ;;  %vm10325_vm3 = vcmp.gt.f32.partialorder %v10309_v13, 0.005 }
 0x72c   :  { %vm10326_vm9 = vcmp.gt.f32.partialorder %v10310_v45, 0.005 }
 0x72e   :  { %11470 = vmatpush3.bf16.msra.mxu0 %v10410_v17  ;;  %v10312_v17 = vld [vmem:[%s16035_s11 + $0x18] sm:$0xff] }
 0x72f   :  { %11483 = vmatprep.subr.bf16.mxu0 %v11574_v1 }
 0x732   :  { %v9865_v9 = vld [vmem:[#allocation6 + $0x50] sm:$0xf] }
 0x733   :  { %v9817_v62 = vld [vmem:[#allocation6 + $0x52] sm:$0xf]  ;;  %9887 = vrot.lane.b32.xlu0 %v9865_v9, %s11589_s24 }
 0x734   :  { %9840 = vrot.lane.b32.xlu1 %v9817_v62, %s11587_s21  ;;  %v9801_v60 = vld [vmem:[#allocation6 + $0x51] sm:$0xf] }
 0x735   :  { %v9961_v0 = vld [vmem:[#allocation6 + $0x52] sm:$0xf]  ;;  %9809 = vst.msk [vmem:[#allocation7 + $0x58] sm:$0xf] %vm9622_vm12, %v9801_v60 }
 0x736   :  { %9969 = vst.msk [vmem:[#allocation7 + $0x50] sm:$0xf] %vm9622_vm12, %v9961_v0  ;;  %v9913_v56 = vld [vmem:[#allocation6 + $0x51] sm:$0xf]  ;;  %vm9251_vm12 = vcmp.gt.f32.partialorder %v9215_v11, 0.005 }
 0x737   :  { %9769 = vrot.lane.b32.xlu0 %v9749_v41, %s11591_s22  ;;  %v11232_v10 = vsel %vm9251_vm12, 1.0, %v11574_v1  ;;  %v9752_v52 = vld [vmem:[#allocation6 + $0x50] sm:$0xf]  ;;  %vm10328_vm12 = vcmp.gt.f32.partialorder %v10312_v17, 0.005 }
 0x738   :  { %9722 = vrot.lane.b32.xlu1 %v9701_v26, %s11589_s24  ;;  %v9395_v25 = vmul.f32 %v11232_v10, %v9359_v47  ;;  %v11541_v10 = vld [vmem:[#allocation7 + $0x20] ss:$12 sps:$4 sm:$0xff]  }
 0x73a   :  { %v9414_v30 = vpack.c.bf16 %v9395_v25, %v9394_v46 }
 0x73b   :  { %9773 = vrot.lane.b32.xlu0 %v9751_v14, %s11591_s22 }
 0x73c   :  { %9726 = vrot.lane.b32.xlu1 %v9703_v15, %s11589_s24  ;;  %11443 = vmatprep.subr.bf16.mxu1 %v9414_v30 }
 0x73d   :  { %11444 = vmatpush3.bf16.msra.mxu1 %v9414_v30  ;;  %v11543_v21 = vld [vmem:[#allocation7 + $0x50] ss:$12 sps:$4 sm:$0xff]  }
 0x73e   :  { %11445 = vmatprep.subr.bf16.mxu1 %v9415_v12  ;;  %v10032_v48 = vpack.c.bf16 %v11543_v21, %v11542_v57 }
 0x73f   :  { %9931 = vrot.lane.b32.xlu0 %v9911_v8, %s11591_s22 }
 0x740   :  { %9885 = vrot.lane.b32.xlu1 %v9864_v50, %s11589_s24 }
 0x741   :  { %11446 = vmatpush3.bf16.msra.mxu1 %v9415_v12  ;;  %v11258_v12 = vsel %vm10329_vm14, 1.0, %v11574_v1  ;;  %vm16232_vm14 = vmmov %vm16231_vm0 }
 0x742   :  { %11451 = vmatprep.subr.bf16.mxu1 %v11574_v1  ;;  %v10393_v6 = vmul.f32 %v11258_v12, %v10377_v33 }
 0x743   :  { %9935 = vrot.lane.b32.xlu0 %v9913_v56, %s11591_s22 }
 0x744   :  { %9889 = vrot.lane.b32.xlu1 %v9866_v53, %s11589_s24 }
 0x748   :  { %9771 = vrot.lane.b32.xlu1 %v9750_v28, %s11591_s22 }
 0x74c   :  { %9775 = vrot.lane.b32.xlu1 %v9752_v52, %s11591_s22 }
 0x750   :  { %9933 = vrot.lane.b32.xlu1 %v9912_v22, %s11591_s22  ;;  %v11540_v22 = vld [vmem:[#allocation7 + $0x8] ss:$12 sps:$4 sm:$0xff]  }
 0x754   :  { %9937 = vrot.lane.b32.xlu1 %v9914_v19, %s11591_s22  ;;  %v10029_v19 = vpack.c.bf16 %v11541_v10, %v11540_v22 }
 0x75e   :  { %v9839_v63 = vpop.permute.xlu0 %9838 }
 0x75f   :  { %v9678_v36 = vpop.permute.xlu1 %9677  ;;  %9856 = vst.msk [vmem:[#allocation7 + $0x4c] sm:$0xf] %vm9687_vm8, %v9839_v63  ;;  %v11260_v63 = vsel %vm10331_vm11, 1.0, %v11574_v1 }
 0x760   :  { %9695 = vst.msk [vmem:[#allocation7 + $0x54] sm:$0xf] %vm9687_vm8, %v9678_v36  ;;  %v10380_v36 = vld [vmem:[%s16034_s10 + $0x38] sm:$0xff]  ;;  %v10395_v20 = vmul.f32 %v11260_v63, %v10379_v4 }
 0x761   :  { %v10396_v37 = vmul.f32 %v11261_v23, %v10380_v36 }
 0x762   :  { %v9721_v3 = vpop.permute.xlu0 %9720 }
 0x763   :  { %v9837_v55 = vpop.permute.xlu1 %9836  ;;  %9741 = vst.msk [vmem:[#allocation7 + $0x30] sm:$0xf] %vm9736_vm4, %v9721_v3  ;;  %v10408_v51 = vpack.c.bf16 %v10396_v37, %v10395_v20  ;;  %v10311_v3 = vld [vmem:[%s16035_s11 + $0x10] sm:$0xff] }
 0x764   :  { %9855 = vst.msk [vmem:[#allocation7 + $0x40] sm:$0xf] %vm9687_vm8, %v9837_v55  ;;  %vm10327_vm5 = vcmp.gt.f32.partialorder %v10311_v3, 0.005 }
 0x766   :  { %v9725_v49 = vpop.permute.xlu0 %9724 }
 0x767   :  { %9743 = vst.msk [vmem:[#allocation7 + $0x48] sm:$0xf] %vm9736_vm4, %v9725_v49  ;;  %v11235_v49 = vld [vmem:[%s16033_s9] ss:$0 sm:$0xff] }
 0x76a   :  { %v9884_v54 = vpop.permute.xlu0 %9883 }
 0x76b   :  { %9903 = vst.msk [vmem:[#allocation7 + $0x34] sm:$0xf] %vm9736_vm4, %v9884_v54  ;;  %v11254_v54 = vsel %vm10325_vm3, 1.0, %v11574_v1 }
 0x78f   :  { %v11337_v32 = vpop.f32.mrb[32].mxu1 }
 0x790   :  { %v11338_v18 = vpop.f32.mrb[33].mxu1 }
 0x791   :  { %v15752_v58 = vadd.f32 %v11338_v18, %v11337_v32  ;;  %v11340_v42 = vpop.f32.mrb[34].mxu1  ;;  %v11255_v32 = vsel %vm10326_vm9, 1.0, %v11574_v1  ;;  %v10373_v18 = vld [vmem:[%s16034_s10] sm:$0xff] }
 0x792   :  { %v11341_v9 = vpop.f32.mrb[35].mxu1 }
 0x793   :  { %v15754_v62 = vadd.f32 %v11341_v9, %v11340_v42  ;;  %v10374_v42 = vld [vmem:[%s16034_s10 + $0x8] sm:$0xff] }
 0x7a5   :  { %v9888_v60 = vpop.permute.xlu0 %9887 }
 0x7a6   :  { %v9841_v0 = vpop.permute.xlu1 %9840  ;;  %9905 = vst.msk [vmem:[#allocation7 + $0x4c] sm:$0xf] %vm9736_vm4, %v9888_v60 }
 0x7a7   :  { %9857 = vst.msk [vmem:[#allocation7 + $0x58] sm:$0xf] %vm9687_vm8, %v9841_v0  ;;  %vm10040_vm8 = vcmask 261120   ;;  %v10082_v0 = vadd.f32 %v15752_v58, %v11235_v49  ;;  %v10085_v58 = vadd.f32 %v15754_v62, %v11235_v49 }
 0x7a9   :  { %v9770_v41 = vpop.permute.xlu0 %9769 }
 0x7aa   :  { %v9723_v26 = vpop.permute.xlu1 %9722  ;;  %9790 = vst.msk [vmem:[#allocation7 + $0x30] sm:$0xf] %vm9785_vm6, %v9770_v41  ;;  %v15830_v41 = vmul.f32 %v11254_v54, %v10373_v18 }
 0x7ab   :  { %9742 = vst.msk [vmem:[#allocation7 + $0x3c] sm:$0xf] %vm9736_vm4, %v9723_v26  ;;  %v15832_v26 = vmul.f32 %v11255_v32, %v10374_v42 }
 0x7ad   :  { %v9774_v14 = vpop.permute.xlu0 %9773 }
 0x7ae   :  { %v9727_v15 = vpop.permute.xlu1 %9726  ;;  %9792 = vst.msk [vmem:[#allocation7 + $0x48] sm:$0xf] %vm9785_vm6, %v9774_v14  ;;  %v10321_v14 = vld [vmem:[%s16035_s11 + $0x60] sm:$0xff] }
 0x7af   :  { %9744 = vst.msk [vmem:[#allocation7 + $0x54] sm:$0xf] %vm9736_vm4, %v9727_v15  ;;  %vm10337_vm1 = vcmp.gt.f32.partialorder %v10321_v14, 0.005 }
 0x7b1   :  { %v9932_v8 = vpop.permute.xlu0 %9931 }
 0x7b2   :  { %v9886_v50 = vpop.permute.xlu1 %9885  ;;  %9951 = vst.msk [vmem:[#allocation7 + $0x34] sm:$0xf] %vm9785_vm6, %v9932_v8 }
 0x7b3   :  { %9904 = vst.msk [vmem:[#allocation7 + $0x40] sm:$0xf] %vm9736_vm4, %v9886_v50 }
 0x7b5   :  { %v9936_v53 = vpop.permute.xlu0 %9935 }
 0x7b6   :  { %v9890_v56 = vpop.permute.xlu1 %9889  ;;  %9953 = vst.msk [vmem:[#allocation7 + $0x4c] sm:$0xf] %vm9785_vm6, %v9936_v53  ;;  %v11256_v53 = vsel %vm10327_vm5, 1.0, %v11574_v1 }
 0x7b7   :  { %9906 = vst.msk [vmem:[#allocation7 + $0x58] sm:$0xf] %vm9736_vm4, %v9890_v56  ;;  %vm10330_vm4 = vcmp.gt.f32.partialorder %v10314_v59, 0.005  ;;  %v10375_v56 = vld [vmem:[%s16034_s10 + $0x10] sm:$0xff]  ;;  %v15855_v59 = vsel %vm10337_vm1, 1.0, %v11574_v1 }
 0x7b8   :  { %v11259_v16 = vsel %vm10330_vm4, 1.0, %v11574_v1  ;;  %vm16233_vm4 = vmmov %vm16231_vm0  ;;  %vm10692_vm1 = vcmask 523264  }
 0x7b9   :  { %v10394_v34 = vmul.f32 %v11259_v16, %v10378_v38 }
 0x7ba   :  { %v9772_v28 = vpop.permute.xlu1 %9771 }
 0x7bb   :  { %9791 = vst.msk [vmem:[#allocation7 + $0x3c] sm:$0xf] %vm9785_vm6, %v9772_v28  ;;  %v10407_v39 = vpack.c.bf16 %v10394_v34, %v10393_v6  ;;  %v10322_v34 = vld [vmem:[%s16035_s11 + $0x68] sm:$0xff] }
 0x7bc   :  { %vm10338_vm2 = vcmp.gt.f32.partialorder %v10322_v34, 0.005 }
 0x7be   :  { %v9776_v43 = vpop.permute.xlu1 %9775 }
 0x7bf   :  { %9793 = vst.msk [vmem:[#allocation7 + $0x54] sm:$0xf] %vm9785_vm6, %v9776_v43 }
 0x7c2   :  { %v9934_v11 = vpop.permute.xlu1 %9933  ;;  %v11538_v40 = vld [vmem:[#allocation7 + $0x30] ss:$12 sps:$4 sm:$0xff]  }
 0x7c3   :  { %9952 = vst.msk [vmem:[#allocation7 + $0x40] sm:$0xf] %vm9785_vm6, %v9934_v11  ;;  %v11257_v11 = vsel %vm10328_vm12, 1.0, %v11574_v1 }
 0x7c6   :  { %v9938_v44 = vpop.permute.xlu1 %9937  ;;  %v11539_v25 = vld [vmem:[#allocation7 + $0x48] ss:$12 sps:$4 sm:$0xff]  }
 0x7c7   :  { %9954 = vst.msk [vmem:[#allocation7 + $0x58] sm:$0xf] %vm9785_vm6, %v9938_v44  ;;  %v10030_v30 = vpack.c.bf16 %v11539_v25, %v11538_v40  ;;  %vm11593_vm6 = vmmov 0   ;;  %v10376_v44 = vld [vmem:[%s16034_s10 + $0x18] sm:$0xff] }
 0x7c8   :  { %11471 = vmatprep.mubr.msk.bf16.mxu0 %vm11593_vm6, %v11574_v1  ;;  %v15851_v21 = vmul.f32 %v11257_v11, %v10376_v44 }
 0x7ca   :  { %v11534_v47 = vld [vmem:[#allocation7 + $0x34] ss:$12 sps:$4 sm:$0xff]  }
 0x7ce   :  { %v11536_v46 = vld [vmem:[#allocation7 + $0x4c] ss:$12 sps:$4 sm:$0xff]  }
 0x7cf   :  { %v10031_v52 = vpack.c.bf16 %v11536_v46, %v11534_v47 }
 0x7d1   :  { %10087 = vmatprep.mubr.bf16.mxu1 %v10031_v52  ;;  %v10405_v52 = vpack.c.bf16 %v15832_v26, %v15830_v41 }
 0x7d2   :  { %10088 = vmatmul.mubr.bf16.gmra.mrb[36].mxu1 %v10030_v30  ;;  %v15848_v30 = vmul.f32 %v11256_v53, %v10375_v56 }
 0x7d3   :  { %11447 = vmatprep.mubr.msk.bf16.mxu1 %vm10040_vm8, %v10029_v19 }
 0x7da   :  { %11448 = vmatmul.mubr.msk.bf16.vlgmr.msra.gmra.mrb[40].mxu1 %vm10040_vm8, %v10032_v48 }
 0x7db   :  { %11455 = vmatprep.mubr.msk.bf16.mxu1 %vm11593_vm6, %v11574_v1  ;;  %11452 = vmatpush3.bf16.msra.mxu1 %v10407_v39 }
 0x7dc   :  { %11453 = vmatprep.subr.bf16.mxu1 %v11574_v1 }
 0x7df   :  { %11454 = vmatpush3.bf16.msra.mxu1 %v10408_v51 }
 0x7e0   :  { %11459 = vmatprep.subr.bf16.mxu1 %v11574_v1 }
 0x8a5   :  { %v11343_v29 = vpop.f32.mrb[36].mxu1 }
 0x8a6   :  { %v11344_v31 = vpop.f32.mrb[37].mxu1 }
 0x8a7   :  { %v11345_v61 = vadd.f32 %v11344_v31, %v11343_v29  ;;  %v11346_v5 = vpop.f32.mrb[38].mxu1 }
 0x8a8   :  { %v11347_v35 = vpop.f32.mrb[39].mxu1 }
 0x8a9   :  { %v11348_v55 = vadd.f32 %v11347_v35, %v11346_v5  ;;  %v10090_v9 = vadd.f32 %v11345_v61, %v11235_v49 }
 0x8ab   :  { %v10093_v50 = vadd.f32 %v11348_v55, %v11235_v49 }
 0x8ad   :  { %v11449_v60 = vpop.f32.mrb[40].mxu1 }
 0x8ae   :  { %v10139_v15 = vadd.f32 %v11449_v60, %v10090_v9  ;;  %v10130_v8 = vpop.f32.mrb[41].mxu1 }
 0x8af   :  { %v10131_v28 = vadd.f32 %v10130_v8, %v10082_v0  ;;  %v11450_v43 = vpop.f32.mrb[42].mxu1 }
 0x8b0   :  { %v10147_v47 = vmax.f32 %v10139_v15, 0.0  ;;  %v10142_v40 = vadd.f32 %v11450_v43, %v10093_v50  ;;  %v10133_v10 = vpop.f32.mrb[43].mxu1 }
 0x8b1   :  { %v10145_v46 = vmax.f32 %v10131_v28, 0.0  ;;  %v10134_v25 = vadd.f32 %v10133_v10, %v10085_v58 }
 0x8b2   :  { %v10187_v22 = vcombine.high %v10147_v47, %v10147_v47  ;;  %v10194_v62 = vrot.slane %v10147_v47, %v12830_v24  ;;  %v10148_v19 = vmax.f32 %v10142_v40, 0.0 }
 0x8b3   :  { %v10153_v57 = vcombine.high %v10145_v46, %v10145_v46  ;;  %v10160_v48 = vrot.slane %v10145_v46, %v12830_v24  ;;  %v10146_v27 = vmax.f32 %v10134_v25, 0.0 }
 0x8b4   :  { %v10201_v33 = vrot.slane %v10187_v22, %v12830_v24  ;;  %v10202_v38 = vcombine.high %v10194_v62, %v10194_v62  ;;  %v11242_v2 = vrot.slane %v10194_v62, 9  ;;  %v10204_v12 = vcombine.high %v10148_v19, %v10148_v19 }
 0x8b5   :  { %v10167_v16 = vrot.slane %v10153_v57, %v12830_v24  ;;  %v10168_v7 = vcombine.high %v10160_v48, %v10160_v48  ;;  %v11238_v4 = vrot.slane %v10160_v48, 9  ;;  %v10211_v6 = vrot.slane %v10148_v19, %v12830_v24 }
 0x8b6   :  { %v10203_v63 = vcombine.high %v10201_v33, %v10201_v33  ;;  %v11243_v36 = vrot.slane %v10202_v38, 9  ;;  %v10265_v23 = vmax.f32 %v10194_v62, %v11242_v2  ;;  %v11250_v20 = vrot.slane %v10201_v33, 9 }
 0x8b7   :  { %v10169_v39 = vcombine.high %v10167_v16, %v10167_v16  ;;  %v11239_v37 = vrot.slane %v10168_v7, 9  ;;  %v10261_v51 = vmax.f32 %v10160_v48, %v11238_v4  ;;  %v11246_v13 = vrot.slane %v10167_v16, 9  ;;  %v10323_v4 = vld [vmem:[%s16035_s11 + $0x70] sm:$0xff] }
 0x8b8   :  { %v10266_v45 = vmax.f32 %v10202_v38, %v11243_v36  ;;  %v11251_v29 = vrot.slane %v10203_v63, 9  ;;  %v10297_v31 = vmax.f32 %v10201_v33, %v11250_v20  ;;  %v10218_v61 = vrot.slane %v10204_v12, %v12830_v24 }
 0x8b9   :  { %v10262_v5 = vmax.f32 %v10168_v7, %v11239_v37  ;;  %v11247_v35 = vrot.slane %v10169_v39, 9  ;;  %v10293_v3 = vmax.f32 %v10167_v16, %v11246_v13  ;;  %v10219_v55 = vcombine.high %v10211_v6, %v10211_v6  ;;  %v10386_v13 = vld [vmem:[%s16034_s10 + $0x68] sm:$0xff] }
 0x8ba   :  { %v10298_v17 = vmax.f32 %v10203_v63, %v11251_v29  ;;  %v10305_v49 = vmax.f32 %v10265_v23, %v10297_v31  ;;  %v10220_v54 = vcombine.high %v10218_v61, %v10218_v61  ;;  %v11244_v32 = vrot.slane %v10211_v6, 9 }
 0x8bb   :  { %v10294_v18 = vmax.f32 %v10169_v39, %v11247_v35  ;;  %v10301_v42 = vmax.f32 %v10261_v51, %v10293_v3  ;;  %v11245_v9 = vrot.slane %v10219_v55, 9  ;;  %v11252_v60 = vrot.slane %v10218_v61, 9  ;;  %v10385_v51 = vld [vmem:[%s16034_s10 + $0x60] sm:$0xff] }
 0x8bc   :  { %v10306_v0 = vmax.f32 %v10266_v45, %v10298_v17  ;;  %v10414_v14 = vpack.c.bf16 %v10305_v49, %v10305_v49  ;;  %v10267_v15 = vmax.f32 %v10211_v6, %v11244_v32  ;;  %v11253_v8 = vrot.slane %v10220_v54, 9  ;;  %v10387_v32 = vld [vmem:[%s16034_s10 + $0x70] sm:$0xff] }
 0x8bd   :  { %v10302_v50 = vmax.f32 %v10262_v5, %v10294_v18  ;;  %v10413_v53 = vpack.c.bf16 %v10301_v42, %v10301_v42  ;;  %v10268_v56 = vmax.f32 %v10219_v55, %v11245_v9  ;;  %v10299_v28 = vmax.f32 %v10218_v61, %v11252_v60 }
 0x8be   :  { %v10416_v43 = vpack.c.bf16 %v10306_v0, %v10306_v0  ;;  %v10470_v58 = vunpack.c.l.b16 %v10414_v14  ;;  %v10300_v11 = vmax.f32 %v10220_v54, %v11253_v8  ;;  %v10170_v44 = vcombine.high %v10146_v27, %v10146_v27 }
 0x8bf   :  { %v10415_v47 = vpack.c.bf16 %v10302_v50, %v10302_v50  ;;  %v10469_v40 = vunpack.c.l.b16 %v10413_v53  ;;  %v10307_v10 = vmax.f32 %v10267_v15, %v10299_v28  ;;  %v10177_v46 = vrot.slane %v10146_v27, %v12830_v24  ;;  %v10324_v27 = vld [vmem:[%s16035_s11 + $0x78] sm:$0xff]  ;;  %v10633_v53 = vld [vmem:[%s16038_s14] sm:$0xff] }
 0x8c0   :  { %v10420_v25 = vunpack.c.l.b16 %v10416_v43  ;;  %v10471_v22 = vrot.slane %v10470_v58, 7  ;;  %v10308_v62 = vmax.f32 %v10268_v56, %v10300_v11  ;;  %v10184_v19 = vrot.slane %v10170_v44, %v12830_v24  ;;  %v10634_v56 = vld [vmem:[%s16038_s14 + $0x8] sm:$0xff]  ;;  %v10665_v28 = vld [vmem:[%s16037_s13] sm:$0xff]  ;;  %v10635_v58 = vld [vmem:[%s16038_s14 + $0x10] sm:$0xff] }
 0x8c1   :  { %v10419_v57 = vunpack.c.l.b16 %v10415_v47  ;;  %v10518_v48 = vpack.c.bf16 %v10307_v10, %v10307_v10  ;;  %v10185_v33 = vcombine.high %v10177_v46, %v10177_v46  ;;  %v11240_v38 = vrot.slane %v10177_v46, 9  ;;  %v10666_v43 = vld [vmem:[%s16037_s13 + $0x8] sm:$0xff]  ;;  %v10636_v47 = vld [vmem:[%s16038_s14 + $0x18] sm:$0xff] }
 0x8c2   :  { %v10421_v2 = vrot.slane %v10420_v25, 7  ;;  %v10571_v12 = vpack.c.bf16 %v10308_v62, %v10308_v62  ;;  %v10186_v16 = vcombine.high %v10184_v19, %v10184_v19  ;;  %v11248_v7 = vrot.slane %v10184_v19, 9 }
 0x8c3   :  { %v10522_v6 = vunpack.c.l.b16 %v10518_v48  ;;  %v11241_v63 = vrot.slane %v10185_v33, 9  ;;  %v10472_v24 = vsel %vm16230_vm10, %v10471_v22, %v10469_v40  ;;  %v11267_v36 = vsel %vm10338_vm2, 1.0, %v11574_v1  ;;  %v10667_v40 = vld [vmem:[%s16037_s13 + $0x10] sm:$0xff]  ;;  %v10668_v22 = vld [vmem:[%s16037_s13 + $0x18] sm:$0xff] }
 0x8c4   :  { %v10263_v23 = vmax.f32 %v10177_v46, %v11240_v38  ;;  %v11249_v20 = vrot.slane %v10186_v16, 9  ;;  %v10295_v39 = vmax.f32 %v10184_v19, %v11248_v7  ;;  %v10422_v37 = vsel %vm16231_vm0, %v10421_v2, %v10419_v57  ;;  %v10637_v38 = vld [vmem:[%s16038_s14 + $0x20] sm:$0xff]  ;;  %v10638_v2 = vld [vmem:[%s16038_s14 + $0x28] sm:$0xff]  ;;  %v10639_v7 = vld [vmem:[%s16038_s14 + $0x30] sm:$0xff] }
 0x8c5   :  { %v10423_v45 = vpack.c.b16 %v10422_v37, %v10422_v37  ;;  %vm10339_vm13 = vcmp.gt.f32.partialorder %v10323_v4, 0.005  ;;  %vm10340_vm15 = vcmp.gt.f32.partialorder %v10324_v27, 0.005  ;;  %v10575_v29 = vunpack.c.l.b16 %v10571_v12  ;;  %v10669_v12 = vld [vmem:[%s16037_s13 + $0x20] sm:$0xff]  ;;  %v10739_v37 = vld [vmem:[%s16040_s16 + $0x8] sm:$0xff] }
 0x8c6   :  { %v10264_v31 = vmax.f32 %v10185_v33, %v11241_v63  ;;  %v10296_v34 = vmax.f32 %v10186_v16, %v11249_v20  ;;  %v10303_v61 = vmax.f32 %v10263_v23, %v10295_v39  ;;  %v10406_v5 = vpack.c.bf16 %v15851_v21, %v15848_v30  ;;  %v10388_v21 = vld [vmem:[%s16034_s10 + $0x78] sm:$0xff]  ;;  %v10670_v16 = vld [vmem:[%s16037_s13 + $0x28] sm:$0xff]  ;;  %v10671_v63 = vld [vmem:[%s16037_s13 + $0x30] sm:$0xff] }
 0x8c7   :  { %11456 = vmatmul.mubr.msk.bf16.vlgmr.msra.gmra.mrb[44].mxu1 %vm10040_vm8, %v10423_v45  ;;  %v10401_v35 = vmul.f32 %v15855_v59, %v10385_v51  ;;  %v10402_v3 = vmul.f32 %v11267_v36, %v10386_v13  ;;  %v10523_v55 = vrot.slane %v10522_v6, 7  ;;  %v11268_v54 = vsel %vm10339_vm13, 1.0, %v11574_v1  ;;  %v10640_v6 = vld [vmem:[%s16038_s14 + $0x38] sm:$0xff]  ;;  %v10738_v39 = vld [vmem:[%s16040_s16] sm:$0xff] }
 0x8c8   :  { %v10304_v17 = vmax.f32 %v10264_v31, %v10296_v34  ;;  %v10517_v49 = vpack.c.bf16 %v10303_v61, %v10303_v61  ;;  %11460 = vmatpush3.bf16.msra.mxu1 %v10405_v52  ;;  %11463 = vmatprep.mubr.msk.bf16.mxu1 %vm11593_vm6, %v11574_v1  ;;  %v11269_v30 = vsel %vm10340_vm15, 1.0, %v11574_v1  ;;  %v10576_v41 = vrot.slane %v10575_v29, 7  ;;  %v10672_v20 = vld [vmem:[%s16037_s13 + $0x38] sm:$0xff]  ;;  %v10740_v29 = vld [vmem:[%s16040_s16 + $0x10] sm:$0xff] }
 0x8c9   :  { %11461 = vmatprep.subr.bf16.mxu1 %v11574_v1  ;;  %v10403_v59 = vmul.f32 %v11268_v54, %v10387_v32  ;;  %v10411_v9 = vpack.c.bf16 %v10402_v3, %v10401_v35  ;;  %v10404_v60 = vmul.f32 %v11269_v30, %v10388_v21  ;;  %v10473_v14 = vpack.c.b16 %v10472_v24, %v10472_v24  ;;  %v10741_v31 = vld [vmem:[%s16040_s16 + $0x18] sm:$0xff] }
 0x8ca   :  { %v10521_v26 = vunpack.c.l.b16 %v10517_v49  ;;  %v10570_v52 = vpack.c.bf16 %v10304_v17, %v10304_v17  ;;  %vm10641_vm11 = vcmp.gt.f32.partialorder %v10633_v53, 0.005  ;;  %vm10642_vm7 = vcmp.gt.f32.partialorder %v10634_v56, 0.005 }
 0x8cb   :  { %v10412_v8 = vpack.c.bf16 %v10404_v60, %v10403_v59  ;;  %v11275_v11 = vsel %vm10641_vm11, 1.0, %v11574_v1  ;;  %v11276_v44 = vsel %vm10642_vm7, 1.0, %v11574_v1  ;;  %vm10645_vm3 = vcmp.gt.f32.partialorder %v10637_v38, 0.005  ;;  %v11274_v60 = vld [vmem:[%s16036_s12] ss:$0 sm:$0xff] }
 0x8cc   :  { %v10524_v18 = vsel %vm16232_vm14, %v10523_v55, %v10521_v26  ;;  %v10574_v42 = vunpack.c.l.b16 %v10570_v52  ;;  %11462 = vmatpush3.bf16.msra.mxu1 %v10406_v5  ;;  %v10673_v10 = vmul.f32 %v11275_v11, %v10665_v28  ;;  %v10674_v46 = vmul.f32 %v11276_v44, %v10666_v43  ;;  %v10742_v28 = vld [vmem:[%s16040_s16 + $0x20] sm:$0xff]  ;;  %v10743_v43 = vld [vmem:[%s16040_s16 + $0x28] sm:$0xff]  ;;  %v10745_v44 = vld [vmem:[%s16040_s16 + $0x38] sm:$0xff] }
 0x8cd   :  { %v10525_v0 = vpack.c.b16 %v10524_v18, %v10524_v18  ;;  %11475 = vmatprep.subr.bf16.mxu1 %v11574_v1  ;;  %vm10646_vm9 = vcmp.gt.f32.partialorder %v10638_v2, 0.005  ;;  %v11279_v4 = vsel %vm10645_vm3, 1.0, %v11574_v1  ;;  %vm10647_vm5 = vcmp.gt.f32.partialorder %v10639_v7, 0.005 }
 0x8ce   :  { %v10577_v15 = vsel %vm16233_vm4, %v10576_v41, %v10574_v42  ;;  %v10681_v57 = vpack.c.bf16 %v10674_v46, %v10673_v10  ;;  %v11280_v27 = vsel %vm10646_vm9, 1.0, %v11574_v1  ;;  %v10677_v24 = vmul.f32 %v11279_v4, %v10669_v12 }
 0x8cf   :  { %11472 = vmatmul.mubr.msk.bf16.vlgmr.msra.gmra.mrb[64].mxu0 %vm10040_vm8, %v10525_v0  ;;  %11464 = vmatmul.mubr.msk.bf16.vlgmr.msra.gmra.mrb[48].mxu1 %vm10040_vm8, %v10473_v14  ;;  %v10578_v50 = vpack.c.b16 %v10577_v15, %v10577_v15  ;;  %v10678_v36 = vmul.f32 %v11280_v27, %v10670_v16  ;;  %vm10648_vm12 = vcmp.gt.f32.partialorder %v10640_v6, 0.005  ;;  %v11281_v23 = vsel %vm10647_vm5, 1.0, %v11574_v1 }
 0x8d0   :  { %11476 = vmatpush3.bf16.msra.mxu1 %v10411_v9  ;;  %11479 = vmatprep.mubr.msk.bf16.mxu1 %vm11593_vm6, %v11574_v1  ;;  %v11282_v51 = vsel %vm10648_vm12, 1.0, %v11574_v1  ;;  %v10679_v13 = vmul.f32 %v11281_v23, %v10671_v63  ;;  %v10746_v45 = vpack.c.bf16 %v10739_v37, %v10738_v39  ;;  %v10747_v5 = vpack.c.bf16 %v10741_v31, %v10740_v29 }
 0x8d1   :  { %11477 = vmatprep.subr.bf16.mxu1 %v11574_v1  ;;  %11491 = vmatprep.mubr.msk.bf16.mxu0 %vm11593_vm6, %v11574_v1  ;;  %v10683_v34 = vpack.c.bf16 %v10678_v36, %v10677_v24  ;;  %v10680_v61 = vmul.f32 %v11282_v51, %v10672_v20  ;;  %v10748_v11 = vpack.c.bf16 %v10743_v43, %v10742_v28 }
 0x8d2   :  { %11484 = vmatpush3.bf16.msra.mxu0 %v10681_v57 }
 0x8d3   :  { %11485 = vmatprep.subr.bf16.mxu0 %v11574_v1  ;;  %v10684_v35 = vpack.c.bf16 %v10680_v61, %v10679_v13 }
 0x8d4   :  { %11478 = vmatpush3.bf16.msra.mxu1 %v10412_v8 }
 0x8d5   :  { %11495 = vmatprep.subr.bf16.mxu1 %v11574_v1 }
 0x8d7   :  { %11480 = vmatmul.mubr.msk.bf16.vlgmr.msra.gmra.mrb[52].mxu1 %vm10040_vm8, %v10578_v50  ;;  %vm10643_vm8 = vcmp.gt.f32.partialorder %v10635_v58, 0.005  ;;  %v10744_v58 = vld [vmem:[%s16040_s16 + $0x30] sm:$0xff] }
 0x8d8   :  { %11503 = vmatprep.mubr.msk.bf16.mxu1 %vm11593_vm6, %v11574_v1  ;;  %vm10644_vm6 = vcmp.gt.f32.partialorder %v10636_v47, 0.005  ;;  %v11277_v25 = vsel %vm10643_vm8, 1.0, %v11574_v1  ;;  %11496 = vmatpush3.bf16.msra.mxu1 %v10746_v45  ;;  %v10749_v47 = vpack.c.bf16 %v10745_v44, %v10744_v58 }
 0x8d9   :  { %v11278_v62 = vsel %vm10644_vm6, 1.0, %v11574_v1  ;;  %v10675_v19 = vmul.f32 %v11277_v25, %v10667_v40  ;;  %11497 = vmatprep.subr.bf16.mxu1 %v11574_v1  ;;  %v11283_v40 = vld [vmem:[%s16039_s15] ss:$0 sm:$0xff]  ;;  %s11550_s15 = scalar_lea.vmem %s10808_s6, 32 }
 0x8da   :  { %v10676_v48 = vmul.f32 %v11278_v62, %v10668_v22  ;;  %p11551_p0 = scmp.ne.s32.totalorder %s10808_s6, %s11550_s15  ;;  %p11556_p2 = scmp.lt.s32.totalorder %s11550_s15, %s11550_s15 }
 0x8dc   :  { %v10682_v33 = vpack.c.bf16 %v10676_v48, %v10675_v19  ;;  %11498 = vmatpush3.bf16.msra.mxu1 %v10747_v5  ;;  %v11285_v48 = vld [vmem:[%s16041_s17] ss:$0 sm:$0xff]  ;;  %p11557_p3 = por %p11556_p2, %p11555_p1 }
 0x8dd   :  { %11499 = vmatprep.subr.bf16.mxu1 %v11574_v1 }
 0x8de   :  { %11486 = vmatpush3.bf16.msra.mxu0 %v10682_v33  ;;  %p11558_p4 = pnand %p11557_p3, %p11551_p0 }
 0x8df   :  { %11487 = vmatprep.subr.bf16.mxu0 %v11574_v1 }
 0x8e0   :  { %11500 = vmatpush3.bf16.msra.mxu1 %v10748_v11 }
 0x8e1   :  { %11501 = vmatprep.subr.bf16.mxu1 %v11574_v1 }
 0x8e2   :  { %11488 = vmatpush3.bf16.msra.mxu0 %v10683_v34 }
 0x8e3   :  { %11489 = vmatprep.subr.bf16.mxu0 %v11574_v1 }
 0x8e4   :  { %11502 = vmatpush3.bf16.msra.mxu1 %v10749_v47 }
 0x8e6   :  { %11490 = vmatpush3.bf16.msra.mxu0 %v10684_v35 }
 0x99a   :  { %v10461_v3 = vpop.f32.mrb[44].mxu1 }
 0x99b   :  { %v11457_v55 = vpop.f32.mrb[45].mxu1 }
 0x99c   :  { %v10464_v17 = vpop.f32.mrb[46].mxu1 }
 0x99d   :  { %v11458_v49 = vpop.f32.mrb[47].mxu1 }
 0x9a2   :  { %v10563_v54 = vpop.f32.mrb[64].mxu0  ;;  %v10511_v32 = vpop.f32.mrb[48].mxu1 }
 0x9a3   :  { %v11473_v30 = vpop.f32.mrb[65].mxu0  ;;  %v10512_v21 = vadd.f32 %v10511_v32, %v10461_v3  ;;  %v11465_v41 = vpop.f32.mrb[49].mxu1 }
 0x9a4   :  { %v10566_v26 = vpop.f32.mrb[66].mxu0  ;;  %v10514_v52 = vpop.f32.mrb[50].mxu1 }
 0x9a5   :  { %v11474_v59 = vpop.f32.mrb[67].mxu0  ;;  %v11466_v18 = vpop.f32.mrb[51].mxu1  ;;  %v10569_v42 = vadd.f32 %v10563_v54, %v10512_v21 }
 0x9aa   :  { %v10616_v9 = vpop.f32.mrb[52].mxu1 }
 0x9ab   :  { %v10622_v0 = vadd.f32 %v10616_v9, %v10569_v42  ;;  %v11481_v14 = vpop.f32.mrb[53].mxu1 }
 0x9ac   :  { %v10619_v15 = vpop.f32.mrb[54].mxu1 }
 0x9ad   :  { %v10630_v8 = vadd.f32 %v11274_v60, %v10622_v0  ;;  %v11482_v50 = vpop.f32.mrb[55].mxu1 }
 0x9af   :  { %v10631_v53 = vmax.f32 %v10630_v8, 0.0 }
 0x9b1   :  { %v10632_v56 = vpack.c.bf16 %v10631_v53, %v10631_v53 }
 0x9b3   :  { %11492 = vmatmul.mubr.msk.bf16.vlgmr.msra.gmra.mrb[68].mxu0 %vm10692_vm1, %v10632_v56 }
 0xa86   :  { %v10730_v10 = vpop.f32.mrb[68].mxu0 }
 0xa87   :  { %v10731_v46 = vadd.f32 %v11283_v40, %v10730_v10  ;;  %v11493_v25 = vpop.f32.mrb[69].mxu0 }
 0xa88   :  { %v10733_v22 = vpop.f32.mrb[70].mxu0 }
 0xa89   :  { %v10736_v62 = vmax.f32 %v10731_v46, 0.0  ;;  %v11494_v19 = vpop.f32.mrb[71].mxu0 }
 0xa8b   :  { %v10737_v57 = vpack.c.bf16 %v10736_v62, %v10736_v62 }
 0xa8d   :  { %11504 = vmatmul.mubr.msk.bf16.vlgmr.msra.gmra.mrb[56].mxu1 %vm10692_vm1, %v10737_v57 }
 0xb60   :  { %v10794_v1 = vpop.f32.mrb[56].mxu1 }
 0xb61   :  { %v10795_v33 = vadd.f32 %v11285_v48, %v10794_v1  ;;  %v11505_v38 = vpop.f32.mrb[57].mxu1 }
 0xb62   :  { %v10797_v2 = vpop.f32.mrb[58].mxu1 }
 0xb63   :  { %10800 = vst [vmem:[#allocation8] sm:$0x3] %v10795_v33  ;;  %v11506_v12 = vpop.f32.mrb[59].mxu1 }
 0xb64   :  { %11561 = shalt.err (!%p11558_p4)
}
 0xb65   :  { %s11562_s17 = scalar_lea.hbm %s16042_s18, 32 }
 0xb66   :  { %p11563_p5 = scmp.ne.s32.totalorder %s16042_s18, %s11562_s17  ;;  %p11566_p6 = scmp.lt.u32.totalorder %s11562_s17, %s16042_s18 }
 0xb68   :  { %p11568_p7 = pnand %p11566_p6, %p11563_p5 }
 0xb6a   :  { %11571 = shalt.err (!%p11568_p7)
}
 0xb6b   :  { %10810 = dma.vmem_to_hbm [thread:$0]  %s10808_s6, 32, %s16042_s18, [#allocation9]  }
 0xb6c   :  { %11572 = dma.done.wait [#allocation9], 32  }
 0xb6d   :  { %11573 = vsyncadd [#allocation9], 4294967264 }
 0xb6e   :  { %10814 = vsyncpa [#allocation9], 1 }

</bundles_post_ra>
